<compile_context>
chip_gen: v7x
topology: tpu7x:2x2x1
jax: 0.10.0
libtpu: 0.0.40
codegen_flags: <defaults>
</compile_context>

<pallas_src>
import functools
import math

import jax
import jax.numpy as jnp
from jax import lax
from jax.experimental import pallas as pl
from jax.experimental.pallas import tpu as pltpu


def _round_up(x, m):
    return ((x + m - 1) // m) * m


# ---------------------------------------------------------------------------
# Fused forward kernel (built per static config)
# ---------------------------------------------------------------------------
def _make_kernel(num_layers, T, BB, HP, num_act, merge_dirs):
    """Refs: [x2d, (w_ih, w_hh, b_ih, b_hh_n) * L, fc_w, fc_b] -> out,
    scratch: num_act act buffers (T*BB, 2*HP) f32 + gi buffer (T*BB, 6*HP) f32."""
    H3 = 3 * HP
    H6 = 6 * HP

    def kernel(*refs):
        x_ref = refs[0]
        lrefs = refs[1:1 + 4 * num_layers]
        fc_w_ref, fc_b_ref = refs[1 + 4 * num_layers: 3 + 4 * num_layers]
        out_ref = refs[3 + 4 * num_layers]
        act_refs = refs[4 + 4 * num_layers: 4 + 4 * num_layers + num_act]
        gi_ref = refs[4 + 4 * num_layers + num_act]

        cur = x_ref[...]                                 # bf16 (T*BB, Din_pad)
        for layer in range(num_layers):
            w_ih_ref, w_hh_ref, b_ih_ref, bhn_ref = lrefs[4 * layer:4 * layer + 4]
            act_ref = act_refs[layer % num_act]

            # Hoisted input projection: both directions, all timesteps, one
            # bf16 MXU pass; b_ih (with b_hh[r], b_hh[z] folded in) added once.
            gi_ref[...] = (jnp.dot(cur, w_ih_ref[...],
                                   preferred_element_type=jnp.float32)
                           + b_ih_ref[...])

            w_hh = w_hh_ref[...]                         # bf16 (2*HP, 6*HP)
            # Hoisted broadcasts of the n-gate hidden bias (one per direction).
            bhn_f = jnp.broadcast_to(bhn_ref[:, 0:HP], (BB, HP))
            bhn_b = jnp.broadcast_to(bhn_ref[:, HP:2 * HP], (BB, HP))

            h_f = jnp.zeros((BB, HP), jnp.float32)
            h_b = jnp.zeros((BB, HP), jnp.float32)

            for i in range(T):                           # fully unrolled (T small)
                j = T - 1 - i
                if merge_dirs:
                    # One K=2*HP matmul driving both direction chains (v6e/v7x).
                    h_cat = jnp.concatenate([h_f, h_b], axis=1).astype(jnp.bfloat16)
                    gh = jnp.dot(h_cat, w_hh, preferred_element_type=jnp.float32)
                    gh_f = gh[:, 0:H3]
                    gh_b = gh[:, H3:H6]
                else:
                    # v5e path: two K=HP matmuls (128-wide MXU).
                    gh_f = jnp.dot(h_f.astype(jnp.bfloat16), w_hh[0:HP, 0:H3],
                                   preferred_element_type=jnp.float32)
                    gh_b = jnp.dot(h_b.astype(jnp.bfloat16), w_hh[HP:2 * HP, H3:H6],
                                   preferred_element_type=jnp.float32)

                gi_f = gi_ref[i * BB:(i + 1) * BB, 0:H3]      # aligned (8,128) tiles
                gi_b = gi_ref[j * BB:(j + 1) * BB, H3:H6]

                r_f = jax.nn.sigmoid(gi_f[:, 0:HP] + gh_f[:, 0:HP])
                z_f = jax.nn.sigmoid(gi_f[:, HP:2 * HP] + gh_f[:, HP:2 * HP])
                n_f = jnp.tanh(gi_f[:, 2 * HP:H3] + r_f * (gh_f[:, 2 * HP:H3] + bhn_f))
                h_f = (1.0 - z_f) * n_f + z_f * h_f

                r_b = jax.nn.sigmoid(gi_b[:, 0:HP] + gh_b[:, 0:HP])
                z_b = jax.nn.sigmoid(gi_b[:, HP:2 * HP] + gh_b[:, HP:2 * HP])
                n_b = jnp.tanh(gi_b[:, 2 * HP:H3] + r_b * (gh_b[:, 2 * HP:H3] + bhn_b))
                h_b = (1.0 - z_b) * n_b + z_b * h_b

                # Full (8,128) f32 tile stores (fwd row i, bwd row T-1-i).
                act_ref[i * BB:(i + 1) * BB, 0:HP] = h_f
                act_ref[j * BB:(j + 1) * BB, HP:2 * HP] = h_b

            cur = act_ref[...].astype(jnp.bfloat16)      # (T*BB, 2*HP)

        # Collapsed fc1@fc2 head: single lane-dense matmul, padded C -> 256.
        out_ref[...] = (jnp.dot(cur, fc_w_ref[...],
                                preferred_element_type=jnp.float32)
                        + fc_b_ref[...])

    return kernel


# ---------------------------------------------------------------------------
# Wrapper calling pallas_call
# ---------------------------------------------------------------------------
def seq_tagger_forward(packed, x_btd, merge_dirs=None):
    """x_btd: (B, T, input_size) -> logits (B, T, num_classes)."""
    num_layers = len(packed["gru"])
    HP = packed["HP"]
    CP = packed["CP"]
    C = packed["num_classes"]
    Din_pad = packed["din_pad"]

    B, T, Din = x_btd.shape

    if merge_dirs is None:
        # Block-diag fwd/bwd merge only pays on 256-wide MXUs (v6e/v7x).
        try:
            kind = jax.devices()[0].device_kind.lower()
            merge_dirs = not any(v in kind for v in ("v2", "v3", "v4", "v5"))
        except Exception:
            merge_dirs = True

    # Batch padded to sublane granule and blocked for the grid.
    B_BLK = min(_round_up(B, 8), 64)
    BPT = _round_up(B, B_BLK)
    nb = BPT // B_BLK
    TB = T * B_BLK

    # Pad batch & feature dims, lay each batch block out time-major, cast bf16.
    x_pad = jnp.zeros((BPT, T, Din_pad), jnp.float32)
    x_pad = x_pad.at[:B, :, :Din].set(x_btd.astype(jnp.float32))
    x2d = (x_pad.reshape(nb, B_BLK, T, Din_pad)
                .transpose(0, 2, 1, 3)
                .reshape(nb * TB, Din_pad)
                .astype(jnp.bfloat16))

    inputs = [x2d]
    for lp in packed["gru"]:
        inputs += [lp["w_ih"], lp["w_hh"], lp["b_ih"], lp["b_hh_n"]]
    inputs += [packed["fc_w"], packed["fc_b"]]

    def full_spec(a):
        nd = a.ndim
        return pl.BlockSpec(a.shape, lambda b, nd=nd: (0,) * nd)

    in_specs = [pl.BlockSpec((TB, Din_pad), lambda b: (b, 0))]
    for lp in packed["gru"]:
        for name in ("w_ih", "w_hh", "b_ih", "b_hh_n"):
            in_specs.append(full_spec(lp[name]))
    in_specs += [full_spec(packed["fc_w"]), full_spec(packed["fc_b"])]

    num_act = 2 if num_layers > 1 else 1
    kernel = _make_kernel(num_layers, T, B_BLK, HP, num_act, merge_dirs)

    out = pl.pallas_call(
        kernel,
        out_shape=jax.ShapeDtypeStruct((nb * TB, CP), jnp.float32),
        grid_spec=pltpu.PrefetchScalarGridSpec(
            num_scalar_prefetch=0,
            grid=(nb,),
            in_specs=in_specs,
            out_specs=pl.BlockSpec((TB, CP), lambda b: (b, 0)),
            scratch_shapes=[pltpu.VMEM((TB, 2 * HP), jnp.float32)] * num_act
                         + [pltpu.VMEM((TB, 6 * HP), jnp.float32)]),
        compiler_params=pltpu.CompilerParams(
            dimension_semantics=("parallel",)),
    )(*inputs)

    # (nb*T*B_BLK, CP) -> (B, T, C)
    out = (out.reshape(nb, T, B_BLK, CP)
              .transpose(0, 2, 1, 3)
              .reshape(BPT, T, CP))
    return out[:B, :, :C]


# ---------------------------------------------------------------------------
# Parameters: logical (PyTorch-equivalent) init + packing into padded layout
# ---------------------------------------------------------------------------
def init_params(key, input_size, hidden_size, num_layers, num_classes):
    """PyTorch-style uniform(-1/sqrt(fan), 1/sqrt(fan)) init, transposed layout,
    gate order [r, z, n]."""
    def uni(k, shape, bound):
        return jax.random.uniform(k, shape, jnp.float32, -bound, bound)

    params = {"gru": []}
    k_gru = 1.0 / math.sqrt(hidden_size)
    for layer in range(num_layers):
        d_in = input_size if layer == 0 else 2 * hidden_size
        layer_params = {}
        for dname in ("fwd", "bwd"):
            key, k1, k2, k3, k4 = jax.random.split(key, 5)
            layer_params[dname] = dict(
                w_ih_t=uni(k1, (d_in, 3 * hidden_size), k_gru),
                w_hh_t=uni(k2, (hidden_size, 3 * hidden_size), k_gru),
                b_ih=uni(k3, (3 * hidden_size,), k_gru),
                b_hh=uni(k4, (3 * hidden_size,), k_gru),
            )
        params["gru"].append(layer_params)

    d_fc1_in = 2 * hidden_size
    k_fc1 = 1.0 / math.sqrt(d_fc1_in)
    k_fc2 = 1.0 / math.sqrt(36.0)
    key, k1, k2, k3, k4 = jax.random.split(key, 5)
    params["fc1_w_t"] = uni(k1, (d_fc1_in, 36), k_fc1)
    params["fc1_b"] = uni(k2, (36,), k_fc1)
    params["fc2_w_t"] = uni(k3, (36, num_classes), k_fc2)
    params["fc2_b"] = uni(k4, (num_classes,), k_fc2)
    return params


def pack_params(lp, input_size, hidden_size, num_layers, num_classes):
    """Pad/repack logical params into the 128-lane-aligned kernel layout.

    Per layer (both directions merged):
      w_ih   (Din_pad or 2*HP, 6*HP) bf16, columns [fwd r|z|n | bwd r|z|n]
      w_hh   (2*HP, 6*HP)            bf16, block-diagonal (fwd / bwd blocks)
      b_ih   (1, 6*HP)               f32, with b_hh[r], b_hh[z] folded in
      b_hh_n (1, 2*HP)               f32, hidden bias of the n gate only
    FC head collapsed: fc_w = fc1_w@fc2_w padded (2*HP, CP) bf16, fc_b (1, CP).
    """
    H = hidden_size
    HP = _round_up(H, 128)
    C = num_classes
    CP = _round_up(C, 128)
    Din_pad = _round_up(input_size, 8)

    packed = {"gru": [], "num_classes": C, "HP": HP, "CP": CP, "din_pad": Din_pad}
    for layer in range(num_layers):
        d_in_pad = Din_pad if layer == 0 else 2 * HP
        w_ih = jnp.zeros((d_in_pad, 6 * HP), jnp.float32)
        w_hh = jnp.zeros((2 * HP, 6 * HP), jnp.float32)
        b_ih = jnp.zeros((1, 6 * HP), jnp.float32)
        b_hh_n = jnp.zeros((1, 2 * HP), jnp.float32)
        for d, dname in enumerate(("fwd", "bwd")):
            p = lp["gru"][layer][dname]
            for g in range(3):
                src = slice(g * H, (g + 1) * H)
                dst = slice(d * 3 * HP + g * HP, d * 3 * HP + g * HP + H)
                if layer == 0:
                    w_ih = w_ih.at[0:input_size, dst].set(p["w_ih_t"][:, src])
                else:
                    # layer input lanes: fwd h at [0:H], bwd h at [HP:HP+H]
                    w_ih = w_ih.at[0:H, dst].set(p["w_ih_t"][0:H, src])
                    w_ih = w_ih.at[HP:HP + H, dst].set(p["w_ih_t"][H:2 * H, src])
                w_hh = w_hh.at[d * HP:d * HP + H, dst].set(p["w_hh_t"][:, src])
                bias = p["b_ih"][src]
                if g < 2:  # fold b_hh of r and z gates into b_ih
                    bias = bias + p["b_hh"][src]
                b_ih = b_ih.at[0, dst].set(bias)
            b_hh_n = b_hh_n.at[0, d * HP:d * HP + H].set(p["b_hh"][2 * H:3 * H])
        packed["gru"].append({
            "w_ih": w_ih.astype(jnp.bfloat16),
            "w_hh": w_hh.astype(jnp.bfloat16),
            "b_ih": b_ih,
            "b_hh_n": b_hh_n,
        })

    # Collapse fc1/fc2 (no nonlinearity between them in the module).
    w12 = lp["fc1_w_t"] @ lp["fc2_w_t"]                     # (2H, C)
    b12 = lp["fc1_b"] @ lp["fc2_w_t"] + lp["fc2_b"]         # (C,)
    fc_w = jnp.zeros((2 * HP, CP), jnp.float32)
    fc_w = fc_w.at[0:H, 0:C].set(w12[0:H])
    fc_w = fc_w.at[HP:HP + H, 0:C].set(w12[H:2 * H])
    fc_b = jnp.zeros((1, CP), jnp.float32).at[0, 0:C].set(b12)
    packed["fc_w"] = fc_w.astype(jnp.bfloat16)
    packed["fc_b"] = fc_b
    return packed


# ---------------------------------------------------------------------------
# Pure-JAX reference (same math, unpadded, all f32) for the correctness check
# ---------------------------------------------------------------------------
def _gru_dir_ref(x_tbd, p):
    H = p["w_hh_t"].shape[0]
    B = x_tbd.shape[1]
    h0 = jnp.zeros((B, H), jnp.float32)

    def step(h_prev, x_t):
        gi = x_t @ p["w_ih_t"] + p["b_ih"]
        gh = h_prev @ p["w_hh_t"] + p["b_hh"]
        r = jax.nn.sigmoid(gi[:, :H] + gh[:, :H])
        z = jax.nn.sigmoid(gi[:, H:2 * H] + gh[:, H:2 * H])
        n = jnp.tanh(gi[:, 2 * H:] + r * gh[:, 2 * H:])
        h = (1.0 - z) * n + z * h_prev
        return h, h

    _, out = lax.scan(step, h0, x_tbd)
    return out


def seq_tagger_ref(params, x_btd):
    x = jnp.transpose(x_btd, (1, 0, 2)).astype(jnp.float32)
    for lp in params["gru"]:
        out_f = _gru_dir_ref(x, lp["fwd"])
        out_b = jnp.flip(_gru_dir_ref(jnp.flip(x, axis=0), lp["bwd"]), axis=0)
        x = jnp.concatenate([out_f, out_b], axis=-1)
    h = x @ params["fc1_w_t"] + params["fc1_b"]
    y = h @ params["fc2_w_t"] + params["fc2_b"]
    return jnp.transpose(y, (1, 0, 2))


# ---------------------------------------------------------------------------
if __name__ == "__main__":
    # Small shapes consistent with the module's batch_first forward.
    B, T = 2, 8
    INPUT_SIZE, HIDDEN, NUM_LAYERS, NUM_CLASSES = 16, 32, 2, 150

    key = jax.random.PRNGKey(0)
    k_params, k_x = jax.random.split(key)
    logical = init_params(k_params, INPUT_SIZE, HIDDEN, NUM_LAYERS, NUM_CLASSES)
    packed = pack_params(logical, INPUT_SIZE, HIDDEN, NUM_LAYERS, NUM_CLASSES)
    x = jax.random.normal(k_x, (B, T, INPUT_SIZE), jnp.float32)

    fwd = jax.jit(functools.partial(seq_tagger_forward, packed))
    out = jax.block_until_ready(fwd(x))

    assert out.shape == (B, T, NUM_CLASSES), out.shape
    assert bool(jnp.all(jnp.isfinite(out)))

    ref = jax.block_until_ready(seq_tagger_ref(logical, x))
    max_err = float(jnp.max(jnp.abs(out - ref)))
    # bf16 MXU operands vs. the all-f32 reference -> allow ~1e-2-scale error.
    assert jnp.allclose(out, ref, atol=5e-2, rtol=5e-2), f"max_err={max_err}"

    print("KERNEL_OK")
</pallas_src>

<mosaic_0001>
module attributes {stable_mosaic.version = 11 : i64} {
  func.func @kernel(%arg0: i32, %arg1: memref<64x16xbf16, #tpu.memory_space<vmem>>, %arg2: memref<16x768xbf16, #tpu.memory_space<vmem>>, %arg3: memref<256x768xbf16, #tpu.memory_space<vmem>>, %arg4: memref<1x768xf32, #tpu.memory_space<vmem>>, %arg5: memref<1x256xf32, #tpu.memory_space<vmem>>, %arg6: memref<256x768xbf16, #tpu.memory_space<vmem>>, %arg7: memref<256x768xbf16, #tpu.memory_space<vmem>>, %arg8: memref<1x768xf32, #tpu.memory_space<vmem>>, %arg9: memref<1x256xf32, #tpu.memory_space<vmem>>, %arg10: memref<256x256xbf16, #tpu.memory_space<vmem>>, %arg11: memref<1x256xf32, #tpu.memory_space<vmem>>, %arg12: memref<64x256xf32, #tpu.memory_space<vmem>>, %arg13: memref<64x256xf32, #tpu.memory_space<vmem>>, %arg14: memref<64x256xf32, #tpu.memory_space<vmem>>, %arg15: memref<64x768xf32, #tpu.memory_space<vmem>>) attributes {dimension_semantics = [#tpu.dimension_semantics<parallel>], iteration_bounds = array<i64: 1>, scalar_prefetch = 0 : i64, scratch_operands = 3 : i64, tpu.core_type = #tpu.core_type<tc>, window_params = [{transform_indices = @transform_0, window_bounds = array<i64: 64, 16>}, {pipeline_mode = #tpu.pipeline_mode<synchronous>, transform_indices = @transform_1, window_bounds = array<i64: 16, 768>}, {pipeline_mode = #tpu.pipeline_mode<synchronous>, transform_indices = @transform_2, window_bounds = array<i64: 256, 768>}, {pipeline_mode = #tpu.pipeline_mode<synchronous>, transform_indices = @transform_3, window_bounds = array<i64: 1, 768>}, {pipeline_mode = #tpu.pipeline_mode<synchronous>, transform_indices = @transform_4, window_bounds = array<i64: 1, 256>}, {pipeline_mode = #tpu.pipeline_mode<synchronous>, transform_indices = @transform_5, window_bounds = array<i64: 256, 768>}, {pipeline_mode = #tpu.pipeline_mode<synchronous>, transform_indices = @transform_6, window_bounds = array<i64: 256, 768>}, {pipeline_mode = #tpu.pipeline_mode<synchronous>, transform_indices = @transform_7, window_bounds = array<i64: 1, 768>}, {pipeline_mode = #tpu.pipeline_mode<synchronous>, transform_indices = @transform_8, window_bounds = array<i64: 1, 256>}, {pipeline_mode = #tpu.pipeline_mode<synchronous>, transform_indices = @transform_9, window_bounds = array<i64: 256, 256>}, {pipeline_mode = #tpu.pipeline_mode<synchronous>, transform_indices = @transform_10, window_bounds = array<i64: 1, 256>}, {transform_indices = @transform_11, window_bounds = array<i64: 64, 256>}]} {
    %c0 = arith.constant 0 : index
    %c0_0 = arith.constant 0 : index
    %0 = vector.load %arg1[%c0, %c0_0] : memref<64x16xbf16, #tpu.memory_space<vmem>>, vector<64x16xbf16>
    %c0_1 = arith.constant 0 : index
    %c0_2 = arith.constant 0 : index
    %1 = vector.load %arg2[%c0_1, %c0_2] : memref<16x768xbf16, #tpu.memory_space<vmem>>, vector<16x768xbf16>
    %cst = arith.constant dense<0.000000e+00> : vector<64x768xf32>
    %2 = tpu.matmul %0, %1, %cst {dimension_numbers = #tpu.dot_dimension_numbers<[1], [0], [0], [1], [0, 0, 1, 1], [], []>} : vector<64x16xbf16>, vector<16x768xbf16>, vector<64x768xf32> -> vector<64x768xf32>
    %c0_3 = arith.constant 0 : index
    %c0_4 = arith.constant 0 : index
    %3 = vector.load %arg4[%c0_3, %c0_4] : memref<1x768xf32, #tpu.memory_space<vmem>>, vector<1x768xf32>
    %4 = vector.broadcast %3 : vector<1x768xf32> to vector<64x768xf32>
    %5 = arith.addf %2, %4 : vector<64x768xf32>
    %c0_5 = arith.constant 0 : index
    %c0_6 = arith.constant 0 : index
    %6 = vector.load %arg15[%c0_5, %c0_6] : memref<64x768xf32, #tpu.memory_space<vmem>>, vector<64x768xf32>
    tpu.vector_store %arg15[%c0_5, %c0_6], %5 {strides = array<i32>} : memref<64x768xf32, #tpu.memory_space<vmem>>, vector<64x768xf32>,
    %c0_7 = arith.constant 0 : index
    %c0_8 = arith.constant 0 : index
    %7 = vector.load %arg3[%c0_7, %c0_8] : memref<256x768xbf16, #tpu.memory_space<vmem>>, vector<256x768xbf16>
    %c0_9 = arith.constant 0 : index
    %c0_10 = arith.constant 0 : index
    %8 = vector.load %arg5[%c0_9, %c0_10] : memref<1x256xf32, #tpu.memory_space<vmem>>, vector<1x128xf32>
    %9 = vector.shape_cast %8 : vector<1x128xf32> to vector<1x128xf32>
    %10 = vector.broadcast %9 : vector<1x128xf32> to vector<8x128xf32>
    %c0_11 = arith.constant 0 : index
    %c128 = arith.constant 128 : index
    %11 = vector.load %arg5[%c0_11, %c128] : memref<1x256xf32, #tpu.memory_space<vmem>>, vector<1x128xf32>
    %12 = vector.shape_cast %11 : vector<1x128xf32> to vector<1x128xf32>
    %13 = vector.broadcast %12 : vector<1x128xf32> to vector<8x128xf32>
    %cst_12 = arith.constant 0.000000e+00 : f32
    %14 = vector.broadcast %cst_12 : f32 to vector<8x128xf32>
    %cst_13 = arith.constant 0.000000e+00 : f32
    %15 = vector.broadcast %cst_13 : f32 to vector<8x128xf32>
    %16 = tpu.concatenate %14, %15 in 1 : vector<8x128xf32>, vector<8x128xf32> -> vector<8x256xf32>
    %17 = arith.truncf %16 : vector<8x256xf32> to vector<8x256xbf16>
    %cst_14 = arith.constant dense<0.000000e+00> : vector<8x768xf32>
    %18 = tpu.matmul %17, %7, %cst_14 {dimension_numbers = #tpu.dot_dimension_numbers<[1], [0], [0], [1], [0, 0, 1, 1], [], []>} : vector<8x256xbf16>, vector<256x768xbf16>, vector<8x768xf32> -> vector<8x768xf32>
    %19 = vector.extract_strided_slice %18 {offsets = [0, 0], sizes = [8, 384], strides = [1, 1]} : vector<8x768xf32> to vector<8x384xf32>
    %20 = vector.extract_strided_slice %18 {offsets = [0, 384], sizes = [8, 384], strides = [1, 1]} : vector<8x768xf32> to vector<8x384xf32>
    %c0_15 = arith.constant 0 : index
    %c0_16 = arith.constant 0 : index
    %21 = vector.load %arg15[%c0_15, %c0_16] : memref<64x768xf32, #tpu.memory_space<vmem>>, vector<8x384xf32>
    %c56 = arith.constant 56 : index
    %c384 = arith.constant 384 : index
    %22 = vector.load %arg15[%c56, %c384] : memref<64x768xf32, #tpu.memory_space<vmem>>, vector<8x384xf32>
    %23 = vector.extract_strided_slice %21 {offsets = [0, 0], sizes = [8, 128], strides = [1, 1]} : vector<8x384xf32> to vector<8x128xf32>
    %24 = vector.extract_strided_slice %19 {offsets = [0, 0], sizes = [8, 128], strides = [1, 1]} : vector<8x384xf32> to vector<8x128xf32>
    %25 = arith.addf %23, %24 : vector<8x128xf32>
    %26 = arith.negf %25 : vector<8x128xf32>
    %27 = math.exp %26 : vector<8x128xf32>
    %cst_17 = arith.constant 1.000000e+00 : f32
    %28 = vector.broadcast %cst_17 : f32 to vector<8x128xf32>
    %29 = arith.addf %28, %27 : vector<8x128xf32>
    %30 = arith.divf %28, %29 : vector<8x128xf32>
    %31 = vector.extract_strided_slice %21 {offsets = [0, 128], sizes = [8, 128], strides = [1, 1]} : vector<8x384xf32> to vector<8x128xf32>
    %32 = vector.extract_strided_slice %19 {offsets = [0, 128], sizes = [8, 128], strides = [1, 1]} : vector<8x384xf32> to vector<8x128xf32>
    %33 = arith.addf %31, %32 : vector<8x128xf32>
    %34 = arith.negf %33 : vector<8x128xf32>
    %35 = math.exp %34 : vector<8x128xf32>
    %cst_18 = arith.constant 1.000000e+00 : f32
    %36 = vector.broadcast %cst_18 : f32 to vector<8x128xf32>
    %37 = arith.addf %36, %35 : vector<8x128xf32>
    %38 = arith.divf %36, %37 : vector<8x128xf32>
    %39 = vector.extract_strided_slice %21 {offsets = [0, 256], sizes = [8, 128], strides = [1, 1]} : vector<8x384xf32> to vector<8x128xf32>
    %40 = vector.extract_strided_slice %19 {offsets = [0, 256], sizes = [8, 128], strides = [1, 1]} : vector<8x384xf32> to vector<8x128xf32>
    %41 = arith.addf %40, %10 : vector<8x128xf32>
    %42 = arith.mulf %30, %41 : vector<8x128xf32>
    %43 = arith.addf %39, %42 : vector<8x128xf32>
    %44 = math.tanh %43 : vector<8x128xf32>
    %cst_19 = arith.constant 1.000000e+00 : f32
    %45 = vector.broadcast %cst_19 : f32 to vector<8x128xf32>
    %46 = arith.subf %45, %38 : vector<8x128xf32>
    %47 = arith.mulf %46, %44 : vector<8x128xf32>
    %48 = arith.mulf %38, %14 : vector<8x128xf32>
    %49 = arith.addf %47, %48 : vector<8x128xf32>
    %50 = vector.extract_strided_slice %22 {offsets = [0, 0], sizes = [8, 128], strides = [1, 1]} : vector<8x384xf32> to vector<8x128xf32>
    %51 = vector.extract_strided_slice %20 {offsets = [0, 0], sizes = [8, 128], strides = [1, 1]} : vector<8x384xf32> to vector<8x128xf32>
    %52 = arith.addf %50, %51 : vector<8x128xf32>
    %53 = arith.negf %52 : vector<8x128xf32>
    %54 = math.exp %53 : vector<8x128xf32>
    %cst_20 = arith.constant 1.000000e+00 : f32
    %55 = vector.broadcast %cst_20 : f32 to vector<8x128xf32>
    %56 = arith.addf %55, %54 : vector<8x128xf32>
    %57 = arith.divf %55, %56 : vector<8x128xf32>
    %58 = vector.extract_strided_slice %22 {offsets = [0, 128], sizes = [8, 128], strides = [1, 1]} : vector<8x384xf32> to vector<8x128xf32>
    %59 = vector.extract_strided_slice %20 {offsets = [0, 128], sizes = [8, 128], strides = [1, 1]} : vector<8x384xf32> to vector<8x128xf32>
    %60 = arith.addf %58, %59 : vector<8x128xf32>
    %61 = arith.negf %60 : vector<8x128xf32>
    %62 = math.exp %61 : vector<8x128xf32>
    %cst_21 = arith.constant 1.000000e+00 : f32
    %63 = vector.broadcast %cst_21 : f32 to vector<8x128xf32>
    %64 = arith.addf %63, %62 : vector<8x128xf32>
    %65 = arith.divf %63, %64 : vector<8x128xf32>
    %66 = vector.extract_strided_slice %22 {offsets = [0, 256], sizes = [8, 128], strides = [1, 1]} : vector<8x384xf32> to vector<8x128xf32>
    %67 = vector.extract_strided_slice %20 {offsets = [0, 256], sizes = [8, 128], strides = [1, 1]} : vector<8x384xf32> to vector<8x128xf32>
    %68 = arith.addf %67, %13 : vector<8x128xf32>
    %69 = arith.mulf %57, %68 : vector<8x128xf32>
    %70 = arith.addf %66, %69 : vector<8x128xf32>
    %71 = math.tanh %70 : vector<8x128xf32>
    %cst_22 = arith.constant 1.000000e+00 : f32
    %72 = vector.broadcast %cst_22 : f32 to vector<8x128xf32>
    %73 = arith.subf %72, %65 : vector<8x128xf32>
    %74 = arith.mulf %73, %71 : vector<8x128xf32>
    %75 = arith.mulf %65, %15 : vector<8x128xf32>
    %76 = arith.addf %74, %75 : vector<8x128xf32>
    %c0_23 = arith.constant 0 : index
    %c0_24 = arith.constant 0 : index
    %77 = vector.load %arg13[%c0_23, %c0_24] : memref<64x256xf32, #tpu.memory_space<vmem>>, vector<8x128xf32>
    tpu.vector_store %arg13[%c0_23, %c0_24], %49 {strides = array<i32>} : memref<64x256xf32, #tpu.memory_space<vmem>>, vector<8x128xf32>,
    %c56_25 = arith.constant 56 : index
    %c128_26 = arith.constant 128 : index
    %78 = vector.load %arg13[%c56_25, %c128_26] : memref<64x256xf32, #tpu.memory_space<vmem>>, vector<8x128xf32>
    tpu.vector_store %arg13[%c56_25, %c128_26], %76 {strides = array<i32>} : memref<64x256xf32, #tpu.memory_space<vmem>>, vector<8x128xf32>,
    %79 = tpu.concatenate %49, %76 in 1 : vector<8x128xf32>, vector<8x128xf32> -> vector<8x256xf32>
    %80 = arith.truncf %79 : vector<8x256xf32> to vector<8x256xbf16>
    %cst_27 = arith.constant dense<0.000000e+00> : vector<8x768xf32>
    %81 = tpu.matmul %80, %7, %cst_27 {dimension_numbers = #tpu.dot_dimension_numbers<[1], [0], [0], [1], [0, 0, 1, 1], [], []>} : vector<8x256xbf16>, vector<256x768xbf16>, vector<8x768xf32> -> vector<8x768xf32>
    %82 = vector.extract_strided_slice %81 {offsets = [0, 0], sizes = [8, 384], strides = [1, 1]} : vector<8x768xf32> to vector<8x384xf32>
    %83 = vector.extract_strided_slice %81 {offsets = [0, 384], sizes = [8, 384], strides = [1, 1]} : vector<8x768xf32> to vector<8x384xf32>
    %c8 = arith.constant 8 : index
    %c0_28 = arith.constant 0 : index
    %84 = vector.load %arg15[%c8, %c0_28] : memref<64x768xf32, #tpu.memory_space<vmem>>, vector<8x384xf32>
    %c48 = arith.constant 48 : index
    %c384_29 = arith.constant 384 : index
    %85 = vector.load %arg15[%c48, %c384_29] : memref<64x768xf32, #tpu.memory_space<vmem>>, vector<8x384xf32>
    %86 = vector.extract_strided_slice %84 {offsets = [0, 0], sizes = [8, 128], strides = [1, 1]} : vector<8x384xf32> to vector<8x128xf32>
    %87 = vector.extract_strided_slice %82 {offsets = [0, 0], sizes = [8, 128], strides = [1, 1]} : vector<8x384xf32> to vector<8x128xf32>
    %88 = arith.addf %86, %87 : vector<8x128xf32>
    %89 = arith.negf %88 : vector<8x128xf32>
    %90 = math.exp %89 : vector<8x128xf32>
    %cst_30 = arith.constant 1.000000e+00 : f32
    %91 = vector.broadcast %cst_30 : f32 to vector<8x128xf32>
    %92 = arith.addf %91, %90 : vector<8x128xf32>
    %93 = arith.divf %91, %92 : vector<8x128xf32>
    %94 = vector.extract_strided_slice %84 {offsets = [0, 128], sizes = [8, 128], strides = [1, 1]} : vector<8x384xf32> to vector<8x128xf32>
    %95 = vector.extract_strided_slice %82 {offsets = [0, 128], sizes = [8, 128], strides = [1, 1]} : vector<8x384xf32> to vector<8x128xf32>
    %96 = arith.addf %94, %95 : vector<8x128xf32>
    %97 = arith.negf %96 : vector<8x128xf32>
    %98 = math.exp %97 : vector<8x128xf32>
    %cst_31 = arith.constant 1.000000e+00 : f32
    %99 = vector.broadcast %cst_31 : f32 to vector<8x128xf32>
    %100 = arith.addf %99, %98 : vector<8x128xf32>
    %101 = arith.divf %99, %100 : vector<8x128xf32>
    %102 = vector.extract_strided_slice %84 {offsets = [0, 256], sizes = [8, 128], strides = [1, 1]} : vector<8x384xf32> to vector<8x128xf32>
    %103 = vector.extract_strided_slice %82 {offsets = [0, 256], sizes = [8, 128], strides = [1, 1]} : vector<8x384xf32> to vector<8x128xf32>
    %104 = arith.addf %103, %10 : vector<8x128xf32>
    %105 = arith.mulf %93, %104 : vector<8x128xf32>
    %106 = arith.addf %102, %105 : vector<8x128xf32>
    %107 = math.tanh %106 : vector<8x128xf32>
    %cst_32 = arith.constant 1.000000e+00 : f32
    %108 = vector.broadcast %cst_32 : f32 to vector<8x128xf32>
    %109 = arith.subf %108, %101 : vector<8x128xf32>
    %110 = arith.mulf %109, %107 : vector<8x128xf32>
    %111 = arith.mulf %101, %49 : vector<8x128xf32>
    %112 = arith.addf %110, %111 : vector<8x128xf32>
    %113 = vector.extract_strided_slice %85 {offsets = [0, 0], sizes = [8, 128], strides = [1, 1]} : vector<8x384xf32> to vector<8x128xf32>
    %114 = vector.extract_strided_slice %83 {offsets = [0, 0], sizes = [8, 128], strides = [1, 1]} : vector<8x384xf32> to vector<8x128xf32>
    %115 = arith.addf %113, %114 : vector<8x128xf32>
    %116 = arith.negf %115 : vector<8x128xf32>
    %117 = math.exp %116 : vector<8x128xf32>
    %cst_33 = arith.constant 1.000000e+00 : f32
    %118 = vector.broadcast %cst_33 : f32 to vector<8x128xf32>
    %119 = arith.addf %118, %117 : vector<8x128xf32>
    %120 = arith.divf %118, %119 : vector<8x128xf32>
    %121 = vector.extract_strided_slice %85 {offsets = [0, 128], sizes = [8, 128], strides = [1, 1]} : vector<8x384xf32> to vector<8x128xf32>
    %122 = vector.extract_strided_slice %83 {offsets = [0, 128], sizes = [8, 128], strides = [1, 1]} : vector<8x384xf32> to vector<8x128xf32>
    %123 = arith.addf %121, %122 : vector<8x128xf32>
    %124 = arith.negf %123 : vector<8x128xf32>
    %125 = math.exp %124 : vector<8x128xf32>
    %cst_34 = arith.constant 1.000000e+00 : f32
    %126 = vector.broadcast %cst_34 : f32 to vector<8x128xf32>
    %127 = arith.addf %126, %125 : vector<8x128xf32>
    %128 = arith.divf %126, %127 : vector<8x128xf32>
    %129 = vector.extract_strided_slice %85 {offsets = [0, 256], sizes = [8, 128], strides = [1, 1]} : vector<8x384xf32> to vector<8x128xf32>
    %130 = vector.extract_strided_slice %83 {offsets = [0, 256], sizes = [8, 128], strides = [1, 1]} : vector<8x384xf32> to vector<8x128xf32>
    %131 = arith.addf %130, %13 : vector<8x128xf32>
    %132 = arith.mulf %120, %131 : vector<8x128xf32>
    %133 = arith.addf %129, %132 : vector<8x128xf32>
    %134 = math.tanh %133 : vector<8x128xf32>
    %cst_35 = arith.constant 1.000000e+00 : f32
    %135 = vector.broadcast %cst_35 : f32 to vector<8x128xf32>
    %136 = arith.subf %135, %128 : vector<8x128xf32>
    %137 = arith.mulf %136, %134 : vector<8x128xf32>
    %138 = arith.mulf %128, %76 : vector<8x128xf32>
    %139 = arith.addf %137, %138 : vector<8x128xf32>
    %c8_36 = arith.constant 8 : index
    %c0_37 = arith.constant 0 : index
    %140 = vector.load %arg13[%c8_36, %c0_37] : memref<64x256xf32, #tpu.memory_space<vmem>>, vector<8x128xf32>
    tpu.vector_store %arg13[%c8_36, %c0_37], %112 {strides = array<i32>} : memref<64x256xf32, #tpu.memory_space<vmem>>, vector<8x128xf32>,
    %c48_38 = arith.constant 48 : index
    %c128_39 = arith.constant 128 : index
    %141 = vector.load %arg13[%c48_38, %c128_39] : memref<64x256xf32, #tpu.memory_space<vmem>>, vector<8x128xf32>
    tpu.vector_store %arg13[%c48_38, %c128_39], %139 {strides = array<i32>} : memref<64x256xf32, #tpu.memory_space<vmem>>, vector<8x128xf32>,
    %142 = tpu.concatenate %112, %139 in 1 : vector<8x128xf32>, vector<8x128xf32> -> vector<8x256xf32>
    %143 = arith.truncf %142 : vector<8x256xf32> to vector<8x256xbf16>
    %cst_40 = arith.constant dense<0.000000e+00> : vector<8x768xf32>
    %144 = tpu.matmul %143, %7, %cst_40 {dimension_numbers = #tpu.dot_dimension_numbers<[1], [0], [0], [1], [0, 0, 1, 1], [], []>} : vector<8x256xbf16>, vector<256x768xbf16>, vector<8x768xf32> -> vector<8x768xf32>
    %145 = vector.extract_strided_slice %144 {offsets = [0, 0], sizes = [8, 384], strides = [1, 1]} : vector<8x768xf32> to vector<8x384xf32>
    %146 = vector.extract_strided_slice %144 {offsets = [0, 384], sizes = [8, 384], strides = [1, 1]} : vector<8x768xf32> to vector<8x384xf32>
    %c16 = arith.constant 16 : index
    %c0_41 = arith.constant 0 : index
    %147 = vector.load %arg15[%c16, %c0_41] : memref<64x768xf32, #tpu.memory_space<vmem>>, vector<8x384xf32>
    %c40 = arith.constant 40 : index
    %c384_42 = arith.constant 384 : index
    %148 = vector.load %arg15[%c40, %c384_42] : memref<64x768xf32, #tpu.memory_space<vmem>>, vector<8x384xf32>
    %149 = vector.extract_strided_slice %147 {offsets = [0, 0], sizes = [8, 128], strides = [1, 1]} : vector<8x384xf32> to vector<8x128xf32>
    %150 = vector.extract_strided_slice %145 {offsets = [0, 0], sizes = [8, 128], strides = [1, 1]} : vector<8x384xf32> to vector<8x128xf32>
    %151 = arith.addf %149, %150 : vector<8x128xf32>
    %152 = arith.negf %151 : vector<8x128xf32>
    %153 = math.exp %152 : vector<8x128xf32>
    %cst_43 = arith.constant 1.000000e+00 : f32
    %154 = vector.broadcast %cst_43 : f32 to vector<8x128xf32>
    %155 = arith.addf %154, %153 : vector<8x128xf32>
    %156 = arith.divf %154, %155 : vector<8x128xf32>
    %157 = vector.extract_strided_slice %147 {offsets = [0, 128], sizes = [8, 128], strides = [1, 1]} : vector<8x384xf32> to vector<8x128xf32>
    %158 = vector.extract_strided_slice %145 {offsets = [0, 128], sizes = [8, 128], strides = [1, 1]} : vector<8x384xf32> to vector<8x128xf32>
    %159 = arith.addf %157, %158 : vector<8x128xf32>
    %160 = arith.negf %159 : vector<8x128xf32>
    %161 = math.exp %160 : vector<8x128xf32>
    %cst_44 = arith.constant 1.000000e+00 : f32
    %162 = vector.broadcast %cst_44 : f32 to vector<8x128xf32>
    %163 = arith.addf %162, %161 : vector<8x128xf32>
    %164 = arith.divf %162, %163 : vector<8x128xf32>
    %165 = vector.extract_strided_slice %147 {offsets = [0, 256], sizes = [8, 128], strides = [1, 1]} : vector<8x384xf32> to vector<8x128xf32>
    %166 = vector.extract_strided_slice %145 {offsets = [0, 256], sizes = [8, 128], strides = [1, 1]} : vector<8x384xf32> to vector<8x128xf32>
    %167 = arith.addf %166, %10 : vector<8x128xf32>
    %168 = arith.mulf %156, %167 : vector<8x128xf32>
    %169 = arith.addf %165, %168 : vector<8x128xf32>
    %170 = math.tanh %169 : vector<8x128xf32>
    %cst_45 = arith.constant 1.000000e+00 : f32
    %171 = vector.broadcast %cst_45 : f32 to vector<8x128xf32>
    %172 = arith.subf %171, %164 : vector<8x128xf32>
    %173 = arith.mulf %172, %170 : vector<8x128xf32>
    %174 = arith.mulf %164, %112 : vector<8x128xf32>
    %175 = arith.addf %173, %174 : vector<8x128xf32>
    %176 = vector.extract_strided_slice %148 {offsets = [0, 0], sizes = [8, 128], strides = [1, 1]} : vector<8x384xf32> to vector<8x128xf32>
    %177 = vector.extract_strided_slice %146 {offsets = [0, 0], sizes = [8, 128], strides = [1, 1]} : vector<8x384xf32> to vector<8x128xf32>
    %178 = arith.addf %176, %177 : vector<8x128xf32>
    %179 = arith.negf %178 : vector<8x128xf32>
    %180 = math.exp %179 : vector<8x128xf32>
    %cst_46 = arith.constant 1.000000e+00 : f32
    %181 = vector.broadcast %cst_46 : f32 to vector<8x128xf32>
    %182 = arith.addf %181, %180 : vector<8x128xf32>
    %183 = arith.divf %181, %182 : vector<8x128xf32>
    %184 = vector.extract_strided_slice %148 {offsets = [0, 128], sizes = [8, 128], strides = [1, 1]} : vector<8x384xf32> to vector<8x128xf32>
    %185 = vector.extract_strided_slice %146 {offsets = [0, 128], sizes = [8, 128], strides = [1, 1]} : vector<8x384xf32> to vector<8x128xf32>
    %186 = arith.addf %184, %185 : vector<8x128xf32>
    %187 = arith.negf %186 : vector<8x128xf32>
    %188 = math.exp %187 : vector<8x128xf32>
    %cst_47 = arith.constant 1.000000e+00 : f32
    %189 = vector.broadcast %cst_47 : f32 to vector<8x128xf32>
    %190 = arith.addf %189, %188 : vector<8x128xf32>
    %191 = arith.divf %189, %190 : vector<8x128xf32>
    %192 = vector.extract_strided_slice %148 {offsets = [0, 256], sizes = [8, 128], strides = [1, 1]} : vector<8x384xf32> to vector<8x128xf32>
    %193 = vector.extract_strided_slice %146 {offsets = [0, 256], sizes = [8, 128], strides = [1, 1]} : vector<8x384xf32> to vector<8x128xf32>
    %194 = arith.addf %193, %13 : vector<8x128xf32>
    %195 = arith.mulf %183, %194 : vector<8x128xf32>
    %196 = arith.addf %192, %195 : vector<8x128xf32>
    %197 = math.tanh %196 : vector<8x128xf32>
    %cst_48 = arith.constant 1.000000e+00 : f32
    %198 = vector.broadcast %cst_48 : f32 to vector<8x128xf32>
    %199 = arith.subf %198, %191 : vector<8x128xf32>
    %200 = arith.mulf %199, %197 : vector<8x128xf32>
    %201 = arith.mulf %191, %139 : vector<8x128xf32>
    %202 = arith.addf %200, %201 : vector<8x128xf32>
    %c16_49 = arith.constant 16 : index
    %c0_50 = arith.constant 0 : index
    %203 = vector.load %arg13[%c16_49, %c0_50] : memref<64x256xf32, #tpu.memory_space<vmem>>, vector<8x128xf32>
    tpu.vector_store %arg13[%c16_49, %c0_50], %175 {strides = array<i32>} : memref<64x256xf32, #tpu.memory_space<vmem>>, vector<8x128xf32>,
    %c40_51 = arith.constant 40 : index
    %c128_52 = arith.constant 128 : index
    %204 = vector.load %arg13[%c40_51, %c128_52] : memref<64x256xf32, #tpu.memory_space<vmem>>, vector<8x128xf32>
    tpu.vector_store %arg13[%c40_51, %c128_52], %202 {strides = array<i32>} : memref<64x256xf32, #tpu.memory_space<vmem>>, vector<8x128xf32>,
    %205 = tpu.concatenate %175, %202 in 1 : vector<8x128xf32>, vector<8x128xf32> -> vector<8x256xf32>
    %206 = arith.truncf %205 : vector<8x256xf32> to vector<8x256xbf16>
    %cst_53 = arith.constant dense<0.000000e+00> : vector<8x768xf32>
    %207 = tpu.matmul %206, %7, %cst_53 {dimension_numbers = #tpu.dot_dimension_numbers<[1], [0], [0], [1], [0, 0, 1, 1], [], []>} : vector<8x256xbf16>, vector<256x768xbf16>, vector<8x768xf32> -> vector<8x768xf32>
    %208 = vector.extract_strided_slice %207 {offsets = [0, 0], sizes = [8, 384], strides = [1, 1]} : vector<8x768xf32> to vector<8x384xf32>
    %209 = vector.extract_strided_slice %207 {offsets = [0, 384], sizes = [8, 384], strides = [1, 1]} : vector<8x768xf32> to vector<8x384xf32>
    %c24 = arith.constant 24 : index
    %c0_54 = arith.constant 0 : index
    %210 = vector.load %arg15[%c24, %c0_54] : memref<64x768xf32, #tpu.memory_space<vmem>>, vector<8x384xf32>
    %c32 = arith.constant 32 : index
    %c384_55 = arith.constant 384 : index
    %211 = vector.load %arg15[%c32, %c384_55] : memref<64x768xf32, #tpu.memory_space<vmem>>, vector<8x384xf32>
    %212 = vector.extract_strided_slice %210 {offsets = [0, 0], sizes = [8, 128], strides = [1, 1]} : vector<8x384xf32> to vector<8x128xf32>
    %213 = vector.extract_strided_slice %208 {offsets = [0, 0], sizes = [8, 128], strides = [1, 1]} : vector<8x384xf32> to vector<8x128xf32>
    %214 = arith.addf %212, %213 : vector<8x128xf32>
    %215 = arith.negf %214 : vector<8x128xf32>
    %216 = math.exp %215 : vector<8x128xf32>
    %cst_56 = arith.constant 1.000000e+00 : f32
    %217 = vector.broadcast %cst_56 : f32 to vector<8x128xf32>
    %218 = arith.addf %217, %216 : vector<8x128xf32>
    %219 = arith.divf %217, %218 : vector<8x128xf32>
    %220 = vector.extract_strided_slice %210 {offsets = [0, 128], sizes = [8, 128], strides = [1, 1]} : vector<8x384xf32> to vector<8x128xf32>
    %221 = vector.extract_strided_slice %208 {offsets = [0, 128], sizes = [8, 128], strides = [1, 1]} : vector<8x384xf32> to vector<8x128xf32>
    %222 = arith.addf %220, %221 : vector<8x128xf32>
    %223 = arith.negf %222 : vector<8x128xf32>
    %224 = math.exp %223 : vector<8x128xf32>
    %cst_57 = arith.constant 1.000000e+00 : f32
    %225 = vector.broadcast %cst_57 : f32 to vector<8x128xf32>
    %226 = arith.addf %225, %224 : vector<8x128xf32>
    %227 = arith.divf %225, %226 : vector<8x128xf32>
    %228 = vector.extract_strided_slice %210 {offsets = [0, 256], sizes = [8, 128], strides = [1, 1]} : vector<8x384xf32> to vector<8x128xf32>
    %229 = vector.extract_strided_slice %208 {offsets = [0, 256], sizes = [8, 128], strides = [1, 1]} : vector<8x384xf32> to vector<8x128xf32>
    %230 = arith.addf %229, %10 : vector<8x128xf32>
    %231 = arith.mulf %219, %230 : vector<8x128xf32>
    %232 = arith.addf %228, %231 : vector<8x128xf32>
    %233 = math.tanh %232 : vector<8x128xf32>
    %cst_58 = arith.constant 1.000000e+00 : f32
    %234 = vector.broadcast %cst_58 : f32 to vector<8x128xf32>
    %235 = arith.subf %234, %227 : vector<8x128xf32>
    %236 = arith.mulf %235, %233 : vector<8x128xf32>
    %237 = arith.mulf %227, %175 : vector<8x128xf32>
    %238 = arith.addf %236, %237 : vector<8x128xf32>
    %239 = vector.extract_strided_slice %211 {offsets = [0, 0], sizes = [8, 128], strides = [1, 1]} : vector<8x384xf32> to vector<8x128xf32>
    %240 = vector.extract_strided_slice %209 {offsets = [0, 0], sizes = [8, 128], strides = [1, 1]} : vector<8x384xf32> to vector<8x128xf32>
    %241 = arith.addf %239, %240 : vector<8x128xf32>
    %242 = arith.negf %241 : vector<8x128xf32>
    %243 = math.exp %242 : vector<8x128xf32>
    %cst_59 = arith.constant 1.000000e+00 : f32
    %244 = vector.broadcast %cst_59 : f32 to vector<8x128xf32>
    %245 = arith.addf %244, %243 : vector<8x128xf32>
    %246 = arith.divf %244, %245 : vector<8x128xf32>
    %247 = vector.extract_strided_slice %211 {offsets = [0, 128], sizes = [8, 128], strides = [1, 1]} : vector<8x384xf32> to vector<8x128xf32>
    %248 = vector.extract_strided_slice %209 {offsets = [0, 128], sizes = [8, 128], strides = [1, 1]} : vector<8x384xf32> to vector<8x128xf32>
    %249 = arith.addf %247, %248 : vector<8x128xf32>
    %250 = arith.negf %249 : vector<8x128xf32>
    %251 = math.exp %250 : vector<8x128xf32>
    %cst_60 = arith.constant 1.000000e+00 : f32
    %252 = vector.broadcast %cst_60 : f32 to vector<8x128xf32>
    %253 = arith.addf %252, %251 : vector<8x128xf32>
    %254 = arith.divf %252, %253 : vector<8x128xf32>
    %255 = vector.extract_strided_slice %211 {offsets = [0, 256], sizes = [8, 128], strides = [1, 1]} : vector<8x384xf32> to vector<8x128xf32>
    %256 = vector.extract_strided_slice %209 {offsets = [0, 256], sizes = [8, 128], strides = [1, 1]} : vector<8x384xf32> to vector<8x128xf32>
    %257 = arith.addf %256, %13 : vector<8x128xf32>
    %258 = arith.mulf %246, %257 : vector<8x128xf32>
    %259 = arith.addf %255, %258 : vector<8x128xf32>
    %260 = math.tanh %259 : vector<8x128xf32>
    %cst_61 = arith.constant 1.000000e+00 : f32
    %261 = vector.broadcast %cst_61 : f32 to vector<8x128xf32>
    %262 = arith.subf %261, %254 : vector<8x128xf32>
    %263 = arith.mulf %262, %260 : vector<8x128xf32>
    %264 = arith.mulf %254, %202 : vector<8x128xf32>
    %265 = arith.addf %263, %264 : vector<8x128xf32>
    %c24_62 = arith.constant 24 : index
    %c0_63 = arith.constant 0 : index
    %266 = vector.load %arg13[%c24_62, %c0_63] : memref<64x256xf32, #tpu.memory_space<vmem>>, vector<8x128xf32>
    tpu.vector_store %arg13[%c24_62, %c0_63], %238 {strides = array<i32>} : memref<64x256xf32, #tpu.memory_space<vmem>>, vector<8x128xf32>,
    %c32_64 = arith.constant 32 : index
    %c128_65 = arith.constant 128 : index
    %267 = vector.load %arg13[%c32_64, %c128_65] : memref<64x256xf32, #tpu.memory_space<vmem>>, vector<8x128xf32>
    tpu.vector_store %arg13[%c32_64, %c128_65], %265 {strides = array<i32>} : memref<64x256xf32, #tpu.memory_space<vmem>>, vector<8x128xf32>,
    %268 = tpu.concatenate %238, %265 in 1 : vector<8x128xf32>, vector<8x128xf32> -> vector<8x256xf32>
    %269 = arith.truncf %268 : vector<8x256xf32> to vector<8x256xbf16>
    %cst_66 = arith.constant dense<0.000000e+00> : vector<8x768xf32>
    %270 = tpu.matmul %269, %7, %cst_66 {dimension_numbers = #tpu.dot_dimension_numbers<[1], [0], [0], [1], [0, 0, 1, 1], [], []>} : vector<8x256xbf16>, vector<256x768xbf16>, vector<8x768xf32> -> vector<8x768xf32>
    %271 = vector.extract_strided_slice %270 {offsets = [0, 0], sizes = [8, 384], strides = [1, 1]} : vector<8x768xf32> to vector<8x384xf32>
    %272 = vector.extract_strided_slice %270 {offsets = [0, 384], sizes = [8, 384], strides = [1, 1]} : vector<8x768xf32> to vector<8x384xf32>
    %c32_67 = arith.constant 32 : index
    %c0_68 = arith.constant 0 : index
    %273 = vector.load %arg15[%c32_67, %c0_68] : memref<64x768xf32, #tpu.memory_space<vmem>>, vector<8x384xf32>
    %c24_69 = arith.constant 24 : index
    %c384_70 = arith.constant 384 : index
    %274 = vector.load %arg15[%c24_69, %c384_70] : memref<64x768xf32, #tpu.memory_space<vmem>>, vector<8x384xf32>
    %275 = vector.extract_strided_slice %273 {offsets = [0, 0], sizes = [8, 128], strides = [1, 1]} : vector<8x384xf32> to vector<8x128xf32>
    %276 = vector.extract_strided_slice %271 {offsets = [0, 0], sizes = [8, 128], strides = [1, 1]} : vector<8x384xf32> to vector<8x128xf32>
    %277 = arith.addf %275, %276 : vector<8x128xf32>
    %278 = arith.negf %277 : vector<8x128xf32>
    %279 = math.exp %278 : vector<8x128xf32>
    %cst_71 = arith.constant 1.000000e+00 : f32
    %280 = vector.broadcast %cst_71 : f32 to vector<8x128xf32>
    %281 = arith.addf %280, %279 : vector<8x128xf32>
    %282 = arith.divf %280, %281 : vector<8x128xf32>
    %283 = vector.extract_strided_slice %273 {offsets = [0, 128], sizes = [8, 128], strides = [1, 1]} : vector<8x384xf32> to vector<8x128xf32>
    %284 = vector.extract_strided_slice %271 {offsets = [0, 128], sizes = [8, 128], strides = [1, 1]} : vector<8x384xf32> to vector<8x128xf32>
    %285 = arith.addf %283, %284 : vector<8x128xf32>
    %286 = arith.negf %285 : vector<8x128xf32>
    %287 = math.exp %286 : vector<8x128xf32>
    %cst_72 = arith.constant 1.000000e+00 : f32
    %288 = vector.broadcast %cst_72 : f32 to vector<8x128xf32>
    %289 = arith.addf %288, %287 : vector<8x128xf32>
    %290 = arith.divf %288, %289 : vector<8x128xf32>
    %291 = vector.extract_strided_slice %273 {offsets = [0, 256], sizes = [8, 128], strides = [1, 1]} : vector<8x384xf32> to vector<8x128xf32>
    %292 = vector.extract_strided_slice %271 {offsets = [0, 256], sizes = [8, 128], strides = [1, 1]} : vector<8x384xf32> to vector<8x128xf32>
    %293 = arith.addf %292, %10 : vector<8x128xf32>
    %294 = arith.mulf %282, %293 : vector<8x128xf32>
    %295 = arith.addf %291, %294 : vector<8x128xf32>
    %296 = math.tanh %295 : vector<8x128xf32>
    %cst_73 = arith.constant 1.000000e+00 : f32
    %297 = vector.broadcast %cst_73 : f32 to vector<8x128xf32>
    %298 = arith.subf %297, %290 : vector<8x128xf32>
    %299 = arith.mulf %298, %296 : vector<8x128xf32>
    %300 = arith.mulf %290, %238 : vector<8x128xf32>
    %301 = arith.addf %299, %300 : vector<8x128xf32>
    %302 = vector.extract_strided_slice %274 {offsets = [0, 0], sizes = [8, 128], strides = [1, 1]} : vector<8x384xf32> to vector<8x128xf32>
    %303 = vector.extract_strided_slice %272 {offsets = [0, 0], sizes = [8, 128], strides = [1, 1]} : vector<8x384xf32> to vector<8x128xf32>
    %304 = arith.addf %302, %303 : vector<8x128xf32>
    %305 = arith.negf %304 : vector<8x128xf32>
    %306 = math.exp %305 : vector<8x128xf32>
    %cst_74 = arith.constant 1.000000e+00 : f32
    %307 = vector.broadcast %cst_74 : f32 to vector<8x128xf32>
    %308 = arith.addf %307, %306 : vector<8x128xf32>
    %309 = arith.divf %307, %308 : vector<8x128xf32>
    %310 = vector.extract_strided_slice %274 {offsets = [0, 128], sizes = [8, 128], strides = [1, 1]} : vector<8x384xf32> to vector<8x128xf32>
    %311 = vector.extract_strided_slice %272 {offsets = [0, 128], sizes = [8, 128], strides = [1, 1]} : vector<8x384xf32> to vector<8x128xf32>
    %312 = arith.addf %310, %311 : vector<8x128xf32>
    %313 = arith.negf %312 : vector<8x128xf32>
    %314 = math.exp %313 : vector<8x128xf32>
    %cst_75 = arith.constant 1.000000e+00 : f32
    %315 = vector.broadcast %cst_75 : f32 to vector<8x128xf32>
    %316 = arith.addf %315, %314 : vector<8x128xf32>
    %317 = arith.divf %315, %316 : vector<8x128xf32>
    %318 = vector.extract_strided_slice %274 {offsets = [0, 256], sizes = [8, 128], strides = [1, 1]} : vector<8x384xf32> to vector<8x128xf32>
    %319 = vector.extract_strided_slice %272 {offsets = [0, 256], sizes = [8, 128], strides = [1, 1]} : vector<8x384xf32> to vector<8x128xf32>
    %320 = arith.addf %319, %13 : vector<8x128xf32>
    %321 = arith.mulf %309, %320 : vector<8x128xf32>
    %322 = arith.addf %318, %321 : vector<8x128xf32>
    %323 = math.tanh %322 : vector<8x128xf32>
    %cst_76 = arith.constant 1.000000e+00 : f32
    %324 = vector.broadcast %cst_76 : f32 to vector<8x128xf32>
    %325 = arith.subf %324, %317 : vector<8x128xf32>
    %326 = arith.mulf %325, %323 : vector<8x128xf32>
    %327 = arith.mulf %317, %265 : vector<8x128xf32>
    %328 = arith.addf %326, %327 : vector<8x128xf32>
    %c32_77 = arith.constant 32 : index
    %c0_78 = arith.constant 0 : index
    %329 = vector.load %arg13[%c32_77, %c0_78] : memref<64x256xf32, #tpu.memory_space<vmem>>, vector<8x128xf32>
    tpu.vector_store %arg13[%c32_77, %c0_78], %301 {strides = array<i32>} : memref<64x256xf32, #tpu.memory_space<vmem>>, vector<8x128xf32>,
    %c24_79 = arith.constant 24 : index
    %c128_80 = arith.constant 128 : index
    %330 = vector.load %arg13[%c24_79, %c128_80] : memref<64x256xf32, #tpu.memory_space<vmem>>, vector<8x128xf32>
    tpu.vector_store %arg13[%c24_79, %c128_80], %328 {strides = array<i32>} : memref<64x256xf32, #tpu.memory_space<vmem>>, vector<8x128xf32>,
    %331 = tpu.concatenate %301, %328 in 1 : vector<8x128xf32>, vector<8x128xf32> -> vector<8x256xf32>
    %332 = arith.truncf %331 : vector<8x256xf32> to vector<8x256xbf16>
    %cst_81 = arith.constant dense<0.000000e+00> : vector<8x768xf32>
    %333 = tpu.matmul %332, %7, %cst_81 {dimension_numbers = #tpu.dot_dimension_numbers<[1], [0], [0], [1], [0, 0, 1, 1], [], []>} : vector<8x256xbf16>, vector<256x768xbf16>, vector<8x768xf32> -> vector<8x768xf32>
    %334 = vector.extract_strided_slice %333 {offsets = [0, 0], sizes = [8, 384], strides = [1, 1]} : vector<8x768xf32> to vector<8x384xf32>
    %335 = vector.extract_strided_slice %333 {offsets = [0, 384], sizes = [8, 384], strides = [1, 1]} : vector<8x768xf32> to vector<8x384xf32>
    %c40_82 = arith.constant 40 : index
    %c0_83 = arith.constant 0 : index
    %336 = vector.load %arg15[%c40_82, %c0_83] : memref<64x768xf32, #tpu.memory_space<vmem>>, vector<8x384xf32>
    %c16_84 = arith.constant 16 : index
    %c384_85 = arith.constant 384 : index
    %337 = vector.load %arg15[%c16_84, %c384_85] : memref<64x768xf32, #tpu.memory_space<vmem>>, vector<8x384xf32>
    %338 = vector.extract_strided_slice %336 {offsets = [0, 0], sizes = [8, 128], strides = [1, 1]} : vector<8x384xf32> to vector<8x128xf32>
    %339 = vector.extract_strided_slice %334 {offsets = [0, 0], sizes = [8, 128], strides = [1, 1]} : vector<8x384xf32> to vector<8x128xf32>
    %340 = arith.addf %338, %339 : vector<8x128xf32>
    %341 = arith.negf %340 : vector<8x128xf32>
    %342 = math.exp %341 : vector<8x128xf32>
    %cst_86 = arith.constant 1.000000e+00 : f32
    %343 = vector.broadcast %cst_86 : f32 to vector<8x128xf32>
    %344 = arith.addf %343, %342 : vector<8x128xf32>
    %345 = arith.divf %343, %344 : vector<8x128xf32>
    %346 = vector.extract_strided_slice %336 {offsets = [0, 128], sizes = [8, 128], strides = [1, 1]} : vector<8x384xf32> to vector<8x128xf32>
    %347 = vector.extract_strided_slice %334 {offsets = [0, 128], sizes = [8, 128], strides = [1, 1]} : vector<8x384xf32> to vector<8x128xf32>
    %348 = arith.addf %346, %347 : vector<8x128xf32>
    %349 = arith.negf %348 : vector<8x128xf32>
    %350 = math.exp %349 : vector<8x128xf32>
    %cst_87 = arith.constant 1.000000e+00 : f32
    %351 = vector.broadcast %cst_87 : f32 to vector<8x128xf32>
    %352 = arith.addf %351, %350 : vector<8x128xf32>
    %353 = arith.divf %351, %352 : vector<8x128xf32>
    %354 = vector.extract_strided_slice %336 {offsets = [0, 256], sizes = [8, 128], strides = [1, 1]} : vector<8x384xf32> to vector<8x128xf32>
    %355 = vector.extract_strided_slice %334 {offsets = [0, 256], sizes = [8, 128], strides = [1, 1]} : vector<8x384xf32> to vector<8x128xf32>
    %356 = arith.addf %355, %10 : vector<8x128xf32>
    %357 = arith.mulf %345, %356 : vector<8x128xf32>
    %358 = arith.addf %354, %357 : vector<8x128xf32>
    %359 = math.tanh %358 : vector<8x128xf32>
    %cst_88 = arith.constant 1.000000e+00 : f32
    %360 = vector.broadcast %cst_88 : f32 to vector<8x128xf32>
    %361 = arith.subf %360, %353 : vector<8x128xf32>
    %362 = arith.mulf %361, %359 : vector<8x128xf32>
    %363 = arith.mulf %353, %301 : vector<8x128xf32>
    %364 = arith.addf %362, %363 : vector<8x128xf32>
    %365 = vector.extract_strided_slice %337 {offsets = [0, 0], sizes = [8, 128], strides = [1, 1]} : vector<8x384xf32> to vector<8x128xf32>
    %366 = vector.extract_strided_slice %335 {offsets = [0, 0], sizes = [8, 128], strides = [1, 1]} : vector<8x384xf32> to vector<8x128xf32>
    %367 = arith.addf %365, %366 : vector<8x128xf32>
    %368 = arith.negf %367 : vector<8x128xf32>
    %369 = math.exp %368 : vector<8x128xf32>
    %cst_89 = arith.constant 1.000000e+00 : f32
    %370 = vector.broadcast %cst_89 : f32 to vector<8x128xf32>
    %371 = arith.addf %370, %369 : vector<8x128xf32>
    %372 = arith.divf %370, %371 : vector<8x128xf32>
    %373 = vector.extract_strided_slice %337 {offsets = [0, 128], sizes = [8, 128], strides = [1, 1]} : vector<8x384xf32> to vector<8x128xf32>
    %374 = vector.extract_strided_slice %335 {offsets = [0, 128], sizes = [8, 128], strides = [1, 1]} : vector<8x384xf32> to vector<8x128xf32>
    %375 = arith.addf %373, %374 : vector<8x128xf32>
    %376 = arith.negf %375 : vector<8x128xf32>
    %377 = math.exp %376 : vector<8x128xf32>
    %cst_90 = arith.constant 1.000000e+00 : f32
    %378 = vector.broadcast %cst_90 : f32 to vector<8x128xf32>
    %379 = arith.addf %378, %377 : vector<8x128xf32>
    %380 = arith.divf %378, %379 : vector<8x128xf32>
    %381 = vector.extract_strided_slice %337 {offsets = [0, 256], sizes = [8, 128], strides = [1, 1]} : vector<8x384xf32> to vector<8x128xf32>
    %382 = vector.extract_strided_slice %335 {offsets = [0, 256], sizes = [8, 128], strides = [1, 1]} : vector<8x384xf32> to vector<8x128xf32>
    %383 = arith.addf %382, %13 : vector<8x128xf32>
    %384 = arith.mulf %372, %383 : vector<8x128xf32>
    %385 = arith.addf %381, %384 : vector<8x128xf32>
    %386 = math.tanh %385 : vector<8x128xf32>
    %cst_91 = arith.constant 1.000000e+00 : f32
    %387 = vector.broadcast %cst_91 : f32 to vector<8x128xf32>
    %388 = arith.subf %387, %380 : vector<8x128xf32>
    %389 = arith.mulf %388, %386 : vector<8x128xf32>
    %390 = arith.mulf %380, %328 : vector<8x128xf32>
    %391 = arith.addf %389, %390 : vector<8x128xf32>
    %c40_92 = arith.constant 40 : index
    %c0_93 = arith.constant 0 : index
    %392 = vector.load %arg13[%c40_92, %c0_93] : memref<64x256xf32, #tpu.memory_space<vmem>>, vector<8x128xf32>
    tpu.vector_store %arg13[%c40_92, %c0_93], %364 {strides = array<i32>} : memref<64x256xf32, #tpu.memory_space<vmem>>, vector<8x128xf32>,
    %c16_94 = arith.constant 16 : index
    %c128_95 = arith.constant 128 : index
    %393 = vector.load %arg13[%c16_94, %c128_95] : memref<64x256xf32, #tpu.memory_space<vmem>>, vector<8x128xf32>
    tpu.vector_store %arg13[%c16_94, %c128_95], %391 {strides = array<i32>} : memref<64x256xf32, #tpu.memory_space<vmem>>, vector<8x128xf32>,
    %394 = tpu.concatenate %364, %391 in 1 : vector<8x128xf32>, vector<8x128xf32> -> vector<8x256xf32>
    %395 = arith.truncf %394 : vector<8x256xf32> to vector<8x256xbf16>
    %cst_96 = arith.constant dense<0.000000e+00> : vector<8x768xf32>
    %396 = tpu.matmul %395, %7, %cst_96 {dimension_numbers = #tpu.dot_dimension_numbers<[1], [0], [0], [1], [0, 0, 1, 1], [], []>} : vector<8x256xbf16>, vector<256x768xbf16>, vector<8x768xf32> -> vector<8x768xf32>
    %397 = vector.extract_strided_slice %396 {offsets = [0, 0], sizes = [8, 384], strides = [1, 1]} : vector<8x768xf32> to vector<8x384xf32>
    %398 = vector.extract_strided_slice %396 {offsets = [0, 384], sizes = [8, 384], strides = [1, 1]} : vector<8x768xf32> to vector<8x384xf32>
    %c48_97 = arith.constant 48 : index
    %c0_98 = arith.constant 0 : index
    %399 = vector.load %arg15[%c48_97, %c0_98] : memref<64x768xf32, #tpu.memory_space<vmem>>, vector<8x384xf32>
    %c8_99 = arith.constant 8 : index
    %c384_100 = arith.constant 384 : index
    %400 = vector.load %arg15[%c8_99, %c384_100] : memref<64x768xf32, #tpu.memory_space<vmem>>, vector<8x384xf32>
    %401 = vector.extract_strided_slice %399 {offsets = [0, 0], sizes = [8, 128], strides = [1, 1]} : vector<8x384xf32> to vector<8x128xf32>
    %402 = vector.extract_strided_slice %397 {offsets = [0, 0], sizes = [8, 128], strides = [1, 1]} : vector<8x384xf32> to vector<8x128xf32>
    %403 = arith.addf %401, %402 : vector<8x128xf32>
    %404 = arith.negf %403 : vector<8x128xf32>
    %405 = math.exp %404 : vector<8x128xf32>
    %cst_101 = arith.constant 1.000000e+00 : f32
    %406 = vector.broadcast %cst_101 : f32 to vector<8x128xf32>
    %407 = arith.addf %406, %405 : vector<8x128xf32>
    %408 = arith.divf %406, %407 : vector<8x128xf32>
    %409 = vector.extract_strided_slice %399 {offsets = [0, 128], sizes = [8, 128], strides = [1, 1]} : vector<8x384xf32> to vector<8x128xf32>
    %410 = vector.extract_strided_slice %397 {offsets = [0, 128], sizes = [8, 128], strides = [1, 1]} : vector<8x384xf32> to vector<8x128xf32>
    %411 = arith.addf %409, %410 : vector<8x128xf32>
    %412 = arith.negf %411 : vector<8x128xf32>
    %413 = math.exp %412 : vector<8x128xf32>
    %cst_102 = arith.constant 1.000000e+00 : f32
    %414 = vector.broadcast %cst_102 : f32 to vector<8x128xf32>
    %415 = arith.addf %414, %413 : vector<8x128xf32>
    %416 = arith.divf %414, %415 : vector<8x128xf32>
    %417 = vector.extract_strided_slice %399 {offsets = [0, 256], sizes = [8, 128], strides = [1, 1]} : vector<8x384xf32> to vector<8x128xf32>
    %418 = vector.extract_strided_slice %397 {offsets = [0, 256], sizes = [8, 128], strides = [1, 1]} : vector<8x384xf32> to vector<8x128xf32>
    %419 = arith.addf %418, %10 : vector<8x128xf32>
    %420 = arith.mulf %408, %419 : vector<8x128xf32>
    %421 = arith.addf %417, %420 : vector<8x128xf32>
    %422 = math.tanh %421 : vector<8x128xf32>
    %cst_103 = arith.constant 1.000000e+00 : f32
    %423 = vector.broadcast %cst_103 : f32 to vector<8x128xf32>
    %424 = arith.subf %423, %416 : vector<8x128xf32>
    %425 = arith.mulf %424, %422 : vector<8x128xf32>
    %426 = arith.mulf %416, %364 : vector<8x128xf32>
    %427 = arith.addf %425, %426 : vector<8x128xf32>
    %428 = vector.extract_strided_slice %400 {offsets = [0, 0], sizes = [8, 128], strides = [1, 1]} : vector<8x384xf32> to vector<8x128xf32>
    %429 = vector.extract_strided_slice %398 {offsets = [0, 0], sizes = [8, 128], strides = [1, 1]} : vector<8x384xf32> to vector<8x128xf32>
    %430 = arith.addf %428, %429 : vector<8x128xf32>
    %431 = arith.negf %430 : vector<8x128xf32>
    %432 = math.exp %431 : vector<8x128xf32>
    %cst_104 = arith.constant 1.000000e+00 : f32
    %433 = vector.broadcast %cst_104 : f32 to vector<8x128xf32>
    %434 = arith.addf %433, %432 : vector<8x128xf32>
    %435 = arith.divf %433, %434 : vector<8x128xf32>
    %436 = vector.extract_strided_slice %400 {offsets = [0, 128], sizes = [8, 128], strides = [1, 1]} : vector<8x384xf32> to vector<8x128xf32>
    %437 = vector.extract_strided_slice %398 {offsets = [0, 128], sizes = [8, 128], strides = [1, 1]} : vector<8x384xf32> to vector<8x128xf32>
    %438 = arith.addf %436, %437 : vector<8x128xf32>
    %439 = arith.negf %438 : vector<8x128xf32>
    %440 = math.exp %439 : vector<8x128xf32>
    %cst_105 = arith.constant 1.000000e+00 : f32
    %441 = vector.broadcast %cst_105 : f32 to vector<8x128xf32>
    %442 = arith.addf %441, %440 : vector<8x128xf32>
    %443 = arith.divf %441, %442 : vector<8x128xf32>
    %444 = vector.extract_strided_slice %400 {offsets = [0, 256], sizes = [8, 128], strides = [1, 1]} : vector<8x384xf32> to vector<8x128xf32>
    %445 = vector.extract_strided_slice %398 {offsets = [0, 256], sizes = [8, 128], strides = [1, 1]} : vector<8x384xf32> to vector<8x128xf32>
    %446 = arith.addf %445, %13 : vector<8x128xf32>
    %447 = arith.mulf %435, %446 : vector<8x128xf32>
    %448 = arith.addf %444, %447 : vector<8x128xf32>
    %449 = math.tanh %448 : vector<8x128xf32>
    %cst_106 = arith.constant 1.000000e+00 : f32
    %450 = vector.broadcast %cst_106 : f32 to vector<8x128xf32>
    %451 = arith.subf %450, %443 : vector<8x128xf32>
    %452 = arith.mulf %451, %449 : vector<8x128xf32>
    %453 = arith.mulf %443, %391 : vector<8x128xf32>
    %454 = arith.addf %452, %453 : vector<8x128xf32>
    %c48_107 = arith.constant 48 : index
    %c0_108 = arith.constant 0 : index
    %455 = vector.load %arg13[%c48_107, %c0_108] : memref<64x256xf32, #tpu.memory_space<vmem>>, vector<8x128xf32>
    tpu.vector_store %arg13[%c48_107, %c0_108], %427 {strides = array<i32>} : memref<64x256xf32, #tpu.memory_space<vmem>>, vector<8x128xf32>,
    %c8_109 = arith.constant 8 : index
    %c128_110 = arith.constant 128 : index
    %456 = vector.load %arg13[%c8_109, %c128_110] : memref<64x256xf32, #tpu.memory_space<vmem>>, vector<8x128xf32>
    tpu.vector_store %arg13[%c8_109, %c128_110], %454 {strides = array<i32>} : memref<64x256xf32, #tpu.memory_space<vmem>>, vector<8x128xf32>,
    %457 = tpu.concatenate %427, %454 in 1 : vector<8x128xf32>, vector<8x128xf32> -> vector<8x256xf32>
    %458 = arith.truncf %457 : vector<8x256xf32> to vector<8x256xbf16>
    %cst_111 = arith.constant dense<0.000000e+00> : vector<8x768xf32>
    %459 = tpu.matmul %458, %7, %cst_111 {dimension_numbers = #tpu.dot_dimension_numbers<[1], [0], [0], [1], [0, 0, 1, 1], [], []>} : vector<8x256xbf16>, vector<256x768xbf16>, vector<8x768xf32> -> vector<8x768xf32>
    %460 = vector.extract_strided_slice %459 {offsets = [0, 0], sizes = [8, 384], strides = [1, 1]} : vector<8x768xf32> to vector<8x384xf32>
    %461 = vector.extract_strided_slice %459 {offsets = [0, 384], sizes = [8, 384], strides = [1, 1]} : vector<8x768xf32> to vector<8x384xf32>
    %c56_112 = arith.constant 56 : index
    %c0_113 = arith.constant 0 : index
    %462 = vector.load %arg15[%c56_112, %c0_113] : memref<64x768xf32, #tpu.memory_space<vmem>>, vector<8x384xf32>
    %c0_114 = arith.constant 0 : index
    %c384_115 = arith.constant 384 : index
    %463 = vector.load %arg15[%c0_114, %c384_115] : memref<64x768xf32, #tpu.memory_space<vmem>>, vector<8x384xf32>
    %464 = vector.extract_strided_slice %462 {offsets = [0, 0], sizes = [8, 128], strides = [1, 1]} : vector<8x384xf32> to vector<8x128xf32>
    %465 = vector.extract_strided_slice %460 {offsets = [0, 0], sizes = [8, 128], strides = [1, 1]} : vector<8x384xf32> to vector<8x128xf32>
    %466 = arith.addf %464, %465 : vector<8x128xf32>
    %467 = arith.negf %466 : vector<8x128xf32>
    %468 = math.exp %467 : vector<8x128xf32>
    %cst_116 = arith.constant 1.000000e+00 : f32
    %469 = vector.broadcast %cst_116 : f32 to vector<8x128xf32>
    %470 = arith.addf %469, %468 : vector<8x128xf32>
    %471 = arith.divf %469, %470 : vector<8x128xf32>
    %472 = vector.extract_strided_slice %462 {offsets = [0, 128], sizes = [8, 128], strides = [1, 1]} : vector<8x384xf32> to vector<8x128xf32>
    %473 = vector.extract_strided_slice %460 {offsets = [0, 128], sizes = [8, 128], strides = [1, 1]} : vector<8x384xf32> to vector<8x128xf32>
    %474 = arith.addf %472, %473 : vector<8x128xf32>
    %475 = arith.negf %474 : vector<8x128xf32>
    %476 = math.exp %475 : vector<8x128xf32>
    %cst_117 = arith.constant 1.000000e+00 : f32
    %477 = vector.broadcast %cst_117 : f32 to vector<8x128xf32>
    %478 = arith.addf %477, %476 : vector<8x128xf32>
    %479 = arith.divf %477, %478 : vector<8x128xf32>
    %480 = vector.extract_strided_slice %462 {offsets = [0, 256], sizes = [8, 128], strides = [1, 1]} : vector<8x384xf32> to vector<8x128xf32>
    %481 = vector.extract_strided_slice %460 {offsets = [0, 256], sizes = [8, 128], strides = [1, 1]} : vector<8x384xf32> to vector<8x128xf32>
    %482 = arith.addf %481, %10 : vector<8x128xf32>
    %483 = arith.mulf %471, %482 : vector<8x128xf32>
    %484 = arith.addf %480, %483 : vector<8x128xf32>
    %485 = math.tanh %484 : vector<8x128xf32>
    %cst_118 = arith.constant 1.000000e+00 : f32
    %486 = vector.broadcast %cst_118 : f32 to vector<8x128xf32>
    %487 = arith.subf %486, %479 : vector<8x128xf32>
    %488 = arith.mulf %487, %485 : vector<8x128xf32>
    %489 = arith.mulf %479, %427 : vector<8x128xf32>
    %490 = arith.addf %488, %489 : vector<8x128xf32>
    %491 = vector.extract_strided_slice %463 {offsets = [0, 0], sizes = [8, 128], strides = [1, 1]} : vector<8x384xf32> to vector<8x128xf32>
    %492 = vector.extract_strided_slice %461 {offsets = [0, 0], sizes = [8, 128], strides = [1, 1]} : vector<8x384xf32> to vector<8x128xf32>
    %493 = arith.addf %491, %492 : vector<8x128xf32>
    %494 = arith.negf %493 : vector<8x128xf32>
    %495 = math.exp %494 : vector<8x128xf32>
    %cst_119 = arith.constant 1.000000e+00 : f32
    %496 = vector.broadcast %cst_119 : f32 to vector<8x128xf32>
    %497 = arith.addf %496, %495 : vector<8x128xf32>
    %498 = arith.divf %496, %497 : vector<8x128xf32>
    %499 = vector.extract_strided_slice %463 {offsets = [0, 128], sizes = [8, 128], strides = [1, 1]} : vector<8x384xf32> to vector<8x128xf32>
    %500 = vector.extract_strided_slice %461 {offsets = [0, 128], sizes = [8, 128], strides = [1, 1]} : vector<8x384xf32> to vector<8x128xf32>
    %501 = arith.addf %499, %500 : vector<8x128xf32>
    %502 = arith.negf %501 : vector<8x128xf32>
    %503 = math.exp %502 : vector<8x128xf32>
    %cst_120 = arith.constant 1.000000e+00 : f32
    %504 = vector.broadcast %cst_120 : f32 to vector<8x128xf32>
    %505 = arith.addf %504, %503 : vector<8x128xf32>
    %506 = arith.divf %504, %505 : vector<8x128xf32>
    %507 = vector.extract_strided_slice %463 {offsets = [0, 256], sizes = [8, 128], strides = [1, 1]} : vector<8x384xf32> to vector<8x128xf32>
    %508 = vector.extract_strided_slice %461 {offsets = [0, 256], sizes = [8, 128], strides = [1, 1]} : vector<8x384xf32> to vector<8x128xf32>
    %509 = arith.addf %508, %13 : vector<8x128xf32>
    %510 = arith.mulf %498, %509 : vector<8x128xf32>
    %511 = arith.addf %507, %510 : vector<8x128xf32>
    %512 = math.tanh %511 : vector<8x128xf32>
    %cst_121 = arith.constant 1.000000e+00 : f32
    %513 = vector.broadcast %cst_121 : f32 to vector<8x128xf32>
    %514 = arith.subf %513, %506 : vector<8x128xf32>
    %515 = arith.mulf %514, %512 : vector<8x128xf32>
    %516 = arith.mulf %506, %454 : vector<8x128xf32>
    %517 = arith.addf %515, %516 : vector<8x128xf32>
    %c56_122 = arith.constant 56 : index
    %c0_123 = arith.constant 0 : index
    %518 = vector.load %arg13[%c56_122, %c0_123] : memref<64x256xf32, #tpu.memory_space<vmem>>, vector<8x128xf32>
    tpu.vector_store %arg13[%c56_122, %c0_123], %490 {strides = array<i32>} : memref<64x256xf32, #tpu.memory_space<vmem>>, vector<8x128xf32>,
    %c0_124 = arith.constant 0 : index
    %c128_125 = arith.constant 128 : index
    %519 = vector.load %arg13[%c0_124, %c128_125] : memref<64x256xf32, #tpu.memory_space<vmem>>, vector<8x128xf32>
    tpu.vector_store %arg13[%c0_124, %c128_125], %517 {strides = array<i32>} : memref<64x256xf32, #tpu.memory_space<vmem>>, vector<8x128xf32>,
    %c0_126 = arith.constant 0 : index
    %c0_127 = arith.constant 0 : index
    %520 = vector.load %arg13[%c0_126, %c0_127] : memref<64x256xf32, #tpu.memory_space<vmem>>, vector<64x256xf32>
    %521 = arith.truncf %520 : vector<64x256xf32> to vector<64x256xbf16>
    %c0_128 = arith.constant 0 : index
    %c0_129 = arith.constant 0 : index
    %522 = vector.load %arg6[%c0_128, %c0_129] : memref<256x768xbf16, #tpu.memory_space<vmem>>, vector<256x768xbf16>
    %cst_130 = arith.constant dense<0.000000e+00> : vector<64x768xf32>
    %523 = tpu.matmul %521, %522, %cst_130 {dimension_numbers = #tpu.dot_dimension_numbers<[1], [0], [0], [1], [0, 0, 1, 1], [], []>} : vector<64x256xbf16>, vector<256x768xbf16>, vector<64x768xf32> -> vector<64x768xf32>
    %c0_131 = arith.constant 0 : index
    %c0_132 = arith.constant 0 : index
    %524 = vector.load %arg8[%c0_131, %c0_132] : memref<1x768xf32, #tpu.memory_space<vmem>>, vector<1x768xf32>
    %525 = vector.broadcast %524 : vector<1x768xf32> to vector<64x768xf32>
    %526 = arith.addf %523, %525 : vector<64x768xf32>
    %c0_133 = arith.constant 0 : index
    %c0_134 = arith.constant 0 : index
    %527 = vector.load %arg15[%c0_133, %c0_134] : memref<64x768xf32, #tpu.memory_space<vmem>>, vector<64x768xf32>
    tpu.vector_store %arg15[%c0_133, %c0_134], %526 {strides = array<i32>} : memref<64x768xf32, #tpu.memory_space<vmem>>, vector<64x768xf32>,
    %c0_135 = arith.constant 0 : index
    %c0_136 = arith.constant 0 : index
    %528 = vector.load %arg7[%c0_135, %c0_136] : memref<256x768xbf16, #tpu.memory_space<vmem>>, vector<256x768xbf16>
    %c0_137 = arith.constant 0 : index
    %c0_138 = arith.constant 0 : index
    %529 = vector.load %arg9[%c0_137, %c0_138] : memref<1x256xf32, #tpu.memory_space<vmem>>, vector<1x128xf32>
    %530 = vector.shape_cast %529 : vector<1x128xf32> to vector<1x128xf32>
    %531 = vector.broadcast %530 : vector<1x128xf32> to vector<8x128xf32>
    %c0_139 = arith.constant 0 : index
    %c128_140 = arith.constant 128 : index
    %532 = vector.load %arg9[%c0_139, %c128_140] : memref<1x256xf32, #tpu.memory_space<vmem>>, vector<1x128xf32>
    %533 = vector.shape_cast %532 : vector<1x128xf32> to vector<1x128xf32>
    %534 = vector.broadcast %533 : vector<1x128xf32> to vector<8x128xf32>
    %cst_141 = arith.constant 0.000000e+00 : f32
    %535 = vector.broadcast %cst_141 : f32 to vector<8x128xf32>
    %cst_142 = arith.constant 0.000000e+00 : f32
    %536 = vector.broadcast %cst_142 : f32 to vector<8x128xf32>
    %537 = tpu.concatenate %535, %536 in 1 : vector<8x128xf32>, vector<8x128xf32> -> vector<8x256xf32>
    %538 = arith.truncf %537 : vector<8x256xf32> to vector<8x256xbf16>
    %cst_143 = arith.constant dense<0.000000e+00> : vector<8x768xf32>
    %539 = tpu.matmul %538, %528, %cst_143 {dimension_numbers = #tpu.dot_dimension_numbers<[1], [0], [0], [1], [0, 0, 1, 1], [], []>} : vector<8x256xbf16>, vector<256x768xbf16>, vector<8x768xf32> -> vector<8x768xf32>
    %540 = vector.extract_strided_slice %539 {offsets = [0, 0], sizes = [8, 384], strides = [1, 1]} : vector<8x768xf32> to vector<8x384xf32>
    %541 = vector.extract_strided_slice %539 {offsets = [0, 384], sizes = [8, 384], strides = [1, 1]} : vector<8x768xf32> to vector<8x384xf32>
    %c0_144 = arith.constant 0 : index
    %c0_145 = arith.constant 0 : index
    %542 = vector.load %arg15[%c0_144, %c0_145] : memref<64x768xf32, #tpu.memory_space<vmem>>, vector<8x384xf32>
    %c56_146 = arith.constant 56 : index
    %c384_147 = arith.constant 384 : index
    %543 = vector.load %arg15[%c56_146, %c384_147] : memref<64x768xf32, #tpu.memory_space<vmem>>, vector<8x384xf32>
    %544 = vector.extract_strided_slice %542 {offsets = [0, 0], sizes = [8, 128], strides = [1, 1]} : vector<8x384xf32> to vector<8x128xf32>
    %545 = vector.extract_strided_slice %540 {offsets = [0, 0], sizes = [8, 128], strides = [1, 1]} : vector<8x384xf32> to vector<8x128xf32>
    %546 = arith.addf %544, %545 : vector<8x128xf32>
    %547 = arith.negf %546 : vector<8x128xf32>
    %548 = math.exp %547 : vector<8x128xf32>
    %cst_148 = arith.constant 1.000000e+00 : f32
    %549 = vector.broadcast %cst_148 : f32 to vector<8x128xf32>
    %550 = arith.addf %549, %548 : vector<8x128xf32>
    %551 = arith.divf %549, %550 : vector<8x128xf32>
    %552 = vector.extract_strided_slice %542 {offsets = [0, 128], sizes = [8, 128], strides = [1, 1]} : vector<8x384xf32> to vector<8x128xf32>
    %553 = vector.extract_strided_slice %540 {offsets = [0, 128], sizes = [8, 128], strides = [1, 1]} : vector<8x384xf32> to vector<8x128xf32>
    %554 = arith.addf %552, %553 : vector<8x128xf32>
    %555 = arith.negf %554 : vector<8x128xf32>
    %556 = math.exp %555 : vector<8x128xf32>
    %cst_149 = arith.constant 1.000000e+00 : f32
    %557 = vector.broadcast %cst_149 : f32 to vector<8x128xf32>
    %558 = arith.addf %557, %556 : vector<8x128xf32>
    %559 = arith.divf %557, %558 : vector<8x128xf32>
    %560 = vector.extract_strided_slice %542 {offsets = [0, 256], sizes = [8, 128], strides = [1, 1]} : vector<8x384xf32> to vector<8x128xf32>
    %561 = vector.extract_strided_slice %540 {offsets = [0, 256], sizes = [8, 128], strides = [1, 1]} : vector<8x384xf32> to vector<8x128xf32>
    %562 = arith.addf %561, %531 : vector<8x128xf32>
    %563 = arith.mulf %551, %562 : vector<8x128xf32>
    %564 = arith.addf %560, %563 : vector<8x128xf32>
    %565 = math.tanh %564 : vector<8x128xf32>
    %cst_150 = arith.constant 1.000000e+00 : f32
    %566 = vector.broadcast %cst_150 : f32 to vector<8x128xf32>
    %567 = arith.subf %566, %559 : vector<8x128xf32>
    %568 = arith.mulf %567, %565 : vector<8x128xf32>
    %569 = arith.mulf %559, %535 : vector<8x128xf32>
    %570 = arith.addf %568, %569 : vector<8x128xf32>
    %571 = vector.extract_strided_slice %543 {offsets = [0, 0], sizes = [8, 128], strides = [1, 1]} : vector<8x384xf32> to vector<8x128xf32>
    %572 = vector.extract_strided_slice %541 {offsets = [0, 0], sizes = [8, 128], strides = [1, 1]} : vector<8x384xf32> to vector<8x128xf32>
    %573 = arith.addf %571, %572 : vector<8x128xf32>
    %574 = arith.negf %573 : vector<8x128xf32>
    %575 = math.exp %574 : vector<8x128xf32>
    %cst_151 = arith.constant 1.000000e+00 : f32
    %576 = vector.broadcast %cst_151 : f32 to vector<8x128xf32>
    %577 = arith.addf %576, %575 : vector<8x128xf32>
    %578 = arith.divf %576, %577 : vector<8x128xf32>
    %579 = vector.extract_strided_slice %543 {offsets = [0, 128], sizes = [8, 128], strides = [1, 1]} : vector<8x384xf32> to vector<8x128xf32>
    %580 = vector.extract_strided_slice %541 {offsets = [0, 128], sizes = [8, 128], strides = [1, 1]} : vector<8x384xf32> to vector<8x128xf32>
    %581 = arith.addf %579, %580 : vector<8x128xf32>
    %582 = arith.negf %581 : vector<8x128xf32>
    %583 = math.exp %582 : vector<8x128xf32>
    %cst_152 = arith.constant 1.000000e+00 : f32
    %584 = vector.broadcast %cst_152 : f32 to vector<8x128xf32>
    %585 = arith.addf %584, %583 : vector<8x128xf32>
    %586 = arith.divf %584, %585 : vector<8x128xf32>
    %587 = vector.extract_strided_slice %543 {offsets = [0, 256], sizes = [8, 128], strides = [1, 1]} : vector<8x384xf32> to vector<8x128xf32>
    %588 = vector.extract_strided_slice %541 {offsets = [0, 256], sizes = [8, 128], strides = [1, 1]} : vector<8x384xf32> to vector<8x128xf32>
    %589 = arith.addf %588, %534 : vector<8x128xf32>
    %590 = arith.mulf %578, %589 : vector<8x128xf32>
    %591 = arith.addf %587, %590 : vector<8x128xf32>
    %592 = math.tanh %591 : vector<8x128xf32>
    %cst_153 = arith.constant 1.000000e+00 : f32
    %593 = vector.broadcast %cst_153 : f32 to vector<8x128xf32>
    %594 = arith.subf %593, %586 : vector<8x128xf32>
    %595 = arith.mulf %594, %592 : vector<8x128xf32>
    %596 = arith.mulf %586, %536 : vector<8x128xf32>
    %597 = arith.addf %595, %596 : vector<8x128xf32>
    %c0_154 = arith.constant 0 : index
    %c0_155 = arith.constant 0 : index
    %598 = vector.load %arg14[%c0_154, %c0_155] : memref<64x256xf32, #tpu.memory_space<vmem>>, vector<8x128xf32>
    tpu.vector_store %arg14[%c0_154, %c0_155], %570 {strides = array<i32>} : memref<64x256xf32, #tpu.memory_space<vmem>>, vector<8x128xf32>,
    %c56_156 = arith.constant 56 : index
    %c128_157 = arith.constant 128 : index
    %599 = vector.load %arg14[%c56_156, %c128_157] : memref<64x256xf32, #tpu.memory_space<vmem>>, vector<8x128xf32>
    tpu.vector_store %arg14[%c56_156, %c128_157], %597 {strides = array<i32>} : memref<64x256xf32, #tpu.memory_space<vmem>>, vector<8x128xf32>,
    %600 = tpu.concatenate %570, %597 in 1 : vector<8x128xf32>, vector<8x128xf32> -> vector<8x256xf32>
    %601 = arith.truncf %600 : vector<8x256xf32> to vector<8x256xbf16>
    %cst_158 = arith.constant dense<0.000000e+00> : vector<8x768xf32>
    %602 = tpu.matmul %601, %528, %cst_158 {dimension_numbers = #tpu.dot_dimension_numbers<[1], [0], [0], [1], [0, 0, 1, 1], [], []>} : vector<8x256xbf16>, vector<256x768xbf16>, vector<8x768xf32> -> vector<8x768xf32>
    %603 = vector.extract_strided_slice %602 {offsets = [0, 0], sizes = [8, 384], strides = [1, 1]} : vector<8x768xf32> to vector<8x384xf32>
    %604 = vector.extract_strided_slice %602 {offsets = [0, 384], sizes = [8, 384], strides = [1, 1]} : vector<8x768xf32> to vector<8x384xf32>
    %c8_159 = arith.constant 8 : index
    %c0_160 = arith.constant 0 : index
    %605 = vector.load %arg15[%c8_159, %c0_160] : memref<64x768xf32, #tpu.memory_space<vmem>>, vector<8x384xf32>
    %c48_161 = arith.constant 48 : index
    %c384_162 = arith.constant 384 : index
    %606 = vector.load %arg15[%c48_161, %c384_162] : memref<64x768xf32, #tpu.memory_space<vmem>>, vector<8x384xf32>
    %607 = vector.extract_strided_slice %605 {offsets = [0, 0], sizes = [8, 128], strides = [1, 1]} : vector<8x384xf32> to vector<8x128xf32>
    %608 = vector.extract_strided_slice %603 {offsets = [0, 0], sizes = [8, 128], strides = [1, 1]} : vector<8x384xf32> to vector<8x128xf32>
    %609 = arith.addf %607, %608 : vector<8x128xf32>
    %610 = arith.negf %609 : vector<8x128xf32>
    %611 = math.exp %610 : vector<8x128xf32>
    %cst_163 = arith.constant 1.000000e+00 : f32
    %612 = vector.broadcast %cst_163 : f32 to vector<8x128xf32>
    %613 = arith.addf %612, %611 : vector<8x128xf32>
    %614 = arith.divf %612, %613 : vector<8x128xf32>
    %615 = vector.extract_strided_slice %605 {offsets = [0, 128], sizes = [8, 128], strides = [1, 1]} : vector<8x384xf32> to vector<8x128xf32>
    %616 = vector.extract_strided_slice %603 {offsets = [0, 128], sizes = [8, 128], strides = [1, 1]} : vector<8x384xf32> to vector<8x128xf32>
    %617 = arith.addf %615, %616 : vector<8x128xf32>
    %618 = arith.negf %617 : vector<8x128xf32>
    %619 = math.exp %618 : vector<8x128xf32>
    %cst_164 = arith.constant 1.000000e+00 : f32
    %620 = vector.broadcast %cst_164 : f32 to vector<8x128xf32>
    %621 = arith.addf %620, %619 : vector<8x128xf32>
    %622 = arith.divf %620, %621 : vector<8x128xf32>
    %623 = vector.extract_strided_slice %605 {offsets = [0, 256], sizes = [8, 128], strides = [1, 1]} : vector<8x384xf32> to vector<8x128xf32>
    %624 = vector.extract_strided_slice %603 {offsets = [0, 256], sizes = [8, 128], strides = [1, 1]} : vector<8x384xf32> to vector<8x128xf32>
    %625 = arith.addf %624, %531 : vector<8x128xf32>
    %626 = arith.mulf %614, %625 : vector<8x128xf32>
    %627 = arith.addf %623, %626 : vector<8x128xf32>
    %628 = math.tanh %627 : vector<8x128xf32>
    %cst_165 = arith.constant 1.000000e+00 : f32
    %629 = vector.broadcast %cst_165 : f32 to vector<8x128xf32>
    %630 = arith.subf %629, %622 : vector<8x128xf32>
    %631 = arith.mulf %630, %628 : vector<8x128xf32>
    %632 = arith.mulf %622, %570 : vector<8x128xf32>
    %633 = arith.addf %631, %632 : vector<8x128xf32>
    %634 = vector.extract_strided_slice %606 {offsets = [0, 0], sizes = [8, 128], strides = [1, 1]} : vector<8x384xf32> to vector<8x128xf32>
    %635 = vector.extract_strided_slice %604 {offsets = [0, 0], sizes = [8, 128], strides = [1, 1]} : vector<8x384xf32> to vector<8x128xf32>
    %636 = arith.addf %634, %635 : vector<8x128xf32>
    %637 = arith.negf %636 : vector<8x128xf32>
    %638 = math.exp %637 : vector<8x128xf32>
    %cst_166 = arith.constant 1.000000e+00 : f32
    %639 = vector.broadcast %cst_166 : f32 to vector<8x128xf32>
    %640 = arith.addf %639, %638 : vector<8x128xf32>
    %641 = arith.divf %639, %640 : vector<8x128xf32>
    %642 = vector.extract_strided_slice %606 {offsets = [0, 128], sizes = [8, 128], strides = [1, 1]} : vector<8x384xf32> to vector<8x128xf32>
    %643 = vector.extract_strided_slice %604 {offsets = [0, 128], sizes = [8, 128], strides = [1, 1]} : vector<8x384xf32> to vector<8x128xf32>
    %644 = arith.addf %642, %643 : vector<8x128xf32>
    %645 = arith.negf %644 : vector<8x128xf32>
    %646 = math.exp %645 : vector<8x128xf32>
    %cst_167 = arith.constant 1.000000e+00 : f32
    %647 = vector.broadcast %cst_167 : f32 to vector<8x128xf32>
    %648 = arith.addf %647, %646 : vector<8x128xf32>
    %649 = arith.divf %647, %648 : vector<8x128xf32>
    %650 = vector.extract_strided_slice %606 {offsets = [0, 256], sizes = [8, 128], strides = [1, 1]} : vector<8x384xf32> to vector<8x128xf32>
    %651 = vector.extract_strided_slice %604 {offsets = [0, 256], sizes = [8, 128], strides = [1, 1]} : vector<8x384xf32> to vector<8x128xf32>
    %652 = arith.addf %651, %534 : vector<8x128xf32>
    %653 = arith.mulf %641, %652 : vector<8x128xf32>
    %654 = arith.addf %650, %653 : vector<8x128xf32>
    %655 = math.tanh %654 : vector<8x128xf32>
    %cst_168 = arith.constant 1.000000e+00 : f32
    %656 = vector.broadcast %cst_168 : f32 to vector<8x128xf32>
    %657 = arith.subf %656, %649 : vector<8x128xf32>
    %658 = arith.mulf %657, %655 : vector<8x128xf32>
    %659 = arith.mulf %649, %597 : vector<8x128xf32>
    %660 = arith.addf %658, %659 : vector<8x128xf32>
    %c8_169 = arith.constant 8 : index
    %c0_170 = arith.constant 0 : index
    %661 = vector.load %arg14[%c8_169, %c0_170] : memref<64x256xf32, #tpu.memory_space<vmem>>, vector<8x128xf32>
    tpu.vector_store %arg14[%c8_169, %c0_170], %633 {strides = array<i32>} : memref<64x256xf32, #tpu.memory_space<vmem>>, vector<8x128xf32>,
    %c48_171 = arith.constant 48 : index
    %c128_172 = arith.constant 128 : index
    %662 = vector.load %arg14[%c48_171, %c128_172] : memref<64x256xf32, #tpu.memory_space<vmem>>, vector<8x128xf32>
    tpu.vector_store %arg14[%c48_171, %c128_172], %660 {strides = array<i32>} : memref<64x256xf32, #tpu.memory_space<vmem>>, vector<8x128xf32>,
    %663 = tpu.concatenate %633, %660 in 1 : vector<8x128xf32>, vector<8x128xf32> -> vector<8x256xf32>
    %664 = arith.truncf %663 : vector<8x256xf32> to vector<8x256xbf16>
    %cst_173 = arith.constant dense<0.000000e+00> : vector<8x768xf32>
    %665 = tpu.matmul %664, %528, %cst_173 {dimension_numbers = #tpu.dot_dimension_numbers<[1], [0], [0], [1], [0, 0, 1, 1], [], []>} : vector<8x256xbf16>, vector<256x768xbf16>, vector<8x768xf32> -> vector<8x768xf32>
    %666 = vector.extract_strided_slice %665 {offsets = [0, 0], sizes = [8, 384], strides = [1, 1]} : vector<8x768xf32> to vector<8x384xf32>
    %667 = vector.extract_strided_slice %665 {offsets = [0, 384], sizes = [8, 384], strides = [1, 1]} : vector<8x768xf32> to vector<8x384xf32>
    %c16_174 = arith.constant 16 : index
    %c0_175 = arith.constant 0 : index
    %668 = vector.load %arg15[%c16_174, %c0_175] : memref<64x768xf32, #tpu.memory_space<vmem>>, vector<8x384xf32>
    %c40_176 = arith.constant 40 : index
    %c384_177 = arith.constant 384 : index
    %669 = vector.load %arg15[%c40_176, %c384_177] : memref<64x768xf32, #tpu.memory_space<vmem>>, vector<8x384xf32>
    %670 = vector.extract_strided_slice %668 {offsets = [0, 0], sizes = [8, 128], strides = [1, 1]} : vector<8x384xf32> to vector<8x128xf32>
    %671 = vector.extract_strided_slice %666 {offsets = [0, 0], sizes = [8, 128], strides = [1, 1]} : vector<8x384xf32> to vector<8x128xf32>
    %672 = arith.addf %670, %671 : vector<8x128xf32>
    %673 = arith.negf %672 : vector<8x128xf32>
    %674 = math.exp %673 : vector<8x128xf32>
    %cst_178 = arith.constant 1.000000e+00 : f32
    %675 = vector.broadcast %cst_178 : f32 to vector<8x128xf32>
    %676 = arith.addf %675, %674 : vector<8x128xf32>
    %677 = arith.divf %675, %676 : vector<8x128xf32>
    %678 = vector.extract_strided_slice %668 {offsets = [0, 128], sizes = [8, 128], strides = [1, 1]} : vector<8x384xf32> to vector<8x128xf32>
    %679 = vector.extract_strided_slice %666 {offsets = [0, 128], sizes = [8, 128], strides = [1, 1]} : vector<8x384xf32> to vector<8x128xf32>
    %680 = arith.addf %678, %679 : vector<8x128xf32>
    %681 = arith.negf %680 : vector<8x128xf32>
    %682 = math.exp %681 : vector<8x128xf32>
    %cst_179 = arith.constant 1.000000e+00 : f32
    %683 = vector.broadcast %cst_179 : f32 to vector<8x128xf32>
    %684 = arith.addf %683, %682 : vector<8x128xf32>
    %685 = arith.divf %683, %684 : vector<8x128xf32>
    %686 = vector.extract_strided_slice %668 {offsets = [0, 256], sizes = [8, 128], strides = [1, 1]} : vector<8x384xf32> to vector<8x128xf32>
    %687 = vector.extract_strided_slice %666 {offsets = [0, 256], sizes = [8, 128], strides = [1, 1]} : vector<8x384xf32> to vector<8x128xf32>
    %688 = arith.addf %687, %531 : vector<8x128xf32>
    %689 = arith.mulf %677, %688 : vector<8x128xf32>
    %690 = arith.addf %686, %689 : vector<8x128xf32>
    %691 = math.tanh %690 : vector<8x128xf32>
    %cst_180 = arith.constant 1.000000e+00 : f32
    %692 = vector.broadcast %cst_180 : f32 to vector<8x128xf32>
    %693 = arith.subf %692, %685 : vector<8x128xf32>
    %694 = arith.mulf %693, %691 : vector<8x128xf32>
    %695 = arith.mulf %685, %633 : vector<8x128xf32>
    %696 = arith.addf %694, %695 : vector<8x128xf32>
    %697 = vector.extract_strided_slice %669 {offsets = [0, 0], sizes = [8, 128], strides = [1, 1]} : vector<8x384xf32> to vector<8x128xf32>
    %698 = vector.extract_strided_slice %667 {offsets = [0, 0], sizes = [8, 128], strides = [1, 1]} : vector<8x384xf32> to vector<8x128xf32>
    %699 = arith.addf %697, %698 : vector<8x128xf32>
    %700 = arith.negf %699 : vector<8x128xf32>
    %701 = math.exp %700 : vector<8x128xf32>
    %cst_181 = arith.constant 1.000000e+00 : f32
    %702 = vector.broadcast %cst_181 : f32 to vector<8x128xf32>
    %703 = arith.addf %702, %701 : vector<8x128xf32>
    %704 = arith.divf %702, %703 : vector<8x128xf32>
    %705 = vector.extract_strided_slice %669 {offsets = [0, 128], sizes = [8, 128], strides = [1, 1]} : vector<8x384xf32> to vector<8x128xf32>
    %706 = vector.extract_strided_slice %667 {offsets = [0, 128], sizes = [8, 128], strides = [1, 1]} : vector<8x384xf32> to vector<8x128xf32>
    %707 = arith.addf %705, %706 : vector<8x128xf32>
    %708 = arith.negf %707 : vector<8x128xf32>
    %709 = math.exp %708 : vector<8x128xf32>
    %cst_182 = arith.constant 1.000000e+00 : f32
    %710 = vector.broadcast %cst_182 : f32 to vector<8x128xf32>
    %711 = arith.addf %710, %709 : vector<8x128xf32>
    %712 = arith.divf %710, %711 : vector<8x128xf32>
    %713 = vector.extract_strided_slice %669 {offsets = [0, 256], sizes = [8, 128], strides = [1, 1]} : vector<8x384xf32> to vector<8x128xf32>
    %714 = vector.extract_strided_slice %667 {offsets = [0, 256], sizes = [8, 128], strides = [1, 1]} : vector<8x384xf32> to vector<8x128xf32>
    %715 = arith.addf %714, %534 : vector<8x128xf32>
    %716 = arith.mulf %704, %715 : vector<8x128xf32>
    %717 = arith.addf %713, %716 : vector<8x128xf32>
    %718 = math.tanh %717 : vector<8x128xf32>
    %cst_183 = arith.constant 1.000000e+00 : f32
    %719 = vector.broadcast %cst_183 : f32 to vector<8x128xf32>
    %720 = arith.subf %719, %712 : vector<8x128xf32>
    %721 = arith.mulf %720, %718 : vector<8x128xf32>
    %722 = arith.mulf %712, %660 : vector<8x128xf32>
    %723 = arith.addf %721, %722 : vector<8x128xf32>
    %c16_184 = arith.constant 16 : index
    %c0_185 = arith.constant 0 : index
    %724 = vector.load %arg14[%c16_184, %c0_185] : memref<64x256xf32, #tpu.memory_space<vmem>>, vector<8x128xf32>
    tpu.vector_store %arg14[%c16_184, %c0_185], %696 {strides = array<i32>} : memref<64x256xf32, #tpu.memory_space<vmem>>, vector<8x128xf32>,
    %c40_186 = arith.constant 40 : index
    %c128_187 = arith.constant 128 : index
    %725 = vector.load %arg14[%c40_186, %c128_187] : memref<64x256xf32, #tpu.memory_space<vmem>>, vector<8x128xf32>
    tpu.vector_store %arg14[%c40_186, %c128_187], %723 {strides = array<i32>} : memref<64x256xf32, #tpu.memory_space<vmem>>, vector<8x128xf32>,
    %726 = tpu.concatenate %696, %723 in 1 : vector<8x128xf32>, vector<8x128xf32> -> vector<8x256xf32>
    %727 = arith.truncf %726 : vector<8x256xf32> to vector<8x256xbf16>
    %cst_188 = arith.constant dense<0.000000e+00> : vector<8x768xf32>
    %728 = tpu.matmul %727, %528, %cst_188 {dimension_numbers = #tpu.dot_dimension_numbers<[1], [0], [0], [1], [0, 0, 1, 1], [], []>} : vector<8x256xbf16>, vector<256x768xbf16>, vector<8x768xf32> -> vector<8x768xf32>
    %729 = vector.extract_strided_slice %728 {offsets = [0, 0], sizes = [8, 384], strides = [1, 1]} : vector<8x768xf32> to vector<8x384xf32>
    %730 = vector.extract_strided_slice %728 {offsets = [0, 384], sizes = [8, 384], strides = [1, 1]} : vector<8x768xf32> to vector<8x384xf32>
    %c24_189 = arith.constant 24 : index
    %c0_190 = arith.constant 0 : index
    %731 = vector.load %arg15[%c24_189, %c0_190] : memref<64x768xf32, #tpu.memory_space<vmem>>, vector<8x384xf32>
    %c32_191 = arith.constant 32 : index
    %c384_192 = arith.constant 384 : index
    %732 = vector.load %arg15[%c32_191, %c384_192] : memref<64x768xf32, #tpu.memory_space<vmem>>, vector<8x384xf32>
    %733 = vector.extract_strided_slice %731 {offsets = [0, 0], sizes = [8, 128], strides = [1, 1]} : vector<8x384xf32> to vector<8x128xf32>
    %734 = vector.extract_strided_slice %729 {offsets = [0, 0], sizes = [8, 128], strides = [1, 1]} : vector<8x384xf32> to vector<8x128xf32>
    %735 = arith.addf %733, %734 : vector<8x128xf32>
    %736 = arith.negf %735 : vector<8x128xf32>
    %737 = math.exp %736 : vector<8x128xf32>
    %cst_193 = arith.constant 1.000000e+00 : f32
    %738 = vector.broadcast %cst_193 : f32 to vector<8x128xf32>
    %739 = arith.addf %738, %737 : vector<8x128xf32>
    %740 = arith.divf %738, %739 : vector<8x128xf32>
    %741 = vector.extract_strided_slice %731 {offsets = [0, 128], sizes = [8, 128], strides = [1, 1]} : vector<8x384xf32> to vector<8x128xf32>
    %742 = vector.extract_strided_slice %729 {offsets = [0, 128], sizes = [8, 128], strides = [1, 1]} : vector<8x384xf32> to vector<8x128xf32>
    %743 = arith.addf %741, %742 : vector<8x128xf32>
    %744 = arith.negf %743 : vector<8x128xf32>
    %745 = math.exp %744 : vector<8x128xf32>
    %cst_194 = arith.constant 1.000000e+00 : f32
    %746 = vector.broadcast %cst_194 : f32 to vector<8x128xf32>
    %747 = arith.addf %746, %745 : vector<8x128xf32>
    %748 = arith.divf %746, %747 : vector<8x128xf32>
    %749 = vector.extract_strided_slice %731 {offsets = [0, 256], sizes = [8, 128], strides = [1, 1]} : vector<8x384xf32> to vector<8x128xf32>
    %750 = vector.extract_strided_slice %729 {offsets = [0, 256], sizes = [8, 128], strides = [1, 1]} : vector<8x384xf32> to vector<8x128xf32>
    %751 = arith.addf %750, %531 : vector<8x128xf32>
    %752 = arith.mulf %740, %751 : vector<8x128xf32>
    %753 = arith.addf %749, %752 : vector<8x128xf32>
    %754 = math.tanh %753 : vector<8x128xf32>
    %cst_195 = arith.constant 1.000000e+00 : f32
    %755 = vector.broadcast %cst_195 : f32 to vector<8x128xf32>
    %756 = arith.subf %755, %748 : vector<8x128xf32>
    %757 = arith.mulf %756, %754 : vector<8x128xf32>
    %758 = arith.mulf %748, %696 : vector<8x128xf32>
    %759 = arith.addf %757, %758 : vector<8x128xf32>
    %760 = vector.extract_strided_slice %732 {offsets = [0, 0], sizes = [8, 128], strides = [1, 1]} : vector<8x384xf32> to vector<8x128xf32>
    %761 = vector.extract_strided_slice %730 {offsets = [0, 0], sizes = [8, 128], strides = [1, 1]} : vector<8x384xf32> to vector<8x128xf32>
    %762 = arith.addf %760, %761 : vector<8x128xf32>
    %763 = arith.negf %762 : vector<8x128xf32>
    %764 = math.exp %763 : vector<8x128xf32>
    %cst_196 = arith.constant 1.000000e+00 : f32
    %765 = vector.broadcast %cst_196 : f32 to vector<8x128xf32>
    %766 = arith.addf %765, %764 : vector<8x128xf32>
    %767 = arith.divf %765, %766 : vector<8x128xf32>
    %768 = vector.extract_strided_slice %732 {offsets = [0, 128], sizes = [8, 128], strides = [1, 1]} : vector<8x384xf32> to vector<8x128xf32>
    %769 = vector.extract_strided_slice %730 {offsets = [0, 128], sizes = [8, 128], strides = [1, 1]} : vector<8x384xf32> to vector<8x128xf32>
    %770 = arith.addf %768, %769 : vector<8x128xf32>
    %771 = arith.negf %770 : vector<8x128xf32>
    %772 = math.exp %771 : vector<8x128xf32>
    %cst_197 = arith.constant 1.000000e+00 : f32
    %773 = vector.broadcast %cst_197 : f32 to vector<8x128xf32>
    %774 = arith.addf %773, %772 : vector<8x128xf32>
    %775 = arith.divf %773, %774 : vector<8x128xf32>
    %776 = vector.extract_strided_slice %732 {offsets = [0, 256], sizes = [8, 128], strides = [1, 1]} : vector<8x384xf32> to vector<8x128xf32>
    %777 = vector.extract_strided_slice %730 {offsets = [0, 256], sizes = [8, 128], strides = [1, 1]} : vector<8x384xf32> to vector<8x128xf32>
    %778 = arith.addf %777, %534 : vector<8x128xf32>
    %779 = arith.mulf %767, %778 : vector<8x128xf32>
    %780 = arith.addf %776, %779 : vector<8x128xf32>
    %781 = math.tanh %780 : vector<8x128xf32>
    %cst_198 = arith.constant 1.000000e+00 : f32
    %782 = vector.broadcast %cst_198 : f32 to vector<8x128xf32>
    %783 = arith.subf %782, %775 : vector<8x128xf32>
    %784 = arith.mulf %783, %781 : vector<8x128xf32>
    %785 = arith.mulf %775, %723 : vector<8x128xf32>
    %786 = arith.addf %784, %785 : vector<8x128xf32>
    %c24_199 = arith.constant 24 : index
    %c0_200 = arith.constant 0 : index
    %787 = vector.load %arg14[%c24_199, %c0_200] : memref<64x256xf32, #tpu.memory_space<vmem>>, vector<8x128xf32>
    tpu.vector_store %arg14[%c24_199, %c0_200], %759 {strides = array<i32>} : memref<64x256xf32, #tpu.memory_space<vmem>>, vector<8x128xf32>,
    %c32_201 = arith.constant 32 : index
    %c128_202 = arith.constant 128 : index
    %788 = vector.load %arg14[%c32_201, %c128_202] : memref<64x256xf32, #tpu.memory_space<vmem>>, vector<8x128xf32>
    tpu.vector_store %arg14[%c32_201, %c128_202], %786 {strides = array<i32>} : memref<64x256xf32, #tpu.memory_space<vmem>>, vector<8x128xf32>,
    %789 = tpu.concatenate %759, %786 in 1 : vector<8x128xf32>, vector<8x128xf32> -> vector<8x256xf32>
    %790 = arith.truncf %789 : vector<8x256xf32> to vector<8x256xbf16>
    %cst_203 = arith.constant dense<0.000000e+00> : vector<8x768xf32>
    %791 = tpu.matmul %790, %528, %cst_203 {dimension_numbers = #tpu.dot_dimension_numbers<[1], [0], [0], [1], [0, 0, 1, 1], [], []>} : vector<8x256xbf16>, vector<256x768xbf16>, vector<8x768xf32> -> vector<8x768xf32>
    %792 = vector.extract_strided_slice %791 {offsets = [0, 0], sizes = [8, 384], strides = [1, 1]} : vector<8x768xf32> to vector<8x384xf32>
    %793 = vector.extract_strided_slice %791 {offsets = [0, 384], sizes = [8, 384], strides = [1, 1]} : vector<8x768xf32> to vector<8x384xf32>
    %c32_204 = arith.constant 32 : index
    %c0_205 = arith.constant 0 : index
    %794 = vector.load %arg15[%c32_204, %c0_205] : memref<64x768xf32, #tpu.memory_space<vmem>>, vector<8x384xf32>
    %c24_206 = arith.constant 24 : index
    %c384_207 = arith.constant 384 : index
    %795 = vector.load %arg15[%c24_206, %c384_207] : memref<64x768xf32, #tpu.memory_space<vmem>>, vector<8x384xf32>
    %796 = vector.extract_strided_slice %794 {offsets = [0, 0], sizes = [8, 128], strides = [1, 1]} : vector<8x384xf32> to vector<8x128xf32>
    %797 = vector.extract_strided_slice %792 {offsets = [0, 0], sizes = [8, 128], strides = [1, 1]} : vector<8x384xf32> to vector<8x128xf32>
    %798 = arith.addf %796, %797 : vector<8x128xf32>
    %799 = arith.negf %798 : vector<8x128xf32>
    %800 = math.exp %799 : vector<8x128xf32>
    %cst_208 = arith.constant 1.000000e+00 : f32
    %801 = vector.broadcast %cst_208 : f32 to vector<8x128xf32>
    %802 = arith.addf %801, %800 : vector<8x128xf32>
    %803 = arith.divf %801, %802 : vector<8x128xf32>
    %804 = vector.extract_strided_slice %794 {offsets = [0, 128], sizes = [8, 128], strides = [1, 1]} : vector<8x384xf32> to vector<8x128xf32>
    %805 = vector.extract_strided_slice %792 {offsets = [0, 128], sizes = [8, 128], strides = [1, 1]} : vector<8x384xf32> to vector<8x128xf32>
    %806 = arith.addf %804, %805 : vector<8x128xf32>
    %807 = arith.negf %806 : vector<8x128xf32>
    %808 = math.exp %807 : vector<8x128xf32>
    %cst_209 = arith.constant 1.000000e+00 : f32
    %809 = vector.broadcast %cst_209 : f32 to vector<8x128xf32>
    %810 = arith.addf %809, %808 : vector<8x128xf32>
    %811 = arith.divf %809, %810 : vector<8x128xf32>
    %812 = vector.extract_strided_slice %794 {offsets = [0, 256], sizes = [8, 128], strides = [1, 1]} : vector<8x384xf32> to vector<8x128xf32>
    %813 = vector.extract_strided_slice %792 {offsets = [0, 256], sizes = [8, 128], strides = [1, 1]} : vector<8x384xf32> to vector<8x128xf32>
    %814 = arith.addf %813, %531 : vector<8x128xf32>
    %815 = arith.mulf %803, %814 : vector<8x128xf32>
    %816 = arith.addf %812, %815 : vector<8x128xf32>
    %817 = math.tanh %816 : vector<8x128xf32>
    %cst_210 = arith.constant 1.000000e+00 : f32
    %818 = vector.broadcast %cst_210 : f32 to vector<8x128xf32>
    %819 = arith.subf %818, %811 : vector<8x128xf32>
    %820 = arith.mulf %819, %817 : vector<8x128xf32>
    %821 = arith.mulf %811, %759 : vector<8x128xf32>
    %822 = arith.addf %820, %821 : vector<8x128xf32>
    %823 = vector.extract_strided_slice %795 {offsets = [0, 0], sizes = [8, 128], strides = [1, 1]} : vector<8x384xf32> to vector<8x128xf32>
    %824 = vector.extract_strided_slice %793 {offsets = [0, 0], sizes = [8, 128], strides = [1, 1]} : vector<8x384xf32> to vector<8x128xf32>
    %825 = arith.addf %823, %824 : vector<8x128xf32>
    %826 = arith.negf %825 : vector<8x128xf32>
    %827 = math.exp %826 : vector<8x128xf32>
    %cst_211 = arith.constant 1.000000e+00 : f32
    %828 = vector.broadcast %cst_211 : f32 to vector<8x128xf32>
    %829 = arith.addf %828, %827 : vector<8x128xf32>
    %830 = arith.divf %828, %829 : vector<8x128xf32>
    %831 = vector.extract_strided_slice %795 {offsets = [0, 128], sizes = [8, 128], strides = [1, 1]} : vector<8x384xf32> to vector<8x128xf32>
    %832 = vector.extract_strided_slice %793 {offsets = [0, 128], sizes = [8, 128], strides = [1, 1]} : vector<8x384xf32> to vector<8x128xf32>
    %833 = arith.addf %831, %832 : vector<8x128xf32>
    %834 = arith.negf %833 : vector<8x128xf32>
    %835 = math.exp %834 : vector<8x128xf32>
    %cst_212 = arith.constant 1.000000e+00 : f32
    %836 = vector.broadcast %cst_212 : f32 to vector<8x128xf32>
    %837 = arith.addf %836, %835 : vector<8x128xf32>
    %838 = arith.divf %836, %837 : vector<8x128xf32>
    %839 = vector.extract_strided_slice %795 {offsets = [0, 256], sizes = [8, 128], strides = [1, 1]} : vector<8x384xf32> to vector<8x128xf32>
    %840 = vector.extract_strided_slice %793 {offsets = [0, 256], sizes = [8, 128], strides = [1, 1]} : vector<8x384xf32> to vector<8x128xf32>
    %841 = arith.addf %840, %534 : vector<8x128xf32>
    %842 = arith.mulf %830, %841 : vector<8x128xf32>
    %843 = arith.addf %839, %842 : vector<8x128xf32>
    %844 = math.tanh %843 : vector<8x128xf32>
    %cst_213 = arith.constant 1.000000e+00 : f32
    %845 = vector.broadcast %cst_213 : f32 to vector<8x128xf32>
    %846 = arith.subf %845, %838 : vector<8x128xf32>
    %847 = arith.mulf %846, %844 : vector<8x128xf32>
    %848 = arith.mulf %838, %786 : vector<8x128xf32>
    %849 = arith.addf %847, %848 : vector<8x128xf32>
    %c32_214 = arith.constant 32 : index
    %c0_215 = arith.constant 0 : index
    %850 = vector.load %arg14[%c32_214, %c0_215] : memref<64x256xf32, #tpu.memory_space<vmem>>, vector<8x128xf32>
    tpu.vector_store %arg14[%c32_214, %c0_215], %822 {strides = array<i32>} : memref<64x256xf32, #tpu.memory_space<vmem>>, vector<8x128xf32>,
    %c24_216 = arith.constant 24 : index
    %c128_217 = arith.constant 128 : index
    %851 = vector.load %arg14[%c24_216, %c128_217] : memref<64x256xf32, #tpu.memory_space<vmem>>, vector<8x128xf32>
    tpu.vector_store %arg14[%c24_216, %c128_217], %849 {strides = array<i32>} : memref<64x256xf32, #tpu.memory_space<vmem>>, vector<8x128xf32>,
    %852 = tpu.concatenate %822, %849 in 1 : vector<8x128xf32>, vector<8x128xf32> -> vector<8x256xf32>
    %853 = arith.truncf %852 : vector<8x256xf32> to vector<8x256xbf16>
    %cst_218 = arith.constant dense<0.000000e+00> : vector<8x768xf32>
    %854 = tpu.matmul %853, %528, %cst_218 {dimension_numbers = #tpu.dot_dimension_numbers<[1], [0], [0], [1], [0, 0, 1, 1], [], []>} : vector<8x256xbf16>, vector<256x768xbf16>, vector<8x768xf32> -> vector<8x768xf32>
    %855 = vector.extract_strided_slice %854 {offsets = [0, 0], sizes = [8, 384], strides = [1, 1]} : vector<8x768xf32> to vector<8x384xf32>
    %856 = vector.extract_strided_slice %854 {offsets = [0, 384], sizes = [8, 384], strides = [1, 1]} : vector<8x768xf32> to vector<8x384xf32>
    %c40_219 = arith.constant 40 : index
    %c0_220 = arith.constant 0 : index
    %857 = vector.load %arg15[%c40_219, %c0_220] : memref<64x768xf32, #tpu.memory_space<vmem>>, vector<8x384xf32>
    %c16_221 = arith.constant 16 : index
    %c384_222 = arith.constant 384 : index
    %858 = vector.load %arg15[%c16_221, %c384_222] : memref<64x768xf32, #tpu.memory_space<vmem>>, vector<8x384xf32>
    %859 = vector.extract_strided_slice %857 {offsets = [0, 0], sizes = [8, 128], strides = [1, 1]} : vector<8x384xf32> to vector<8x128xf32>
    %860 = vector.extract_strided_slice %855 {offsets = [0, 0], sizes = [8, 128], strides = [1, 1]} : vector<8x384xf32> to vector<8x128xf32>
    %861 = arith.addf %859, %860 : vector<8x128xf32>
    %862 = arith.negf %861 : vector<8x128xf32>
    %863 = math.exp %862 : vector<8x128xf32>
    %cst_223 = arith.constant 1.000000e+00 : f32
    %864 = vector.broadcast %cst_223 : f32 to vector<8x128xf32>
    %865 = arith.addf %864, %863 : vector<8x128xf32>
    %866 = arith.divf %864, %865 : vector<8x128xf32>
    %867 = vector.extract_strided_slice %857 {offsets = [0, 128], sizes = [8, 128], strides = [1, 1]} : vector<8x384xf32> to vector<8x128xf32>
    %868 = vector.extract_strided_slice %855 {offsets = [0, 128], sizes = [8, 128], strides = [1, 1]} : vector<8x384xf32> to vector<8x128xf32>
    %869 = arith.addf %867, %868 : vector<8x128xf32>
    %870 = arith.negf %869 : vector<8x128xf32>
    %871 = math.exp %870 : vector<8x128xf32>
    %cst_224 = arith.constant 1.000000e+00 : f32
    %872 = vector.broadcast %cst_224 : f32 to vector<8x128xf32>
    %873 = arith.addf %872, %871 : vector<8x128xf32>
    %874 = arith.divf %872, %873 : vector<8x128xf32>
    %875 = vector.extract_strided_slice %857 {offsets = [0, 256], sizes = [8, 128], strides = [1, 1]} : vector<8x384xf32> to vector<8x128xf32>
    %876 = vector.extract_strided_slice %855 {offsets = [0, 256], sizes = [8, 128], strides = [1, 1]} : vector<8x384xf32> to vector<8x128xf32>
    %877 = arith.addf %876, %531 : vector<8x128xf32>
    %878 = arith.mulf %866, %877 : vector<8x128xf32>
    %879 = arith.addf %875, %878 : vector<8x128xf32>
    %880 = math.tanh %879 : vector<8x128xf32>
    %cst_225 = arith.constant 1.000000e+00 : f32
    %881 = vector.broadcast %cst_225 : f32 to vector<8x128xf32>
    %882 = arith.subf %881, %874 : vector<8x128xf32>
    %883 = arith.mulf %882, %880 : vector<8x128xf32>
    %884 = arith.mulf %874, %822 : vector<8x128xf32>
    %885 = arith.addf %883, %884 : vector<8x128xf32>
    %886 = vector.extract_strided_slice %858 {offsets = [0, 0], sizes = [8, 128], strides = [1, 1]} : vector<8x384xf32> to vector<8x128xf32>
    %887 = vector.extract_strided_slice %856 {offsets = [0, 0], sizes = [8, 128], strides = [1, 1]} : vector<8x384xf32> to vector<8x128xf32>
    %888 = arith.addf %886, %887 : vector<8x128xf32>
    %889 = arith.negf %888 : vector<8x128xf32>
    %890 = math.exp %889 : vector<8x128xf32>
    %cst_226 = arith.constant 1.000000e+00 : f32
    %891 = vector.broadcast %cst_226 : f32 to vector<8x128xf32>
    %892 = arith.addf %891, %890 : vector<8x128xf32>
    %893 = arith.divf %891, %892 : vector<8x128xf32>
    %894 = vector.extract_strided_slice %858 {offsets = [0, 128], sizes = [8, 128], strides = [1, 1]} : vector<8x384xf32> to vector<8x128xf32>
    %895 = vector.extract_strided_slice %856 {offsets = [0, 128], sizes = [8, 128], strides = [1, 1]} : vector<8x384xf32> to vector<8x128xf32>
    %896 = arith.addf %894, %895 : vector<8x128xf32>
    %897 = arith.negf %896 : vector<8x128xf32>
    %898 = math.exp %897 : vector<8x128xf32>
    %cst_227 = arith.constant 1.000000e+00 : f32
    %899 = vector.broadcast %cst_227 : f32 to vector<8x128xf32>
    %900 = arith.addf %899, %898 : vector<8x128xf32>
    %901 = arith.divf %899, %900 : vector<8x128xf32>
    %902 = vector.extract_strided_slice %858 {offsets = [0, 256], sizes = [8, 128], strides = [1, 1]} : vector<8x384xf32> to vector<8x128xf32>
    %903 = vector.extract_strided_slice %856 {offsets = [0, 256], sizes = [8, 128], strides = [1, 1]} : vector<8x384xf32> to vector<8x128xf32>
    %904 = arith.addf %903, %534 : vector<8x128xf32>
    %905 = arith.mulf %893, %904 : vector<8x128xf32>
    %906 = arith.addf %902, %905 : vector<8x128xf32>
    %907 = math.tanh %906 : vector<8x128xf32>
    %cst_228 = arith.constant 1.000000e+00 : f32
    %908 = vector.broadcast %cst_228 : f32 to vector<8x128xf32>
    %909 = arith.subf %908, %901 : vector<8x128xf32>
    %910 = arith.mulf %909, %907 : vector<8x128xf32>
    %911 = arith.mulf %901, %849 : vector<8x128xf32>
    %912 = arith.addf %910, %911 : vector<8x128xf32>
    %c40_229 = arith.constant 40 : index
    %c0_230 = arith.constant 0 : index
    %913 = vector.load %arg14[%c40_229, %c0_230] : memref<64x256xf32, #tpu.memory_space<vmem>>, vector<8x128xf32>
    tpu.vector_store %arg14[%c40_229, %c0_230], %885 {strides = array<i32>} : memref<64x256xf32, #tpu.memory_space<vmem>>, vector<8x128xf32>,
    %c16_231 = arith.constant 16 : index
    %c128_232 = arith.constant 128 : index
    %914 = vector.load %arg14[%c16_231, %c128_232] : memref<64x256xf32, #tpu.memory_space<vmem>>, vector<8x128xf32>
    tpu.vector_store %arg14[%c16_231, %c128_232], %912 {strides = array<i32>} : memref<64x256xf32, #tpu.memory_space<vmem>>, vector<8x128xf32>,
    %915 = tpu.concatenate %885, %912 in 1 : vector<8x128xf32>, vector<8x128xf32> -> vector<8x256xf32>
    %916 = arith.truncf %915 : vector<8x256xf32> to vector<8x256xbf16>
    %cst_233 = arith.constant dense<0.000000e+00> : vector<8x768xf32>
    %917 = tpu.matmul %916, %528, %cst_233 {dimension_numbers = #tpu.dot_dimension_numbers<[1], [0], [0], [1], [0, 0, 1, 1], [], []>} : vector<8x256xbf16>, vector<256x768xbf16>, vector<8x768xf32> -> vector<8x768xf32>
    %918 = vector.extract_strided_slice %917 {offsets = [0, 0], sizes = [8, 384], strides = [1, 1]} : vector<8x768xf32> to vector<8x384xf32>
    %919 = vector.extract_strided_slice %917 {offsets = [0, 384], sizes = [8, 384], strides = [1, 1]} : vector<8x768xf32> to vector<8x384xf32>
    %c48_234 = arith.constant 48 : index
    %c0_235 = arith.constant 0 : index
    %920 = vector.load %arg15[%c48_234, %c0_235] : memref<64x768xf32, #tpu.memory_space<vmem>>, vector<8x384xf32>
    %c8_236 = arith.constant 8 : index
    %c384_237 = arith.constant 384 : index
    %921 = vector.load %arg15[%c8_236, %c384_237] : memref<64x768xf32, #tpu.memory_space<vmem>>, vector<8x384xf32>
    %922 = vector.extract_strided_slice %920 {offsets = [0, 0], sizes = [8, 128], strides = [1, 1]} : vector<8x384xf32> to vector<8x128xf32>
    %923 = vector.extract_strided_slice %918 {offsets = [0, 0], sizes = [8, 128], strides = [1, 1]} : vector<8x384xf32> to vector<8x128xf32>
    %924 = arith.addf %922, %923 : vector<8x128xf32>
    %925 = arith.negf %924 : vector<8x128xf32>
    %926 = math.exp %925 : vector<8x128xf32>
    %cst_238 = arith.constant 1.000000e+00 : f32
    %927 = vector.broadcast %cst_238 : f32 to vector<8x128xf32>
    %928 = arith.addf %927, %926 : vector<8x128xf32>
    %929 = arith.divf %927, %928 : vector<8x128xf32>
    %930 = vector.extract_strided_slice %920 {offsets = [0, 128], sizes = [8, 128], strides = [1, 1]} : vector<8x384xf32> to vector<8x128xf32>
    %931 = vector.extract_strided_slice %918 {offsets = [0, 128], sizes = [8, 128], strides = [1, 1]} : vector<8x384xf32> to vector<8x128xf32>
    %932 = arith.addf %930, %931 : vector<8x128xf32>
    %933 = arith.negf %932 : vector<8x128xf32>
    %934 = math.exp %933 : vector<8x128xf32>
    %cst_239 = arith.constant 1.000000e+00 : f32
    %935 = vector.broadcast %cst_239 : f32 to vector<8x128xf32>
    %936 = arith.addf %935, %934 : vector<8x128xf32>
    %937 = arith.divf %935, %936 : vector<8x128xf32>
    %938 = vector.extract_strided_slice %920 {offsets = [0, 256], sizes = [8, 128], strides = [1, 1]} : vector<8x384xf32> to vector<8x128xf32>
    %939 = vector.extract_strided_slice %918 {offsets = [0, 256], sizes = [8, 128], strides = [1, 1]} : vector<8x384xf32> to vector<8x128xf32>
    %940 = arith.addf %939, %531 : vector<8x128xf32>
    %941 = arith.mulf %929, %940 : vector<8x128xf32>
    %942 = arith.addf %938, %941 : vector<8x128xf32>
    %943 = math.tanh %942 : vector<8x128xf32>
    %cst_240 = arith.constant 1.000000e+00 : f32
    %944 = vector.broadcast %cst_240 : f32 to vector<8x128xf32>
    %945 = arith.subf %944, %937 : vector<8x128xf32>
    %946 = arith.mulf %945, %943 : vector<8x128xf32>
    %947 = arith.mulf %937, %885 : vector<8x128xf32>
    %948 = arith.addf %946, %947 : vector<8x128xf32>
    %949 = vector.extract_strided_slice %921 {offsets = [0, 0], sizes = [8, 128], strides = [1, 1]} : vector<8x384xf32> to vector<8x128xf32>
    %950 = vector.extract_strided_slice %919 {offsets = [0, 0], sizes = [8, 128], strides = [1, 1]} : vector<8x384xf32> to vector<8x128xf32>
    %951 = arith.addf %949, %950 : vector<8x128xf32>
    %952 = arith.negf %951 : vector<8x128xf32>
    %953 = math.exp %952 : vector<8x128xf32>
    %cst_241 = arith.constant 1.000000e+00 : f32
    %954 = vector.broadcast %cst_241 : f32 to vector<8x128xf32>
    %955 = arith.addf %954, %953 : vector<8x128xf32>
    %956 = arith.divf %954, %955 : vector<8x128xf32>
    %957 = vector.extract_strided_slice %921 {offsets = [0, 128], sizes = [8, 128], strides = [1, 1]} : vector<8x384xf32> to vector<8x128xf32>
    %958 = vector.extract_strided_slice %919 {offsets = [0, 128], sizes = [8, 128], strides = [1, 1]} : vector<8x384xf32> to vector<8x128xf32>
    %959 = arith.addf %957, %958 : vector<8x128xf32>
    %960 = arith.negf %959 : vector<8x128xf32>
    %961 = math.exp %960 : vector<8x128xf32>
    %cst_242 = arith.constant 1.000000e+00 : f32
    %962 = vector.broadcast %cst_242 : f32 to vector<8x128xf32>
    %963 = arith.addf %962, %961 : vector<8x128xf32>
    %964 = arith.divf %962, %963 : vector<8x128xf32>
    %965 = vector.extract_strided_slice %921 {offsets = [0, 256], sizes = [8, 128], strides = [1, 1]} : vector<8x384xf32> to vector<8x128xf32>
    %966 = vector.extract_strided_slice %919 {offsets = [0, 256], sizes = [8, 128], strides = [1, 1]} : vector<8x384xf32> to vector<8x128xf32>
    %967 = arith.addf %966, %534 : vector<8x128xf32>
    %968 = arith.mulf %956, %967 : vector<8x128xf32>
    %969 = arith.addf %965, %968 : vector<8x128xf32>
    %970 = math.tanh %969 : vector<8x128xf32>
    %cst_243 = arith.constant 1.000000e+00 : f32
    %971 = vector.broadcast %cst_243 : f32 to vector<8x128xf32>
    %972 = arith.subf %971, %964 : vector<8x128xf32>
    %973 = arith.mulf %972, %970 : vector<8x128xf32>
    %974 = arith.mulf %964, %912 : vector<8x128xf32>
    %975 = arith.addf %973, %974 : vector<8x128xf32>
    %c48_244 = arith.constant 48 : index
    %c0_245 = arith.constant 0 : index
    %976 = vector.load %arg14[%c48_244, %c0_245] : memref<64x256xf32, #tpu.memory_space<vmem>>, vector<8x128xf32>
    tpu.vector_store %arg14[%c48_244, %c0_245], %948 {strides = array<i32>} : memref<64x256xf32, #tpu.memory_space<vmem>>, vector<8x128xf32>,
    %c8_246 = arith.constant 8 : index
    %c128_247 = arith.constant 128 : index
    %977 = vector.load %arg14[%c8_246, %c128_247] : memref<64x256xf32, #tpu.memory_space<vmem>>, vector<8x128xf32>
    tpu.vector_store %arg14[%c8_246, %c128_247], %975 {strides = array<i32>} : memref<64x256xf32, #tpu.memory_space<vmem>>, vector<8x128xf32>,
    %978 = tpu.concatenate %948, %975 in 1 : vector<8x128xf32>, vector<8x128xf32> -> vector<8x256xf32>
    %979 = arith.truncf %978 : vector<8x256xf32> to vector<8x256xbf16>
    %cst_248 = arith.constant dense<0.000000e+00> : vector<8x768xf32>
    %980 = tpu.matmul %979, %528, %cst_248 {dimension_numbers = #tpu.dot_dimension_numbers<[1], [0], [0], [1], [0, 0, 1, 1], [], []>} : vector<8x256xbf16>, vector<256x768xbf16>, vector<8x768xf32> -> vector<8x768xf32>
    %981 = vector.extract_strided_slice %980 {offsets = [0, 0], sizes = [8, 384], strides = [1, 1]} : vector<8x768xf32> to vector<8x384xf32>
    %982 = vector.extract_strided_slice %980 {offsets = [0, 384], sizes = [8, 384], strides = [1, 1]} : vector<8x768xf32> to vector<8x384xf32>
    %c56_249 = arith.constant 56 : index
    %c0_250 = arith.constant 0 : index
    %983 = vector.load %arg15[%c56_249, %c0_250] : memref<64x768xf32, #tpu.memory_space<vmem>>, vector<8x384xf32>
    %c0_251 = arith.constant 0 : index
    %c384_252 = arith.constant 384 : index
    %984 = vector.load %arg15[%c0_251, %c384_252] : memref<64x768xf32, #tpu.memory_space<vmem>>, vector<8x384xf32>
    %985 = vector.extract_strided_slice %983 {offsets = [0, 0], sizes = [8, 128], strides = [1, 1]} : vector<8x384xf32> to vector<8x128xf32>
    %986 = vector.extract_strided_slice %981 {offsets = [0, 0], sizes = [8, 128], strides = [1, 1]} : vector<8x384xf32> to vector<8x128xf32>
    %987 = arith.addf %985, %986 : vector<8x128xf32>
    %988 = arith.negf %987 : vector<8x128xf32>
    %989 = math.exp %988 : vector<8x128xf32>
    %cst_253 = arith.constant 1.000000e+00 : f32
    %990 = vector.broadcast %cst_253 : f32 to vector<8x128xf32>
    %991 = arith.addf %990, %989 : vector<8x128xf32>
    %992 = arith.divf %990, %991 : vector<8x128xf32>
    %993 = vector.extract_strided_slice %983 {offsets = [0, 128], sizes = [8, 128], strides = [1, 1]} : vector<8x384xf32> to vector<8x128xf32>
    %994 = vector.extract_strided_slice %981 {offsets = [0, 128], sizes = [8, 128], strides = [1, 1]} : vector<8x384xf32> to vector<8x128xf32>
    %995 = arith.addf %993, %994 : vector<8x128xf32>
    %996 = arith.negf %995 : vector<8x128xf32>
    %997 = math.exp %996 : vector<8x128xf32>
    %cst_254 = arith.constant 1.000000e+00 : f32
    %998 = vector.broadcast %cst_254 : f32 to vector<8x128xf32>
    %999 = arith.addf %998, %997 : vector<8x128xf32>
    %1000 = arith.divf %998, %999 : vector<8x128xf32>
    %1001 = vector.extract_strided_slice %983 {offsets = [0, 256], sizes = [8, 128], strides = [1, 1]} : vector<8x384xf32> to vector<8x128xf32>
    %1002 = vector.extract_strided_slice %981 {offsets = [0, 256], sizes = [8, 128], strides = [1, 1]} : vector<8x384xf32> to vector<8x128xf32>
    %1003 = arith.addf %1002, %531 : vector<8x128xf32>
    %1004 = arith.mulf %992, %1003 : vector<8x128xf32>
    %1005 = arith.addf %1001, %1004 : vector<8x128xf32>
    %1006 = math.tanh %1005 : vector<8x128xf32>
    %cst_255 = arith.constant 1.000000e+00 : f32
    %1007 = vector.broadcast %cst_255 : f32 to vector<8x128xf32>
    %1008 = arith.subf %1007, %1000 : vector<8x128xf32>
    %1009 = arith.mulf %1008, %1006 : vector<8x128xf32>
    %1010 = arith.mulf %1000, %948 : vector<8x128xf32>
    %1011 = arith.addf %1009, %1010 : vector<8x128xf32>
    %1012 = vector.extract_strided_slice %984 {offsets = [0, 0], sizes = [8, 128], strides = [1, 1]} : vector<8x384xf32> to vector<8x128xf32>
    %1013 = vector.extract_strided_slice %982 {offsets = [0, 0], sizes = [8, 128], strides = [1, 1]} : vector<8x384xf32> to vector<8x128xf32>
    %1014 = arith.addf %1012, %1013 : vector<8x128xf32>
    %1015 = arith.negf %1014 : vector<8x128xf32>
    %1016 = math.exp %1015 : vector<8x128xf32>
    %cst_256 = arith.constant 1.000000e+00 : f32
    %1017 = vector.broadcast %cst_256 : f32 to vector<8x128xf32>
    %1018 = arith.addf %1017, %1016 : vector<8x128xf32>
    %1019 = arith.divf %1017, %1018 : vector<8x128xf32>
    %1020 = vector.extract_strided_slice %984 {offsets = [0, 128], sizes = [8, 128], strides = [1, 1]} : vector<8x384xf32> to vector<8x128xf32>
    %1021 = vector.extract_strided_slice %982 {offsets = [0, 128], sizes = [8, 128], strides = [1, 1]} : vector<8x384xf32> to vector<8x128xf32>
    %1022 = arith.addf %1020, %1021 : vector<8x128xf32>
    %1023 = arith.negf %1022 : vector<8x128xf32>
    %1024 = math.exp %1023 : vector<8x128xf32>
    %cst_257 = arith.constant 1.000000e+00 : f32
    %1025 = vector.broadcast %cst_257 : f32 to vector<8x128xf32>
    %1026 = arith.addf %1025, %1024 : vector<8x128xf32>
    %1027 = arith.divf %1025, %1026 : vector<8x128xf32>
    %1028 = vector.extract_strided_slice %984 {offsets = [0, 256], sizes = [8, 128], strides = [1, 1]} : vector<8x384xf32> to vector<8x128xf32>
    %1029 = vector.extract_strided_slice %982 {offsets = [0, 256], sizes = [8, 128], strides = [1, 1]} : vector<8x384xf32> to vector<8x128xf32>
    %1030 = arith.addf %1029, %534 : vector<8x128xf32>
    %1031 = arith.mulf %1019, %1030 : vector<8x128xf32>
    %1032 = arith.addf %1028, %1031 : vector<8x128xf32>
    %1033 = math.tanh %1032 : vector<8x128xf32>
    %cst_258 = arith.constant 1.000000e+00 : f32
    %1034 = vector.broadcast %cst_258 : f32 to vector<8x128xf32>
    %1035 = arith.subf %1034, %1027 : vector<8x128xf32>
    %1036 = arith.mulf %1035, %1033 : vector<8x128xf32>
    %1037 = arith.mulf %1027, %975 : vector<8x128xf32>
    %1038 = arith.addf %1036, %1037 : vector<8x128xf32>
    %c56_259 = arith.constant 56 : index
    %c0_260 = arith.constant 0 : index
    %1039 = vector.load %arg14[%c56_259, %c0_260] : memref<64x256xf32, #tpu.memory_space<vmem>>, vector<8x128xf32>
    tpu.vector_store %arg14[%c56_259, %c0_260], %1011 {strides = array<i32>} : memref<64x256xf32, #tpu.memory_space<vmem>>, vector<8x128xf32>,
    %c0_261 = arith.constant 0 : index
    %c128_262 = arith.constant 128 : index
    %1040 = vector.load %arg14[%c0_261, %c128_262] : memref<64x256xf32, #tpu.memory_space<vmem>>, vector<8x128xf32>
    tpu.vector_store %arg14[%c0_261, %c128_262], %1038 {strides = array<i32>} : memref<64x256xf32, #tpu.memory_space<vmem>>, vector<8x128xf32>,
    %c0_263 = arith.constant 0 : index
    %c0_264 = arith.constant 0 : index
    %1041 = vector.load %arg14[%c0_263, %c0_264] : memref<64x256xf32, #tpu.memory_space<vmem>>, vector<64x256xf32>
    %1042 = arith.truncf %1041 : vector<64x256xf32> to vector<64x256xbf16>
    %c0_265 = arith.constant 0 : index
    %c0_266 = arith.constant 0 : index
    %1043 = vector.load %arg10[%c0_265, %c0_266] : memref<256x256xbf16, #tpu.memory_space<vmem>>, vector<256x256xbf16>
    %cst_267 = arith.constant dense<0.000000e+00> : vector<64x256xf32>
    %1044 = tpu.matmul %1042, %1043, %cst_267 {dimension_numbers = #tpu.dot_dimension_numbers<[1], [0], [0], [1], [0, 0, 1, 1], [], []>} : vector<64x256xbf16>, vector<256x256xbf16>, vector<64x256xf32> -> vector<64x256xf32>
    %c0_268 = arith.constant 0 : index
    %c0_269 = arith.constant 0 : index
    %1045 = vector.load %arg11[%c0_268, %c0_269] : memref<1x256xf32, #tpu.memory_space<vmem>>, vector<1x256xf32>
    %1046 = vector.broadcast %1045 : vector<1x256xf32> to vector<64x256xf32>
    %1047 = arith.addf %1044, %1046 : vector<64x256xf32>
    %c0_270 = arith.constant 0 : index
    %c0_271 = arith.constant 0 : index
    %1048 = vector.load %arg12[%c0_270, %c0_271] : memref<64x256xf32, #tpu.memory_space<vmem>>, vector<64x256xf32>
    tpu.vector_store %arg12[%c0_270, %c0_271], %1047 {strides = array<i32>} : memref<64x256xf32, #tpu.memory_space<vmem>>, vector<64x256xf32>,
    return
  }
  func.func @transform_0(%arg0: i32) -> (i32, i32) {
    %c0_i32 = arith.constant 0 : i32
    %c0_i32_0 = arith.constant 0 : i32
    return %arg0, %c0_i32 : i32, i32
  }
  func.func @transform_1(%arg0: i32) -> (i32, i32) {
    %c0_i32 = arith.constant 0 : i32
    %c0_i32_0 = arith.constant 0 : i32
    %c0_i32_1 = arith.constant 0 : i32
    return %c0_i32, %c0_i32_0 : i32, i32
  }
  func.func @transform_2(%arg0: i32) -> (i32, i32) {
    %c0_i32 = arith.constant 0 : i32
    %c0_i32_0 = arith.constant 0 : i32
    %c0_i32_1 = arith.constant 0 : i32
    return %c0_i32, %c0_i32_0 : i32, i32
  }
  func.func @transform_3(%arg0: i32) -> (i32, i32) {
    %c0_i32 = arith.constant 0 : i32
    %c0_i32_0 = arith.constant 0 : i32
    %c0_i32_1 = arith.constant 0 : i32
    return %c0_i32, %c0_i32_0 : i32, i32
  }
  func.func @transform_4(%arg0: i32) -> (i32, i32) {
    %c0_i32 = arith.constant 0 : i32
    %c0_i32_0 = arith.constant 0 : i32
    %c0_i32_1 = arith.constant 0 : i32
    return %c0_i32, %c0_i32_0 : i32, i32
  }
  func.func @transform_5(%arg0: i32) -> (i32, i32) {
    %c0_i32 = arith.constant 0 : i32
    %c0_i32_0 = arith.constant 0 : i32
    %c0_i32_1 = arith.constant 0 : i32
    return %c0_i32, %c0_i32_0 : i32, i32
  }
  func.func @transform_6(%arg0: i32) -> (i32, i32) {
    %c0_i32 = arith.constant 0 : i32
    %c0_i32_0 = arith.constant 0 : i32
    %c0_i32_1 = arith.constant 0 : i32
    return %c0_i32, %c0_i32_0 : i32, i32
  }
  func.func @transform_7(%arg0: i32) -> (i32, i32) {
    %c0_i32 = arith.constant 0 : i32
    %c0_i32_0 = arith.constant 0 : i32
    %c0_i32_1 = arith.constant 0 : i32
    return %c0_i32, %c0_i32_0 : i32, i32
  }
  func.func @transform_8(%arg0: i32) -> (i32, i32) {
    %c0_i32 = arith.constant 0 : i32
    %c0_i32_0 = arith.constant 0 : i32
    %c0_i32_1 = arith.constant 0 : i32
    return %c0_i32, %c0_i32_0 : i32, i32
  }
  func.func @transform_9(%arg0: i32) -> (i32, i32) {
    %c0_i32 = arith.constant 0 : i32
    %c0_i32_0 = arith.constant 0 : i32
    %c0_i32_1 = arith.constant 0 : i32
    return %c0_i32, %c0_i32_0 : i32, i32
  }
  func.func @transform_10(%arg0: i32) -> (i32, i32) {
    %c0_i32 = arith.constant 0 : i32
    %c0_i32_0 = arith.constant 0 : i32
    %c0_i32_1 = arith.constant 0 : i32
    return %c0_i32, %c0_i32_0 : i32, i32
  }
  func.func @transform_11(%arg0: i32) -> (i32, i32) {
    %c0_i32 = arith.constant 0 : i32
    %c0_i32_0 = arith.constant 0 : i32
    return %arg0, %c0_i32 : i32, i32
  }
}

</mosaic_0001>

<bundles_post_ra>
// kernel: seq_tagger_forward.1
= control target key start
LH: loop header
LB: loop body
LE: loop exit
PB: predicated region body
PF: predicated region fallthrough
CT: control target
= control target key end

     0   :  { %v7258_v1 = vmov 0   ;;  %vm135_vm0 = vcmask 130048   ;;  %v12557_v30 = vmov 0.0|0.0   ;;  %s12545_s1 = inlined_call_operand.vmem [shape: bf16[16,768], index: 1, kind: input, shape index: {}]   ;;  %s12546_s0 = inlined_call_operand.vmem [shape: bf16[64,16], index: 0, kind: input, shape index: {}]   ;;  %s12547_s2 = inlined_call_operand.vmem [shape: bf16[256,768], index: 2, kind: input, shape index: {}]   ;;  %s12548_s3 = inlined_call_operand.vmem [shape: f32[1,768], index: 3, kind: input, shape index: {}]   ;;  %s12549_s4 = inlined_call_operand.vmem [shape: f32[1,256], index: 4, kind: input, shape index: {}]   ;;  %s12550_s5 = inlined_call_operand.vmem [shape: bf16[256,768], index: 5, kind: input, shape index: {}]   ;;  %s12551_s6 = inlined_call_operand.vmem [shape: bf16[256,768], index: 6, kind: input, shape index: {}]   ;;  %s12552_s7 = inlined_call_operand.vmem [shape: f32[1,768], index: 7, kind: input, shape index: {}]   ;;  %s12553_s8 = inlined_call_operand.vmem [shape: f32[1,256], index: 8, kind: input, shape index: {}]   ;;  %s12554_s9 = inlined_call_operand.vmem [shape: bf16[256,256], index: 9, kind: input, shape index: {}]   ;;  %s12555_s10 = inlined_call_operand.vmem [shape: f32[1,256], index: 10, kind: input, shape index: {}]   ;;  %s12556_s11 = inlined_call_operand.vmem [shape: f32[64,256], index: 11, kind: output, shape index: {}]  }
   0x1   :  { %v6056_v0 = vld [vmem:[%s12545_s1 + $0x4] ss:$24 sps:$4 sm:$0xff]   ;;  %180 = vmatprep.mubr.bf16.mxu1 %v7258_v1  ;;  %326 = vmatprep.mubr.bf16.mxu0 %v7258_v1  ;;  %v6058_v2 = vld [vmem:[%s12545_s1] ss:$24 sps:$4 sm:$0xff]   ;;  %v6065_v6 = vld [vmem:[%s12545_s1 + $0x14] ss:$24 sps:$4 sm:$0xff]  }
   0x2   :  { %148 = vmatprep.subr.bf16.mxu1 %v6056_v0  ;;  %v7331_v3 = vld [vmem:[%s12546_s0] sm:$0xff]   ;;  %v6067_v7 = vld [vmem:[%s12545_s1 + $0x10] ss:$24 sps:$4 sm:$0xff]   ;;  %294 = vmatprep.subr.bf16.mxu0 %v6065_v6  ;;  %v7367_v11 = vld [vmem:[%s12547_s2 + $0x3c] ss:$24 sps:$4 sm:$0xff]  }
   0x3   :  { %149 = vmatpush1.bf16.msra.mxu1 %v6058_v2  ;;  %v6060_v4 = vld [vmem:[%s12545_s1 + $0x8] ss:$24 sps:$4 sm:$0xff]   ;;  %v6062_v5 = vld [vmem:[%s12545_s1 + $0xc] ss:$24 sps:$4 sm:$0xff]   ;;  %295 = vmatpush1.bf16.msra.mxu0 %v6067_v7  ;;  %v7381_v13 = vld [vmem:[%s12547_s2 + $0x38] ss:$24 sps:$4 sm:$0xff]  }
   0x4   :  { %221 = vmatprep.subr.bf16.mxu1 %v6062_v5  ;;  %v7351_v8 = vld [vmem:[%s12546_s0 + $0x8] sm:$0xff]   ;;  %v7372_v12 = vld [vmem:[%s12547_s2 + $0x4] ss:$24 sps:$4 sm:$0xff]   ;;  %v7396_v15 = vld [vmem:[%s12546_s0 + $0x10] sm:$0xff]  }
   0x5   :  { %v7356_v9 = vld [vmem:[%s12547_s2 + $0xc] ss:$24 sps:$4 sm:$0xff]   ;;  %v7361_v10 = vld [vmem:[%s12547_s2 + $0x8] ss:$24 sps:$4 sm:$0xff]   ;;  %v7408_v17 = vld [vmem:[%s12547_s2 + $0x9c] ss:$24 sps:$4 sm:$0xff]  }
   0x6   :  { %5654 = vmatmul.mubr.msk.bf16.vlgmr.msra.gmra.mrb[0].mxu1 %vm135_vm0, %v7331_v3  ;;  %1047 = vmatprep.subr.bf16.mxu0 %v7356_v9  ;;  %v7389_v14 = vld [vmem:[%s12547_s2 + $0x6c] ss:$24 sps:$4 sm:$0xff]   ;;  %v7402_v16 = vld [vmem:[%s12547_s2 + $0x68] ss:$24 sps:$4 sm:$0xff]   ;;  %v7416_v18 = vld [vmem:[%s12547_s2 + $0x98] ss:$24 sps:$4 sm:$0xff]  }
   0x7   :  { %222 = vmatpush1.bf16.msra.mxu1 %v6060_v4  ;;  %190 = vmatprep.mubr.bf16.mxu1 %v7258_v1  ;;  %v7425_v19 = vld [vmem:[%s12547_s2 + $0xcc] ss:$24 sps:$4 sm:$0xff]   ;;  %v7431_v20 = vld [vmem:[%s12546_s0 + $0x18] sm:$0xff]   ;;  %v7437_v21 = vld [vmem:[%s12547_s2 + $0xc8] ss:$24 sps:$4 sm:$0xff]  }
   0x8   :  { %5662 = vmatmul.mubr.msk.bf16.vlgmr.msra.gmra.mrb[0].mxu0 %vm135_vm0, %v7331_v3  ;;  %1006 = vmatprep.subr.bf16.mxu1 %v7372_v12  ;;  %v7443_v22 = vld [vmem:[%s12547_s2 + $0xfc] ss:$24 sps:$4 sm:$0xff]   ;;  %v7451_v23 = vld [vmem:[%s12547_s2 + $0xf8] ss:$24 sps:$4 sm:$0xff]   ;;  %v7460_v24 = vld [vmem:[%s12547_s2 + $0x12c] ss:$24 sps:$4 sm:$0xff]  }
   0x9   :  { %1048 = vmatpush1.bf16.msra.mxu0 %v7361_v10  ;;  %336 = vmatprep.mubr.bf16.mxu0 %v7258_v1  ;;  %v7467_v25 = vld [vmem:[%s12547_s2 + $0x128] ss:$24 sps:$4 sm:$0xff]   ;;  %v7473_v26 = vld [vmem:[%s12547_s2 + $0x15c] ss:$24 sps:$4 sm:$0xff]   ;;  %v7491_v29 = vld [vmem:[%s12547_s2 + $0x158] ss:$24 sps:$4 sm:$0xff]  }
   0xa   :  { %1049 = vmatprep.subr.bf16.mxu0 %v7367_v11  ;;  %v7478_v27 = vld [vmem:[%s12547_s2] ss:$24 sps:$4 sm:$0xff]   ;;  %v7483_v28 = vld [vmem:[%s12547_s2 + $0x34] ss:$24 sps:$4 sm:$0xff]   ;;  %v7506_v32 = vld [vmem:[%s12547_s2 + $0x30] ss:$24 sps:$4 sm:$0xff]  }
   0xb   :  { %v7500_v31 = vld [vmem:[%s12547_s2 + $0x18c] ss:$24 sps:$4 sm:$0xff]   ;;  %v7519_v34 = vld [vmem:[%s12547_s2 + $0x188] ss:$24 sps:$4 sm:$0xff]   ;;  %v7525_v35 = vld [vmem:[%s12547_s2 + $0x1bc] ss:$24 sps:$4 sm:$0xff]  }
   0xc   :  { %v7513_v33 = vld [vmem:[%s12547_s2 + $0x64] ss:$24 sps:$4 sm:$0xff]   ;;  %v7531_v36 = vld [vmem:[%s12547_s2 + $0x60] ss:$24 sps:$4 sm:$0xff]   ;;  %v7537_v37 = vld [vmem:[%s12547_s2 + $0x94] ss:$24 sps:$4 sm:$0xff]  }
   0xd   :  { %1050 = vmatpush1.bf16.msra.mxu0 %v7381_v13  ;;  %v7543_v38 = vld [vmem:[%s12547_s2 + $0x1b8] ss:$24 sps:$4 sm:$0xff]   ;;  %v7549_v39 = vld [vmem:[%s12547_s2 + $0x1ec] ss:$24 sps:$4 sm:$0xff]   ;;  %v7570_v42 = vld [vmem:[%s12547_s2 + $0x1e8] ss:$24 sps:$4 sm:$0xff]  }
   0xe   :  { %5655 = vmatmul.mubr.msk.bf16.gmra.mrb[4].mxu1 %vm135_vm0, %v7351_v8  ;;  %1051 = vmatprep.subr.bf16.mxu0 %v7389_v14  ;;  %v7557_v40 = vld [vmem:[%s12547_s2 + $0x90] ss:$24 sps:$4 sm:$0xff]   ;;  %v7564_v41 = vld [vmem:[%s12547_s2 + $0xc4] ss:$24 sps:$4 sm:$0xff]   ;;  %v7582_v44 = vld [vmem:[%s12547_s2 + $0xc0] ss:$24 sps:$4 sm:$0xff]  }
   0xf   :  { %200 = vmatprep.mubr.bf16.mxu1 %v7258_v1  ;;  %12949 = vst [vmem:[#allocation5_spill] sm:$0xff] %v7557_v40  ;;  %12950 = vst [vmem:[#allocation6_spill] sm:$0xff] %v7564_v41  ;;  %v7576_v43 = vld [vmem:[%s12547_s2 + $0x21c] ss:$24 sps:$4 sm:$0xff]   ;;  %v7594_v46 = vld [vmem:[%s12547_s2 + $0x218] ss:$24 sps:$4 sm:$0xff]  }
  0x10   :  { %5663 = vmatmul.mubr.msk.bf16.gmra.mrb[4].mxu0 %vm135_vm0, %v7351_v8  ;;  %12951 = vst [vmem:[#allocation7_spill] sm:$0xff] %v7582_v44  ;;  %v7588_v45 = vld [vmem:[%s12547_s2 + $0xf4] ss:$24 sps:$4 sm:$0xff]   ;;  %v7608_v48 = vld [vmem:[%s12547_s2 + $0xf0] ss:$24 sps:$4 sm:$0xff]  }
  0x11   :  { %1052 = vmatpush1.bf16.msra.mxu0 %v7402_v16  ;;  %346 = vmatprep.mubr.bf16.mxu0 %v7258_v1  ;;  %12952 = vst [vmem:[#allocation8_spill] sm:$0xff] %v7588_v45  ;;  %v7600_v47 = vld [vmem:[%s12547_s2 + $0x24c] ss:$24 sps:$4 sm:$0xff]   ;;  %12953 = vst [vmem:[#allocation9_spill] sm:$0xff] %v7608_v48  ;;  %v7621_v50 = vld [vmem:[%s12547_s2 + $0x248] ss:$24 sps:$4 sm:$0xff]  }
  0x12   :  { %1053 = vmatprep.subr.bf16.mxu0 %v7408_v17  ;;  %v7615_v49 = vld [vmem:[%s12547_s2 + $0x124] ss:$24 sps:$4 sm:$0xff]   ;;  %v7633_v52 = vld [vmem:[%s12547_s2 + $0x120] ss:$24 sps:$4 sm:$0xff]   ;;  %v7639_v53 = vld [vmem:[%s12547_s2 + $0x154] ss:$24 sps:$4 sm:$0xff]  }
  0x13   :  { %12954 = vst [vmem:[#allocation10_spill] sm:$0xff] %v7615_v49  ;;  %v7627_v51 = vld [vmem:[%s12547_s2 + $0x27c] ss:$24 sps:$4 sm:$0xff]   ;;  %12955 = vst [vmem:[#allocation11_spill] sm:$0xff] %v7633_v52  ;;  %v7645_v54 = vld [vmem:[%s12547_s2 + $0x278] ss:$24 sps:$4 sm:$0xff]  }
  0x14   :  { %12956 = vst [vmem:[#allocation12_spill] sm:$0xff] %v7639_v53  ;;  %v7651_v55 = vld [vmem:[%s12547_s2 + $0x2ac] ss:$24 sps:$4 sm:$0xff]   ;;  %v7659_v56 = vld [vmem:[%s12547_s2 + $0x150] ss:$24 sps:$4 sm:$0xff]  }
  0x15   :  { %1054 = vmatpush1.bf16.msra.mxu0 %v7416_v18  ;;  %12957 = vst [vmem:[#allocation13_spill] sm:$0xff] %v7651_v55  ;;  %12958 = vst [vmem:[#allocation14_spill] sm:$0xff] %v7659_v56  ;;  %v7666_v57 = vld [vmem:[%s12547_s2 + $0x184] ss:$24 sps:$4 sm:$0xff]   ;;  %v7672_v58 = vld [vmem:[%s12547_s2 + $0x2a8] ss:$24 sps:$4 sm:$0xff]  }
  0x16   :  { %5656 = vmatmul.mubr.msk.bf16.gmra.mrb[8].mxu1 %vm135_vm0, %v7396_v15  ;;  %1055 = vmatprep.subr.bf16.mxu0 %v7425_v19  ;;  %12959 = vst [vmem:[#allocation15_spill] sm:$0xff] %v7666_v57  ;;  %12960 = vst [vmem:[#allocation16_spill] sm:$0xff] %v7672_v58  ;;  %v7678_v59 = vld [vmem:[%s12547_s2 + $0x2dc] ss:$24 sps:$4 sm:$0xff]   ;;  %v7684_v60 = vld [vmem:[%s12547_s2 + $0x180] ss:$24 sps:$4 sm:$0xff]  }
  0x17   :  { %210 = vmatprep.mubr.bf16.mxu1 %v7258_v1  ;;  %12961 = vst [vmem:[#allocation17_spill] sm:$0xff] %v7678_v59  ;;  %12962 = vst [vmem:[#allocation18_spill] sm:$0xff] %v7684_v60  ;;  %v7690_v61 = vld [vmem:[%s12547_s2 + $0x1b4] ss:$24 sps:$4 sm:$0xff]   ;;  %v7696_v62 = vld [vmem:[%s12547_s2 + $0x2d8] ss:$24 sps:$4 sm:$0xff]  }
  0x18   :  { %5664 = vmatmul.mubr.msk.bf16.gmra.mrb[8].mxu0 %vm135_vm0, %v7396_v15  ;;  %12963 = vst [vmem:[#allocation19_spill] sm:$0xff] %v7690_v61  ;;  %12964 = vst [vmem:[#allocation20_spill] sm:$0xff] %v7696_v62  ;;  %v7703_v63 = vld [vmem:[%s12547_s2 + $0x1b0] ss:$24 sps:$4 sm:$0xff]   ;;  %v7709_v0 = vld [vmem:[%s12547_s2 + $0x1e4] ss:$24 sps:$4 sm:$0xff]  }
  0x19   :  { %1056 = vmatpush1.bf16.msra.mxu0 %v7437_v21  ;;  %356 = vmatprep.mubr.bf16.mxu0 %v7258_v1  ;;  %12965 = vst [vmem:[#allocation21_spill] sm:$0xff] %v7703_v63  ;;  %12966 = vst [vmem:[#allocation22_spill] sm:$0xff] %v7709_v0  ;;  %v7723_v2 = vld [vmem:[%s12547_s2 + $0x214] ss:$24 sps:$4 sm:$0xff]   ;;  %v7738_v4 = vld [vmem:[%s12547_s2 + $0x244] ss:$24 sps:$4 sm:$0xff]  }
  0x1a   :  { %1057 = vmatprep.subr.bf16.mxu0 %v7443_v22  ;;  %12968 = vst [vmem:[#allocation24_spill] sm:$0xff] %v7723_v2  ;;  %12970 = vst [vmem:[#allocation26_spill] sm:$0xff] %v7738_v4  ;;  %v7746_v5 = vld [vmem:[%s12547_s2 + $0x240] ss:$24 sps:$4 sm:$0xff]   ;;  %v7752_v6 = vld [vmem:[%s12547_s2 + $0x274] ss:$24 sps:$4 sm:$0xff]  }
  0x1b   :  { %12971 = vst [vmem:[#allocation27_spill] sm:$0xff] %v7746_v5  ;;  %12972 = vst [vmem:[#allocation28_spill] sm:$0xff] %v7752_v6  ;;  %v7760_v7 = vld [vmem:[%s12547_s2 + $0x270] ss:$24 sps:$4 sm:$0xff]  }
  0x1c   :  { %12973 = vst [vmem:[#allocation29_spill] sm:$0xff] %v7760_v7 }
  0x1d   :  { %1058 = vmatpush1.bf16.msra.mxu0 %v7451_v23 }
  0x1e   :  { %5657 = vmatmul.mubr.msk.bf16.gmra.mrb[12].mxu1 %vm135_vm0, %v7431_v20  ;;  %1059 = vmatprep.subr.bf16.mxu0 %v7460_v24 }
  0x1f   :  { %253 = vmatprep.mubr.bf16.mxu1 %v7258_v1 }
  0x20   :  { %5665 = vmatmul.mubr.msk.bf16.gmra.mrb[12].mxu0 %vm135_vm0, %v7431_v20 }
  0x21   :  { %1060 = vmatpush1.bf16.msra.mxu0 %v7467_v25  ;;  %1079 = vmatprep.mubr.bf16.mxu0 %v12557_v30 }
  0x22   :  { %1061 = vmatprep.subr.bf16.mxu0 %v7473_v26 }
  0x25   :  { %1062 = vmatpush1.bf16.msra.mxu0 %v7491_v29 }
  0x26   :  { %5658 = vmatmul.mubr.msk.bf16.vlgmr.msra.gmra.mrb[16].mxu1 %vm135_vm0, %v7331_v3  ;;  %1063 = vmatprep.subr.bf16.mxu0 %v7500_v31  ;;  %v7732_v3 = vld [vmem:[%s12547_s2 + $0x210] ss:$24 sps:$4 sm:$0xff]  }
  0x27   :  { %1007 = vmatpush1.bf16.msra.mxu1 %v7478_v27  ;;  %263 = vmatprep.mubr.bf16.mxu1 %v7258_v1  ;;  %12969 = vst [vmem:[#allocation25_spill] sm:$0xff] %v7732_v3 }
  0x28   :  { %1008 = vmatprep.subr.bf16.mxu1 %v7483_v28 }
  0x29   :  { %1064 = vmatpush1.bf16.msra.mxu0 %v7519_v34 }
  0x2a   :  { %1065 = vmatprep.subr.bf16.mxu0 %v7525_v35 }
  0x2b   :  { %1009 = vmatpush1.bf16.msra.mxu1 %v7506_v32 }
  0x2c   :  { %1010 = vmatprep.subr.bf16.mxu1 %v7513_v33 }
  0x2d   :  { %1066 = vmatpush1.bf16.msra.mxu0 %v7543_v38 }
  0x2e   :  { %5659 = vmatmul.mubr.msk.bf16.gmra.mrb[20].mxu1 %vm135_vm0, %v7351_v8  ;;  %1067 = vmatprep.subr.bf16.mxu0 %v7549_v39  ;;  %v7766_v8 = vld [vmem:[%s12547_s2 + $0x2a4] ss:$24 sps:$4 sm:$0xff]  }
  0x2f   :  { %1011 = vmatpush1.bf16.msra.mxu1 %v7531_v36  ;;  %273 = vmatprep.mubr.bf16.mxu1 %v7258_v1  ;;  %12974 = vst [vmem:[#allocation30_spill] sm:$0xff] %v7766_v8 }
  0x30   :  { %1012 = vmatprep.subr.bf16.mxu1 %v7537_v37 }
  0x31   :  { %1068 = vmatpush1.bf16.msra.mxu0 %v7570_v42 }
  0x32   :  { %1069 = vmatprep.subr.bf16.mxu0 %v7576_v43 }
  0x33   :  { %1013 = vmatpush1.bf16.msra.mxu1 %v7557_v40 }
  0x34   :  { %1014 = vmatprep.subr.bf16.mxu1 %v7564_v41 }
  0x35   :  { %1070 = vmatpush1.bf16.msra.mxu0 %v7594_v46 }
  0x36   :  { %5660 = vmatmul.mubr.msk.bf16.gmra.mrb[24].mxu1 %vm135_vm0, %v7396_v15  ;;  %1071 = vmatprep.subr.bf16.mxu0 %v7600_v47  ;;  %v7774_v15 = vld [vmem:[%s12547_s2 + $0x2a0] ss:$24 sps:$4 sm:$0xff]  }
  0x37   :  { %1015 = vmatpush1.bf16.msra.mxu1 %v7582_v44  ;;  %283 = vmatprep.mubr.bf16.mxu1 %v7258_v1  ;;  %v7717_v1 = vld [vmem:[%s12547_s2 + $0x1e0] ss:$24 sps:$4 sm:$0xff]   ;;  %12975 = vst [vmem:[#allocation31_spill] sm:$0xff] %v7774_v15 }
  0x38   :  { %1016 = vmatprep.subr.bf16.mxu1 %v7588_v45  ;;  %12967 = vst [vmem:[#allocation23_spill] sm:$0xff] %v7717_v1 }
  0x39   :  { %1072 = vmatpush1.bf16.msra.mxu0 %v7621_v50 }
  0x3a   :  { %1073 = vmatprep.subr.bf16.mxu0 %v7627_v51 }
  0x3b   :  { %1017 = vmatpush1.bf16.msra.mxu1 %v7608_v48 }
  0x3c   :  { %1018 = vmatprep.subr.bf16.mxu1 %v7615_v49 }
  0x3d   :  { %1074 = vmatpush1.bf16.msra.mxu0 %v7645_v54 }
  0x3e   :  { %5661 = vmatmul.mubr.msk.bf16.gmra.mrb[28].mxu1 %vm135_vm0, %v7431_v20  ;;  %1075 = vmatprep.subr.bf16.mxu0 %v7651_v55  ;;  %v7780_v20 = vld [vmem:[%s12547_s2 + $0x2d4] ss:$24 sps:$4 sm:$0xff]  }
  0x3f   :  { %1019 = vmatpush1.bf16.msra.mxu1 %v7633_v52  ;;  %1038 = vmatprep.mubr.bf16.mxu1 %v12557_v30  ;;  %12976 = vst [vmem:[#allocation32_spill] sm:$0xff] %v7780_v20 }
  0x40   :  { %1020 = vmatprep.subr.bf16.mxu1 %v7639_v53 }
  0x41   :  { %1076 = vmatpush1.bf16.msra.mxu0 %v7672_v58 }
  0x42   :  { %1077 = vmatprep.subr.bf16.mxu0 %v7678_v59 }
  0x43   :  { %1021 = vmatpush1.bf16.msra.mxu1 %v7659_v56 }
  0x44   :  { %1022 = vmatprep.subr.bf16.mxu1 %v7666_v57 }
  0x45   :  { %1078 = vmatpush1.bf16.msra.mxu0 %v7696_v62 }
  0x46   :  { %1183 = vmatprep.subr.bf16.mxu0 %v7372_v12 }
  0x47   :  { %1023 = vmatpush1.bf16.msra.mxu1 %v7684_v60 }
  0x48   :  { %1024 = vmatprep.subr.bf16.mxu1 %v7690_v61  ;;  %1080 = vmatmul.mubr.bf16.vlgmr.msra.gmra.mrb[16].mxu0 %v12557_v30  ;;  %v7788_v30 = vld [vmem:[%s12547_s2 + $0x2d0] ss:$24 sps:$4 sm:$0xff]  }
  0x49   :  { %1184 = vmatpush1.bf16.msra.mxu0 %v7478_v27  ;;  %12977 = vst [vmem:[#allocation33_spill] sm:$0xff] %v7788_v30 }
  0x4a   :  { %1185 = vmatprep.subr.bf16.mxu0 %v7483_v28 }
  0x4b   :  { %1025 = vmatpush1.bf16.msra.mxu1 %v7703_v63 }
  0x4c   :  { %1026 = vmatprep.subr.bf16.mxu1 %v7709_v0 }
  0x4d   :  { %1186 = vmatpush1.bf16.msra.mxu0 %v7506_v32 }
  0x4e   :  { %1187 = vmatprep.subr.bf16.mxu0 %v7513_v33 }
  0x4f   :  { %1027 = vmatpush1.bf16.msra.mxu1 %v7717_v1 }
  0x50   :  { %1028 = vmatprep.subr.bf16.mxu1 %v7723_v2 }
  0x51   :  { %1188 = vmatpush1.bf16.msra.mxu0 %v7531_v36 }
  0x52   :  { %1189 = vmatprep.subr.bf16.mxu0 %v7537_v37 }
  0x53   :  { %1029 = vmatpush1.bf16.msra.mxu1 %v7732_v3 }
  0x54   :  { %1030 = vmatprep.subr.bf16.mxu1 %v7738_v4 }
  0x55   :  { %1190 = vmatpush1.bf16.msra.mxu0 %v7557_v40  ;;  %v12979_v40 = vmov 0.0|0.0  }
  0x56   :  { %1191 = vmatprep.subr.bf16.mxu0 %v7564_v41  ;;  %v7794_v41 = vld [vmem:[%s12547_s2 + $0x14] ss:$24 sps:$4 sm:$0xff]  }
  0x57   :  { %1031 = vmatpush1.bf16.msra.mxu1 %v7746_v5  ;;  %12978 = vst [vmem:[#allocation34_spill] sm:$0xff] %v7794_v41 }
  0x58   :  { %1032 = vmatprep.subr.bf16.mxu1 %v7752_v6 }
  0x59   :  { %1192 = vmatpush1.bf16.msra.mxu0 %v7582_v44  ;;  %v7808_v44 = vld [vmem:[%s12547_s2 + $0x44] ss:$24 sps:$4 sm:$0xff]  }
  0x5a   :  { %1193 = vmatprep.subr.bf16.mxu0 %v7588_v45  ;;  %v7802_v45 = vld [vmem:[%s12547_s2 + $0x10] ss:$24 sps:$4 sm:$0xff]  }
  0x5b   :  { %1033 = vmatpush1.bf16.msra.mxu1 %v7760_v7 }
  0x5c   :  { %1034 = vmatprep.subr.bf16.mxu1 %v7766_v8 }
  0x5d   :  { %1194 = vmatpush1.bf16.msra.mxu0 %v7608_v48  ;;  %v7824_v48 = vld [vmem:[%s12547_s2 + $0x74] ss:$24 sps:$4 sm:$0xff]  }
  0x5e   :  { %1195 = vmatprep.subr.bf16.mxu0 %v7615_v49  ;;  %v7817_v49 = vld [vmem:[%s12547_s2 + $0x40] ss:$24 sps:$4 sm:$0xff]  }
  0x5f   :  { %1035 = vmatpush1.bf16.msra.mxu1 %v7774_v15 }
  0x60   :  { %1036 = vmatprep.subr.bf16.mxu1 %v7780_v20 }
  0x61   :  { %1196 = vmatpush1.bf16.msra.mxu0 %v7633_v52  ;;  %v7838_v52 = vld [vmem:[%s12547_s2 + $0xa4] ss:$24 sps:$4 sm:$0xff]  }
  0x62   :  { %1197 = vmatprep.subr.bf16.mxu0 %v7639_v53  ;;  %v7832_v53 = vld [vmem:[%s12547_s2 + $0x70] ss:$24 sps:$4 sm:$0xff]  }
  0x63   :  { %1037 = vmatpush1.bf16.msra.mxu1 %v7788_v30 }
  0x64   :  { %1088 = vmatprep.subr.bf16.mxu1 %v7794_v41 }
  0x65   :  { %1198 = vmatpush1.bf16.msra.mxu0 %v7659_v56  ;;  %v7852_v56 = vld [vmem:[%s12547_s2 + $0xd4] ss:$24 sps:$4 sm:$0xff]  }
  0x66   :  { %1039 = vmatmul.mubr.bf16.vlgmr.msra.gmra.mrb[32].mxu1 %v12979_v40  ;;  %1199 = vmatprep.subr.bf16.mxu0 %v7666_v57  ;;  %v7846_v57 = vld [vmem:[%s12547_s2 + $0xa0] ss:$24 sps:$4 sm:$0xff]  }
  0x67   :  { %1089 = vmatpush1.bf16.msra.mxu1 %v7802_v45  ;;  %1120 = vmatprep.mubr.bf16.mxu1 %v12979_v40 }
  0x68   :  { %1090 = vmatprep.subr.bf16.mxu1 %v7808_v44 }
  0x69   :  { %1200 = vmatpush1.bf16.msra.mxu0 %v7684_v60  ;;  %v7866_v60 = vld [vmem:[%s12547_s2 + $0x104] ss:$24 sps:$4 sm:$0xff]  }
  0x6a   :  { %1201 = vmatprep.subr.bf16.mxu0 %v7690_v61  ;;  %v7860_v61 = vld [vmem:[%s12547_s2 + $0xd0] ss:$24 sps:$4 sm:$0xff]  }
  0x6b   :  { %1091 = vmatpush1.bf16.msra.mxu1 %v7817_v49 }
  0x6c   :  { %1092 = vmatprep.subr.bf16.mxu1 %v7824_v48 }
  0x6d   :  { %1202 = vmatpush1.bf16.msra.mxu0 %v7703_v63  ;;  %v7880_v63 = vld [vmem:[%s12547_s2 + $0x134] ss:$24 sps:$4 sm:$0xff]  }
  0x6e   :  { %1203 = vmatprep.subr.bf16.mxu0 %v7709_v0  ;;  %v7874_v0 = vld [vmem:[%s12547_s2 + $0x100] ss:$24 sps:$4 sm:$0xff]  }
  0x6f   :  { %1093 = vmatpush1.bf16.msra.mxu1 %v7832_v53 }
  0x70   :  { %1094 = vmatprep.subr.bf16.mxu1 %v7838_v52 }
  0x71   :  { %1204 = vmatpush1.bf16.msra.mxu0 %v7717_v1  ;;  %v7894_v1 = vld [vmem:[%s12547_s2 + $0x164] ss:$24 sps:$4 sm:$0xff]  }
  0x72   :  { %1205 = vmatprep.subr.bf16.mxu0 %v7723_v2  ;;  %v7888_v2 = vld [vmem:[%s12547_s2 + $0x130] ss:$24 sps:$4 sm:$0xff]  }
  0x73   :  { %1095 = vmatpush1.bf16.msra.mxu1 %v7846_v57 }
  0x74   :  { %1096 = vmatprep.subr.bf16.mxu1 %v7852_v56 }
  0x75   :  { %1206 = vmatpush1.bf16.msra.mxu0 %v7732_v3  ;;  %v7908_v3 = vld [vmem:[%s12547_s2 + $0x194] ss:$24 sps:$4 sm:$0xff]  }
  0x76   :  { %1207 = vmatprep.subr.bf16.mxu0 %v7738_v4  ;;  %v7902_v4 = vld [vmem:[%s12547_s2 + $0x160] ss:$24 sps:$4 sm:$0xff]  }
  0x77   :  { %1097 = vmatpush1.bf16.msra.mxu1 %v7860_v61 }
  0x78   :  { %1098 = vmatprep.subr.bf16.mxu1 %v7866_v60 }
  0x79   :  { %1208 = vmatpush1.bf16.msra.mxu0 %v7746_v5  ;;  %v7922_v5 = vld [vmem:[%s12547_s2 + $0x1c4] ss:$24 sps:$4 sm:$0xff]  }
  0x7a   :  { %1209 = vmatprep.subr.bf16.mxu0 %v7752_v6  ;;  %v7916_v6 = vld [vmem:[%s12547_s2 + $0x190] ss:$24 sps:$4 sm:$0xff]  }
  0x7b   :  { %1099 = vmatpush1.bf16.msra.mxu1 %v7874_v0 }
  0x7c   :  { %1100 = vmatprep.subr.bf16.mxu1 %v7880_v63 }
  0x7d   :  { %1210 = vmatpush1.bf16.msra.mxu0 %v7760_v7  ;;  %v7936_v7 = vld [vmem:[%s12547_s2 + $0x1f4] ss:$24 sps:$4 sm:$0xff]  }
  0x7e   :  { %1211 = vmatprep.subr.bf16.mxu0 %v7766_v8  ;;  %v7930_v8 = vld [vmem:[%s12547_s2 + $0x1c0] ss:$24 sps:$4 sm:$0xff]   ;;  %12980 = vst [vmem:[#allocation35_spill] sm:$0xff] %v7936_v7 }
  0x7f   :  { %1101 = vmatpush1.bf16.msra.mxu1 %v7888_v2 }
  0x80   :  { %1102 = vmatprep.subr.bf16.mxu1 %v7894_v1 }
  0x81   :  { %1212 = vmatpush1.bf16.msra.mxu0 %v7774_v15  ;;  %v7950_v15 = vld [vmem:[%s12547_s2 + $0x224] ss:$24 sps:$4 sm:$0xff]  }
  0x82   :  { %1213 = vmatprep.subr.bf16.mxu0 %v7780_v20  ;;  %v7944_v20 = vld [vmem:[%s12547_s2 + $0x1f0] ss:$24 sps:$4 sm:$0xff]   ;;  %12982 = vst [vmem:[#allocation37_spill] sm:$0xff] %v7950_v15 }
  0x83   :  { %1103 = vmatpush1.bf16.msra.mxu1 %v7902_v4  ;;  %12981 = vst [vmem:[#allocation36_spill] sm:$0xff] %v7944_v20 }
  0x84   :  { %1104 = vmatprep.subr.bf16.mxu1 %v7908_v3 }
  0x85   :  { %1214 = vmatpush1.bf16.msra.mxu0 %v7788_v30  ;;  %v7962_v30 = vld [vmem:[%s12547_s2 + $0x254] ss:$24 sps:$4 sm:$0xff]  }
  0x86   :  { %1265 = vmatprep.subr.bf16.mxu0 %v7794_v41  ;;  %v7956_v41 = vld [vmem:[%s12547_s2 + $0x220] ss:$24 sps:$4 sm:$0xff]   ;;  %12984 = vst [vmem:[#allocation39_spill] sm:$0xff] %v7962_v30 }
  0x87   :  { %1105 = vmatpush1.bf16.msra.mxu1 %v7916_v6  ;;  %12983 = vst [vmem:[#allocation38_spill] sm:$0xff] %v7956_v41 }
  0x88   :  { %1106 = vmatprep.subr.bf16.mxu1 %v7922_v5 }
  0x8b   :  { %1107 = vmatpush1.bf16.msra.mxu1 %v7930_v8 }
  0x8c   :  { %1108 = vmatprep.subr.bf16.mxu1 %v7936_v7  ;;  %v7968_v7 = vld [vmem:[%s12547_s2 + $0x250] ss:$24 sps:$4 sm:$0xff]  }
  0x8d   :  { %12985 = vst [vmem:[#allocation40_spill] sm:$0xff] %v7968_v7 }
  0x8f   :  { %1109 = vmatpush1.bf16.msra.mxu1 %v7944_v20  ;;  %v7974_v20 = vld [vmem:[%s12547_s2 + $0x284] ss:$24 sps:$4 sm:$0xff]  }
  0x90   :  { %1110 = vmatprep.subr.bf16.mxu1 %v7950_v15  ;;  %12986 = vst [vmem:[#allocation41_spill] sm:$0xff] %v7974_v20  ;;  %v7980_v15 = vld [vmem:[%s12547_s2 + $0x280] ss:$24 sps:$4 sm:$0xff]  }
  0x93   :  { %1111 = vmatpush1.bf16.msra.mxu1 %v7956_v41  ;;  %v7986_v41 = vld [vmem:[%s12547_s2 + $0x2b4] ss:$24 sps:$4 sm:$0xff]  }
  0x94   :  { %1112 = vmatprep.subr.bf16.mxu1 %v7962_v30  ;;  %v7992_v30 = vld [vmem:[%s12547_s2 + $0x2b0] ss:$24 sps:$4 sm:$0xff]  }
  0x97   :  { %1113 = vmatpush1.bf16.msra.mxu1 %v7968_v7  ;;  %v7998_v7 = vld [vmem:[%s12547_s2 + $0x2e4] ss:$24 sps:$4 sm:$0xff]  }
  0x98   :  { %1114 = vmatprep.subr.bf16.mxu1 %v7974_v20  ;;  %v8004_v20 = vld [vmem:[%s12547_s2 + $0x2e0] ss:$24 sps:$4 sm:$0xff]  }
  0x9b   :  { %1115 = vmatpush1.bf16.msra.mxu1 %v7980_v15 }
  0x9c   :  { %1116 = vmatprep.subr.bf16.mxu1 %v7986_v41 }
  0x9f   :  { %1117 = vmatpush1.bf16.msra.mxu1 %v7992_v30 }
  0xa0   :  { %1118 = vmatprep.subr.bf16.mxu1 %v7998_v7 }
  0xa3   :  { %1119 = vmatpush1.bf16.msra.mxu1 %v8004_v20 }
  0xa4   :  { %1224 = vmatprep.subr.bf16.mxu1 %v7356_v9  ;;  %v55_v9 = vlaneseq }
  0xa6   :  { %1121 = vmatmul.mubr.bf16.vlgmr.msra.gmra.mrb[36].mxu1 %v12979_v40 }
  0xa7   :  { %1225 = vmatpush1.bf16.msra.mxu1 %v7361_v10  ;;  %v8032_v10 = vshrl.u32 %v55_v9, 7 }
  0xa8   :  { %1226 = vmatprep.subr.bf16.mxu1 %v7367_v11 }
  0xa9   :  { %12987 = vst [vmem:[#allocation42_spill] sm:$0xff] %v8032_v10  ;;  %v8037_v11 = vsub.s32 0, %v8032_v10 }
  0xab   :  { %1227 = vmatpush1.bf16.msra.mxu1 %v7381_v13  ;;  %12988 = vst [vmem:[#allocation43_spill] sm:$0xff] %v8037_v11  ;;  %v8042_v13 = vld [vmem:[%s12548_s3] sm:$0x3f] }
  0xac   :  { %1228 = vmatprep.subr.bf16.mxu1 %v7389_v14  ;;  %v8045_v14 = vsub.s32 1, %v8032_v10 }
  0xae   :  { %12989 = vst [vmem:[#allocation44_spill] sm:$0xff] %v8045_v14 }
  0xaf   :  { %1229 = vmatpush1.bf16.msra.mxu1 %v7402_v16  ;;  %v12599_v16 = vsub.s32 4, %v8032_v10 }
  0xb0   :  { %1230 = vmatprep.subr.bf16.mxu1 %v7408_v17 }
  0xb3   :  { %1231 = vmatpush1.bf16.msra.mxu1 %v7416_v18  ;;  %v12600_v18 = vsub.s32 5, %v8032_v10 }
  0xb4   :  { %1232 = vmatprep.subr.bf16.mxu1 %v7425_v19  ;;  %v8055_v19 = vrot.slane %v8042_v13, %v8037_v11 }
  0xb7   :  { %1233 = vmatpush1.bf16.msra.mxu1 %v7437_v21 }
  0xb8   :  { %1234 = vmatprep.subr.bf16.mxu1 %v7443_v22  ;;  %v8061_v22 = vrot.slane %v8042_v13, %v8045_v14 }
  0xbb   :  { %1235 = vmatpush1.bf16.msra.mxu1 %v7451_v23 }
  0xbc   :  { %1236 = vmatprep.subr.bf16.mxu1 %v7460_v24 }
  0xbf   :  { %1237 = vmatpush1.bf16.msra.mxu1 %v7467_v25 }
  0xc0   :  { %1238 = vmatprep.subr.bf16.mxu1 %v7473_v26  ;;  %v8070_v26 = vrot.slane %v8042_v13, %v12599_v16 }
  0xc3   :  { %1239 = vmatpush1.bf16.msra.mxu1 %v7491_v29 }
  0xc4   :  { %1240 = vmatprep.subr.bf16.mxu1 %v7500_v31  ;;  %v8079_v31 = vrot.slane %v8042_v13, %v12600_v18 }
  0xc7   :  { %1241 = vmatpush1.bf16.msra.mxu1 %v7519_v34 }
  0xc8   :  { %1242 = vmatprep.subr.bf16.mxu1 %v7525_v35 }
  0xcb   :  { %1243 = vmatpush1.bf16.msra.mxu1 %v7543_v38 }
  0xcc   :  { %1244 = vmatprep.subr.bf16.mxu1 %v7549_v39 }
  0xcf   :  { %1245 = vmatpush1.bf16.msra.mxu1 %v7570_v42 }
  0xd0   :  { %1246 = vmatprep.subr.bf16.mxu1 %v7576_v43 }
  0xd3   :  { %1247 = vmatpush1.bf16.msra.mxu1 %v7594_v46 }
  0xd4   :  { %1248 = vmatprep.subr.bf16.mxu1 %v7600_v47 }
  0xd7   :  { %1249 = vmatpush1.bf16.msra.mxu1 %v7621_v50 }
  0xd8   :  { %1250 = vmatprep.subr.bf16.mxu1 %v7627_v51 }
  0xd9   :  { %v8050_v17 = vpop.f32.mrb[0].mxu1 }
  0xda   :  { %v8057_v21 = vpop.f32.mrb[1].mxu1 }
  0xdb   :  { %v186_v23 = vpop.f32.mrb[2].mxu1  ;;  %1251 = vmatpush1.bf16.msra.mxu1 %v7645_v54  ;;  %v328_v34 = vpop.f32.mrb[0].mxu0 }
  0xdc   :  { %v8065_v24 = vadd.f32 %v186_v23, %v8055_v19  ;;  %v188_v25 = vpop.f32.mrb[3].mxu1  ;;  %1252 = vmatprep.subr.bf16.mxu1 %v7651_v55  ;;  %v8083_v35 = vadd.f32 %v328_v34, %v8070_v26  ;;  %v330_v38 = vpop.f32.mrb[1].mxu0 }
  0xdd   :  { %v8074_v29 = vadd.f32 %v188_v25, %v8061_v22  ;;  %v8087_v9 = vadd.f32 %v330_v38, %v8079_v31  ;;  %v332_v23 = vpop.f32.mrb[2].mxu0 }
  0xde   :  { %12990 = vst [vmem:[#allocation45_spill] sm:$0xff] %v8065_v24  ;;  %12992 = vst [vmem:[#allocation47_spill] sm:$0xff] %v8083_v35  ;;  %v8093_v18 = vadd.f32 %v332_v23, %v8070_v26  ;;  %v334_v14 = vpop.f32.mrb[3].mxu0 }
  0xdf   :  { %12991 = vst [vmem:[#allocation46_spill] sm:$0xff] %v8074_v29  ;;  %1253 = vmatpush1.bf16.msra.mxu1 %v7672_v58  ;;  %12993 = vst [vmem:[#allocation48_spill] sm:$0xff] %v8087_v9  ;;  %v8099_v40 = vadd.f32 %v334_v14, %v8079_v31 }
  0xe0   :  { %1254 = vmatprep.subr.bf16.mxu1 %v7678_v59  ;;  %12995 = vst [vmem:[#allocation50_spill] sm:$0xff] %v8093_v18 }
  0xe1   :  { %v192_v39 = vpop.f32.mrb[4].mxu1  ;;  %12997 = vst [vmem:[#allocation52_spill] sm:$0xff] %v8099_v40 }
  0xe2   :  { %v8090_v25 = vadd.f32 %v192_v39, %v8055_v19  ;;  %v194_v16 = vpop.f32.mrb[5].mxu1 }
  0xe3   :  { %v8096_v11 = vadd.f32 %v194_v16, %v8061_v22  ;;  %v196_v34 = vpop.f32.mrb[6].mxu1  ;;  %1255 = vmatpush1.bf16.msra.mxu1 %v7696_v62  ;;  %v338_v23 = vpop.f32.mrb[4].mxu0 }
  0xe4   :  { %12994 = vst [vmem:[#allocation49_spill] sm:$0xff] %v8090_v25  ;;  %v8103_v38 = vadd.f32 %v196_v34, %v8055_v19  ;;  %v198_v9 = vpop.f32.mrb[7].mxu1  ;;  %1360 = vmatprep.subr.bf16.mxu1 %v7372_v12  ;;  %v8110_v35 = vadd.f32 %v338_v23, %v8070_v26  ;;  %v340_v16 = vpop.f32.mrb[5].mxu0 }
  0xe5   :  { %12996 = vst [vmem:[#allocation51_spill] sm:$0xff] %v8096_v11  ;;  %v8107_v39 = vadd.f32 %v198_v9, %v8061_v22  ;;  %v8113_v14 = vadd.f32 %v340_v16, %v8079_v31  ;;  %v342_v40 = vpop.f32.mrb[6].mxu0 }
  0xe6   :  { %12998 = vst [vmem:[#allocation53_spill] sm:$0xff] %v8103_v38  ;;  %13000 = vst [vmem:[#allocation55_spill] sm:$0xff] %v8110_v35  ;;  %v8119_v38 = vadd.f32 %v342_v40, %v8070_v26  ;;  %v344_v12 = vpop.f32.mrb[7].mxu0 }
  0xe7   :  { %12999 = vst [vmem:[#allocation54_spill] sm:$0xff] %v8107_v39  ;;  %13001 = vst [vmem:[#allocation56_spill] sm:$0xff] %v8113_v14  ;;  %v8125_v23 = vadd.f32 %v344_v12, %v8079_v31 }
  0xe8   :  { %13003 = vst [vmem:[#allocation58_spill] sm:$0xff] %v8119_v38 }
  0xe9   :  { %v202_v18 = vpop.f32.mrb[8].mxu1  ;;  %13005 = vst [vmem:[#allocation60_spill] sm:$0xff] %v8125_v23 }
  0xea   :  { %v8116_v11 = vadd.f32 %v202_v18, %v8055_v19  ;;  %v204_v34 = vpop.f32.mrb[9].mxu1 }
  0xeb   :  { %v8122_v9 = vadd.f32 %v204_v34, %v8061_v22  ;;  %v206_v39 = vpop.f32.mrb[10].mxu1  ;;  %v348_v18 = vpop.f32.mrb[8].mxu0 }
  0xec   :  { %13002 = vst [vmem:[#allocation57_spill] sm:$0xff] %v8116_v11  ;;  %v8128_v35 = vadd.f32 %v206_v39, %v8055_v19  ;;  %v208_v16 = vpop.f32.mrb[11].mxu1  ;;  %v8134_v11 = vadd.f32 %v348_v18, %v8070_v26  ;;  %v350_v40 = vpop.f32.mrb[9].mxu0  ;;  %v12606_v18 = vsub.s32 3, %v8032_v10 }
  0xed   :  { %13004 = vst [vmem:[#allocation59_spill] sm:$0xff] %v8122_v9  ;;  %v8131_v14 = vadd.f32 %v208_v16, %v8061_v22  ;;  %v8137_v34 = vadd.f32 %v350_v40, %v8079_v31  ;;  %v352_v9 = vpop.f32.mrb[10].mxu0 }
  0xee   :  { %13006 = vst [vmem:[#allocation61_spill] sm:$0xff] %v8128_v35  ;;  %13008 = vst [vmem:[#allocation63_spill] sm:$0xff] %v8134_v11  ;;  %v8143_v39 = vadd.f32 %v352_v9, %v8070_v26  ;;  %v354_v35 = vpop.f32.mrb[11].mxu0  ;;  %v12611_v9 = vsub.s32 2, %v8032_v10 }
  0xef   :  { %13007 = vst [vmem:[#allocation62_spill] sm:$0xff] %v8131_v14  ;;  %13009 = vst [vmem:[#allocation64_spill] sm:$0xff] %v8137_v34  ;;  %v8150_v11 = vadd.f32 %v354_v35, %v8079_v31 }
  0xf0   :  { %13011 = vst [vmem:[#allocation66_spill] sm:$0xff] %v8143_v39 }
  0xf1   :  { %v212_v38 = vpop.f32.mrb[12].mxu1  ;;  %13013 = vst [vmem:[#allocation68_spill] sm:$0xff] %v8150_v11 }
  0xf2   :  { %v8140_v12 = vadd.f32 %v212_v38, %v8055_v19  ;;  %v214_v23 = vpop.f32.mrb[13].mxu1 }
  0xf3   :  { %v8146_v16 = vadd.f32 %v214_v23, %v8061_v22  ;;  %v216_v14 = vpop.f32.mrb[14].mxu1  ;;  %v70_v23 = vrot.slane %v8042_v13, %v12606_v18 }
  0xf4   :  { %13010 = vst [vmem:[#allocation65_spill] sm:$0xff] %v8140_v12  ;;  %v8153_v40 = vadd.f32 %v216_v14, %v8055_v19  ;;  %v218_v34 = vpop.f32.mrb[15].mxu1 }
  0xf5   :  { %13012 = vst [vmem:[#allocation67_spill] sm:$0xff] %v8146_v16  ;;  %v8156_v38 = vadd.f32 %v218_v34, %v8061_v22  ;;  %v358_v16 = vpop.f32.mrb[12].mxu0  ;;  %v66_v34 = vrot.slane %v8042_v13, %v12611_v9 }
  0xf6   :  { %13014 = vst [vmem:[#allocation69_spill] sm:$0xff] %v8153_v40  ;;  %v8163_v12 = vadd.f32 %v358_v16, %v8070_v26  ;;  %v360_v39 = vpop.f32.mrb[13].mxu0 }
  0xf7   :  { %13015 = vst [vmem:[#allocation70_spill] sm:$0xff] %v8156_v38  ;;  %v8166_v11 = vadd.f32 %v360_v39, %v8079_v31  ;;  %v8168_v14 = vpop.f32.mrb[14].mxu0 }
  0xf8   :  { %13016 = vst [vmem:[#allocation71_spill] sm:$0xff] %v8163_v12  ;;  %v8173_v40 = vpop.f32.mrb[15].mxu0 }
  0xf9   :  { %v255_v35 = vpop.f32.mrb[16].mxu1  ;;  %13017 = vst [vmem:[#allocation72_spill] sm:$0xff] %v8166_v11 }
  0xfa   :  { %v257_v38 = vpop.f32.mrb[17].mxu1 }
  0xfb   :  { %v8175_v25 = vadd.f32 %v257_v38, %v70_v23  ;;  %v259_v18 = vpop.f32.mrb[18].mxu1 }
  0xfc   :  { %v8177_v29 = vadd.f32 %v259_v18, %v66_v34  ;;  %v261_v16 = vpop.f32.mrb[19].mxu1 }
  0xfd   :  { %13018 = vst [vmem:[#allocation73_spill] sm:$0xff] %v8175_v25  ;;  %v8179_v12 = vadd.f32 %v261_v16, %v70_v23 }
  0xfe   :  { %13019 = vst [vmem:[#allocation74_spill] sm:$0xff] %v8177_v29 }
  0xff   :  { %13020 = vst [vmem:[#allocation75_spill] sm:$0xff] %v8179_v12 }
 0x101   :  { %v265_v24 = vpop.f32.mrb[20].mxu1 }
 0x102   :  { %v8181_v39 = vadd.f32 %v265_v24, %v66_v34  ;;  %v267_v11 = vpop.f32.mrb[21].mxu1 }
 0x103   :  { %v8183_v62 = vadd.f32 %v267_v11, %v70_v23  ;;  %v269_v10 = vpop.f32.mrb[22].mxu1 }
 0x104   :  { %13021 = vst [vmem:[#allocation76_spill] sm:$0xff] %v8181_v39  ;;  %v8185_v59 = vadd.f32 %v269_v10, %v66_v34  ;;  %v271_v13 = vpop.f32.mrb[23].mxu1 }
 0x105   :  { %13022 = vst [vmem:[#allocation77_spill] sm:$0xff] %v8183_v62  ;;  %v8187_v9 = vadd.f32 %v271_v13, %v70_v23 }
 0x106   :  { %13023 = vst [vmem:[#allocation78_spill] sm:$0xff] %v8185_v59 }
 0x107   :  { %13024 = vst [vmem:[#allocation79_spill] sm:$0xff] %v8187_v9 }
 0x109   :  { %v275_v38 = vpop.f32.mrb[24].mxu1 }
 0x10a   :  { %v8189_v25 = vadd.f32 %v275_v38, %v66_v34  ;;  %v277_v18 = vpop.f32.mrb[25].mxu1 }
 0x10b   :  { %v8191_v29 = vadd.f32 %v277_v18, %v70_v23  ;;  %v279_v16 = vpop.f32.mrb[26].mxu1 }
 0x10c   :  { %13025 = vst [vmem:[#allocation80_spill] sm:$0xff] %v8189_v25  ;;  %v8193_v12 = vadd.f32 %v279_v16, %v66_v34  ;;  %v281_v24 = vpop.f32.mrb[27].mxu1 }
 0x10d   :  { %13026 = vst [vmem:[#allocation81_spill] sm:$0xff] %v8191_v29  ;;  %v8195_v39 = vadd.f32 %v281_v24, %v70_v23  ;;  %v183_v24 = vadd.f32 %v8050_v17, %v8055_v19  ;;  %v8210_v17 = vld [vmem:[%s12549_s4] ss:$0 sm:$0xff] }
 0x10e   :  { %13027 = vst [vmem:[#allocation82_spill] sm:$0xff] %v8193_v12 }
 0x10f   :  { %13028 = vst [vmem:[#allocation83_spill] sm:$0xff] %v8195_v39 }
 0x111   :  { %v285_v11 = vpop.f32.mrb[28].mxu1 }
 0x112   :  { %v8197_v62 = vadd.f32 %v285_v11, %v66_v34  ;;  %v287_v10 = vpop.f32.mrb[29].mxu1  ;;  %v185_v11 = vadd.f32 %v8057_v21, %v8061_v22  ;;  %v256_v22 = vadd.f32 %v255_v35, %v66_v34  ;;  %v8220_v35 = vld [vmem:[%s12549_s4 + $0x1] ss:$0 sm:$0xff] }
 0x113   :  { %v8199_v59 = vadd.f32 %v287_v10, %v70_v23  ;;  %v289_v13 = vpop.f32.mrb[30].mxu1 }
 0x114   :  { %13029 = vst [vmem:[#allocation84_spill] sm:$0xff] %v8197_v62  ;;  %v8201_v9 = vadd.f32 %v289_v13, %v66_v34  ;;  %v291_v38 = vpop.f32.mrb[31].mxu1 }
 0x115   :  { %13030 = vst [vmem:[#allocation85_spill] sm:$0xff] %v8199_v59  ;;  %v292_v25 = vadd.f32 %v291_v38, %v70_v23 }
 0x116   :  { %13031 = vst [vmem:[#allocation86_spill] sm:$0xff] %v8201_v9 }
 0x11b   :  { %v1081_v58 = vpop.f32.mrb[16].mxu0 }
 0x11c   :  { %v1083_v18 = vpop.f32.mrb[17].mxu0  ;;  %v1149_v19 = vadd.f32 %v8210_v17, %v1081_v58  ;;  %v363_v58 = vadd.f32 %v8168_v14, %v8070_v26 }
 0x11d   :  { %v1157_v29 = vadd.f32 %v1083_v18, %v292_v25  ;;  %v1085_v55 = vpop.f32.mrb[18].mxu0 }
 0x11e   :  { %v1086_v16 = vpop.f32.mrb[19].mxu0 }
 0x139   :  { %v1040_v62 = vpop.f32.mrb[32].mxu1 }
 0x13a   :  { %v1135_v12 = vadd.f32 %v1040_v62, %v183_v24  ;;  %v1042_v10 = vpop.f32.mrb[33].mxu1 }
 0x13b   :  { %v1142_v39 = vadd.f32 %v1042_v10, %v185_v11  ;;  %v1044_v59 = vpop.f32.mrb[34].mxu1 }
 0x13c   :  { %v5764_v13 = vmul.f32 -1.442695, %v1135_v12  ;;  %v1045_v9 = vpop.f32.mrb[35].mxu1 }
 0x13d   :  { %v5765_v23 = vmul.f32 -1.442695, %v1142_v39  ;;  %v5766_v9 = vmul.f32 -1.442695, %v1157_v29 }
 0x13e   :  { %6549 = vpow2.f32 %v5764_v13 }
 0x13f   :  { %6551 = vpow2.f32 %v5765_v23 }
 0x148   :  { %v6550_v38 = vpop.eup %6549 }
 0x149   :  { %v1139_v25 = vadd.f32 1.0, %v6550_v38  ;;  %v6552_v55 = vpop.eup %6551 }
 0x14a   :  { %v1146_v62 = vadd.f32 1.0, %v6552_v55 }
 0x14b   :  { %6553 = vrcp.f32 %v1139_v25 }
 0x14c   :  { %6555 = vrcp.f32 %v1146_v62 }
 0x155   :  { %v6554_v21 = vpop.eup %6553 }
 0x156   :  { %v1150_v59 = vmul.f32 %v6554_v21, %v1149_v19  ;;  %v6556_v39 = vpop.eup %6555 }
 0x157   :  { %v1153_v18 = vsub.f32 1.0, %v6556_v39  ;;  %v1155_v11 = vmul.f32 0.0, %v6556_v39 }
 0x158   :  { %v1151_v12 = vadd.f32 %v1150_v59, %v256_v22  ;;  %v365_v22 = vadd.f32 %v8173_v40, %v8079_v31  ;;  %v13040_v40 = vld [vmem:[#allocation11_spill] sm:$0xff] }
 0x15a   :  { %6557 = vtanh.f32 %v1151_v12 }
 0x15b   :  { %6559 = vpow2.f32 %v5766_v9 }
 0x164   :  { %v6558_v16 = vpop.eup %6557 }
 0x165   :  { %v1154_v24 = vmul.f32 %v6558_v16, %v1153_v18  ;;  %v6560_v13 = vpop.eup %6559 }
 0x166   :  { %v1161_v23 = vadd.f32 1.0, %v6560_v13 }
 0x167   :  { %v8213_v10 = vadd.f32 %v1155_v11, %v1154_v24 }
 0x168   :  { %6561 = vrcp.f32 %v1161_v23  ;;  %v13041_v23 = vld [vmem:[#allocation12_spill] sm:$0xff] }
 0x169   :  { %13032 = vst [vmem:[#allocation87_spill] sm:$0xff] %v8213_v10  ;;  %v8231_v31 = vpack.c.bf16 %v8213_v10, %v8213_v10 }
 0x172   :  { %v6562_v19 = vpop.eup %6561 }
 0x179   :  { %v1122_v29 = vpop.f32.mrb[36].mxu1 }
 0x17a   :  { %v1164_v34 = vadd.f32 %v1122_v29, %v363_v58  ;;  %v1124_v38 = vpop.f32.mrb[37].mxu1  ;;  %v13042_v58 = vld [vmem:[#allocation14_spill] sm:$0xff]  ;;  %v13043_v29 = vld [vmem:[#allocation15_spill] sm:$0xff] }
 0x17b   :  { %v1171_v25 = vadd.f32 %v8220_v35, %v1124_v38  ;;  %v1126_v55 = vpop.f32.mrb[38].mxu1  ;;  %v13045_v38 = vld [vmem:[#allocation19_spill] sm:$0xff] }
 0x17c   :  { %v5767_v62 = vmul.f32 -1.442695, %v1164_v34  ;;  %v1127_v21 = vpop.f32.mrb[39].mxu1  ;;  %v13044_v34 = vld [vmem:[#allocation18_spill] sm:$0xff]  ;;  %v13047_v55 = vld [vmem:[#allocation21_spill] sm:$0xff] }
 0x17d   :  { %v1172_v59 = vmul.f32 %v6562_v19, %v1171_v25  ;;  %v13046_v25 = vld [vmem:[#allocation35_spill] sm:$0xff]  ;;  %v13048_v19 = vld [vmem:[#allocation22_spill] sm:$0xff]  ;;  %v13050_v21 = vld [vmem:[#allocation37_spill] sm:$0xff] }
 0x17e   :  { %6563 = vpow2.f32 %v5767_v62  ;;  %v13049_v62 = vld [vmem:[#allocation36_spill] sm:$0xff] }
 0x17f   :  { %v1173_v26 = vadd.f32 %v1172_v59, %v365_v22  ;;  %v13051_v22 = vld [vmem:[#allocation23_spill] sm:$0xff]  ;;  %v13052_v59 = vld [vmem:[#allocation24_spill] sm:$0xff] }
 0x188   :  { %v6564_v14 = vpop.eup %6563 }
 0x189   :  { %v1168_v12 = vadd.f32 1.0, %v6564_v14  ;;  %v13054_v14 = vld [vmem:[#allocation39_spill] sm:$0xff] }
 0x18b   :  { %6565 = vrcp.f32 %v1168_v12  ;;  %v13055_v12 = vld [vmem:[#allocation25_spill] sm:$0xff] }
 0x18c   :  { %6567 = vtanh.f32 %v1173_v26  ;;  %v13053_v26 = vld [vmem:[#allocation38_spill] sm:$0xff] }
 0x195   :  { %v6566_v9 = vpop.eup %6565 }
 0x196   :  { %v1175_v39 = vsub.f32 1.0, %v6566_v9  ;;  %v6568_v18 = vpop.eup %6567  ;;  %v1177_v24 = vmul.f32 0.0, %v6566_v9  ;;  %v13056_v9 = vld [vmem:[#allocation26_spill] sm:$0xff] }
 0x198   :  { %v1176_v16 = vmul.f32 %v6568_v18, %v1175_v39  ;;  %v13057_v39 = vld [vmem:[#allocation40_spill] sm:$0xff]  ;;  %v13058_v18 = vld [vmem:[#allocation41_spill] sm:$0xff] }
 0x19a   :  { %v8225_v11 = vadd.f32 %v1177_v24, %v1176_v16  ;;  %v13059_v16 = vld [vmem:[#allocation27_spill] sm:$0xff]  ;;  %v13060_v24 = vld [vmem:[#allocation28_spill] sm:$0xff] }
 0x19c   :  { %13033 = vst [vmem:[#allocation88_spill] sm:$0xff] %v8225_v11  ;;  %v1182_v13 = vpack.c.bf16 %v8225_v11, %v8225_v11 }
 0x19e   :  { %1215 = vmatprep.mubr.bf16.mxu0 %v1182_v13  ;;  %1256 = vmatprep.mubr.bf16.mxu1 %v1182_v13 }
 0x19f   :  { %1216 = vmatmul.mubr.bf16.vlgmr.msra.gmra.mrb[20].mxu0 %v8231_v31  ;;  %1257 = vmatmul.mubr.bf16.vlgmr.msra.gmra.mrb[40].mxu1 %v8231_v31 }
 0x1a0   :  { %1266 = vmatpush1.bf16.msra.mxu0 %v7802_v45  ;;  %1297 = vmatprep.mubr.bf16.mxu0 %v1182_v13  ;;  %v13061_v13 = vld [vmem:[#allocation29_spill] sm:$0xff] }
 0x1a1   :  { %1267 = vmatprep.subr.bf16.mxu0 %v7808_v44  ;;  %1361 = vmatpush1.bf16.msra.mxu1 %v7478_v27  ;;  %v13034_v27 = vld [vmem:[#allocation5_spill] sm:$0xff] }
 0x1a2   :  { %1362 = vmatprep.subr.bf16.mxu1 %v7483_v28  ;;  %v13035_v28 = vld [vmem:[#allocation6_spill] sm:$0xff] }
 0x1a4   :  { %1268 = vmatpush1.bf16.msra.mxu0 %v7817_v49 }
 0x1a5   :  { %1269 = vmatprep.subr.bf16.mxu0 %v7824_v48  ;;  %1363 = vmatpush1.bf16.msra.mxu1 %v7506_v32  ;;  %v13036_v32 = vld [vmem:[#allocation7_spill] sm:$0xff] }
 0x1a6   :  { %1364 = vmatprep.subr.bf16.mxu1 %v7513_v33  ;;  %v13037_v33 = vld [vmem:[#allocation8_spill] sm:$0xff] }
 0x1a8   :  { %1270 = vmatpush1.bf16.msra.mxu0 %v7832_v53 }
 0x1a9   :  { %1271 = vmatprep.subr.bf16.mxu0 %v7838_v52  ;;  %1365 = vmatpush1.bf16.msra.mxu1 %v7531_v36  ;;  %v13038_v36 = vld [vmem:[#allocation9_spill] sm:$0xff] }
 0x1aa   :  { %1366 = vmatprep.subr.bf16.mxu1 %v7537_v37  ;;  %v13039_v37 = vld [vmem:[#allocation10_spill] sm:$0xff] }
 0x1ac   :  { %1272 = vmatpush1.bf16.msra.mxu0 %v7846_v57 }
 0x1ad   :  { %1273 = vmatprep.subr.bf16.mxu0 %v7852_v56  ;;  %1367 = vmatpush1.bf16.msra.mxu1 %v13034_v27  ;;  %v13062_v27 = vld [vmem:[#allocation30_spill] sm:$0xff] }
 0x1ae   :  { %1368 = vmatprep.subr.bf16.mxu1 %v13035_v28  ;;  %v13063_v28 = vld [vmem:[#allocation31_spill] sm:$0xff] }
 0x1b0   :  { %1274 = vmatpush1.bf16.msra.mxu0 %v7860_v61 }
 0x1b1   :  { %1275 = vmatprep.subr.bf16.mxu0 %v7866_v60  ;;  %1369 = vmatpush1.bf16.msra.mxu1 %v13036_v32  ;;  %v13064_v32 = vld [vmem:[#allocation32_spill] sm:$0xff] }
 0x1b2   :  { %1370 = vmatprep.subr.bf16.mxu1 %v13037_v33  ;;  %v8299_v33 = vld [vmem:[%s12547_s2 + $0xc] ss:$24 sps:$4 sm:$0xff]  }
 0x1b3   :  { %13065 = vst [vmem:[#allocation5_spill] sm:$0xff] %v8299_v33 }
 0x1b4   :  { %1276 = vmatpush1.bf16.msra.mxu0 %v7874_v0 }
 0x1b5   :  { %1277 = vmatprep.subr.bf16.mxu0 %v7880_v63  ;;  %1371 = vmatpush1.bf16.msra.mxu1 %v13038_v36  ;;  %v13066_v36 = vld [vmem:[#allocation33_spill] sm:$0xff] }
 0x1b6   :  { %1372 = vmatprep.subr.bf16.mxu1 %v13039_v37  ;;  %v13067_v37 = vld [vmem:[#allocation34_spill] sm:$0xff] }
 0x1b8   :  { %1278 = vmatpush1.bf16.msra.mxu0 %v7888_v2 }
 0x1b9   :  { %1279 = vmatprep.subr.bf16.mxu0 %v7894_v1  ;;  %1373 = vmatpush1.bf16.msra.mxu1 %v13040_v40  ;;  %v8308_v40 = vld [vmem:[%s12547_s2 + $0x8] ss:$24 sps:$4 sm:$0xff]  }
 0x1ba   :  { %1374 = vmatprep.subr.bf16.mxu1 %v13041_v23  ;;  %13068 = vst [vmem:[#allocation6_spill] sm:$0xff] %v8308_v40  ;;  %v8314_v23 = vld [vmem:[%s12547_s2 + $0x3c] ss:$24 sps:$4 sm:$0xff]  }
 0x1bb   :  { %13069 = vst [vmem:[#allocation7_spill] sm:$0xff] %v8314_v23 }
 0x1bc   :  { %1280 = vmatpush1.bf16.msra.mxu0 %v7902_v4 }
 0x1bd   :  { %1281 = vmatprep.subr.bf16.mxu0 %v7908_v3  ;;  %1375 = vmatpush1.bf16.msra.mxu1 %v13042_v58  ;;  %v8320_v58 = vld [vmem:[%s12547_s2 + $0x38] ss:$24 sps:$4 sm:$0xff]  }
 0x1be   :  { %1376 = vmatprep.subr.bf16.mxu1 %v13043_v29  ;;  %13070 = vst [vmem:[#allocation8_spill] sm:$0xff] %v8320_v58  ;;  %v8332_v29 = vld [vmem:[%s12547_s2 + $0x68] ss:$24 sps:$4 sm:$0xff]  }
 0x1bf   :  { %13072 = vst [vmem:[#allocation10_spill] sm:$0xff] %v8332_v29 }
 0x1c0   :  { %1282 = vmatpush1.bf16.msra.mxu0 %v7916_v6 }
 0x1c1   :  { %1283 = vmatprep.subr.bf16.mxu0 %v7922_v5  ;;  %1377 = vmatpush1.bf16.msra.mxu1 %v13044_v34  ;;  %v8338_v34 = vld [vmem:[%s12547_s2 + $0x9c] ss:$24 sps:$4 sm:$0xff]  }
 0x1c2   :  { %1378 = vmatprep.subr.bf16.mxu1 %v13045_v38  ;;  %13073 = vst [vmem:[#allocation11_spill] sm:$0xff] %v8338_v34  ;;  %v8344_v38 = vld [vmem:[%s12547_s2 + $0x98] ss:$24 sps:$4 sm:$0xff]  }
 0x1c3   :  { %13074 = vst [vmem:[#allocation12_spill] sm:$0xff] %v8344_v38 }
 0x1c4   :  { %1284 = vmatpush1.bf16.msra.mxu0 %v7930_v8 }
 0x1c5   :  { %1285 = vmatprep.subr.bf16.mxu0 %v13046_v25  ;;  %1379 = vmatpush1.bf16.msra.mxu1 %v13047_v55  ;;  %v8350_v55 = vld [vmem:[%s12547_s2 + $0xcc] ss:$24 sps:$4 sm:$0xff]  }
 0x1c6   :  { %1380 = vmatprep.subr.bf16.mxu1 %v13048_v19  ;;  %13075 = vst [vmem:[#allocation14_spill] sm:$0xff] %v8350_v55  ;;  %v8356_v19 = vld [vmem:[%s12547_s2 + $0xc8] ss:$24 sps:$4 sm:$0xff]  }
 0x1c7   :  { %13076 = vst [vmem:[#allocation15_spill] sm:$0xff] %v8356_v19 }
 0x1c8   :  { %1286 = vmatpush1.bf16.msra.mxu0 %v13049_v62 }
 0x1c9   :  { %1287 = vmatprep.subr.bf16.mxu0 %v13050_v21  ;;  %1381 = vmatpush1.bf16.msra.mxu1 %v13051_v22  ;;  %v8362_v22 = vld [vmem:[%s12547_s2 + $0xfc] ss:$24 sps:$4 sm:$0xff]  }
 0x1ca   :  { %1382 = vmatprep.subr.bf16.mxu1 %v13052_v59  ;;  %13077 = vst [vmem:[#allocation18_spill] sm:$0xff] %v8362_v22  ;;  %v8368_v59 = vld [vmem:[%s12547_s2 + $0xf8] ss:$24 sps:$4 sm:$0xff]  }
 0x1cb   :  { %13078 = vst [vmem:[#allocation19_spill] sm:$0xff] %v8368_v59 }
 0x1cc   :  { %1288 = vmatpush1.bf16.msra.mxu0 %v13053_v26 }
 0x1cd   :  { %1289 = vmatprep.subr.bf16.mxu0 %v13054_v14  ;;  %1383 = vmatpush1.bf16.msra.mxu1 %v13055_v12  ;;  %v8374_v12 = vld [vmem:[%s12547_s2 + $0x12c] ss:$24 sps:$4 sm:$0xff]  }
 0x1ce   :  { %1384 = vmatprep.subr.bf16.mxu1 %v13056_v9  ;;  %13079 = vst [vmem:[#allocation35_spill] sm:$0xff] %v8374_v12  ;;  %v8380_v9 = vld [vmem:[%s12547_s2 + $0x128] ss:$24 sps:$4 sm:$0xff]  }
 0x1cf   :  { %13080 = vst [vmem:[#allocation21_spill] sm:$0xff] %v8380_v9 }
 0x1d0   :  { %1290 = vmatpush1.bf16.msra.mxu0 %v13057_v39 }
 0x1d1   :  { %1291 = vmatprep.subr.bf16.mxu0 %v13058_v18  ;;  %1385 = vmatpush1.bf16.msra.mxu1 %v13059_v16  ;;  %v8386_v16 = vld [vmem:[%s12547_s2 + $0x15c] ss:$24 sps:$4 sm:$0xff]  }
 0x1d2   :  { %1386 = vmatprep.subr.bf16.mxu1 %v13060_v24  ;;  %13081 = vst [vmem:[#allocation22_spill] sm:$0xff] %v8386_v16  ;;  %v8392_v24 = vld [vmem:[%s12547_s2 + $0x158] ss:$24 sps:$4 sm:$0xff]  }
 0x1d3   :  { %13082 = vst [vmem:[#allocation36_spill] sm:$0xff] %v8392_v24 }
 0x1d4   :  { %1292 = vmatpush1.bf16.msra.mxu0 %v7980_v15 }
 0x1d5   :  { %1293 = vmatprep.subr.bf16.mxu0 %v7986_v41  ;;  %1387 = vmatpush1.bf16.msra.mxu1 %v13061_v13  ;;  %v8398_v13 = vld [vmem:[%s12547_s2 + $0x18c] ss:$24 sps:$4 sm:$0xff]  }
 0x1d6   :  { %1388 = vmatprep.subr.bf16.mxu1 %v13062_v27  ;;  %13083 = vst [vmem:[#allocation37_spill] sm:$0xff] %v8398_v13  ;;  %v8404_v27 = vld [vmem:[%s12547_s2 + $0x188] ss:$24 sps:$4 sm:$0xff]  }
 0x1d7   :  { %13084 = vst [vmem:[#allocation23_spill] sm:$0xff] %v8404_v27 }
 0x1d8   :  { %1294 = vmatpush1.bf16.msra.mxu0 %v7992_v30 }
 0x1d9   :  { %1295 = vmatprep.subr.bf16.mxu0 %v7998_v7  ;;  %1389 = vmatpush1.bf16.msra.mxu1 %v13063_v28  ;;  %v8410_v28 = vld [vmem:[%s12547_s2 + $0x1bc] ss:$24 sps:$4 sm:$0xff]  }
 0x1da   :  { %1390 = vmatprep.subr.bf16.mxu1 %v13064_v32  ;;  %13085 = vst [vmem:[#allocation24_spill] sm:$0xff] %v8410_v28  ;;  %v8416_v32 = vld [vmem:[%s12547_s2 + $0x1b8] ss:$24 sps:$4 sm:$0xff]  }
 0x1db   :  { %13086 = vst [vmem:[#allocation38_spill] sm:$0xff] %v8416_v32 }
 0x1dc   :  { %1296 = vmatpush1.bf16.msra.mxu0 %v8004_v20 }
 0x1dd   :  { %1401 = vmatprep.subr.bf16.mxu0 %v8299_v33  ;;  %1391 = vmatpush1.bf16.msra.mxu1 %v13066_v36  ;;  %v8422_v36 = vld [vmem:[%s12547_s2 + $0x1ec] ss:$24 sps:$4 sm:$0xff]  }
 0x1de   :  { %1442 = vmatprep.subr.bf16.mxu1 %v13067_v37  ;;  %13087 = vst [vmem:[#allocation39_spill] sm:$0xff] %v8422_v36  ;;  %v13088_v37 = vld [vmem:[#allocation13_spill] sm:$0xff] }
 0x1df   :  { %1298 = vmatmul.mubr.bf16.vlgmr.msra.gmra.mrb[24].mxu0 %v8231_v31  ;;  %v8326_v31 = vld [vmem:[%s12547_s2 + $0x6c] ss:$24 sps:$4 sm:$0xff]  }
 0x1e0   :  { %1402 = vmatpush1.bf16.msra.mxu0 %v8308_v40  ;;  %13071 = vst [vmem:[#allocation9_spill] sm:$0xff] %v8326_v31 }
 0x1e1   :  { %1403 = vmatprep.subr.bf16.mxu0 %v8314_v23 }
 0x1e4   :  { %1404 = vmatpush1.bf16.msra.mxu0 %v8320_v58 }
 0x1e5   :  { %1405 = vmatprep.subr.bf16.mxu0 %v8326_v31 }
 0x1e8   :  { %1406 = vmatpush1.bf16.msra.mxu0 %v8332_v29 }
 0x1e9   :  { %1407 = vmatprep.subr.bf16.mxu0 %v8338_v34 }
 0x1ec   :  { %1408 = vmatpush1.bf16.msra.mxu0 %v8344_v38 }
 0x1ed   :  { %1409 = vmatprep.subr.bf16.mxu0 %v8350_v55 }
 0x1f0   :  { %1410 = vmatpush1.bf16.msra.mxu0 %v8356_v19 }
 0x1f1   :  { %1411 = vmatprep.subr.bf16.mxu0 %v8362_v22 }
 0x1f4   :  { %1412 = vmatpush1.bf16.msra.mxu0 %v8368_v59 }
 0x1f5   :  { %1413 = vmatprep.subr.bf16.mxu0 %v8374_v12 }
 0x1f8   :  { %1414 = vmatpush1.bf16.msra.mxu0 %v8380_v9 }
 0x1f9   :  { %1415 = vmatprep.subr.bf16.mxu0 %v8386_v16 }
 0x1fc   :  { %1416 = vmatpush1.bf16.msra.mxu0 %v8392_v24 }
 0x1fd   :  { %1417 = vmatprep.subr.bf16.mxu0 %v8398_v13 }
 0x200   :  { %1418 = vmatpush1.bf16.msra.mxu0 %v8404_v27 }
 0x201   :  { %1419 = vmatprep.subr.bf16.mxu0 %v8410_v28  ;;  %v13090_v28 = vld [vmem:[#allocation17_spill] sm:$0xff] }
 0x204   :  { %1420 = vmatpush1.bf16.msra.mxu0 %v8416_v32  ;;  %v13089_v32 = vld [vmem:[#allocation16_spill] sm:$0xff] }
 0x205   :  { %1421 = vmatprep.subr.bf16.mxu0 %v8422_v36  ;;  %v13091_v36 = vld [vmem:[#allocation20_spill] sm:$0xff] }
 0x208   :  { %1422 = vmatpush1.bf16.msra.mxu0 %v7570_v42  ;;  %v8439_v42 = vld [vmem:[%s12547_s2 + $0x4] ss:$24 sps:$4 sm:$0xff]  }
 0x209   :  { %1423 = vmatprep.subr.bf16.mxu0 %v7576_v43  ;;  %13092 = vst [vmem:[#allocation25_spill] sm:$0xff] %v8439_v42 }
 0x20c   :  { %1424 = vmatpush1.bf16.msra.mxu0 %v7594_v46 }
 0x20d   :  { %1425 = vmatprep.subr.bf16.mxu0 %v7600_v47  ;;  %v13093_v47 = vld [vmem:[#allocation45_spill] sm:$0xff] }
 0x210   :  { %1426 = vmatpush1.bf16.msra.mxu0 %v7621_v50 }
 0x211   :  { %1427 = vmatprep.subr.bf16.mxu0 %v7627_v51 }
 0x214   :  { %1428 = vmatpush1.bf16.msra.mxu0 %v7645_v54 }
 0x215   :  { %1429 = vmatprep.subr.bf16.mxu0 %v13088_v37  ;;  %v13094_v37 = vld [vmem:[#allocation46_spill] sm:$0xff] }
 0x218   :  { %1430 = vmatpush1.bf16.msra.mxu0 %v13089_v32  ;;  %v13095_v32 = vld [vmem:[#allocation85_spill] sm:$0xff] }
 0x219   :  { %1431 = vmatprep.subr.bf16.mxu0 %v13090_v28 }
 0x21c   :  { %1432 = vmatpush1.bf16.msra.mxu0 %v13091_v36 }
 0x21d   :  { %1537 = vmatprep.subr.bf16.mxu0 %v8439_v42 }
 0x272   :  { %v1217_v43 = vpop.f32.mrb[20].mxu0  ;;  %v1258_v46 = vpop.f32.mrb[40].mxu1 }
 0x273   :  { %v1312_v50 = vadd.f32 %v1217_v43, %v13093_v47  ;;  %v1219_v51 = vpop.f32.mrb[21].mxu0  ;;  %v1260_v54 = vpop.f32.mrb[41].mxu1  ;;  %v1326_v43 = vadd.f32 %v8210_v17, %v1258_v46 }
 0x274   :  { %v1319_v27 = vadd.f32 %v1219_v51, %v13094_v37  ;;  %v1334_v13 = vadd.f32 %v1260_v54, %v13095_v32  ;;  %v1221_v28 = vpop.f32.mrb[22].mxu0  ;;  %v1262_v24 = vpop.f32.mrb[42].mxu1  ;;  %v13096_v51 = vld [vmem:[#allocation74_spill] sm:$0xff]  ;;  %v13098_v37 = vld [vmem:[#allocation71_spill] sm:$0xff] }
 0x275   :  { %v5768_v36 = vmul.f32 -1.442695, %v1312_v50  ;;  %v1222_v16 = vpop.f32.mrb[23].mxu0  ;;  %v1263_v9 = vpop.f32.mrb[43].mxu1 }
 0x276   :  { %v5769_v12 = vmul.f32 -1.442695, %v1319_v27  ;;  %v5770_v24 = vmul.f32 -1.442695, %v1334_v13 }
 0x277   :  { %6569 = vpow2.f32 %v5768_v36 }
 0x278   :  { %6571 = vpow2.f32 %v5769_v12 }
 0x281   :  { %v6570_v59 = vpop.eup %6569 }
 0x282   :  { %v1316_v42 = vadd.f32 1.0, %v6570_v59  ;;  %v6572_v22 = vpop.eup %6571 }
 0x283   :  { %v1323_v19 = vadd.f32 1.0, %v6572_v22 }
 0x284   :  { %6573 = vrcp.f32 %v1316_v42 }
 0x285   :  { %6575 = vrcp.f32 %v1323_v19 }
 0x28e   :  { %v6574_v47 = vpop.eup %6573 }
 0x28f   :  { %v1327_v55 = vmul.f32 %v6574_v47, %v1326_v43  ;;  %v6576_v50 = vpop.eup %6575 }
 0x290   :  { %v1330_v9 = vsub.f32 1.0, %v6576_v50  ;;  %v1332_v12 = vmul.f32 %v6576_v50, %v8213_v10  ;;  %v8748_v10 = vld [vmem:[%s12547_s2 + $0x278] ss:$24 sps:$4 sm:$0xff]  }
 0x291   :  { %v1328_v54 = vadd.f32 %v1327_v55, %v13096_v51  ;;  %v13099_v51 = vld [vmem:[#allocation72_spill] sm:$0xff]  ;;  %13134 = vst [vmem:[#allocation90_spill] sm:$0xff] %v8748_v10 }
 0x293   :  { %6577 = vtanh.f32 %v1328_v54 }
 0x294   :  { %6579 = vpow2.f32 %v5770_v24 }
 0x29d   :  { %v6578_v16 = vpop.eup %6577 }
 0x29e   :  { %v1331_v27 = vmul.f32 %v6578_v16, %v1330_v9  ;;  %v6580_v42 = vpop.eup %6579 }
 0x29f   :  { %v1338_v22 = vadd.f32 1.0, %v6580_v42 }
 0x2a0   :  { %v8448_v59 = vadd.f32 %v1332_v12, %v1331_v27 }
 0x2a1   :  { %6581 = vrcp.f32 %v1338_v22 }
 0x2a2   :  { %13097 = vst [vmem:[#allocation26_spill] sm:$0xff] %v8448_v59 }
 0x2ab   :  { %v6582_v13 = vpop.eup %6581 }
 0x2b2   :  { %v1299_v46 = vpop.f32.mrb[24].mxu0 }
 0x2b3   :  { %v1341_v32 = vadd.f32 %v1299_v46, %v13098_v37  ;;  %v1301_v19 = vpop.f32.mrb[25].mxu0  ;;  %v8460_v37 = vpack.c.bf16 %v8448_v59, %v8448_v59 }
 0x2b4   :  { %v1348_v55 = vadd.f32 %v8220_v35, %v1301_v19  ;;  %v1303_v28 = vpop.f32.mrb[26].mxu0  ;;  %v8475_v19 = vld [vmem:[%s12547_s2 + $0x34] ss:$24 sps:$4 sm:$0xff]  }
 0x2b5   :  { %v5771_v36 = vmul.f32 -1.442695, %v1341_v32  ;;  %v1304_v43 = vpop.f32.mrb[27].mxu0  ;;  %v8469_v32 = vld [vmem:[%s12547_s2] ss:$24 sps:$4 sm:$0xff]   ;;  %v13117_v28 = vld [vmem:[#allocation18_spill] sm:$0xff] }
 0x2b6   :  { %v1349_v47 = vmul.f32 %v6582_v13, %v1348_v55  ;;  %v13116_v55 = vld [vmem:[#allocation15_spill] sm:$0xff]  ;;  %v13120_v43 = vld [vmem:[#allocation21_spill] sm:$0xff] }
 0x2b7   :  { %6583 = vpow2.f32 %v5771_v36  ;;  %v13118_v13 = vld [vmem:[#allocation19_spill] sm:$0xff] }
 0x2b8   :  { %v1350_v54 = vadd.f32 %v1349_v47, %v13099_v51  ;;  %v13119_v36 = vld [vmem:[#allocation35_spill] sm:$0xff]  ;;  %v13121_v47 = vld [vmem:[#allocation22_spill] sm:$0xff]  ;;  %v13122_v51 = vld [vmem:[#allocation36_spill] sm:$0xff] }
 0x2c1   :  { %v6584_v24 = vpop.eup %6583 }
 0x2c2   :  { %v1345_v50 = vadd.f32 1.0, %v6584_v24  ;;  %v13124_v24 = vld [vmem:[#allocation23_spill] sm:$0xff] }
 0x2c4   :  { %6585 = vrcp.f32 %v1345_v50  ;;  %v13125_v50 = vld [vmem:[#allocation24_spill] sm:$0xff] }
 0x2c5   :  { %6587 = vtanh.f32 %v1350_v54  ;;  %v13123_v54 = vld [vmem:[#allocation37_spill] sm:$0xff] }
 0x2ce   :  { %v6586_v9 = vpop.eup %6585 }
 0x2cf   :  { %v1352_v16 = vsub.f32 1.0, %v6586_v9  ;;  %v6588_v27 = vpop.eup %6587  ;;  %v1354_v42 = vmul.f32 %v6586_v9, %v8225_v11  ;;  %v13126_v9 = vld [vmem:[#allocation38_spill] sm:$0xff]  ;;  %v8742_v11 = vld [vmem:[%s12547_s2 + $0x27c] ss:$24 sps:$4 sm:$0xff]  }
 0x2d0   :  { %13133 = vst [vmem:[#allocation89_spill] sm:$0xff] %v8742_v11 }
 0x2d1   :  { %v1353_v12 = vmul.f32 %v6588_v27, %v1352_v16  ;;  %v13127_v16 = vld [vmem:[#allocation39_spill] sm:$0xff]  ;;  %v8712_v27 = vld [vmem:[%s12547_s2 + $0x1e8] ss:$24 sps:$4 sm:$0xff]  }
 0x2d2   :  { %13128 = vst [vmem:[#allocation46_spill] sm:$0xff] %v8712_v27 }
 0x2d3   :  { %v8454_v22 = vadd.f32 %v1354_v42, %v1353_v12  ;;  %v8718_v12 = vld [vmem:[%s12547_s2 + $0x21c] ss:$24 sps:$4 sm:$0xff]   ;;  %v8724_v42 = vld [vmem:[%s12547_s2 + $0x218] ss:$24 sps:$4 sm:$0xff]  }
 0x2d4   :  { %13129 = vst [vmem:[#allocation85_spill] sm:$0xff] %v8718_v12  ;;  %13130 = vst [vmem:[#allocation74_spill] sm:$0xff] %v8724_v42 }
 0x2d5   :  { %13100 = vst [vmem:[#allocation40_spill] sm:$0xff] %v8454_v22  ;;  %v1359_v46 = vpack.c.bf16 %v8454_v22, %v8454_v22 }
 0x2d7   :  { %1392 = vmatprep.mubr.bf16.mxu1 %v1359_v46  ;;  %1433 = vmatprep.mubr.bf16.mxu0 %v1359_v46 }
 0x2d8   :  { %1393 = vmatmul.mubr.bf16.vlgmr.msra.gmra.mrb[44].mxu1 %v8460_v37  ;;  %1434 = vmatmul.mubr.bf16.vlgmr.msra.gmra.mrb[28].mxu0 %v8460_v37 }
 0x2d9   :  { %1443 = vmatpush1.bf16.msra.mxu1 %v7802_v45  ;;  %1474 = vmatprep.mubr.bf16.mxu1 %v1359_v46  ;;  %v8489_v45 = vld [vmem:[%s12547_s2 + $0x64] ss:$24 sps:$4 sm:$0xff]  }
 0x2da   :  { %1444 = vmatprep.subr.bf16.mxu1 %v7808_v44  ;;  %1538 = vmatpush1.bf16.msra.mxu0 %v8469_v32  ;;  %v8483_v44 = vld [vmem:[%s12547_s2 + $0x30] ss:$24 sps:$4 sm:$0xff]   ;;  %v8730_v46 = vld [vmem:[%s12547_s2 + $0x24c] ss:$24 sps:$4 sm:$0xff]  }
 0x2db   :  { %1539 = vmatprep.subr.bf16.mxu0 %v8475_v19  ;;  %13131 = vst [vmem:[#allocation71_spill] sm:$0xff] %v8730_v46 }
 0x2dd   :  { %1445 = vmatpush1.bf16.msra.mxu1 %v7817_v49  ;;  %v8503_v49 = vld [vmem:[%s12547_s2 + $0x94] ss:$24 sps:$4 sm:$0xff]  }
 0x2de   :  { %1446 = vmatprep.subr.bf16.mxu1 %v7824_v48  ;;  %1540 = vmatpush1.bf16.msra.mxu0 %v8483_v44  ;;  %v8497_v48 = vld [vmem:[%s12547_s2 + $0x60] ss:$24 sps:$4 sm:$0xff]  }
 0x2df   :  { %1541 = vmatprep.subr.bf16.mxu0 %v8489_v45 }
 0x2e1   :  { %1447 = vmatpush1.bf16.msra.mxu1 %v7832_v53  ;;  %v8517_v53 = vld [vmem:[%s12547_s2 + $0xc4] ss:$24 sps:$4 sm:$0xff]  }
 0x2e2   :  { %1448 = vmatprep.subr.bf16.mxu1 %v7838_v52  ;;  %1542 = vmatpush1.bf16.msra.mxu0 %v8497_v48  ;;  %v8511_v52 = vld [vmem:[%s12547_s2 + $0x90] ss:$24 sps:$4 sm:$0xff]  }
 0x2e3   :  { %1543 = vmatprep.subr.bf16.mxu0 %v8503_v49 }
 0x2e5   :  { %1449 = vmatpush1.bf16.msra.mxu1 %v7846_v57  ;;  %v8531_v57 = vld [vmem:[%s12547_s2 + $0xf4] ss:$24 sps:$4 sm:$0xff]  }
 0x2e6   :  { %1450 = vmatprep.subr.bf16.mxu1 %v7852_v56  ;;  %1544 = vmatpush1.bf16.msra.mxu0 %v8511_v52  ;;  %v8525_v56 = vld [vmem:[%s12547_s2 + $0xc0] ss:$24 sps:$4 sm:$0xff]  }
 0x2e7   :  { %1545 = vmatprep.subr.bf16.mxu0 %v8517_v53 }
 0x2e9   :  { %1451 = vmatpush1.bf16.msra.mxu1 %v7860_v61  ;;  %v8545_v61 = vld [vmem:[%s12547_s2 + $0x124] ss:$24 sps:$4 sm:$0xff]  }
 0x2ea   :  { %1452 = vmatprep.subr.bf16.mxu1 %v7866_v60  ;;  %1546 = vmatpush1.bf16.msra.mxu0 %v8525_v56  ;;  %v8539_v60 = vld [vmem:[%s12547_s2 + $0xf0] ss:$24 sps:$4 sm:$0xff]  }
 0x2eb   :  { %1547 = vmatprep.subr.bf16.mxu0 %v8531_v57 }
 0x2ed   :  { %1453 = vmatpush1.bf16.msra.mxu1 %v7874_v0  ;;  %v8559_v0 = vld [vmem:[%s12547_s2 + $0x154] ss:$24 sps:$4 sm:$0xff]  }
 0x2ee   :  { %1454 = vmatprep.subr.bf16.mxu1 %v7880_v63  ;;  %1548 = vmatpush1.bf16.msra.mxu0 %v8539_v60  ;;  %v8553_v63 = vld [vmem:[%s12547_s2 + $0x120] ss:$24 sps:$4 sm:$0xff]  }
 0x2ef   :  { %1549 = vmatprep.subr.bf16.mxu0 %v8545_v61 }
 0x2f1   :  { %1455 = vmatpush1.bf16.msra.mxu1 %v7888_v2  ;;  %v8573_v2 = vld [vmem:[%s12547_s2 + $0x184] ss:$24 sps:$4 sm:$0xff]  }
 0x2f2   :  { %1456 = vmatprep.subr.bf16.mxu1 %v7894_v1  ;;  %1550 = vmatpush1.bf16.msra.mxu0 %v8553_v63  ;;  %v8567_v1 = vld [vmem:[%s12547_s2 + $0x150] ss:$24 sps:$4 sm:$0xff]  }
 0x2f3   :  { %1551 = vmatprep.subr.bf16.mxu0 %v8559_v0 }
 0x2f5   :  { %1457 = vmatpush1.bf16.msra.mxu1 %v7902_v4  ;;  %v8587_v4 = vld [vmem:[%s12547_s2 + $0x1b4] ss:$24 sps:$4 sm:$0xff]  }
 0x2f6   :  { %1458 = vmatprep.subr.bf16.mxu1 %v7908_v3  ;;  %1552 = vmatpush1.bf16.msra.mxu0 %v8567_v1  ;;  %v8581_v3 = vld [vmem:[%s12547_s2 + $0x180] ss:$24 sps:$4 sm:$0xff]   ;;  %13101 = vst [vmem:[#allocation41_spill] sm:$0xff] %v8587_v4 }
 0x2f7   :  { %1553 = vmatprep.subr.bf16.mxu0 %v8573_v2 }
 0x2f9   :  { %1459 = vmatpush1.bf16.msra.mxu1 %v7916_v6  ;;  %v8601_v6 = vld [vmem:[%s12547_s2 + $0x1e4] ss:$24 sps:$4 sm:$0xff]  }
 0x2fa   :  { %1460 = vmatprep.subr.bf16.mxu1 %v7922_v5  ;;  %1554 = vmatpush1.bf16.msra.mxu0 %v8581_v3  ;;  %v8595_v5 = vld [vmem:[%s12547_s2 + $0x1b0] ss:$24 sps:$4 sm:$0xff]   ;;  %13102 = vst [vmem:[#allocation27_spill] sm:$0xff] %v8601_v6 }
 0x2fb   :  { %1555 = vmatprep.subr.bf16.mxu0 %v8587_v4 }
 0x2fd   :  { %1461 = vmatpush1.bf16.msra.mxu1 %v7930_v8  ;;  %v8609_v8 = vld [vmem:[%s12547_s2 + $0x1e0] ss:$24 sps:$4 sm:$0xff]  }
 0x2fe   :  { %1462 = vmatprep.subr.bf16.mxu1 %v13046_v25  ;;  %1556 = vmatpush1.bf16.msra.mxu0 %v8595_v5  ;;  %13103 = vst [vmem:[#allocation28_spill] sm:$0xff] %v8609_v8  ;;  %v8615_v25 = vld [vmem:[%s12547_s2 + $0x214] ss:$24 sps:$4 sm:$0xff]  }
 0x2ff   :  { %1557 = vmatprep.subr.bf16.mxu0 %v8601_v6  ;;  %13104 = vst [vmem:[#allocation29_spill] sm:$0xff] %v8615_v25 }
 0x301   :  { %1463 = vmatpush1.bf16.msra.mxu1 %v13049_v62  ;;  %v8623_v62 = vld [vmem:[%s12547_s2 + $0x210] ss:$24 sps:$4 sm:$0xff]  }
 0x302   :  { %1464 = vmatprep.subr.bf16.mxu1 %v13050_v21  ;;  %1558 = vmatpush1.bf16.msra.mxu0 %v8609_v8  ;;  %13105 = vst [vmem:[#allocation30_spill] sm:$0xff] %v8623_v62  ;;  %v8629_v21 = vld [vmem:[%s12547_s2 + $0x244] ss:$24 sps:$4 sm:$0xff]  }
 0x303   :  { %1559 = vmatprep.subr.bf16.mxu0 %v8615_v25  ;;  %13106 = vst [vmem:[#allocation31_spill] sm:$0xff] %v8629_v21 }
 0x305   :  { %1465 = vmatpush1.bf16.msra.mxu1 %v13053_v26  ;;  %v8637_v26 = vld [vmem:[%s12547_s2 + $0x240] ss:$24 sps:$4 sm:$0xff]  }
 0x306   :  { %1466 = vmatprep.subr.bf16.mxu1 %v13054_v14  ;;  %1560 = vmatpush1.bf16.msra.mxu0 %v8623_v62  ;;  %13107 = vst [vmem:[#allocation32_spill] sm:$0xff] %v8637_v26  ;;  %v8643_v14 = vld [vmem:[%s12547_s2 + $0x274] ss:$24 sps:$4 sm:$0xff]  }
 0x307   :  { %1561 = vmatprep.subr.bf16.mxu0 %v8629_v21  ;;  %13108 = vst [vmem:[#allocation33_spill] sm:$0xff] %v8643_v14 }
 0x309   :  { %1467 = vmatpush1.bf16.msra.mxu1 %v13057_v39  ;;  %v8651_v39 = vld [vmem:[%s12547_s2 + $0x270] ss:$24 sps:$4 sm:$0xff]  }
 0x30a   :  { %1468 = vmatprep.subr.bf16.mxu1 %v13058_v18  ;;  %1562 = vmatpush1.bf16.msra.mxu0 %v8637_v26  ;;  %13109 = vst [vmem:[#allocation34_spill] sm:$0xff] %v8651_v39  ;;  %v8657_v18 = vld [vmem:[%s12547_s2 + $0x2a4] ss:$24 sps:$4 sm:$0xff]  }
 0x30b   :  { %1563 = vmatprep.subr.bf16.mxu0 %v8643_v14  ;;  %13110 = vst [vmem:[#allocation13_spill] sm:$0xff] %v8657_v18 }
 0x30d   :  { %1469 = vmatpush1.bf16.msra.mxu1 %v7980_v15  ;;  %v8671_v15 = vld [vmem:[%s12547_s2 + $0x2d4] ss:$24 sps:$4 sm:$0xff]  }
 0x30e   :  { %1470 = vmatprep.subr.bf16.mxu1 %v7986_v41  ;;  %1564 = vmatpush1.bf16.msra.mxu0 %v8651_v39  ;;  %v8665_v41 = vld [vmem:[%s12547_s2 + $0x2a0] ss:$24 sps:$4 sm:$0xff]   ;;  %13112 = vst [vmem:[#allocation17_spill] sm:$0xff] %v8671_v15 }
 0x30f   :  { %1565 = vmatprep.subr.bf16.mxu0 %v8657_v18  ;;  %13111 = vst [vmem:[#allocation16_spill] sm:$0xff] %v8665_v41 }
 0x311   :  { %1471 = vmatpush1.bf16.msra.mxu1 %v7992_v30  ;;  %v8679_v30 = vld [vmem:[%s12547_s2 + $0x2d0] ss:$24 sps:$4 sm:$0xff]  }
 0x312   :  { %1472 = vmatprep.subr.bf16.mxu1 %v7998_v7  ;;  %1566 = vmatpush1.bf16.msra.mxu0 %v8665_v41  ;;  %13113 = vst [vmem:[#allocation20_spill] sm:$0xff] %v8679_v30  ;;  %v8685_v7 = vld [vmem:[%s12547_s2 + $0x14] ss:$24 sps:$4 sm:$0xff]  }
 0x313   :  { %1567 = vmatprep.subr.bf16.mxu0 %v8671_v15  ;;  %13114 = vst [vmem:[#allocation45_spill] sm:$0xff] %v8685_v7 }
 0x315   :  { %1473 = vmatpush1.bf16.msra.mxu1 %v8004_v20  ;;  %v13115_v20 = vld [vmem:[#allocation14_spill] sm:$0xff] }
 0x316   :  { %1578 = vmatprep.subr.bf16.mxu1 %v8299_v33  ;;  %1568 = vmatpush1.bf16.msra.mxu0 %v8679_v30 }
 0x317   :  { %1619 = vmatprep.subr.bf16.mxu0 %v8685_v7 }
 0x318   :  { %1475 = vmatmul.mubr.bf16.vlgmr.msra.gmra.mrb[48].mxu1 %v8460_v37  ;;  %v8736_v37 = vld [vmem:[%s12547_s2 + $0x248] ss:$24 sps:$4 sm:$0xff]  }
 0x319   :  { %1579 = vmatpush1.bf16.msra.mxu1 %v8308_v40  ;;  %13132 = vst [vmem:[#allocation72_spill] sm:$0xff] %v8736_v37 }
 0x31a   :  { %1580 = vmatprep.subr.bf16.mxu1 %v8314_v23 }
 0x31d   :  { %1581 = vmatpush1.bf16.msra.mxu1 %v8320_v58 }
 0x31e   :  { %1582 = vmatprep.subr.bf16.mxu1 %v8326_v31 }
 0x321   :  { %1583 = vmatpush1.bf16.msra.mxu1 %v8332_v29 }
 0x322   :  { %1584 = vmatprep.subr.bf16.mxu1 %v8338_v34 }
 0x325   :  { %1585 = vmatpush1.bf16.msra.mxu1 %v8344_v38 }
 0x326   :  { %1586 = vmatprep.subr.bf16.mxu1 %v13115_v20 }
 0x329   :  { %1587 = vmatpush1.bf16.msra.mxu1 %v13116_v55 }
 0x32a   :  { %1588 = vmatprep.subr.bf16.mxu1 %v13117_v28 }
 0x32d   :  { %1589 = vmatpush1.bf16.msra.mxu1 %v13118_v13 }
 0x32e   :  { %1590 = vmatprep.subr.bf16.mxu1 %v13119_v36 }
 0x331   :  { %1591 = vmatpush1.bf16.msra.mxu1 %v13120_v43 }
 0x332   :  { %1592 = vmatprep.subr.bf16.mxu1 %v13121_v47 }
 0x335   :  { %1593 = vmatpush1.bf16.msra.mxu1 %v13122_v51 }
 0x336   :  { %1594 = vmatprep.subr.bf16.mxu1 %v13123_v54  ;;  %v13142_v54 = vld [vmem:[#allocation83_spill] sm:$0xff] }
 0x339   :  { %1595 = vmatpush1.bf16.msra.mxu1 %v13124_v24 }
 0x33a   :  { %1596 = vmatprep.subr.bf16.mxu1 %v13125_v50  ;;  %v13141_v50 = vld [vmem:[#allocation51_spill] sm:$0xff] }
 0x33d   :  { %1597 = vmatpush1.bf16.msra.mxu1 %v13126_v9 }
 0x33e   :  { %1598 = vmatprep.subr.bf16.mxu1 %v13127_v16 }
 0x341   :  { %1599 = vmatpush1.bf16.msra.mxu1 %v8712_v27  ;;  %v13140_v27 = vld [vmem:[#allocation49_spill] sm:$0xff] }
 0x342   :  { %1600 = vmatprep.subr.bf16.mxu1 %v8718_v12 }
 0x345   :  { %1601 = vmatpush1.bf16.msra.mxu1 %v8724_v42 }
 0x346   :  { %1602 = vmatprep.subr.bf16.mxu1 %v8730_v46  ;;  %v8754_v46 = vld [vmem:[%s12547_s2 + $0x2ac] ss:$24 sps:$4 sm:$0xff]  }
 0x347   :  { %13135 = vst [vmem:[#allocation91_spill] sm:$0xff] %v8754_v46 }
 0x349   :  { %1603 = vmatpush1.bf16.msra.mxu1 %v8736_v37  ;;  %v8760_v37 = vld [vmem:[%s12547_s2 + $0x2a8] ss:$24 sps:$4 sm:$0xff]  }
 0x34a   :  { %1604 = vmatprep.subr.bf16.mxu1 %v8742_v11  ;;  %13136 = vst [vmem:[#allocation92_spill] sm:$0xff] %v8760_v37  ;;  %v8766_v11 = vld [vmem:[%s12547_s2 + $0x2dc] ss:$24 sps:$4 sm:$0xff]  }
 0x34b   :  { %13137 = vst [vmem:[#allocation93_spill] sm:$0xff] %v8766_v11 }
 0x34d   :  { %1605 = vmatpush1.bf16.msra.mxu1 %v8748_v10  ;;  %v8772_v10 = vld [vmem:[%s12547_s2 + $0x2d8] ss:$24 sps:$4 sm:$0xff]  }
 0x34e   :  { %1606 = vmatprep.subr.bf16.mxu1 %v8754_v46  ;;  %13138 = vst [vmem:[#allocation94_spill] sm:$0xff] %v8772_v10  ;;  %v13139_v46 = vld [vmem:[#allocation25_spill] sm:$0xff] }
 0x351   :  { %1607 = vmatpush1.bf16.msra.mxu1 %v8760_v37 }
 0x352   :  { %1608 = vmatprep.subr.bf16.mxu1 %v8766_v11 }
 0x355   :  { %1609 = vmatpush1.bf16.msra.mxu1 %v8772_v10 }
 0x356   :  { %1714 = vmatprep.subr.bf16.mxu1 %v13139_v46 }
 0x3ab   :  { %v1394_v42 = vpop.f32.mrb[44].mxu1  ;;  %v1435_v12 = vpop.f32.mrb[28].mxu0 }
 0x3ac   :  { %v1489_v37 = vadd.f32 %v1394_v42, %v13140_v27  ;;  %v1396_v16 = vpop.f32.mrb[45].mxu1  ;;  %v1437_v9 = vpop.f32.mrb[29].mxu0  ;;  %v1503_v27 = vadd.f32 %v8210_v17, %v1435_v12 }
 0x3ad   :  { %v1496_v24 = vadd.f32 %v1396_v16, %v13141_v50  ;;  %v1511_v51 = vadd.f32 %v1437_v9, %v13142_v54  ;;  %v1398_v11 = vpop.f32.mrb[46].mxu1  ;;  %v1439_v47 = vpop.f32.mrb[30].mxu0  ;;  %v13143_v50 = vld [vmem:[#allocation76_spill] sm:$0xff]  ;;  %v13145_v16 = vld [vmem:[#allocation66_spill] sm:$0xff] }
 0x3ae   :  { %v5772_v43 = vmul.f32 -1.442695, %v1489_v37  ;;  %v1399_v36 = vpop.f32.mrb[47].mxu1  ;;  %v1440_v13 = vpop.f32.mrb[31].mxu0 }
 0x3af   :  { %v5773_v28 = vmul.f32 -1.442695, %v1496_v24  ;;  %v5774_v11 = vmul.f32 -1.442695, %v1511_v51 }
 0x3b0   :  { %6589 = vpow2.f32 %v5772_v43 }
 0x3b1   :  { %6591 = vpow2.f32 %v5773_v28 }
 0x3ba   :  { %v6590_v10 = vpop.eup %6589 }
 0x3bb   :  { %v1493_v46 = vadd.f32 1.0, %v6590_v10  ;;  %v6592_v55 = vpop.eup %6591 }
 0x3bc   :  { %v1500_v20 = vadd.f32 1.0, %v6592_v55 }
 0x3bd   :  { %6593 = vrcp.f32 %v1493_v46 }
 0x3be   :  { %6595 = vrcp.f32 %v1500_v20 }
 0x3c7   :  { %v6594_v42 = vpop.eup %6593 }
 0x3c8   :  { %v1504_v38 = vmul.f32 %v6594_v42, %v1503_v27  ;;  %v6596_v47 = vpop.eup %6595 }
 0x3c9   :  { %v1507_v13 = vsub.f32 1.0, %v6596_v47  ;;  %v1509_v28 = vmul.f32 %v6596_v47, %v8448_v59  ;;  %v8933_v59 = vld [vmem:[%s12547_s2 + $0x1f4] ss:$24 sps:$4 sm:$0xff]  }
 0x3ca   :  { %v1505_v54 = vadd.f32 %v1504_v38, %v13143_v50  ;;  %v13146_v50 = vld [vmem:[#allocation68_spill] sm:$0xff] }
 0x3cc   :  { %6597 = vtanh.f32 %v1505_v54 }
 0x3cd   :  { %6599 = vpow2.f32 %v5774_v11 }
 0x3d6   :  { %v6598_v36 = vpop.eup %6597 }
 0x3d7   :  { %v1508_v43 = vmul.f32 %v6598_v36, %v1507_v13  ;;  %v6600_v24 = vpop.eup %6599 }
 0x3d8   :  { %v1515_v55 = vadd.f32 1.0, %v6600_v24 }
 0x3d9   :  { %v8782_v10 = vadd.f32 %v1509_v28, %v1508_v43 }
 0x3da   :  { %6601 = vrcp.f32 %v1515_v55 }
 0x3db   :  { %13144 = vst [vmem:[#allocation49_spill] sm:$0xff] %v8782_v10 }
 0x3e4   :  { %v6602_v51 = vpop.eup %6601 }
 0x3eb   :  { %v1476_v9 = vpop.f32.mrb[48].mxu1 }
 0x3ec   :  { %v1518_v12 = vadd.f32 %v1476_v9, %v13145_v16  ;;  %v1478_v20 = vpop.f32.mrb[49].mxu1  ;;  %v8794_v16 = vpack.c.bf16 %v8782_v10, %v8782_v10 }
 0x3ed   :  { %v1525_v38 = vadd.f32 %v8220_v35, %v1478_v20  ;;  %v1480_v46 = vpop.f32.mrb[50].mxu1  ;;  %v8807_v20 = vld [vmem:[%s12547_s2 + $0x44] ss:$24 sps:$4 sm:$0xff]  }
 0x3ee   :  { %v5775_v37 = vmul.f32 -1.442695, %v1518_v12  ;;  %v1481_v27 = vpop.f32.mrb[51].mxu1  ;;  %v8801_v12 = vld [vmem:[%s12547_s2 + $0x10] ss:$24 sps:$4 sm:$0xff]  }
 0x3ef   :  { %v1526_v42 = vmul.f32 %v6602_v51, %v1525_v38  ;;  %v8815_v38 = vld [vmem:[%s12547_s2 + $0x40] ss:$24 sps:$4 sm:$0xff]   ;;  %v8821_v46 = vld [vmem:[%s12547_s2 + $0x74] ss:$24 sps:$4 sm:$0xff]   ;;  %v8829_v51 = vld [vmem:[%s12547_s2 + $0x70] ss:$24 sps:$4 sm:$0xff]  }
 0x3f0   :  { %6603 = vpow2.f32 %v5775_v37  ;;  %v8835_v37 = vld [vmem:[%s12547_s2 + $0xa4] ss:$24 sps:$4 sm:$0xff]   ;;  %v8843_v27 = vld [vmem:[%s12547_s2 + $0xa0] ss:$24 sps:$4 sm:$0xff]  }
 0x3f1   :  { %v1527_v54 = vadd.f32 %v1526_v42, %v13146_v50  ;;  %v8849_v42 = vld [vmem:[%s12547_s2 + $0xd4] ss:$24 sps:$4 sm:$0xff]   ;;  %v8857_v50 = vld [vmem:[%s12547_s2 + $0xd0] ss:$24 sps:$4 sm:$0xff]  }
 0x3fa   :  { %v6604_v11 = vpop.eup %6603 }
 0x3fb   :  { %v1522_v47 = vadd.f32 1.0, %v6604_v11  ;;  %v8871_v11 = vld [vmem:[%s12547_s2 + $0x100] ss:$24 sps:$4 sm:$0xff]  }
 0x3fd   :  { %6605 = vrcp.f32 %v1522_v47  ;;  %v8877_v47 = vld [vmem:[%s12547_s2 + $0x134] ss:$24 sps:$4 sm:$0xff]  }
 0x3fe   :  { %6607 = vtanh.f32 %v1527_v54  ;;  %v8863_v54 = vld [vmem:[%s12547_s2 + $0x104] ss:$24 sps:$4 sm:$0xff]  }
 0x407   :  { %v6606_v13 = vpop.eup %6605 }
 0x408   :  { %v1529_v36 = vsub.f32 1.0, %v6606_v13  ;;  %v6608_v43 = vpop.eup %6607  ;;  %v1531_v24 = vmul.f32 %v6606_v13, %v8454_v22  ;;  %v8885_v13 = vld [vmem:[%s12547_s2 + $0x130] ss:$24 sps:$4 sm:$0xff]   ;;  %v8927_v22 = vld [vmem:[%s12547_s2 + $0x1c0] ss:$24 sps:$4 sm:$0xff]  }
 0x409   :  { %13148 = vst [vmem:[#allocation83_spill] sm:$0xff] %v8927_v22 }
 0x40a   :  { %v1530_v28 = vmul.f32 %v6608_v43, %v1529_v36  ;;  %v8891_v36 = vld [vmem:[%s12547_s2 + $0x164] ss:$24 sps:$4 sm:$0xff]   ;;  %v8899_v43 = vld [vmem:[%s12547_s2 + $0x160] ss:$24 sps:$4 sm:$0xff]  }
 0x40c   :  { %v8788_v55 = vadd.f32 %v1531_v24, %v1530_v28  ;;  %v8905_v28 = vld [vmem:[%s12547_s2 + $0x194] ss:$24 sps:$4 sm:$0xff]   ;;  %v8913_v24 = vld [vmem:[%s12547_s2 + $0x190] ss:$24 sps:$4 sm:$0xff]  }
 0x40e   :  { %13147 = vst [vmem:[#allocation51_spill] sm:$0xff] %v8788_v55  ;;  %v1536_v9 = vpack.c.bf16 %v8788_v55, %v8788_v55 }
 0x410   :  { %1569 = vmatprep.mubr.bf16.mxu0 %v1536_v9  ;;  %1610 = vmatprep.mubr.bf16.mxu1 %v1536_v9 }
 0x411   :  { %1570 = vmatmul.mubr.bf16.vlgmr.msra.gmra.mrb[32].mxu0 %v8794_v16  ;;  %1611 = vmatmul.mubr.bf16.vlgmr.msra.gmra.mrb[52].mxu1 %v8794_v16 }
 0x412   :  { %1620 = vmatpush1.bf16.msra.mxu0 %v8801_v12  ;;  %1651 = vmatprep.mubr.bf16.mxu0 %v1536_v9  ;;  %v8919_v9 = vld [vmem:[%s12547_s2 + $0x1c4] ss:$24 sps:$4 sm:$0xff]  }
 0x413   :  { %1621 = vmatprep.subr.bf16.mxu0 %v8807_v20  ;;  %1715 = vmatpush1.bf16.msra.mxu1 %v8469_v32 }
 0x414   :  { %1716 = vmatprep.subr.bf16.mxu1 %v8475_v19 }
 0x416   :  { %1622 = vmatpush1.bf16.msra.mxu0 %v8815_v38 }
 0x417   :  { %1623 = vmatprep.subr.bf16.mxu0 %v8821_v46  ;;  %1717 = vmatpush1.bf16.msra.mxu1 %v8483_v44 }
 0x418   :  { %1718 = vmatprep.subr.bf16.mxu1 %v8489_v45 }
 0x41a   :  { %1624 = vmatpush1.bf16.msra.mxu0 %v8829_v51 }
 0x41b   :  { %1625 = vmatprep.subr.bf16.mxu0 %v8835_v37  ;;  %1719 = vmatpush1.bf16.msra.mxu1 %v8497_v48 }
 0x41c   :  { %1720 = vmatprep.subr.bf16.mxu1 %v8503_v49 }
 0x41e   :  { %1626 = vmatpush1.bf16.msra.mxu0 %v8843_v27 }
 0x41f   :  { %1627 = vmatprep.subr.bf16.mxu0 %v8849_v42  ;;  %1721 = vmatpush1.bf16.msra.mxu1 %v8511_v52 }
 0x420   :  { %1722 = vmatprep.subr.bf16.mxu1 %v8517_v53 }
 0x422   :  { %1628 = vmatpush1.bf16.msra.mxu0 %v8857_v50 }
 0x423   :  { %1629 = vmatprep.subr.bf16.mxu0 %v8863_v54  ;;  %1723 = vmatpush1.bf16.msra.mxu1 %v8525_v56 }
 0x424   :  { %1724 = vmatprep.subr.bf16.mxu1 %v8531_v57 }
 0x426   :  { %1630 = vmatpush1.bf16.msra.mxu0 %v8871_v11 }
 0x427   :  { %1631 = vmatprep.subr.bf16.mxu0 %v8877_v47  ;;  %1725 = vmatpush1.bf16.msra.mxu1 %v8539_v60 }
 0x428   :  { %1726 = vmatprep.subr.bf16.mxu1 %v8545_v61 }
 0x42a   :  { %1632 = vmatpush1.bf16.msra.mxu0 %v8885_v13 }
 0x42b   :  { %1633 = vmatprep.subr.bf16.mxu0 %v8891_v36  ;;  %1727 = vmatpush1.bf16.msra.mxu1 %v8553_v63 }
 0x42c   :  { %1728 = vmatprep.subr.bf16.mxu1 %v8559_v0 }
 0x42e   :  { %1634 = vmatpush1.bf16.msra.mxu0 %v8899_v43 }
 0x42f   :  { %1635 = vmatprep.subr.bf16.mxu0 %v8905_v28  ;;  %1729 = vmatpush1.bf16.msra.mxu1 %v8567_v1 }
 0x430   :  { %1730 = vmatprep.subr.bf16.mxu1 %v8573_v2 }
 0x432   :  { %1636 = vmatpush1.bf16.msra.mxu0 %v8913_v24 }
 0x433   :  { %1637 = vmatprep.subr.bf16.mxu0 %v8919_v9  ;;  %1731 = vmatpush1.bf16.msra.mxu1 %v8581_v3 }
 0x434   :  { %1732 = vmatprep.subr.bf16.mxu1 %v8587_v4  ;;  %v8941_v4 = vld [vmem:[%s12547_s2 + $0x1f0] ss:$24 sps:$4 sm:$0xff]  }
 0x435   :  { %13149 = vst [vmem:[#allocation76_spill] sm:$0xff] %v8941_v4 }
 0x436   :  { %1638 = vmatpush1.bf16.msra.mxu0 %v8927_v22  ;;  %v8947_v22 = vld [vmem:[%s12547_s2 + $0x224] ss:$24 sps:$4 sm:$0xff]  }
 0x437   :  { %1639 = vmatprep.subr.bf16.mxu0 %v8933_v59  ;;  %1733 = vmatpush1.bf16.msra.mxu1 %v8595_v5 }
 0x438   :  { %1734 = vmatprep.subr.bf16.mxu1 %v8601_v6  ;;  %v8955_v6 = vld [vmem:[%s12547_s2 + $0x220] ss:$24 sps:$4 sm:$0xff]  }
 0x439   :  { %13150 = vst [vmem:[#allocation66_spill] sm:$0xff] %v8955_v6 }
 0x43a   :  { %1640 = vmatpush1.bf16.msra.mxu0 %v8941_v4  ;;  %v8961_v4 = vld [vmem:[%s12547_s2 + $0x254] ss:$24 sps:$4 sm:$0xff]  }
 0x43b   :  { %1641 = vmatprep.subr.bf16.mxu0 %v8947_v22  ;;  %1735 = vmatpush1.bf16.msra.mxu1 %v8609_v8  ;;  %13151 = vst [vmem:[#allocation68_spill] sm:$0xff] %v8961_v4 }
 0x43c   :  { %1736 = vmatprep.subr.bf16.mxu1 %v8615_v25  ;;  %v8969_v25 = vld [vmem:[%s12547_s2 + $0x250] ss:$24 sps:$4 sm:$0xff]  }
 0x43d   :  { %13152 = vst [vmem:[#allocation95_spill] sm:$0xff] %v8969_v25 }
 0x43e   :  { %1642 = vmatpush1.bf16.msra.mxu0 %v8955_v6  ;;  %v8975_v6 = vld [vmem:[%s12547_s2 + $0x284] ss:$24 sps:$4 sm:$0xff]  }
 0x43f   :  { %1643 = vmatprep.subr.bf16.mxu0 %v8961_v4  ;;  %1737 = vmatpush1.bf16.msra.mxu1 %v8623_v62  ;;  %13153 = vst [vmem:[#allocation96_spill] sm:$0xff] %v8975_v6 }
 0x440   :  { %1738 = vmatprep.subr.bf16.mxu1 %v8629_v21  ;;  %v8983_v21 = vld [vmem:[%s12547_s2 + $0x280] ss:$24 sps:$4 sm:$0xff]  }
 0x441   :  { %13154 = vst [vmem:[#allocation97_spill] sm:$0xff] %v8983_v21 }
 0x442   :  { %1644 = vmatpush1.bf16.msra.mxu0 %v8969_v25  ;;  %v8989_v25 = vld [vmem:[%s12547_s2 + $0x2b4] ss:$24 sps:$4 sm:$0xff]  }
 0x443   :  { %1645 = vmatprep.subr.bf16.mxu0 %v8975_v6  ;;  %1739 = vmatpush1.bf16.msra.mxu1 %v8637_v26  ;;  %13155 = vst [vmem:[#allocation98_spill] sm:$0xff] %v8989_v25 }
 0x444   :  { %1740 = vmatprep.subr.bf16.mxu1 %v8643_v14  ;;  %v8997_v14 = vld [vmem:[%s12547_s2 + $0x2b0] ss:$24 sps:$4 sm:$0xff]  }
 0x445   :  { %13156 = vst [vmem:[#allocation99_spill] sm:$0xff] %v8997_v14 }
 0x446   :  { %1646 = vmatpush1.bf16.msra.mxu0 %v8983_v21  ;;  %v9003_v21 = vld [vmem:[%s12547_s2 + $0x2e4] ss:$24 sps:$4 sm:$0xff]  }
 0x447   :  { %1647 = vmatprep.subr.bf16.mxu0 %v8989_v25  ;;  %1741 = vmatpush1.bf16.msra.mxu1 %v8651_v39  ;;  %13157 = vst [vmem:[#allocation100_spill] sm:$0xff] %v9003_v21 }
 0x448   :  { %1742 = vmatprep.subr.bf16.mxu1 %v8657_v18  ;;  %v9011_v18 = vld [vmem:[%s12547_s2 + $0x2e0] ss:$24 sps:$4 sm:$0xff]  }
 0x449   :  { %13158 = vst [vmem:[#allocation101_spill] sm:$0xff] %v9011_v18 }
 0x44a   :  { %1648 = vmatpush1.bf16.msra.mxu0 %v8997_v14  ;;  %v13187_v14 = vld [vmem:[#allocation81_spill] sm:$0xff] }
 0x44b   :  { %1649 = vmatprep.subr.bf16.mxu0 %v9003_v21  ;;  %1743 = vmatpush1.bf16.msra.mxu1 %v8665_v41  ;;  %v13186_v21 = vld [vmem:[#allocation54_spill] sm:$0xff] }
 0x44c   :  { %1744 = vmatprep.subr.bf16.mxu1 %v8671_v15  ;;  %v13185_v15 = vld [vmem:[#allocation53_spill] sm:$0xff] }
 0x44e   :  { %1650 = vmatpush1.bf16.msra.mxu0 %v9011_v18  ;;  %v13159_v18 = vld [vmem:[#allocation12_spill] sm:$0xff] }
 0x44f   :  { %1755 = vmatprep.subr.bf16.mxu0 %v8299_v33  ;;  %1745 = vmatpush1.bf16.msra.mxu1 %v8679_v30  ;;  %v13160_v33 = vld [vmem:[#allocation14_spill] sm:$0xff]  ;;  %v13161_v30 = vld [vmem:[#allocation15_spill] sm:$0xff] }
 0x450   :  { %1796 = vmatprep.subr.bf16.mxu1 %v8685_v7  ;;  %v13162_v7 = vld [vmem:[#allocation18_spill] sm:$0xff] }
 0x451   :  { %1652 = vmatmul.mubr.bf16.vlgmr.msra.gmra.mrb[36].mxu0 %v8794_v16  ;;  %v13163_v16 = vld [vmem:[#allocation19_spill] sm:$0xff] }
 0x452   :  { %1756 = vmatpush1.bf16.msra.mxu0 %v8308_v40  ;;  %v13164_v40 = vld [vmem:[#allocation35_spill] sm:$0xff] }
 0x453   :  { %1757 = vmatprep.subr.bf16.mxu0 %v8314_v23  ;;  %v13165_v23 = vld [vmem:[#allocation21_spill] sm:$0xff] }
 0x456   :  { %1758 = vmatpush1.bf16.msra.mxu0 %v8320_v58  ;;  %v13166_v58 = vld [vmem:[#allocation22_spill] sm:$0xff] }
 0x457   :  { %1759 = vmatprep.subr.bf16.mxu0 %v8326_v31  ;;  %v13167_v31 = vld [vmem:[#allocation36_spill] sm:$0xff] }
 0x45a   :  { %1760 = vmatpush1.bf16.msra.mxu0 %v8332_v29  ;;  %v13168_v29 = vld [vmem:[#allocation37_spill] sm:$0xff] }
 0x45b   :  { %1761 = vmatprep.subr.bf16.mxu0 %v8338_v34  ;;  %v13169_v34 = vld [vmem:[#allocation23_spill] sm:$0xff] }
 0x45e   :  { %1762 = vmatpush1.bf16.msra.mxu0 %v13159_v18  ;;  %v13170_v18 = vld [vmem:[#allocation24_spill] sm:$0xff] }
 0x45f   :  { %1763 = vmatprep.subr.bf16.mxu0 %v13160_v33  ;;  %v13171_v33 = vld [vmem:[#allocation38_spill] sm:$0xff] }
 0x462   :  { %1764 = vmatpush1.bf16.msra.mxu0 %v13161_v30  ;;  %v13172_v30 = vld [vmem:[#allocation39_spill] sm:$0xff] }
 0x463   :  { %1765 = vmatprep.subr.bf16.mxu0 %v13162_v7  ;;  %v13173_v7 = vld [vmem:[#allocation46_spill] sm:$0xff] }
 0x466   :  { %1766 = vmatpush1.bf16.msra.mxu0 %v13163_v16  ;;  %v13174_v16 = vld [vmem:[#allocation85_spill] sm:$0xff] }
 0x467   :  { %1767 = vmatprep.subr.bf16.mxu0 %v13164_v40  ;;  %v13175_v40 = vld [vmem:[#allocation74_spill] sm:$0xff] }
 0x46a   :  { %1768 = vmatpush1.bf16.msra.mxu0 %v13165_v23  ;;  %v13176_v23 = vld [vmem:[#allocation71_spill] sm:$0xff] }
 0x46b   :  { %1769 = vmatprep.subr.bf16.mxu0 %v13166_v58  ;;  %v13177_v58 = vld [vmem:[#allocation72_spill] sm:$0xff] }
 0x46e   :  { %1770 = vmatpush1.bf16.msra.mxu0 %v13167_v31  ;;  %v13178_v31 = vld [vmem:[#allocation89_spill] sm:$0xff] }
 0x46f   :  { %1771 = vmatprep.subr.bf16.mxu0 %v13168_v29  ;;  %v13179_v29 = vld [vmem:[#allocation90_spill] sm:$0xff] }
 0x472   :  { %1772 = vmatpush1.bf16.msra.mxu0 %v13169_v34  ;;  %v13180_v34 = vld [vmem:[#allocation91_spill] sm:$0xff] }
 0x473   :  { %1773 = vmatprep.subr.bf16.mxu0 %v13170_v18  ;;  %v13181_v18 = vld [vmem:[#allocation92_spill] sm:$0xff] }
 0x476   :  { %1774 = vmatpush1.bf16.msra.mxu0 %v13171_v33  ;;  %v13182_v33 = vld [vmem:[#allocation93_spill] sm:$0xff] }
 0x477   :  { %1775 = vmatprep.subr.bf16.mxu0 %v13172_v30  ;;  %v13183_v30 = vld [vmem:[#allocation94_spill] sm:$0xff] }
 0x47a   :  { %1776 = vmatpush1.bf16.msra.mxu0 %v13173_v7  ;;  %v13184_v7 = vld [vmem:[#allocation25_spill] sm:$0xff] }
 0x47b   :  { %1777 = vmatprep.subr.bf16.mxu0 %v13174_v16 }
 0x47e   :  { %1778 = vmatpush1.bf16.msra.mxu0 %v13175_v40 }
 0x47f   :  { %1779 = vmatprep.subr.bf16.mxu0 %v13176_v23 }
 0x482   :  { %1780 = vmatpush1.bf16.msra.mxu0 %v13177_v58 }
 0x483   :  { %1781 = vmatprep.subr.bf16.mxu0 %v13178_v31 }
 0x486   :  { %1782 = vmatpush1.bf16.msra.mxu0 %v13179_v29 }
 0x487   :  { %1783 = vmatprep.subr.bf16.mxu0 %v13180_v34 }
 0x48a   :  { %1784 = vmatpush1.bf16.msra.mxu0 %v13181_v18 }
 0x48b   :  { %1785 = vmatprep.subr.bf16.mxu0 %v13182_v33 }
 0x48e   :  { %1786 = vmatpush1.bf16.msra.mxu0 %v13183_v30 }
 0x48f   :  { %1891 = vmatprep.subr.bf16.mxu0 %v13184_v7 }
 0x4e4   :  { %v1571_v16 = vpop.f32.mrb[32].mxu0  ;;  %v1612_v40 = vpop.f32.mrb[52].mxu1 }
 0x4e5   :  { %v1666_v23 = vadd.f32 %v1571_v16, %v13185_v15  ;;  %v1573_v41 = vpop.f32.mrb[33].mxu0  ;;  %v1614_v58 = vpop.f32.mrb[53].mxu1  ;;  %v1680_v15 = vadd.f32 %v8210_v17, %v1612_v40  ;;  %v13190_v40 = vld [vmem:[#allocation63_spill] sm:$0xff] }
 0x4e6   :  { %v1673_v31 = vadd.f32 %v1573_v41, %v13186_v21  ;;  %v1688_v29 = vadd.f32 %v1614_v58, %v13187_v14  ;;  %v1575_v39 = vpop.f32.mrb[34].mxu0  ;;  %v1616_v34 = vpop.f32.mrb[54].mxu1  ;;  %v13188_v21 = vld [vmem:[#allocation78_spill] sm:$0xff] }
 0x4e7   :  { %v5776_v25 = vmul.f32 -1.442695, %v1666_v23  ;;  %v1576_v18 = vpop.f32.mrb[35].mxu0  ;;  %v1617_v26 = vpop.f32.mrb[55].mxu1 }
 0x4e8   :  { %v5777_v33 = vmul.f32 -1.442695, %v1673_v31  ;;  %v5778_v34 = vmul.f32 -1.442695, %v1688_v29 }
 0x4e9   :  { %6609 = vpow2.f32 %v5776_v25 }
 0x4ea   :  { %6611 = vpow2.f32 %v5777_v33 }
 0x4f3   :  { %v6610_v30 = vpop.eup %6609 }
 0x4f4   :  { %v1670_v7 = vadd.f32 1.0, %v6610_v30  ;;  %v6612_v6 = vpop.eup %6611 }
 0x4f5   :  { %v1677_v62 = vadd.f32 1.0, %v6612_v6 }
 0x4f6   :  { %6613 = vrcp.f32 %v1670_v7 }
 0x4f7   :  { %6615 = vrcp.f32 %v1677_v62 }
 0x500   :  { %v6614_v16 = vpop.eup %6613 }
 0x501   :  { %v1681_v4 = vmul.f32 %v6614_v16, %v1680_v15  ;;  %v6616_v23 = vpop.eup %6615  ;;  %v13191_v16 = vld [vmem:[#allocation64_spill] sm:$0xff] }
 0x502   :  { %v1684_v26 = vsub.f32 1.0, %v6616_v23  ;;  %v1686_v33 = vmul.f32 %v6616_v23, %v8782_v10  ;;  %v13214_v10 = vld [vmem:[#allocation101_spill] sm:$0xff] }
 0x503   :  { %v1682_v58 = vadd.f32 %v1681_v4, %v13188_v21 }
 0x505   :  { %6617 = vtanh.f32 %v1682_v58 }
 0x506   :  { %6619 = vpow2.f32 %v5778_v34 }
 0x50f   :  { %v6618_v25 = vpop.eup %6617 }
 0x510   :  { %v1685_v31 = vmul.f32 %v6618_v25, %v1684_v26  ;;  %v6620_v39 = vpop.eup %6619 }
 0x511   :  { %v1692_v6 = vadd.f32 1.0, %v6620_v39 }
 0x512   :  { %v9056_v14 = vadd.f32 %v1686_v33, %v1685_v31 }
 0x513   :  { %6621 = vrcp.f32 %v1692_v6 }
 0x514   :  { %13189 = vst [vmem:[#allocation53_spill] sm:$0xff] %v9056_v14  ;;  %v9068_v6 = vpack.c.bf16 %v9056_v14, %v9056_v14 }
 0x51d   :  { %v6622_v29 = vpop.eup %6621 }
 0x524   :  { %v1653_v17 = vpop.f32.mrb[36].mxu0 }
 0x525   :  { %v1695_v18 = vadd.f32 %v1653_v17, %v13190_v40  ;;  %v1655_v62 = vpop.f32.mrb[37].mxu0  ;;  %v13193_v17 = vld [vmem:[#allocation41_spill] sm:$0xff]  ;;  %v13194_v40 = vld [vmem:[#allocation83_spill] sm:$0xff] }
 0x526   :  { %v1702_v4 = vadd.f32 %v8220_v35, %v1655_v62  ;;  %v1657_v41 = vpop.f32.mrb[38].mxu0  ;;  %v13196_v62 = vld [vmem:[#allocation76_spill] sm:$0xff] }
 0x527   :  { %v5779_v30 = vmul.f32 -1.442695, %v1695_v18  ;;  %v1658_v7 = vpop.f32.mrb[39].mxu0  ;;  %v13195_v18 = vld [vmem:[#allocation27_spill] sm:$0xff]  ;;  %v13198_v41 = vld [vmem:[#allocation66_spill] sm:$0xff] }
 0x528   :  { %v1703_v15 = vmul.f32 %v6622_v29, %v1702_v4  ;;  %v13197_v4 = vld [vmem:[#allocation29_spill] sm:$0xff]  ;;  %v13199_v29 = vld [vmem:[#allocation68_spill] sm:$0xff]  ;;  %v13201_v7 = vld [vmem:[#allocation31_spill] sm:$0xff] }
 0x529   :  { %6623 = vpow2.f32 %v5779_v30  ;;  %v13200_v30 = vld [vmem:[#allocation30_spill] sm:$0xff] }
 0x52a   :  { %v1704_v21 = vadd.f32 %v1703_v15, %v13191_v16  ;;  %v13202_v15 = vld [vmem:[#allocation95_spill] sm:$0xff]  ;;  %v13203_v16 = vld [vmem:[#allocation96_spill] sm:$0xff] }
 0x533   :  { %v6624_v58 = vpop.eup %6623 }
 0x534   :  { %v1699_v34 = vadd.f32 1.0, %v6624_v58  ;;  %v13205_v58 = vld [vmem:[#allocation33_spill] sm:$0xff] }
 0x536   :  { %6625 = vrcp.f32 %v1699_v34  ;;  %v13206_v34 = vld [vmem:[#allocation97_spill] sm:$0xff] }
 0x537   :  { %6627 = vtanh.f32 %v1704_v21  ;;  %v13204_v21 = vld [vmem:[#allocation32_spill] sm:$0xff] }
 0x540   :  { %v6626_v23 = vpop.eup %6625 }
 0x541   :  { %v1706_v26 = vsub.f32 1.0, %v6626_v23  ;;  %v6628_v25 = vpop.eup %6627  ;;  %v1708_v33 = vmul.f32 %v6626_v23, %v8788_v55  ;;  %v13207_v23 = vld [vmem:[#allocation98_spill] sm:$0xff]  ;;  %v13213_v55 = vld [vmem:[#allocation17_spill] sm:$0xff] }
 0x543   :  { %v1707_v31 = vmul.f32 %v6628_v25, %v1706_v26  ;;  %v13208_v26 = vld [vmem:[#allocation34_spill] sm:$0xff]  ;;  %v13209_v25 = vld [vmem:[#allocation13_spill] sm:$0xff] }
 0x545   :  { %v9062_v39 = vadd.f32 %v1708_v33, %v1707_v31  ;;  %v13210_v31 = vld [vmem:[#allocation99_spill] sm:$0xff]  ;;  %v13211_v33 = vld [vmem:[#allocation100_spill] sm:$0xff] }
 0x547   :  { %13192 = vst [vmem:[#allocation54_spill] sm:$0xff] %v9062_v39  ;;  %v1713_v35 = vpack.c.bf16 %v9062_v39, %v9062_v39 }
 0x549   :  { %1746 = vmatprep.mubr.bf16.mxu1 %v1713_v35  ;;  %1787 = vmatprep.mubr.bf16.mxu0 %v1713_v35 }
 0x54a   :  { %1747 = vmatmul.mubr.bf16.vlgmr.msra.gmra.mrb[56].mxu1 %v9068_v6  ;;  %1788 = vmatmul.mubr.bf16.vlgmr.msra.gmra.mrb[40].mxu0 %v9068_v6 }
 0x54b   :  { %1797 = vmatpush1.bf16.msra.mxu1 %v8801_v12  ;;  %1828 = vmatprep.mubr.bf16.mxu1 %v1713_v35  ;;  %v13212_v35 = vld [vmem:[#allocation16_spill] sm:$0xff] }
 0x54c   :  { %1798 = vmatprep.subr.bf16.mxu1 %v8807_v20  ;;  %1892 = vmatpush1.bf16.msra.mxu0 %v8469_v32 }
 0x54d   :  { %1893 = vmatprep.subr.bf16.mxu0 %v8475_v19 }
 0x54f   :  { %1799 = vmatpush1.bf16.msra.mxu1 %v8815_v38 }
 0x550   :  { %1800 = vmatprep.subr.bf16.mxu1 %v8821_v46  ;;  %1894 = vmatpush1.bf16.msra.mxu0 %v8483_v44 }
 0x551   :  { %1895 = vmatprep.subr.bf16.mxu0 %v8489_v45 }
 0x553   :  { %1801 = vmatpush1.bf16.msra.mxu1 %v8829_v51 }
 0x554   :  { %1802 = vmatprep.subr.bf16.mxu1 %v8835_v37  ;;  %1896 = vmatpush1.bf16.msra.mxu0 %v8497_v48 }
 0x555   :  { %1897 = vmatprep.subr.bf16.mxu0 %v8503_v49 }
 0x557   :  { %1803 = vmatpush1.bf16.msra.mxu1 %v8843_v27 }
 0x558   :  { %1804 = vmatprep.subr.bf16.mxu1 %v8849_v42  ;;  %1898 = vmatpush1.bf16.msra.mxu0 %v8511_v52 }
 0x559   :  { %1899 = vmatprep.subr.bf16.mxu0 %v8517_v53 }
 0x55b   :  { %1805 = vmatpush1.bf16.msra.mxu1 %v8857_v50 }
 0x55c   :  { %1806 = vmatprep.subr.bf16.mxu1 %v8863_v54  ;;  %1900 = vmatpush1.bf16.msra.mxu0 %v8525_v56 }
 0x55d   :  { %1901 = vmatprep.subr.bf16.mxu0 %v8531_v57 }
 0x55f   :  { %1807 = vmatpush1.bf16.msra.mxu1 %v8871_v11 }
 0x560   :  { %1808 = vmatprep.subr.bf16.mxu1 %v8877_v47  ;;  %1902 = vmatpush1.bf16.msra.mxu0 %v8539_v60 }
 0x561   :  { %1903 = vmatprep.subr.bf16.mxu0 %v8545_v61 }
 0x563   :  { %1809 = vmatpush1.bf16.msra.mxu1 %v8885_v13 }
 0x564   :  { %1810 = vmatprep.subr.bf16.mxu1 %v8891_v36  ;;  %1904 = vmatpush1.bf16.msra.mxu0 %v8553_v63 }
 0x565   :  { %1905 = vmatprep.subr.bf16.mxu0 %v8559_v0 }
 0x567   :  { %1811 = vmatpush1.bf16.msra.mxu1 %v8899_v43 }
 0x568   :  { %1812 = vmatprep.subr.bf16.mxu1 %v8905_v28  ;;  %1906 = vmatpush1.bf16.msra.mxu0 %v8567_v1 }
 0x569   :  { %1907 = vmatprep.subr.bf16.mxu0 %v8573_v2 }
 0x56b   :  { %1813 = vmatpush1.bf16.msra.mxu1 %v8913_v24 }
 0x56c   :  { %1814 = vmatprep.subr.bf16.mxu1 %v8919_v9  ;;  %1908 = vmatpush1.bf16.msra.mxu0 %v8581_v3 }
 0x56d   :  { %1909 = vmatprep.subr.bf16.mxu0 %v13193_v17 }
 0x56f   :  { %1815 = vmatpush1.bf16.msra.mxu1 %v13194_v40 }
 0x570   :  { %1816 = vmatprep.subr.bf16.mxu1 %v8933_v59  ;;  %1910 = vmatpush1.bf16.msra.mxu0 %v8595_v5 }
 0x571   :  { %1911 = vmatprep.subr.bf16.mxu0 %v13195_v18 }
 0x573   :  { %1817 = vmatpush1.bf16.msra.mxu1 %v13196_v62 }
 0x574   :  { %1818 = vmatprep.subr.bf16.mxu1 %v8947_v22  ;;  %1912 = vmatpush1.bf16.msra.mxu0 %v8609_v8 }
 0x575   :  { %1913 = vmatprep.subr.bf16.mxu0 %v13197_v4 }
 0x577   :  { %1819 = vmatpush1.bf16.msra.mxu1 %v13198_v41 }
 0x578   :  { %1820 = vmatprep.subr.bf16.mxu1 %v13199_v29  ;;  %1914 = vmatpush1.bf16.msra.mxu0 %v13200_v30 }
 0x579   :  { %1915 = vmatprep.subr.bf16.mxu0 %v13201_v7  ;;  %v13252_v7 = vld [vmem:[#allocation79_spill] sm:$0xff] }
 0x57b   :  { %1821 = vmatpush1.bf16.msra.mxu1 %v13202_v15  ;;  %v13251_v15 = vld [vmem:[#allocation59_spill] sm:$0xff] }
 0x57c   :  { %1822 = vmatprep.subr.bf16.mxu1 %v13203_v16  ;;  %1916 = vmatpush1.bf16.msra.mxu0 %v13204_v21  ;;  %v13215_v21 = vld [vmem:[#allocation5_spill] sm:$0xff] }
 0x57d   :  { %1917 = vmatprep.subr.bf16.mxu0 %v13205_v58  ;;  %v13216_v58 = vld [vmem:[#allocation20_spill] sm:$0xff] }
 0x57f   :  { %1823 = vmatpush1.bf16.msra.mxu1 %v13206_v34  ;;  %v13217_v34 = vld [vmem:[#allocation45_spill] sm:$0xff] }
 0x580   :  { %1824 = vmatprep.subr.bf16.mxu1 %v13207_v23  ;;  %1918 = vmatpush1.bf16.msra.mxu0 %v13208_v26  ;;  %v13218_v26 = vld [vmem:[#allocation6_spill] sm:$0xff]  ;;  %v13250_v23 = vld [vmem:[#allocation57_spill] sm:$0xff] }
 0x581   :  { %1919 = vmatprep.subr.bf16.mxu0 %v13209_v25  ;;  %v13219_v25 = vld [vmem:[#allocation7_spill] sm:$0xff] }
 0x583   :  { %1825 = vmatpush1.bf16.msra.mxu1 %v13210_v31  ;;  %v13220_v31 = vld [vmem:[#allocation8_spill] sm:$0xff] }
 0x584   :  { %1826 = vmatprep.subr.bf16.mxu1 %v13211_v33  ;;  %1920 = vmatpush1.bf16.msra.mxu0 %v13212_v35  ;;  %v13221_v33 = vld [vmem:[#allocation9_spill] sm:$0xff]  ;;  %v13222_v35 = vld [vmem:[#allocation10_spill] sm:$0xff] }
 0x585   :  { %1921 = vmatprep.subr.bf16.mxu0 %v13213_v55  ;;  %v13223_v55 = vld [vmem:[#allocation11_spill] sm:$0xff] }
 0x587   :  { %1827 = vmatpush1.bf16.msra.mxu1 %v13214_v10  ;;  %v13224_v10 = vld [vmem:[#allocation12_spill] sm:$0xff] }
 0x588   :  { %1932 = vmatprep.subr.bf16.mxu1 %v13215_v21  ;;  %1922 = vmatpush1.bf16.msra.mxu0 %v13216_v58  ;;  %v13225_v21 = vld [vmem:[#allocation14_spill] sm:$0xff]  ;;  %v13226_v58 = vld [vmem:[#allocation15_spill] sm:$0xff] }
 0x589   :  { %1973 = vmatprep.subr.bf16.mxu0 %v13217_v34  ;;  %v13227_v34 = vld [vmem:[#allocation18_spill] sm:$0xff] }
 0x58a   :  { %1829 = vmatmul.mubr.bf16.vlgmr.msra.gmra.mrb[60].mxu1 %v9068_v6  ;;  %v13228_v6 = vld [vmem:[#allocation19_spill] sm:$0xff] }
 0x58b   :  { %1933 = vmatpush1.bf16.msra.mxu1 %v13218_v26  ;;  %v13229_v26 = vld [vmem:[#allocation35_spill] sm:$0xff] }
 0x58c   :  { %1934 = vmatprep.subr.bf16.mxu1 %v13219_v25  ;;  %v13230_v25 = vld [vmem:[#allocation21_spill] sm:$0xff] }
 0x58f   :  { %1935 = vmatpush1.bf16.msra.mxu1 %v13220_v31  ;;  %v13231_v31 = vld [vmem:[#allocation22_spill] sm:$0xff] }
 0x590   :  { %1936 = vmatprep.subr.bf16.mxu1 %v13221_v33  ;;  %v13232_v33 = vld [vmem:[#allocation36_spill] sm:$0xff] }
 0x593   :  { %1937 = vmatpush1.bf16.msra.mxu1 %v13222_v35  ;;  %v13233_v35 = vld [vmem:[#allocation37_spill] sm:$0xff] }
 0x594   :  { %1938 = vmatprep.subr.bf16.mxu1 %v13223_v55  ;;  %v13234_v55 = vld [vmem:[#allocation23_spill] sm:$0xff] }
 0x597   :  { %1939 = vmatpush1.bf16.msra.mxu1 %v13224_v10  ;;  %v13235_v10 = vld [vmem:[#allocation24_spill] sm:$0xff] }
 0x598   :  { %1940 = vmatprep.subr.bf16.mxu1 %v13225_v21  ;;  %v13236_v21 = vld [vmem:[#allocation38_spill] sm:$0xff] }
 0x59b   :  { %1941 = vmatpush1.bf16.msra.mxu1 %v13226_v58  ;;  %v13237_v58 = vld [vmem:[#allocation39_spill] sm:$0xff] }
 0x59c   :  { %1942 = vmatprep.subr.bf16.mxu1 %v13227_v34  ;;  %v13238_v34 = vld [vmem:[#allocation46_spill] sm:$0xff] }
 0x59f   :  { %1943 = vmatpush1.bf16.msra.mxu1 %v13228_v6  ;;  %v13239_v6 = vld [vmem:[#allocation85_spill] sm:$0xff] }
 0x5a0   :  { %1944 = vmatprep.subr.bf16.mxu1 %v13229_v26  ;;  %v13240_v26 = vld [vmem:[#allocation74_spill] sm:$0xff] }
 0x5a3   :  { %1945 = vmatpush1.bf16.msra.mxu1 %v13230_v25  ;;  %v13241_v25 = vld [vmem:[#allocation71_spill] sm:$0xff] }
 0x5a4   :  { %1946 = vmatprep.subr.bf16.mxu1 %v13231_v31  ;;  %v13242_v31 = vld [vmem:[#allocation72_spill] sm:$0xff] }
 0x5a7   :  { %1947 = vmatpush1.bf16.msra.mxu1 %v13232_v33  ;;  %v13243_v33 = vld [vmem:[#allocation89_spill] sm:$0xff] }
 0x5a8   :  { %1948 = vmatprep.subr.bf16.mxu1 %v13233_v35  ;;  %v13244_v35 = vld [vmem:[#allocation90_spill] sm:$0xff] }
 0x5ab   :  { %1949 = vmatpush1.bf16.msra.mxu1 %v13234_v55  ;;  %v13245_v55 = vld [vmem:[#allocation91_spill] sm:$0xff] }
 0x5ac   :  { %1950 = vmatprep.subr.bf16.mxu1 %v13235_v10  ;;  %v13246_v10 = vld [vmem:[#allocation92_spill] sm:$0xff] }
 0x5af   :  { %1951 = vmatpush1.bf16.msra.mxu1 %v13236_v21  ;;  %v13247_v21 = vld [vmem:[#allocation93_spill] sm:$0xff] }
 0x5b0   :  { %1952 = vmatprep.subr.bf16.mxu1 %v13237_v58  ;;  %v13248_v58 = vld [vmem:[#allocation94_spill] sm:$0xff] }
 0x5b3   :  { %1953 = vmatpush1.bf16.msra.mxu1 %v13238_v34  ;;  %v13249_v34 = vld [vmem:[#allocation25_spill] sm:$0xff] }
 0x5b4   :  { %1954 = vmatprep.subr.bf16.mxu1 %v13239_v6 }
 0x5b7   :  { %1955 = vmatpush1.bf16.msra.mxu1 %v13240_v26 }
 0x5b8   :  { %1956 = vmatprep.subr.bf16.mxu1 %v13241_v25 }
 0x5bb   :  { %1957 = vmatpush1.bf16.msra.mxu1 %v13242_v31 }
 0x5bc   :  { %1958 = vmatprep.subr.bf16.mxu1 %v13243_v33 }
 0x5bf   :  { %1959 = vmatpush1.bf16.msra.mxu1 %v13244_v35 }
 0x5c0   :  { %1960 = vmatprep.subr.bf16.mxu1 %v13245_v55 }
 0x5c3   :  { %1961 = vmatpush1.bf16.msra.mxu1 %v13246_v10 }
 0x5c4   :  { %1962 = vmatprep.subr.bf16.mxu1 %v13247_v21 }
 0x5c7   :  { %1963 = vmatpush1.bf16.msra.mxu1 %v13248_v58 }
 0x5c8   :  { %2068 = vmatprep.subr.bf16.mxu1 %v13249_v34 }
 0x61d   :  { %v1748_v6 = vpop.f32.mrb[56].mxu1  ;;  %v1789_v26 = vpop.f32.mrb[40].mxu0 }
 0x61e   :  { %v1843_v25 = vadd.f32 %v1748_v6, %v13250_v23  ;;  %v1750_v16 = vpop.f32.mrb[57].mxu1  ;;  %v1791_v31 = vpop.f32.mrb[41].mxu0  ;;  %v9175_v23 = vld [vmem:[%s12549_s4] ss:$0 sm:$0xff] }
 0x61f   :  { %v1850_v33 = vadd.f32 %v1750_v16, %v13251_v15  ;;  %v1865_v35 = vadd.f32 %v1791_v31, %v13252_v7  ;;  %v1752_v30 = vpop.f32.mrb[58].mxu1  ;;  %v1793_v55 = vpop.f32.mrb[42].mxu0  ;;  %v1857_v7 = vadd.f32 %v9175_v23, %v1789_v26  ;;  %v13253_v16 = vld [vmem:[#allocation80_spill] sm:$0xff] }
 0x620   :  { %v5780_v29 = vmul.f32 -1.442695, %v1843_v25  ;;  %v1753_v10 = vpop.f32.mrb[59].mxu1  ;;  %v1794_v41 = vpop.f32.mrb[43].mxu0 }
 0x621   :  { %v5781_v21 = vmul.f32 -1.442695, %v1850_v33 }
 0x622   :  { %6629 = vpow2.f32 %v5780_v29  ;;  %v5782_v29 = vmul.f32 -1.442695, %v1865_v35  ;;  %v9186_v35 = vld [vmem:[%s12549_s4 + $0x1] ss:$0 sm:$0xff] }
 0x623   :  { %6631 = vpow2.f32 %v5781_v21 }
 0x62c   :  { %v6630_v58 = vpop.eup %6629 }
 0x62d   :  { %v1847_v34 = vadd.f32 1.0, %v6630_v58  ;;  %v6632_v4 = vpop.eup %6631  ;;  %v13254_v58 = vld [vmem:[#allocation58_spill] sm:$0xff] }
 0x62e   :  { %v1854_v8 = vadd.f32 1.0, %v6632_v4 }
 0x62f   :  { %6633 = vrcp.f32 %v1847_v34 }
 0x630   :  { %6635 = vrcp.f32 %v1854_v8 }
 0x639   :  { %v6634_v30 = vpop.eup %6633 }
 0x63a   :  { %v1858_v15 = vmul.f32 %v6634_v30, %v1857_v7  ;;  %v6636_v6 = vpop.eup %6635 }
 0x63b   :  { %v1861_v25 = vsub.f32 1.0, %v6636_v6  ;;  %v1863_v4 = vmul.f32 %v6636_v6, %v9056_v14  ;;  %v13255_v6 = vld [vmem:[#allocation60_spill] sm:$0xff] }
 0x63c   :  { %v1859_v41 = vadd.f32 %v1858_v15, %v13253_v16 }
 0x63e   :  { %6637 = vtanh.f32 %v1859_v41 }
 0x63f   :  { %6639 = vpow2.f32 %v5782_v29 }
 0x648   :  { %v6638_v31 = vpop.eup %6637 }
 0x649   :  { %v1862_v33 = vmul.f32 %v6638_v31, %v1861_v25  ;;  %v6640_v10 = vpop.eup %6639 }
 0x64a   :  { %v1869_v21 = vadd.f32 1.0, %v6640_v10 }
 0x64b   :  { %v9180_v55 = vadd.f32 %v1863_v4, %v1862_v33 }
 0x64c   :  { %6641 = vrcp.f32 %v1869_v21 }
 0x656   :  { %v6642_v15 = vpop.eup %6641 }
 0x65d   :  { %v1830_v26 = vpop.f32.mrb[60].mxu1 }
 0x65e   :  { %v1872_v34 = vadd.f32 %v1830_v26, %v13254_v58  ;;  %v1832_v8 = vpop.f32.mrb[61].mxu1 }
 0x65f   :  { %v1879_v7 = vadd.f32 %v9186_v35, %v1832_v8  ;;  %v1834_v30 = vpop.f32.mrb[62].mxu1  ;;  %v9197_v8 = vpack.c.bf16 %v9180_v55, %v9180_v55 }
 0x660   :  { %v5783_v16 = vmul.f32 -1.442695, %v1872_v34  ;;  %v1835_v41 = vpop.f32.mrb[63].mxu1  ;;  %v13276_v30 = vld [vmem:[#allocation45_spill] sm:$0xff] }
 0x661   :  { %v1880_v29 = vmul.f32 %v6642_v15, %v1879_v7  ;;  %v13275_v7 = vld [vmem:[#allocation20_spill] sm:$0xff]  ;;  %v9274_v15 = vld [vmem:[%s12547_s2 + $0x8] ss:$24 sps:$4 sm:$0xff]  }
 0x662   :  { %6643 = vpow2.f32 %v5783_v16  ;;  %v9280_v16 = vld [vmem:[%s12547_s2 + $0x3c] ss:$24 sps:$4 sm:$0xff]   ;;  %v9286_v41 = vld [vmem:[%s12547_s2 + $0x38] ss:$24 sps:$4 sm:$0xff]  }
 0x663   :  { %v1881_v25 = vadd.f32 %v1880_v29, %v13255_v6  ;;  %v9292_v29 = vld [vmem:[%s12547_s2 + $0x6c] ss:$24 sps:$4 sm:$0xff]   ;;  %v9298_v6 = vld [vmem:[%s12547_s2 + $0x68] ss:$24 sps:$4 sm:$0xff]  }
 0x66c   :  { %v6644_v31 = vpop.eup %6643 }
 0x66d   :  { %v1876_v33 = vadd.f32 1.0, %v6644_v31  ;;  %v9310_v31 = vld [vmem:[%s12547_s2 + $0x98] ss:$24 sps:$4 sm:$0xff]  }
 0x66f   :  { %6645 = vrcp.f32 %v1876_v33  ;;  %v9316_v33 = vld [vmem:[%s12547_s2 + $0xcc] ss:$24 sps:$4 sm:$0xff]  }
 0x670   :  { %6647 = vtanh.f32 %v1881_v25  ;;  %v9304_v25 = vld [vmem:[%s12547_s2 + $0x9c] ss:$24 sps:$4 sm:$0xff]   ;;  %13277 = vst [vmem:[#allocation81_spill] sm:$0xff] %v9316_v33 }
 0x679   :  { %v6646_v4 = vpop.eup %6645 }
 0x67a   :  { %v1883_v10 = vsub.f32 1.0, %v6646_v4  ;;  %v6648_v21 = vpop.eup %6647  ;;  %v1885_v58 = vmul.f32 %v6646_v4, %v9062_v39  ;;  %v9322_v4 = vld [vmem:[%s12547_s2 + $0xc8] ss:$24 sps:$4 sm:$0xff]   ;;  %v13297_v39 = vld [vmem:[#allocation91_spill] sm:$0xff] }
 0x67b   :  { %13278 = vst [vmem:[#allocation78_spill] sm:$0xff] %v9322_v4 }
 0x67c   :  { %v1884_v26 = vmul.f32 %v6648_v21, %v1883_v10  ;;  %v9328_v10 = vld [vmem:[%s12547_s2 + $0xfc] ss:$24 sps:$4 sm:$0xff]   ;;  %v9334_v21 = vld [vmem:[%s12547_s2 + $0xf8] ss:$24 sps:$4 sm:$0xff]  }
 0x67d   :  { %13279 = vst [vmem:[#allocation63_spill] sm:$0xff] %v9328_v10  ;;  %13280 = vst [vmem:[#allocation64_spill] sm:$0xff] %v9334_v21 }
 0x67e   :  { %v9191_v14 = vadd.f32 %v1885_v58, %v1884_v26  ;;  %v9340_v26 = vld [vmem:[%s12547_s2 + $0x12c] ss:$24 sps:$4 sm:$0xff]   ;;  %v9346_v58 = vld [vmem:[%s12547_s2 + $0x128] ss:$24 sps:$4 sm:$0xff]  }
 0x67f   :  { %13281 = vst [vmem:[#allocation41_spill] sm:$0xff] %v9340_v26  ;;  %13282 = vst [vmem:[#allocation83_spill] sm:$0xff] %v9346_v58 }
 0x680   :  { %v1890_v34 = vpack.c.bf16 %v9191_v14, %v9191_v14 }
 0x682   :  { %1923 = vmatprep.mubr.bf16.mxu0 %v1890_v34  ;;  %1964 = vmatprep.mubr.bf16.mxu1 %v1890_v34 }
 0x683   :  { %1924 = vmatmul.mubr.bf16.vlgmr.msra.gmra.mrb[44].mxu0 %v9197_v8  ;;  %1965 = vmatmul.mubr.bf16.vlgmr.msra.gmra.mrb[64].mxu1 %v9197_v8 }
 0x684   :  { %1974 = vmatpush1.bf16.msra.mxu0 %v8801_v12  ;;  %2005 = vmatprep.mubr.bf16.mxu0 %v1890_v34  ;;  %v9352_v34 = vld [vmem:[%s12547_s2 + $0x15c] ss:$24 sps:$4 sm:$0xff]  }
 0x685   :  { %1975 = vmatprep.subr.bf16.mxu0 %v8807_v20  ;;  %2069 = vmatpush1.bf16.msra.mxu1 %v8469_v32  ;;  %v13256_v32 = vld [vmem:[#allocation28_spill] sm:$0xff]  ;;  %13283 = vst [vmem:[#allocation27_spill] sm:$0xff] %v9352_v34 }
 0x686   :  { %2070 = vmatprep.subr.bf16.mxu1 %v8475_v19  ;;  %v13257_v19 = vld [vmem:[#allocation29_spill] sm:$0xff] }
 0x688   :  { %1976 = vmatpush1.bf16.msra.mxu0 %v8815_v38 }
 0x689   :  { %1977 = vmatprep.subr.bf16.mxu0 %v8821_v46  ;;  %2071 = vmatpush1.bf16.msra.mxu1 %v8483_v44  ;;  %v13258_v44 = vld [vmem:[#allocation66_spill] sm:$0xff] }
 0x68a   :  { %2072 = vmatprep.subr.bf16.mxu1 %v8489_v45  ;;  %v13259_v45 = vld [vmem:[#allocation68_spill] sm:$0xff] }
 0x68c   :  { %1978 = vmatpush1.bf16.msra.mxu0 %v8829_v51 }
 0x68d   :  { %1979 = vmatprep.subr.bf16.mxu0 %v8835_v37  ;;  %2073 = vmatpush1.bf16.msra.mxu1 %v8497_v48  ;;  %v13260_v48 = vld [vmem:[#allocation30_spill] sm:$0xff] }
 0x68e   :  { %2074 = vmatprep.subr.bf16.mxu1 %v8503_v49  ;;  %v13261_v49 = vld [vmem:[#allocation31_spill] sm:$0xff] }
 0x690   :  { %1980 = vmatpush1.bf16.msra.mxu0 %v8843_v27 }
 0x691   :  { %1981 = vmatprep.subr.bf16.mxu0 %v8849_v42  ;;  %2075 = vmatpush1.bf16.msra.mxu1 %v8511_v52  ;;  %v13262_v52 = vld [vmem:[#allocation95_spill] sm:$0xff] }
 0x692   :  { %2076 = vmatprep.subr.bf16.mxu1 %v8517_v53  ;;  %v13263_v53 = vld [vmem:[#allocation96_spill] sm:$0xff] }
 0x694   :  { %1982 = vmatpush1.bf16.msra.mxu0 %v8857_v50 }
 0x695   :  { %1983 = vmatprep.subr.bf16.mxu0 %v8863_v54  ;;  %2077 = vmatpush1.bf16.msra.mxu1 %v8525_v56  ;;  %v13264_v56 = vld [vmem:[#allocation32_spill] sm:$0xff] }
 0x696   :  { %2078 = vmatprep.subr.bf16.mxu1 %v8531_v57  ;;  %v13265_v57 = vld [vmem:[#allocation33_spill] sm:$0xff] }
 0x698   :  { %1984 = vmatpush1.bf16.msra.mxu0 %v8871_v11 }
 0x699   :  { %1985 = vmatprep.subr.bf16.mxu0 %v8877_v47  ;;  %2079 = vmatpush1.bf16.msra.mxu1 %v8539_v60  ;;  %v13266_v60 = vld [vmem:[#allocation97_spill] sm:$0xff] }
 0x69a   :  { %2080 = vmatprep.subr.bf16.mxu1 %v8545_v61  ;;  %v13267_v61 = vld [vmem:[#allocation98_spill] sm:$0xff] }
 0x69c   :  { %1986 = vmatpush1.bf16.msra.mxu0 %v8885_v13 }
 0x69d   :  { %1987 = vmatprep.subr.bf16.mxu0 %v8891_v36  ;;  %2081 = vmatpush1.bf16.msra.mxu1 %v8553_v63  ;;  %v13268_v63 = vld [vmem:[#allocation34_spill] sm:$0xff] }
 0x69e   :  { %2082 = vmatprep.subr.bf16.mxu1 %v8559_v0  ;;  %v13269_v0 = vld [vmem:[#allocation13_spill] sm:$0xff] }
 0x6a0   :  { %1988 = vmatpush1.bf16.msra.mxu0 %v8899_v43 }
 0x6a1   :  { %1989 = vmatprep.subr.bf16.mxu0 %v8905_v28  ;;  %2083 = vmatpush1.bf16.msra.mxu1 %v8567_v1  ;;  %v13270_v1 = vld [vmem:[#allocation99_spill] sm:$0xff] }
 0x6a2   :  { %2084 = vmatprep.subr.bf16.mxu1 %v8573_v2  ;;  %v13271_v2 = vld [vmem:[#allocation100_spill] sm:$0xff] }
 0x6a4   :  { %1990 = vmatpush1.bf16.msra.mxu0 %v8913_v24 }
 0x6a5   :  { %1991 = vmatprep.subr.bf16.mxu0 %v8919_v9  ;;  %2085 = vmatpush1.bf16.msra.mxu1 %v8581_v3  ;;  %v13272_v3 = vld [vmem:[#allocation16_spill] sm:$0xff] }
 0x6a6   :  { %2086 = vmatprep.subr.bf16.mxu1 %v13193_v17  ;;  %v13274_v17 = vld [vmem:[#allocation101_spill] sm:$0xff] }
 0x6a8   :  { %1992 = vmatpush1.bf16.msra.mxu0 %v13194_v40 }
 0x6a9   :  { %1993 = vmatprep.subr.bf16.mxu0 %v8933_v59  ;;  %2087 = vmatpush1.bf16.msra.mxu1 %v8595_v5  ;;  %v13273_v5 = vld [vmem:[#allocation17_spill] sm:$0xff] }
 0x6aa   :  { %2088 = vmatprep.subr.bf16.mxu1 %v13195_v18  ;;  %v9265_v18 = vld [vmem:[%s12547_s2 + $0xc] ss:$24 sps:$4 sm:$0xff]  }
 0x6ac   :  { %1994 = vmatpush1.bf16.msra.mxu0 %v13196_v62 }
 0x6ad   :  { %1995 = vmatprep.subr.bf16.mxu0 %v8947_v22  ;;  %2089 = vmatpush1.bf16.msra.mxu1 %v13256_v32  ;;  %v9364_v32 = vld [vmem:[%s12547_s2 + $0x18c] ss:$24 sps:$4 sm:$0xff]  }
 0x6ae   :  { %2090 = vmatprep.subr.bf16.mxu1 %v13257_v19  ;;  %13285 = vst [vmem:[#allocation5_spill] sm:$0xff] %v9364_v32  ;;  %v9370_v19 = vld [vmem:[%s12547_s2 + $0x188] ss:$24 sps:$4 sm:$0xff]  }
 0x6af   :  { %13286 = vst [vmem:[#allocation6_spill] sm:$0xff] %v9370_v19 }
 0x6b0   :  { %1996 = vmatpush1.bf16.msra.mxu0 %v13258_v44 }
 0x6b1   :  { %1997 = vmatprep.subr.bf16.mxu0 %v13259_v45  ;;  %2091 = vmatpush1.bf16.msra.mxu1 %v13260_v48  ;;  %v9376_v48 = vld [vmem:[%s12547_s2 + $0x1bc] ss:$24 sps:$4 sm:$0xff]  }
 0x6b2   :  { %2092 = vmatprep.subr.bf16.mxu1 %v13261_v49  ;;  %13287 = vst [vmem:[#allocation7_spill] sm:$0xff] %v9376_v48  ;;  %v9382_v49 = vld [vmem:[%s12547_s2 + $0x1b8] ss:$24 sps:$4 sm:$0xff]  }
 0x6b3   :  { %13288 = vst [vmem:[#allocation8_spill] sm:$0xff] %v9382_v49 }
 0x6b4   :  { %1998 = vmatpush1.bf16.msra.mxu0 %v13262_v52 }
 0x6b5   :  { %1999 = vmatprep.subr.bf16.mxu0 %v13263_v53  ;;  %2093 = vmatpush1.bf16.msra.mxu1 %v13264_v56  ;;  %v9388_v56 = vld [vmem:[%s12547_s2 + $0x1ec] ss:$24 sps:$4 sm:$0xff]  }
 0x6b6   :  { %2094 = vmatprep.subr.bf16.mxu1 %v13265_v57  ;;  %13289 = vst [vmem:[#allocation9_spill] sm:$0xff] %v9388_v56  ;;  %v13290_v57 = vld [vmem:[#allocation46_spill] sm:$0xff] }
 0x6b8   :  { %2000 = vmatpush1.bf16.msra.mxu0 %v13266_v60 }
 0x6b9   :  { %2001 = vmatprep.subr.bf16.mxu0 %v13267_v61  ;;  %2095 = vmatpush1.bf16.msra.mxu1 %v13268_v63  ;;  %v13291_v63 = vld [vmem:[#allocation85_spill] sm:$0xff] }
 0x6ba   :  { %2096 = vmatprep.subr.bf16.mxu1 %v13269_v0  ;;  %v13292_v0 = vld [vmem:[#allocation74_spill] sm:$0xff] }
 0x6bc   :  { %2002 = vmatpush1.bf16.msra.mxu0 %v13270_v1 }
 0x6bd   :  { %2003 = vmatprep.subr.bf16.mxu0 %v13271_v2  ;;  %2097 = vmatpush1.bf16.msra.mxu1 %v13272_v3  ;;  %v13293_v3 = vld [vmem:[#allocation71_spill] sm:$0xff] }
 0x6be   :  { %2098 = vmatprep.subr.bf16.mxu1 %v13273_v5  ;;  %v13294_v5 = vld [vmem:[#allocation72_spill] sm:$0xff] }
 0x6c0   :  { %2004 = vmatpush1.bf16.msra.mxu0 %v13274_v17 }
 0x6c1   :  { %2109 = vmatprep.subr.bf16.mxu0 %v9265_v18  ;;  %2099 = vmatpush1.bf16.msra.mxu1 %v13275_v7  ;;  %v13295_v7 = vld [vmem:[#allocation89_spill] sm:$0xff] }
 0x6c2   :  { %2150 = vmatprep.subr.bf16.mxu1 %v13276_v30  ;;  %v13296_v30 = vld [vmem:[#allocation90_spill] sm:$0xff] }
 0x6c3   :  { %2006 = vmatmul.mubr.bf16.vlgmr.msra.gmra.mrb[48].mxu0 %v9197_v8  ;;  %v9358_v8 = vld [vmem:[%s12547_s2 + $0x158] ss:$24 sps:$4 sm:$0xff]  }
 0x6c4   :  { %2110 = vmatpush1.bf16.msra.mxu0 %v9274_v15  ;;  %13284 = vst [vmem:[#allocation76_spill] sm:$0xff] %v9358_v8 }
 0x6c5   :  { %2111 = vmatprep.subr.bf16.mxu0 %v9280_v16 }
 0x6c8   :  { %2112 = vmatpush1.bf16.msra.mxu0 %v9286_v41 }
 0x6c9   :  { %2113 = vmatprep.subr.bf16.mxu0 %v9292_v29 }
 0x6cc   :  { %2114 = vmatpush1.bf16.msra.mxu0 %v9298_v6 }
 0x6cd   :  { %2115 = vmatprep.subr.bf16.mxu0 %v9304_v25 }
 0x6d0   :  { %2116 = vmatpush1.bf16.msra.mxu0 %v9310_v31 }
 0x6d1   :  { %2117 = vmatprep.subr.bf16.mxu0 %v9316_v33 }
 0x6d4   :  { %2118 = vmatpush1.bf16.msra.mxu0 %v9322_v4 }
 0x6d5   :  { %2119 = vmatprep.subr.bf16.mxu0 %v9328_v10 }
 0x6d8   :  { %2120 = vmatpush1.bf16.msra.mxu0 %v9334_v21 }
 0x6d9   :  { %2121 = vmatprep.subr.bf16.mxu0 %v9340_v26 }
 0x6dc   :  { %2122 = vmatpush1.bf16.msra.mxu0 %v9346_v58 }
 0x6dd   :  { %2123 = vmatprep.subr.bf16.mxu0 %v9352_v34 }
 0x6e0   :  { %2124 = vmatpush1.bf16.msra.mxu0 %v9358_v8 }
 0x6e1   :  { %2125 = vmatprep.subr.bf16.mxu0 %v9364_v32 }
 0x6e4   :  { %2126 = vmatpush1.bf16.msra.mxu0 %v9370_v19 }
 0x6e5   :  { %2127 = vmatprep.subr.bf16.mxu0 %v9376_v48  ;;  %v13299_v48 = vld [vmem:[#allocation93_spill] sm:$0xff] }
 0x6e8   :  { %2128 = vmatpush1.bf16.msra.mxu0 %v9382_v49  ;;  %v13298_v49 = vld [vmem:[#allocation92_spill] sm:$0xff] }
 0x6e9   :  { %2129 = vmatprep.subr.bf16.mxu0 %v9388_v56  ;;  %v13300_v56 = vld [vmem:[#allocation94_spill] sm:$0xff] }
 0x6ec   :  { %2130 = vmatpush1.bf16.msra.mxu0 %v13290_v57  ;;  %v6988_v57 = vld [vmem:[%s12547_s2 + $0x4] ss:$24 sps:$4 sm:$0xff]  }
 0x6ed   :  { %2131 = vmatprep.subr.bf16.mxu0 %v13291_v63 }
 0x6f0   :  { %2132 = vmatpush1.bf16.msra.mxu0 %v13292_v0 }
 0x6f1   :  { %2133 = vmatprep.subr.bf16.mxu0 %v13293_v3  ;;  %v13301_v3 = vld [vmem:[#allocation61_spill] sm:$0xff] }
 0x6f4   :  { %2134 = vmatpush1.bf16.msra.mxu0 %v13294_v5 }
 0x6f5   :  { %2135 = vmatprep.subr.bf16.mxu0 %v13295_v7 }
 0x6f8   :  { %2136 = vmatpush1.bf16.msra.mxu0 %v13296_v30  ;;  %v13302_v30 = vld [vmem:[#allocation62_spill] sm:$0xff] }
 0x6f9   :  { %2137 = vmatprep.subr.bf16.mxu0 %v13297_v39  ;;  %v13303_v39 = vld [vmem:[#allocation77_spill] sm:$0xff] }
 0x6fc   :  { %2138 = vmatpush1.bf16.msra.mxu0 %v13298_v49 }
 0x6fd   :  { %2139 = vmatprep.subr.bf16.mxu0 %v13299_v48 }
 0x700   :  { %2140 = vmatpush1.bf16.msra.mxu0 %v13300_v56 }
 0x701   :  { %2245 = vmatprep.subr.bf16.mxu0 %v6988_v57 }
 0x756   :  { %v1925_v63 = vpop.f32.mrb[44].mxu0  ;;  %v1966_v0 = vpop.f32.mrb[64].mxu1 }
 0x757   :  { %v2020_v5 = vadd.f32 %v1925_v63, %v13301_v3  ;;  %v1927_v7 = vpop.f32.mrb[45].mxu0  ;;  %v1968_v19 = vpop.f32.mrb[65].mxu1  ;;  %v2034_v63 = vadd.f32 %v9175_v23, %v1966_v0 }
 0x758   :  { %v2027_v32 = vadd.f32 %v1927_v7, %v13302_v30  ;;  %v2042_v8 = vadd.f32 %v1968_v19, %v13303_v39  ;;  %v1929_v49 = vpop.f32.mrb[46].mxu0  ;;  %v1970_v34 = vpop.f32.mrb[66].mxu1  ;;  %v13304_v7 = vld [vmem:[#allocation82_spill] sm:$0xff] }
 0x759   :  { %v5784_v48 = vmul.f32 -1.442695, %v2020_v5  ;;  %v1930_v58 = vpop.f32.mrb[47].mxu0  ;;  %v1971_v56 = vpop.f32.mrb[67].mxu1  ;;  %v13305_v49 = vld [vmem:[#allocation55_spill] sm:$0xff] }
 0x75a   :  { %v5785_v26 = vmul.f32 -1.442695, %v2027_v32  ;;  %v5786_v34 = vmul.f32 -1.442695, %v2042_v8 }
 0x75b   :  { %6649 = vpow2.f32 %v5784_v48 }
 0x75c   :  { %6651 = vpow2.f32 %v5785_v26 }
 0x765   :  { %v6650_v21 = vpop.eup %6649 }
 0x766   :  { %v2024_v57 = vadd.f32 1.0, %v6650_v21  ;;  %v6652_v10 = vpop.eup %6651 }
 0x767   :  { %v2031_v4 = vadd.f32 1.0, %v6652_v10 }
 0x768   :  { %6653 = vrcp.f32 %v2024_v57 }
 0x769   :  { %6655 = vrcp.f32 %v2031_v4 }
 0x772   :  { %v6654_v3 = vpop.eup %6653 }
 0x773   :  { %v2035_v33 = vmul.f32 %v6654_v3, %v2034_v63  ;;  %v6656_v5 = vpop.eup %6655 }
 0x774   :  { %v2038_v58 = vsub.f32 1.0, %v6656_v5  ;;  %v2040_v26 = vmul.f32 %v6656_v5, %v9180_v55 }
 0x775   :  { %v2036_v19 = vadd.f32 %v2035_v33, %v13304_v7  ;;  %v13306_v7 = vld [vmem:[#allocation56_spill] sm:$0xff] }
 0x777   :  { %6657 = vtanh.f32 %v2036_v19 }
 0x778   :  { %6659 = vpow2.f32 %v5786_v34 }
 0x781   :  { %v6658_v30 = vpop.eup %6657 }
 0x782   :  { %v2039_v32 = vmul.f32 %v6658_v30, %v2038_v58  ;;  %v6660_v39 = vpop.eup %6659 }
 0x783   :  { %v2046_v10 = vadd.f32 1.0, %v6660_v39 }
 0x784   :  { %v9411_v21 = vadd.f32 %v2040_v26, %v2039_v32 }
 0x785   :  { %6661 = vrcp.f32 %v2046_v10 }
 0x78f   :  { %v6662_v8 = vpop.eup %6661 }
 0x796   :  { %v2007_v0 = vpop.f32.mrb[48].mxu0 }
 0x797   :  { %v2049_v48 = vadd.f32 %v2007_v0, %v13305_v49  ;;  %v2009_v4 = vpop.f32.mrb[49].mxu0  ;;  %v9423_v49 = vpack.c.bf16 %v9411_v21, %v9411_v21 }
 0x798   :  { %v2056_v33 = vadd.f32 %v9186_v35, %v2009_v4  ;;  %v2011_v56 = vpop.f32.mrb[50].mxu0  ;;  %v6990_v4 = vld [vmem:[%s12547_s2 + $0x34] ss:$24 sps:$4 sm:$0xff]  }
 0x799   :  { %v5787_v57 = vmul.f32 -1.442695, %v2049_v48  ;;  %v2012_v63 = vpop.f32.mrb[51].mxu0  ;;  %v6989_v48 = vld [vmem:[%s12547_s2] ss:$24 sps:$4 sm:$0xff]  }
 0x79a   :  { %v2057_v3 = vmul.f32 %v6662_v8, %v2056_v33  ;;  %v13309_v33 = vld [vmem:[#allocation63_spill] sm:$0xff]  ;;  %v13310_v56 = vld [vmem:[#allocation64_spill] sm:$0xff]  ;;  %v7021_v63 = vld [vmem:[%s12547_s2 + $0x1e8] ss:$24 sps:$4 sm:$0xff]  }
 0x79b   :  { %6663 = vpow2.f32 %v5787_v57  ;;  %v13318_v8 = vld [vmem:[#allocation8_spill] sm:$0xff]  ;;  %v13319_v57 = vld [vmem:[#allocation9_spill] sm:$0xff] }
 0x79c   :  { %v2058_v19 = vadd.f32 %v2057_v3, %v13306_v7  ;;  %v7022_v3 = vld [vmem:[%s12547_s2 + $0x21c] ss:$24 sps:$4 sm:$0xff]   ;;  %v7023_v7 = vld [vmem:[%s12547_s2 + $0x218] ss:$24 sps:$4 sm:$0xff]  }
 0x7a5   :  { %v6664_v34 = vpop.eup %6663 }
 0x7a6   :  { %v2053_v5 = vadd.f32 1.0, %v6664_v34  ;;  %v7025_v34 = vld [vmem:[%s12547_s2 + $0x248] ss:$24 sps:$4 sm:$0xff]  }
 0x7a8   :  { %6665 = vrcp.f32 %v2053_v5  ;;  %v7026_v5 = vld [vmem:[%s12547_s2 + $0x27c] ss:$24 sps:$4 sm:$0xff]  }
 0x7a9   :  { %6667 = vtanh.f32 %v2058_v19  ;;  %v7024_v19 = vld [vmem:[%s12547_s2 + $0x24c] ss:$24 sps:$4 sm:$0xff]  }
 0x7b2   :  { %v6666_v58 = vpop.eup %6665 }
 0x7b3   :  { %v2060_v30 = vsub.f32 1.0, %v6666_v58  ;;  %v6668_v32 = vpop.eup %6667  ;;  %v2062_v39 = vmul.f32 %v6666_v58, %v9191_v14  ;;  %v7027_v58 = vld [vmem:[%s12547_s2 + $0x278] ss:$24 sps:$4 sm:$0xff]  }
 0x7b5   :  { %v2061_v26 = vmul.f32 %v6668_v32, %v2060_v30  ;;  %v7028_v30 = vld [vmem:[%s12547_s2 + $0x2ac] ss:$24 sps:$4 sm:$0xff]   ;;  %v7029_v32 = vld [vmem:[%s12547_s2 + $0x2a8] ss:$24 sps:$4 sm:$0xff]  }
 0x7b7   :  { %v9417_v10 = vadd.f32 %v2062_v39, %v2061_v26  ;;  %v7030_v26 = vld [vmem:[%s12547_s2 + $0x2dc] ss:$24 sps:$4 sm:$0xff]   ;;  %v7031_v39 = vld [vmem:[%s12547_s2 + $0x2d8] ss:$24 sps:$4 sm:$0xff]  }
 0x7b9   :  { %v2067_v0 = vpack.c.bf16 %v9417_v10, %v9417_v10 }
 0x7bb   :  { %2100 = vmatprep.mubr.bf16.mxu1 %v2067_v0  ;;  %2141 = vmatprep.mubr.bf16.mxu0 %v2067_v0 }
 0x7bc   :  { %2101 = vmatmul.mubr.bf16.vlgmr.msra.gmra.mrb[68].mxu1 %v9423_v49  ;;  %2142 = vmatmul.mubr.bf16.vlgmr.msra.gmra.mrb[52].mxu0 %v9423_v49 }
 0x7bd   :  { %2151 = vmatpush1.bf16.msra.mxu1 %v8801_v12  ;;  %2182 = vmatprep.mubr.bf16.mxu1 %v2067_v0  ;;  %v6991_v12 = vld [vmem:[%s12547_s2 + $0x30] ss:$24 sps:$4 sm:$0xff]  }
 0x7be   :  { %2152 = vmatprep.subr.bf16.mxu1 %v8807_v20  ;;  %2246 = vmatpush1.bf16.msra.mxu0 %v6989_v48  ;;  %v6992_v20 = vld [vmem:[%s12547_s2 + $0x64] ss:$24 sps:$4 sm:$0xff]  }
 0x7bf   :  { %2247 = vmatprep.subr.bf16.mxu0 %v6990_v4  ;;  %v13320_v48 = vld [vmem:[#allocation65_spill] sm:$0xff] }
 0x7c1   :  { %2153 = vmatpush1.bf16.msra.mxu1 %v8815_v38  ;;  %v6993_v38 = vld [vmem:[%s12547_s2 + $0x60] ss:$24 sps:$4 sm:$0xff]  }
 0x7c2   :  { %2154 = vmatprep.subr.bf16.mxu1 %v8821_v46  ;;  %2248 = vmatpush1.bf16.msra.mxu0 %v6991_v12  ;;  %v6994_v46 = vld [vmem:[%s12547_s2 + $0x94] ss:$24 sps:$4 sm:$0xff]  }
 0x7c3   :  { %2249 = vmatprep.subr.bf16.mxu0 %v6992_v20 }
 0x7c5   :  { %2155 = vmatpush1.bf16.msra.mxu1 %v8829_v51  ;;  %v6995_v51 = vld [vmem:[%s12547_s2 + $0x90] ss:$24 sps:$4 sm:$0xff]  }
 0x7c6   :  { %2156 = vmatprep.subr.bf16.mxu1 %v8835_v37  ;;  %2250 = vmatpush1.bf16.msra.mxu0 %v6993_v38  ;;  %v6996_v37 = vld [vmem:[%s12547_s2 + $0xc4] ss:$24 sps:$4 sm:$0xff]   ;;  %v13321_v38 = vld [vmem:[#allocation67_spill] sm:$0xff] }
 0x7c7   :  { %2251 = vmatprep.subr.bf16.mxu0 %v6994_v46 }
 0x7c9   :  { %2157 = vmatpush1.bf16.msra.mxu1 %v8843_v27  ;;  %v6997_v27 = vld [vmem:[%s12547_s2 + $0xc0] ss:$24 sps:$4 sm:$0xff]  }
 0x7ca   :  { %2158 = vmatprep.subr.bf16.mxu1 %v8849_v42  ;;  %2252 = vmatpush1.bf16.msra.mxu0 %v6995_v51  ;;  %v6998_v42 = vld [vmem:[%s12547_s2 + $0xf4] ss:$24 sps:$4 sm:$0xff]  }
 0x7cb   :  { %2253 = vmatprep.subr.bf16.mxu0 %v6996_v37  ;;  %v13322_v51 = vld [vmem:[#allocation75_spill] sm:$0xff] }
 0x7cd   :  { %2159 = vmatpush1.bf16.msra.mxu1 %v8857_v50  ;;  %v6999_v50 = vld [vmem:[%s12547_s2 + $0xf0] ss:$24 sps:$4 sm:$0xff]  }
 0x7ce   :  { %2160 = vmatprep.subr.bf16.mxu1 %v8863_v54  ;;  %2254 = vmatpush1.bf16.msra.mxu0 %v6997_v27  ;;  %v7000_v54 = vld [vmem:[%s12547_s2 + $0x124] ss:$24 sps:$4 sm:$0xff]  }
 0x7cf   :  { %2255 = vmatprep.subr.bf16.mxu0 %v6998_v42 }
 0x7d1   :  { %2161 = vmatpush1.bf16.msra.mxu1 %v8871_v11  ;;  %v7001_v11 = vld [vmem:[%s12547_s2 + $0x120] ss:$24 sps:$4 sm:$0xff]  }
 0x7d2   :  { %2162 = vmatprep.subr.bf16.mxu1 %v8877_v47  ;;  %2256 = vmatpush1.bf16.msra.mxu0 %v6999_v50  ;;  %v7002_v47 = vld [vmem:[%s12547_s2 + $0x154] ss:$24 sps:$4 sm:$0xff]  }
 0x7d3   :  { %2257 = vmatprep.subr.bf16.mxu0 %v7000_v54 }
 0x7d5   :  { %2163 = vmatpush1.bf16.msra.mxu1 %v8885_v13  ;;  %v7003_v13 = vld [vmem:[%s12547_s2 + $0x150] ss:$24 sps:$4 sm:$0xff]  }
 0x7d6   :  { %2164 = vmatprep.subr.bf16.mxu1 %v8891_v36  ;;  %2258 = vmatpush1.bf16.msra.mxu0 %v7001_v11  ;;  %v7004_v36 = vld [vmem:[%s12547_s2 + $0x184] ss:$24 sps:$4 sm:$0xff]  }
 0x7d7   :  { %2259 = vmatprep.subr.bf16.mxu0 %v7002_v47 }
 0x7d9   :  { %2165 = vmatpush1.bf16.msra.mxu1 %v8899_v43  ;;  %v7005_v43 = vld [vmem:[%s12547_s2 + $0x180] ss:$24 sps:$4 sm:$0xff]  }
 0x7da   :  { %2166 = vmatprep.subr.bf16.mxu1 %v8905_v28  ;;  %2260 = vmatpush1.bf16.msra.mxu0 %v7003_v13  ;;  %v7006_v28 = vld [vmem:[%s12547_s2 + $0x1b4] ss:$24 sps:$4 sm:$0xff]  }
 0x7db   :  { %2261 = vmatprep.subr.bf16.mxu0 %v7004_v36 }
 0x7dd   :  { %2167 = vmatpush1.bf16.msra.mxu1 %v8913_v24  ;;  %v7007_v24 = vld [vmem:[%s12547_s2 + $0x1b0] ss:$24 sps:$4 sm:$0xff]  }
 0x7de   :  { %2168 = vmatprep.subr.bf16.mxu1 %v8919_v9  ;;  %2262 = vmatpush1.bf16.msra.mxu0 %v7005_v43  ;;  %v7008_v9 = vld [vmem:[%s12547_s2 + $0x1e4] ss:$24 sps:$4 sm:$0xff]  }
 0x7df   :  { %2263 = vmatprep.subr.bf16.mxu0 %v7006_v28 }
 0x7e1   :  { %2169 = vmatpush1.bf16.msra.mxu1 %v13194_v40  ;;  %v7009_v40 = vld [vmem:[%s12547_s2 + $0x1e0] ss:$24 sps:$4 sm:$0xff]  }
 0x7e2   :  { %2170 = vmatprep.subr.bf16.mxu1 %v8933_v59  ;;  %2264 = vmatpush1.bf16.msra.mxu0 %v7007_v24  ;;  %v7010_v59 = vld [vmem:[%s12547_s2 + $0x214] ss:$24 sps:$4 sm:$0xff]  }
 0x7e3   :  { %2265 = vmatprep.subr.bf16.mxu0 %v7008_v9 }
 0x7e5   :  { %2171 = vmatpush1.bf16.msra.mxu1 %v13196_v62  ;;  %v7011_v62 = vld [vmem:[%s12547_s2 + $0x210] ss:$24 sps:$4 sm:$0xff]  }
 0x7e6   :  { %2172 = vmatprep.subr.bf16.mxu1 %v8947_v22  ;;  %2266 = vmatpush1.bf16.msra.mxu0 %v7009_v40  ;;  %v7012_v22 = vld [vmem:[%s12547_s2 + $0x244] ss:$24 sps:$4 sm:$0xff]  }
 0x7e7   :  { %2267 = vmatprep.subr.bf16.mxu0 %v7010_v59  ;;  %v13323_v59 = vld [vmem:[#allocation84_spill] sm:$0xff] }
 0x7e9   :  { %2173 = vmatpush1.bf16.msra.mxu1 %v13258_v44  ;;  %v7013_v44 = vld [vmem:[%s12547_s2 + $0x240] ss:$24 sps:$4 sm:$0xff]  }
 0x7ea   :  { %2174 = vmatprep.subr.bf16.mxu1 %v13259_v45  ;;  %2268 = vmatpush1.bf16.msra.mxu0 %v7011_v62  ;;  %v7014_v45 = vld [vmem:[%s12547_s2 + $0x274] ss:$24 sps:$4 sm:$0xff]  }
 0x7eb   :  { %2269 = vmatprep.subr.bf16.mxu0 %v7012_v22 }
 0x7ed   :  { %2175 = vmatpush1.bf16.msra.mxu1 %v13262_v52  ;;  %v7015_v52 = vld [vmem:[%s12547_s2 + $0x270] ss:$24 sps:$4 sm:$0xff]  }
 0x7ee   :  { %2176 = vmatprep.subr.bf16.mxu1 %v13263_v53  ;;  %2270 = vmatpush1.bf16.msra.mxu0 %v7013_v44  ;;  %v7016_v53 = vld [vmem:[%s12547_s2 + $0x2a4] ss:$24 sps:$4 sm:$0xff]  }
 0x7ef   :  { %2271 = vmatprep.subr.bf16.mxu0 %v7014_v45 }
 0x7f1   :  { %2177 = vmatpush1.bf16.msra.mxu1 %v13266_v60  ;;  %v7017_v60 = vld [vmem:[%s12547_s2 + $0x2a0] ss:$24 sps:$4 sm:$0xff]  }
 0x7f2   :  { %2178 = vmatprep.subr.bf16.mxu1 %v13267_v61  ;;  %2272 = vmatpush1.bf16.msra.mxu0 %v7015_v52  ;;  %v7018_v61 = vld [vmem:[%s12547_s2 + $0x2d4] ss:$24 sps:$4 sm:$0xff]  }
 0x7f3   :  { %2273 = vmatprep.subr.bf16.mxu0 %v7016_v53 }
 0x7f5   :  { %2179 = vmatpush1.bf16.msra.mxu1 %v13270_v1  ;;  %v7019_v1 = vld [vmem:[%s12547_s2 + $0x2d0] ss:$24 sps:$4 sm:$0xff]  }
 0x7f6   :  { %2180 = vmatprep.subr.bf16.mxu1 %v13271_v2  ;;  %2274 = vmatpush1.bf16.msra.mxu0 %v7017_v60  ;;  %v7020_v2 = vld [vmem:[%s12547_s2 + $0x14] ss:$24 sps:$4 sm:$0xff]  }
 0x7f7   :  { %2275 = vmatprep.subr.bf16.mxu0 %v7018_v61 }
 0x7f9   :  { %2181 = vmatpush1.bf16.msra.mxu1 %v13274_v17  ;;  %v13307_v17 = vld [vmem:[#allocation81_spill] sm:$0xff] }
 0x7fa   :  { %2286 = vmatprep.subr.bf16.mxu1 %v9265_v18  ;;  %2276 = vmatpush1.bf16.msra.mxu0 %v7019_v1  ;;  %v13308_v18 = vld [vmem:[#allocation78_spill] sm:$0xff] }
 0x7fb   :  { %2327 = vmatprep.subr.bf16.mxu0 %v7020_v2 }
 0x7fc   :  { %2183 = vmatmul.mubr.bf16.vlgmr.msra.gmra.mrb[72].mxu1 %v9423_v49 }
 0x7fd   :  { %2287 = vmatpush1.bf16.msra.mxu1 %v9274_v15  ;;  %v13311_v15 = vld [vmem:[#allocation41_spill] sm:$0xff] }
 0x7fe   :  { %2288 = vmatprep.subr.bf16.mxu1 %v9280_v16  ;;  %v13312_v16 = vld [vmem:[#allocation83_spill] sm:$0xff] }
 0x801   :  { %2289 = vmatpush1.bf16.msra.mxu1 %v9286_v41  ;;  %v13313_v41 = vld [vmem:[#allocation27_spill] sm:$0xff] }
 0x802   :  { %2290 = vmatprep.subr.bf16.mxu1 %v9292_v29  ;;  %v13314_v29 = vld [vmem:[#allocation76_spill] sm:$0xff] }
 0x805   :  { %2291 = vmatpush1.bf16.msra.mxu1 %v9298_v6  ;;  %v13315_v6 = vld [vmem:[#allocation5_spill] sm:$0xff] }
 0x806   :  { %2292 = vmatprep.subr.bf16.mxu1 %v9304_v25  ;;  %v13316_v25 = vld [vmem:[#allocation6_spill] sm:$0xff] }
 0x809   :  { %2293 = vmatpush1.bf16.msra.mxu1 %v9310_v31  ;;  %v13317_v31 = vld [vmem:[#allocation7_spill] sm:$0xff] }
 0x80a   :  { %2294 = vmatprep.subr.bf16.mxu1 %v13307_v17  ;;  %v13324_v17 = vld [vmem:[#allocation50_spill] sm:$0xff] }
 0x80d   :  { %2295 = vmatpush1.bf16.msra.mxu1 %v13308_v18 }
 0x80e   :  { %2296 = vmatprep.subr.bf16.mxu1 %v13309_v33 }
 0x811   :  { %2297 = vmatpush1.bf16.msra.mxu1 %v13310_v56 }
 0x812   :  { %2298 = vmatprep.subr.bf16.mxu1 %v13311_v15 }
 0x815   :  { %2299 = vmatpush1.bf16.msra.mxu1 %v13312_v16 }
 0x816   :  { %2300 = vmatprep.subr.bf16.mxu1 %v13313_v41 }
 0x819   :  { %2301 = vmatpush1.bf16.msra.mxu1 %v13314_v29 }
 0x81a   :  { %2302 = vmatprep.subr.bf16.mxu1 %v13315_v6 }
 0x81d   :  { %2303 = vmatpush1.bf16.msra.mxu1 %v13316_v25  ;;  %v13325_v25 = vld [vmem:[#allocation52_spill] sm:$0xff] }
 0x81e   :  { %2304 = vmatprep.subr.bf16.mxu1 %v13317_v31 }
 0x821   :  { %2305 = vmatpush1.bf16.msra.mxu1 %v13318_v8 }
 0x822   :  { %2306 = vmatprep.subr.bf16.mxu1 %v13319_v57 }
 0x825   :  { %2307 = vmatpush1.bf16.msra.mxu1 %v7021_v63 }
 0x826   :  { %2308 = vmatprep.subr.bf16.mxu1 %v7022_v3 }
 0x829   :  { %2309 = vmatpush1.bf16.msra.mxu1 %v7023_v7 }
 0x82a   :  { %2310 = vmatprep.subr.bf16.mxu1 %v7024_v19 }
 0x82d   :  { %2311 = vmatpush1.bf16.msra.mxu1 %v7025_v34 }
 0x82e   :  { %2312 = vmatprep.subr.bf16.mxu1 %v7026_v5 }
 0x831   :  { %2313 = vmatpush1.bf16.msra.mxu1 %v7027_v58 }
 0x832   :  { %2314 = vmatprep.subr.bf16.mxu1 %v7028_v30  ;;  %v7032_v30 = vld [vmem:[%s12547_s2 + $0x10] ss:$24 sps:$4 sm:$0xff]  }
 0x835   :  { %2315 = vmatpush1.bf16.msra.mxu1 %v7029_v32  ;;  %v7033_v32 = vld [vmem:[%s12547_s2 + $0x44] ss:$24 sps:$4 sm:$0xff]  }
 0x836   :  { %2316 = vmatprep.subr.bf16.mxu1 %v7030_v26  ;;  %v7034_v26 = vld [vmem:[%s12547_s2 + $0x40] ss:$24 sps:$4 sm:$0xff]  }
 0x839   :  { %2317 = vmatpush1.bf16.msra.mxu1 %v7031_v39  ;;  %v7035_v39 = vld [vmem:[%s12547_s2 + $0x74] ss:$24 sps:$4 sm:$0xff]  }
 0x88f   :  { %v2102_v0 = vpop.f32.mrb[68].mxu1  ;;  %v2143_v49 = vpop.f32.mrb[52].mxu0 }
 0x890   :  { %v2197_v4 = vadd.f32 %v2102_v0, %v13320_v48  ;;  %v2104_v12 = vpop.f32.mrb[69].mxu1  ;;  %v2145_v20 = vpop.f32.mrb[53].mxu0  ;;  %v2211_v24 = vadd.f32 %v9175_v23, %v2143_v49  ;;  %v7036_v0 = vld [vmem:[%s12547_s2 + $0x70] ss:$24 sps:$4 sm:$0xff]   ;;  %v7037_v49 = vld [vmem:[%s12547_s2 + $0xa4] ss:$24 sps:$4 sm:$0xff]  }
 0x891   :  { %v2204_v46 = vadd.f32 %v2104_v12, %v13321_v38  ;;  %v2219_v37 = vadd.f32 %v2145_v20, %v13322_v51  ;;  %v2106_v27 = vpop.f32.mrb[70].mxu1  ;;  %v2147_v42 = vpop.f32.mrb[54].mxu0  ;;  %v7038_v48 = vld [vmem:[%s12547_s2 + $0xa0] ss:$24 sps:$4 sm:$0xff]   ;;  %v7040_v12 = vld [vmem:[%s12547_s2 + $0xd0] ss:$24 sps:$4 sm:$0xff]  }
 0x892   :  { %v5788_v50 = vmul.f32 -1.442695, %v2197_v4  ;;  %v2107_v54 = vpop.f32.mrb[71].mxu1  ;;  %v2148_v11 = vpop.f32.mrb[55].mxu0  ;;  %v7039_v4 = vld [vmem:[%s12547_s2 + $0xd4] ss:$24 sps:$4 sm:$0xff]  }
 0x893   :  { %v5789_v47 = vmul.f32 -1.442695, %v2204_v46  ;;  %v5790_v22 = vmul.f32 -1.442695, %v2219_v37  ;;  %v7041_v20 = vld [vmem:[%s12547_s2 + $0x104] ss:$24 sps:$4 sm:$0xff]  }
 0x894   :  { %6669 = vpow2.f32 %v5788_v50  ;;  %v7042_v38 = vld [vmem:[%s12547_s2 + $0x100] ss:$24 sps:$4 sm:$0xff]   ;;  %v7043_v46 = vld [vmem:[%s12547_s2 + $0x134] ss:$24 sps:$4 sm:$0xff]   ;;  %v7044_v51 = vld [vmem:[%s12547_s2 + $0x130] ss:$24 sps:$4 sm:$0xff]  }
 0x895   :  { %6671 = vpow2.f32 %v5789_v47  ;;  %v7045_v37 = vld [vmem:[%s12547_s2 + $0x164] ss:$24 sps:$4 sm:$0xff]   ;;  %v7046_v27 = vld [vmem:[%s12547_s2 + $0x160] ss:$24 sps:$4 sm:$0xff]   ;;  %v7047_v42 = vld [vmem:[%s12547_s2 + $0x194] ss:$24 sps:$4 sm:$0xff]  }
 0x896   :  { %v7048_v50 = vld [vmem:[%s12547_s2 + $0x190] ss:$24 sps:$4 sm:$0xff]   ;;  %v7049_v54 = vld [vmem:[%s12547_s2 + $0x1c4] ss:$24 sps:$4 sm:$0xff]   ;;  %v7050_v11 = vld [vmem:[%s12547_s2 + $0x1c0] ss:$24 sps:$4 sm:$0xff]  }
 0x897   :  { %v7051_v47 = vld [vmem:[%s12547_s2 + $0x1f4] ss:$24 sps:$4 sm:$0xff]  }
 0x89e   :  { %v6670_v13 = vpop.eup %6669 }
 0x89f   :  { %v2201_v36 = vadd.f32 1.0, %v6670_v13  ;;  %v6672_v43 = vpop.eup %6671  ;;  %v7052_v13 = vld [vmem:[%s12547_s2 + $0x1f0] ss:$24 sps:$4 sm:$0xff]  }
 0x8a0   :  { %v2208_v28 = vadd.f32 1.0, %v6672_v43  ;;  %v7054_v43 = vld [vmem:[%s12547_s2 + $0x220] ss:$24 sps:$4 sm:$0xff]  }
 0x8a1   :  { %6673 = vrcp.f32 %v2201_v36  ;;  %v7053_v36 = vld [vmem:[%s12547_s2 + $0x224] ss:$24 sps:$4 sm:$0xff]  }
 0x8a2   :  { %6675 = vrcp.f32 %v2208_v28  ;;  %v7055_v28 = vld [vmem:[%s12547_s2 + $0x254] ss:$24 sps:$4 sm:$0xff]  }
 0x8ab   :  { %v6674_v9 = vpop.eup %6673 }
 0x8ac   :  { %v2212_v40 = vmul.f32 %v6674_v9, %v2211_v24  ;;  %v6676_v44 = vpop.eup %6675  ;;  %v7056_v24 = vld [vmem:[%s12547_s2 + $0x250] ss:$24 sps:$4 sm:$0xff]   ;;  %v7057_v9 = vld [vmem:[%s12547_s2 + $0x284] ss:$24 sps:$4 sm:$0xff]  }
 0x8ad   :  { %v2215_v45 = vsub.f32 1.0, %v6676_v44  ;;  %v2217_v60 = vmul.f32 %v6676_v44, %v9411_v21  ;;  %v7062_v44 = vld [vmem:[%s12547_s2 + $0x2e0] ss:$24 sps:$4 sm:$0xff]  }
 0x8ae   :  { %v2213_v62 = vadd.f32 %v2212_v40, %v13323_v59  ;;  %v7058_v40 = vld [vmem:[%s12547_s2 + $0x280] ss:$24 sps:$4 sm:$0xff]   ;;  %v7059_v59 = vld [vmem:[%s12547_s2 + $0x2b4] ss:$24 sps:$4 sm:$0xff]  }
 0x8b0   :  { %6677 = vtanh.f32 %v2213_v62  ;;  %v7060_v62 = vld [vmem:[%s12547_s2 + $0x2b0] ss:$24 sps:$4 sm:$0xff]  }
 0x8b1   :  { %6679 = vpow2.f32 %v5790_v22  ;;  %v7061_v22 = vld [vmem:[%s12547_s2 + $0x2e4] ss:$24 sps:$4 sm:$0xff]  }
 0x8ba   :  { %v6678_v52 = vpop.eup %6677 }
 0x8bb   :  { %v2216_v53 = vmul.f32 %v6678_v52, %v2215_v45  ;;  %v6680_v1 = vpop.eup %6679  ;;  %v6213_v45 = vld [vmem:[%s12550_s5] ss:$24 sps:$4 sm:$0xff]   ;;  %v6215_v52 = vld [vmem:[%s12550_s5 + $0x4] ss:$24 sps:$4 sm:$0xff]  }
 0x8bc   :  { %v2223_v2 = vadd.f32 1.0, %v6680_v1  ;;  %3052 = vmatprep.subr.bf16.mxu1 %v6215_v52  ;;  %v6219_v1 = vld [vmem:[%s12550_s5 + $0x30] ss:$24 sps:$4 sm:$0xff]  }
 0x8bd   :  { %v9615_v61 = vadd.f32 %v2217_v60, %v2216_v53  ;;  %v6216_v53 = vld [vmem:[%s12550_s5 + $0x8] ss:$24 sps:$4 sm:$0xff]   ;;  %v6218_v60 = vld [vmem:[%s12550_s5 + $0xc] ss:$24 sps:$4 sm:$0xff]  }
 0x8be   :  { %6681 = vrcp.f32 %v2223_v2  ;;  %v6221_v2 = vld [vmem:[%s12550_s5 + $0x34] ss:$24 sps:$4 sm:$0xff]   ;;  %v6300_v52 = vld [vmem:[%s12550_s5 + $0x2a8] ss:$24 sps:$4 sm:$0xff]  }
 0x8bf   :  { %v9627_v58 = vpack.c.bf16 %v9615_v61, %v9615_v61 }
 0x8c8   :  { %v6682_v16 = vpop.eup %6681 }
 0x8cf   :  { %v2184_v23 = vpop.f32.mrb[72].mxu1 }
 0x8d0   :  { %v2226_v18 = vadd.f32 %v2184_v23, %v13324_v17  ;;  %v2186_v33 = vpop.f32.mrb[73].mxu1  ;;  %v6222_v23 = vld [vmem:[%s12550_s5 + $0x38] ss:$24 sps:$4 sm:$0xff]   ;;  %v6224_v17 = vld [vmem:[%s12550_s5 + $0x3c] ss:$24 sps:$4 sm:$0xff]  }
 0x8d1   :  { %v2233_v56 = vadd.f32 %v9186_v35, %v2186_v33  ;;  %v2188_v15 = vpop.f32.mrb[74].mxu1  ;;  %v6225_v33 = vld [vmem:[%s12550_s5 + $0x60] ss:$24 sps:$4 sm:$0xff]  }
 0x8d2   :  { %v5791_v41 = vmul.f32 -1.442695, %v2226_v18  ;;  %v2189_v29 = vpop.f32.mrb[75].mxu1  ;;  %v6227_v18 = vld [vmem:[%s12550_s5 + $0x64] ss:$24 sps:$4 sm:$0xff]  }
 0x8d3   :  { %v2234_v6 = vmul.f32 %v6682_v16, %v2233_v56  ;;  %v6230_v56 = vld [vmem:[%s12550_s5 + $0x6c] ss:$24 sps:$4 sm:$0xff]   ;;  %v6228_v15 = vld [vmem:[%s12550_s5 + $0x68] ss:$24 sps:$4 sm:$0xff]  }
 0x8d4   :  { %6683 = vpow2.f32 %v5791_v41  ;;  %v6233_v16 = vld [vmem:[%s12550_s5 + $0x94] ss:$24 sps:$4 sm:$0xff]   ;;  %v6231_v29 = vld [vmem:[%s12550_s5 + $0x90] ss:$24 sps:$4 sm:$0xff]  }
 0x8d5   :  { %v2235_v31 = vadd.f32 %v2234_v6, %v13325_v25  ;;  %v6236_v41 = vld [vmem:[%s12550_s5 + $0x9c] ss:$24 sps:$4 sm:$0xff]   ;;  %v6234_v6 = vld [vmem:[%s12550_s5 + $0x98] ss:$24 sps:$4 sm:$0xff]  }
 0x8d6   :  { %v6239_v25 = vld [vmem:[%s12550_s5 + $0xc4] ss:$24 sps:$4 sm:$0xff]  }
 0x8de   :  { %v6684_v8 = vpop.eup %6683 }
 0x8df   :  { %v2230_v57 = vadd.f32 1.0, %v6684_v8  ;;  %v6237_v8 = vld [vmem:[%s12550_s5 + $0xc0] ss:$24 sps:$4 sm:$0xff]  }
 0x8e1   :  { %6685 = vrcp.f32 %v2230_v57  ;;  %v6240_v57 = vld [vmem:[%s12550_s5 + $0xc8] ss:$24 sps:$4 sm:$0xff]  }
 0x8e2   :  { %6687 = vtanh.f32 %v2235_v31  ;;  %v6242_v31 = vld [vmem:[%s12550_s5 + $0xcc] ss:$24 sps:$4 sm:$0xff]  }
 0x8eb   :  { %v6686_v63 = vpop.eup %6685 }
 0x8ec   :  { %v2237_v3 = vsub.f32 1.0, %v6686_v63  ;;  %v6688_v7 = vpop.eup %6687  ;;  %v2239_v34 = vmul.f32 %v6686_v63, %v9417_v10  ;;  %v6245_v63 = vld [vmem:[%s12550_s5 + $0xf4] ss:$24 sps:$4 sm:$0xff]  }
 0x8ee   :  { %v2238_v19 = vmul.f32 %v6688_v7, %v2237_v3  ;;  %v6243_v3 = vld [vmem:[%s12550_s5 + $0xf0] ss:$24 sps:$4 sm:$0xff]   ;;  %v6248_v7 = vld [vmem:[%s12550_s5 + $0xfc] ss:$24 sps:$4 sm:$0xff]  }
 0x8f0   :  { %v9621_v5 = vadd.f32 %v2239_v34, %v2238_v19  ;;  %v6246_v19 = vld [vmem:[%s12550_s5 + $0xf8] ss:$24 sps:$4 sm:$0xff]   ;;  %v6251_v34 = vld [vmem:[%s12550_s5 + $0x124] ss:$24 sps:$4 sm:$0xff]  }
 0x8f2   :  { %v2244_v35 = vpack.c.bf16 %v9621_v5, %v9621_v5 }
 0x8f4   :  { %2277 = vmatprep.mubr.bf16.mxu0 %v2244_v35  ;;  %2318 = vmatprep.mubr.bf16.mxu1 %v2244_v35 }
 0x8f5   :  { %2278 = vmatmul.mubr.bf16.vlgmr.msra.gmra.mrb[56].mxu0 %v9627_v58  ;;  %2319 = vmatmul.mubr.bf16.vlgmr.msra.gmra.mrb[76].mxu1 %v9627_v58 }
 0x8f6   :  { %2328 = vmatpush1.bf16.msra.mxu0 %v7032_v30  ;;  %2359 = vmatprep.mubr.bf16.mxu0 %v2244_v35  ;;  %v6254_v35 = vld [vmem:[%s12550_s5 + $0x12c] ss:$24 sps:$4 sm:$0xff]   ;;  %v6252_v30 = vld [vmem:[%s12550_s5 + $0x128] ss:$24 sps:$4 sm:$0xff]  }
 0x8f7   :  { %2329 = vmatprep.subr.bf16.mxu0 %v7033_v32  ;;  %3053 = vmatpush1.bf16.msra.mxu1 %v6213_v45  ;;  %v6257_v32 = vld [vmem:[%s12550_s5 + $0x154] ss:$24 sps:$4 sm:$0xff]   ;;  %v6297_v45 = vld [vmem:[%s12550_s5 + $0x2a0] ss:$24 sps:$4 sm:$0xff]  }
 0x8f8   :  { %3054 = vmatprep.subr.bf16.mxu1 %v6221_v2  ;;  %v6306_v2 = vld [vmem:[%s12550_s5 + $0x2d8] ss:$24 sps:$4 sm:$0xff]  }
 0x8fa   :  { %2330 = vmatpush1.bf16.msra.mxu0 %v7034_v26  ;;  %v6260_v26 = vld [vmem:[%s12550_s5 + $0x15c] ss:$24 sps:$4 sm:$0xff]  }
 0x8fb   :  { %2331 = vmatprep.subr.bf16.mxu0 %v7035_v39  ;;  %3055 = vmatpush1.bf16.msra.mxu1 %v6219_v1  ;;  %v6255_v39 = vld [vmem:[%s12550_s5 + $0x150] ss:$24 sps:$4 sm:$0xff]  }
 0x8fc   :  { %3056 = vmatprep.subr.bf16.mxu1 %v6227_v18  ;;  %v6303_v1 = vld [vmem:[%s12550_s5 + $0x2d0] ss:$24 sps:$4 sm:$0xff]  }
 0x8fe   :  { %2332 = vmatpush1.bf16.msra.mxu0 %v7036_v0  ;;  %v6258_v0 = vld [vmem:[%s12550_s5 + $0x158] ss:$24 sps:$4 sm:$0xff]  }
 0x8ff   :  { %2333 = vmatprep.subr.bf16.mxu0 %v7037_v49  ;;  %3057 = vmatpush1.bf16.msra.mxu1 %v6225_v33  ;;  %v6263_v49 = vld [vmem:[%s12550_s5 + $0x184] ss:$24 sps:$4 sm:$0xff]  }
 0x900   :  { %3058 = vmatprep.subr.bf16.mxu1 %v6233_v16 }
 0x902   :  { %2334 = vmatpush1.bf16.msra.mxu0 %v7038_v48  ;;  %v6266_v48 = vld [vmem:[%s12550_s5 + $0x18c] ss:$24 sps:$4 sm:$0xff]  }
 0x903   :  { %2335 = vmatprep.subr.bf16.mxu0 %v7039_v4  ;;  %3059 = vmatpush1.bf16.msra.mxu1 %v6231_v29  ;;  %v6261_v4 = vld [vmem:[%s12550_s5 + $0x180] ss:$24 sps:$4 sm:$0xff]   ;;  %v13327_v29 = vld [vmem:[#allocation70_spill] sm:$0xff] }
 0x904   :  { %3060 = vmatprep.subr.bf16.mxu1 %v6239_v25  ;;  %v13328_v25 = vld [vmem:[#allocation73_spill] sm:$0xff] }
 0x906   :  { %2336 = vmatpush1.bf16.msra.mxu0 %v7040_v12  ;;  %v6264_v12 = vld [vmem:[%s12550_s5 + $0x188] ss:$24 sps:$4 sm:$0xff]  }
 0x907   :  { %2337 = vmatprep.subr.bf16.mxu0 %v7041_v20  ;;  %3061 = vmatpush1.bf16.msra.mxu1 %v6237_v8  ;;  %v6269_v20 = vld [vmem:[%s12550_s5 + $0x1b4] ss:$24 sps:$4 sm:$0xff]  }
 0x908   :  { %3062 = vmatprep.subr.bf16.mxu1 %v6245_v63 }
 0x90a   :  { %2338 = vmatpush1.bf16.msra.mxu0 %v7042_v38  ;;  %v6272_v38 = vld [vmem:[%s12550_s5 + $0x1bc] ss:$24 sps:$4 sm:$0xff]  }
 0x90b   :  { %2339 = vmatprep.subr.bf16.mxu0 %v7043_v46  ;;  %3063 = vmatpush1.bf16.msra.mxu1 %v6243_v3  ;;  %v6267_v46 = vld [vmem:[%s12550_s5 + $0x1b0] ss:$24 sps:$4 sm:$0xff]  }
 0x90c   :  { %3064 = vmatprep.subr.bf16.mxu1 %v6251_v34 }
 0x90e   :  { %2340 = vmatpush1.bf16.msra.mxu0 %v7044_v51  ;;  %v6270_v51 = vld [vmem:[%s12550_s5 + $0x1b8] ss:$24 sps:$4 sm:$0xff]  }
 0x90f   :  { %2341 = vmatprep.subr.bf16.mxu0 %v7045_v37  ;;  %v6275_v37 = vld [vmem:[%s12550_s5 + $0x1e4] ss:$24 sps:$4 sm:$0xff]  }
 0x912   :  { %2342 = vmatpush1.bf16.msra.mxu0 %v7046_v27  ;;  %v6278_v27 = vld [vmem:[%s12550_s5 + $0x1ec] ss:$24 sps:$4 sm:$0xff]  }
 0x913   :  { %2343 = vmatprep.subr.bf16.mxu0 %v7047_v42  ;;  %v6273_v42 = vld [vmem:[%s12550_s5 + $0x1e0] ss:$24 sps:$4 sm:$0xff]  }
 0x916   :  { %2344 = vmatpush1.bf16.msra.mxu0 %v7048_v50  ;;  %v6276_v50 = vld [vmem:[%s12550_s5 + $0x1e8] ss:$24 sps:$4 sm:$0xff]  }
 0x917   :  { %2345 = vmatprep.subr.bf16.mxu0 %v7049_v54  ;;  %v6281_v54 = vld [vmem:[%s12550_s5 + $0x214] ss:$24 sps:$4 sm:$0xff]  }
 0x91a   :  { %2346 = vmatpush1.bf16.msra.mxu0 %v7050_v11  ;;  %v6284_v11 = vld [vmem:[%s12550_s5 + $0x21c] ss:$24 sps:$4 sm:$0xff]  }
 0x91b   :  { %2347 = vmatprep.subr.bf16.mxu0 %v7051_v47  ;;  %v6279_v47 = vld [vmem:[%s12550_s5 + $0x210] ss:$24 sps:$4 sm:$0xff]  }
 0x91e   :  { %2348 = vmatpush1.bf16.msra.mxu0 %v7052_v13  ;;  %v6282_v13 = vld [vmem:[%s12550_s5 + $0x218] ss:$24 sps:$4 sm:$0xff]  }
 0x91f   :  { %2349 = vmatprep.subr.bf16.mxu0 %v7053_v36  ;;  %v6285_v36 = vld [vmem:[%s12550_s5 + $0x240] ss:$24 sps:$4 sm:$0xff]  }
 0x922   :  { %2350 = vmatpush1.bf16.msra.mxu0 %v7054_v43  ;;  %v6287_v43 = vld [vmem:[%s12550_s5 + $0x244] ss:$24 sps:$4 sm:$0xff]  }
 0x923   :  { %2351 = vmatprep.subr.bf16.mxu0 %v7055_v28  ;;  %v6288_v28 = vld [vmem:[%s12550_s5 + $0x248] ss:$24 sps:$4 sm:$0xff]  }
 0x926   :  { %2352 = vmatpush1.bf16.msra.mxu0 %v7056_v24  ;;  %v6290_v24 = vld [vmem:[%s12550_s5 + $0x24c] ss:$24 sps:$4 sm:$0xff]  }
 0x927   :  { %2353 = vmatprep.subr.bf16.mxu0 %v7057_v9  ;;  %v6293_v9 = vld [vmem:[%s12550_s5 + $0x274] ss:$24 sps:$4 sm:$0xff]  }
 0x92a   :  { %2354 = vmatpush1.bf16.msra.mxu0 %v7058_v40  ;;  %v6296_v40 = vld [vmem:[%s12550_s5 + $0x27c] ss:$24 sps:$4 sm:$0xff]  }
 0x92b   :  { %2355 = vmatprep.subr.bf16.mxu0 %v7059_v59  ;;  %v6291_v59 = vld [vmem:[%s12550_s5 + $0x270] ss:$24 sps:$4 sm:$0xff]  }
 0x92e   :  { %2356 = vmatpush1.bf16.msra.mxu0 %v7060_v62  ;;  %v6294_v62 = vld [vmem:[%s12550_s5 + $0x278] ss:$24 sps:$4 sm:$0xff]  }
 0x92f   :  { %2357 = vmatprep.subr.bf16.mxu0 %v7061_v22  ;;  %v6299_v22 = vld [vmem:[%s12550_s5 + $0x2a4] ss:$24 sps:$4 sm:$0xff]  }
 0x932   :  { %2358 = vmatpush1.bf16.msra.mxu0 %v7062_v44  ;;  %v6302_v44 = vld [vmem:[%s12550_s5 + $0x2ac] ss:$24 sps:$4 sm:$0xff]  }
 0x933   :  { %3125 = vmatprep.subr.bf16.mxu0 %v6218_v60  ;;  %v6308_v60 = vld [vmem:[%s12550_s5 + $0x2dc] ss:$24 sps:$4 sm:$0xff]  }
 0x935   :  { %2360 = vmatmul.mubr.bf16.vlgmr.msra.gmra.mrb[60].mxu0 %v9627_v58  ;;  %v6249_v58 = vld [vmem:[%s12550_s5 + $0x120] ss:$24 sps:$4 sm:$0xff]  }
 0x936   :  { %3126 = vmatpush1.bf16.msra.mxu0 %v6216_v53  ;;  %3065 = vmatpush1.bf16.msra.mxu1 %v6249_v58  ;;  %v6305_v53 = vld [vmem:[%s12550_s5 + $0x2d4] ss:$24 sps:$4 sm:$0xff]  }
 0x937   :  { %3127 = vmatprep.subr.bf16.mxu0 %v6224_v17  ;;  %3066 = vmatprep.subr.bf16.mxu1 %v6257_v32  ;;  %v9923_v17 = vld [vmem:[%s12551_s6 + $0x4] ss:$24 sps:$4 sm:$0xff]   ;;  %v7063_v32 = vld [vmem:[%s12549_s4] ss:$0 sm:$0xff] }
 0x93a   :  { %3128 = vmatpush1.bf16.msra.mxu0 %v6222_v23  ;;  %3067 = vmatpush1.bf16.msra.mxu1 %v6255_v39  ;;  %v6311_v23 = vld [vmem:[%s12550_s5 + $0x14] ss:$24 sps:$4 sm:$0xff]  }
 0x93b   :  { %3129 = vmatprep.subr.bf16.mxu0 %v6230_v56  ;;  %3068 = vmatprep.subr.bf16.mxu1 %v6263_v49  ;;  %v13326_v56 = vld [vmem:[#allocation69_spill] sm:$0xff]  ;;  %v13329_v49 = vld [vmem:[#allocation86_spill] sm:$0xff] }
 0x93e   :  { %3130 = vmatpush1.bf16.msra.mxu0 %v6228_v15  ;;  %3069 = vmatpush1.bf16.msra.mxu1 %v6261_v4 }
 0x93f   :  { %3131 = vmatprep.subr.bf16.mxu0 %v6236_v41  ;;  %3070 = vmatprep.subr.bf16.mxu1 %v6269_v20 }
 0x942   :  { %3132 = vmatpush1.bf16.msra.mxu0 %v6234_v6  ;;  %3071 = vmatpush1.bf16.msra.mxu1 %v6267_v46 }
 0x943   :  { %3133 = vmatprep.subr.bf16.mxu0 %v6242_v31  ;;  %3072 = vmatprep.subr.bf16.mxu1 %v6275_v37 }
 0x946   :  { %3134 = vmatpush1.bf16.msra.mxu0 %v6240_v57  ;;  %3073 = vmatpush1.bf16.msra.mxu1 %v6273_v42 }
 0x947   :  { %3135 = vmatprep.subr.bf16.mxu0 %v6248_v7  ;;  %3074 = vmatprep.subr.bf16.mxu1 %v6281_v54  ;;  %v13330_v54 = vld [vmem:[#allocation47_spill] sm:$0xff] }
 0x94a   :  { %3136 = vmatpush1.bf16.msra.mxu0 %v6246_v19  ;;  %3075 = vmatpush1.bf16.msra.mxu1 %v6279_v47 }
 0x94b   :  { %3137 = vmatprep.subr.bf16.mxu0 %v6254_v35  ;;  %3076 = vmatprep.subr.bf16.mxu1 %v6287_v43 }
 0x94e   :  { %3138 = vmatpush1.bf16.msra.mxu0 %v6252_v30  ;;  %3077 = vmatpush1.bf16.msra.mxu1 %v6285_v36 }
 0x94f   :  { %3139 = vmatprep.subr.bf16.mxu0 %v6260_v26  ;;  %3078 = vmatprep.subr.bf16.mxu1 %v6293_v9 }
 0x952   :  { %3140 = vmatpush1.bf16.msra.mxu0 %v6258_v0  ;;  %3079 = vmatpush1.bf16.msra.mxu1 %v6291_v59  ;;  %v13331_v59 = vld [vmem:[#allocation48_spill] sm:$0xff] }
 0x953   :  { %3141 = vmatprep.subr.bf16.mxu0 %v6266_v48  ;;  %3080 = vmatprep.subr.bf16.mxu1 %v6299_v22 }
 0x956   :  { %3142 = vmatpush1.bf16.msra.mxu0 %v6264_v12  ;;  %3081 = vmatpush1.bf16.msra.mxu1 %v6297_v45 }
 0x957   :  { %3143 = vmatprep.subr.bf16.mxu0 %v6272_v38  ;;  %3082 = vmatprep.subr.bf16.mxu1 %v6305_v53 }
 0x95a   :  { %3144 = vmatpush1.bf16.msra.mxu0 %v6270_v51  ;;  %3083 = vmatpush1.bf16.msra.mxu1 %v6303_v1 }
 0x95b   :  { %3145 = vmatprep.subr.bf16.mxu0 %v6278_v27  ;;  %3198 = vmatprep.subr.bf16.mxu1 %v6311_v23 }
 0x95e   :  { %3146 = vmatpush1.bf16.msra.mxu0 %v6276_v50 }
 0x95f   :  { %3147 = vmatprep.subr.bf16.mxu0 %v6284_v11 }
 0x962   :  { %3148 = vmatpush1.bf16.msra.mxu0 %v6282_v13  ;;  %v7064_v13 = vld [vmem:[%s12549_s4 + $0x1] ss:$0 sm:$0xff] }
 0x963   :  { %3149 = vmatprep.subr.bf16.mxu0 %v6290_v24 }
 0x966   :  { %3150 = vmatpush1.bf16.msra.mxu0 %v6288_v28 }
 0x967   :  { %3151 = vmatprep.subr.bf16.mxu0 %v6296_v40 }
 0x96a   :  { %3152 = vmatpush1.bf16.msra.mxu0 %v6294_v62 }
 0x96b   :  { %3153 = vmatprep.subr.bf16.mxu0 %v6302_v44 }
 0x96e   :  { %3154 = vmatpush1.bf16.msra.mxu0 %v6300_v52 }
 0x96f   :  { %3155 = vmatprep.subr.bf16.mxu0 %v6308_v60 }
 0x972   :  { %3156 = vmatpush1.bf16.msra.mxu0 %v6306_v2 }
 0x973   :  { %3909 = vmatprep.subr.bf16.mxu0 %v9923_v17 }
 0x9c8   :  { %v2279_v18 = vpop.f32.mrb[56].mxu0  ;;  %v2320_v33 = vpop.f32.mrb[76].mxu1 }
 0x9c9   :  { %v2374_v15 = vadd.f32 %v2279_v18, %v13326_v56  ;;  %v2281_v16 = vpop.f32.mrb[57].mxu0  ;;  %v2322_v41 = vpop.f32.mrb[77].mxu1  ;;  %v2388_v26 = vadd.f32 %v7063_v32, %v2320_v33  ;;  %v6309_v18 = vld [vmem:[%s12550_s5 + $0x10] ss:$24 sps:$4 sm:$0xff]   ;;  %v9951_v33 = vld [vmem:[%s12551_s6] ss:$24 sps:$4 sm:$0xff]  }
 0x9ca   :  { %v2381_v6 = vadd.f32 %v2281_v16, %v13327_v29  ;;  %v2396_v31 = vadd.f32 %v2322_v41, %v13328_v25  ;;  %v2283_v8 = vpop.f32.mrb[58].mxu0  ;;  %v2324_v57 = vpop.f32.mrb[78].mxu1  ;;  %v13332_v56 = vld [vmem:[#allocation87_spill] sm:$0xff]  ;;  %v9971_v29 = vpack.c.bf16 %v9191_v14, %v9417_v10  ;;  %v9990_v10 = vld [vmem:[%s12551_s6 + $0x64] ss:$24 sps:$4 sm:$0xff]  }
 0x9cb   :  { %v5792_v63 = vmul.f32 -1.442695, %v2374_v15  ;;  %v2284_v3 = vpop.f32.mrb[59].mxu0  ;;  %v2325_v7 = vpop.f32.mrb[79].mxu1  ;;  %v13333_v15 = vld [vmem:[#allocation26_spill] sm:$0xff]  ;;  %v13334_v57 = vld [vmem:[#allocation49_spill] sm:$0xff] }
 0x9cc   :  { %v5793_v19 = vmul.f32 -1.442695, %v2381_v6  ;;  %v5794_v4 = vmul.f32 -1.442695, %v2396_v31  ;;  %v9955_v16 = vpack.c.bf16 %v13333_v15, %v13332_v56  ;;  %v9965_v41 = vld [vmem:[%s12551_s6 + $0x34] ss:$24 sps:$4 sm:$0xff]  }
 0x9cd   :  { %6689 = vpow2.f32 %v5792_v63  ;;  %v6315_v6 = vld [vmem:[%s12550_s5 + $0x40] ss:$24 sps:$4 sm:$0xff]   ;;  %v9980_v25 = vld [vmem:[%s12551_s6 + $0x30] ss:$24 sps:$4 sm:$0xff]   ;;  %v6323_v14 = vld [vmem:[%s12550_s5 + $0x74] ss:$24 sps:$4 sm:$0xff]  }
 0x9ce   :  { %6691 = vpow2.f32 %v5793_v19  ;;  %v6321_v31 = vld [vmem:[%s12550_s5 + $0x70] ss:$24 sps:$4 sm:$0xff]   ;;  %v10000_v8 = vld [vmem:[%s12551_s6 + $0x60] ss:$24 sps:$4 sm:$0xff]   ;;  %v6329_v7 = vld [vmem:[%s12550_s5 + $0xa4] ss:$24 sps:$4 sm:$0xff]  }
 0x9cf   :  { %v13335_v63 = vld [vmem:[#allocation53_spill] sm:$0xff]  ;;  %v10013_v19 = vld [vmem:[%s12551_s6 + $0x94] ss:$24 sps:$4 sm:$0xff]   ;;  %v10028_v32 = vld [vmem:[%s12551_s6 + $0x90] ss:$24 sps:$4 sm:$0xff]  }
 0x9d0   :  { %v10005_v3 = vpack.c.bf16 %v13335_v63, %v13334_v57  ;;  %v6381_v56 = vld [vmem:[%s12550_s5 + $0x250] ss:$24 sps:$4 sm:$0xff]   ;;  %v10212_v15 = vld [vmem:[%s12551_s6 + $0x240] ss:$24 sps:$4 sm:$0xff]   ;;  %v6395_v57 = vld [vmem:[%s12550_s5 + $0x2b4] ss:$24 sps:$4 sm:$0xff]  }
 0x9d1   :  { %v10239_v63 = vld [vmem:[%s12551_s6 + $0x2a4] ss:$24 sps:$4 sm:$0xff]  }
 0x9d2   :  { %13341 = vst [vmem:[#allocation10_spill] sm:$0xff] %v10239_v63 }
 0x9d7   :  { %v6690_v34 = vpop.eup %6689 }
 0x9d8   :  { %v2378_v35 = vadd.f32 1.0, %v6690_v34  ;;  %v6692_v58 = vpop.eup %6691  ;;  %v13336_v34 = vld [vmem:[#allocation54_spill] sm:$0xff] }
 0x9d9   :  { %v2385_v30 = vadd.f32 1.0, %v6692_v58 }
 0x9da   :  { %6693 = vrcp.f32 %v2378_v35  ;;  %v13337_v35 = vld [vmem:[#allocation51_spill] sm:$0xff] }
 0x9db   :  { %6695 = vrcp.f32 %v2385_v30  ;;  %v10019_v58 = vpack.c.bf16 %v13337_v35, %v13336_v34  ;;  %v6327_v30 = vld [vmem:[%s12550_s5 + $0xa0] ss:$24 sps:$4 sm:$0xff]   ;;  %v6401_v35 = vld [vmem:[%s12550_s5 + $0x2e4] ss:$24 sps:$4 sm:$0xff]  }
 0x9dc   :  { %v10248_v34 = vld [vmem:[%s12551_s6 + $0x2a0] ss:$24 sps:$4 sm:$0xff]  }
 0x9dd   :  { %13342 = vst [vmem:[#allocation11_spill] sm:$0xff] %v10248_v34 }
 0x9e4   :  { %v6694_v39 = vpop.eup %6693 }
 0x9e5   :  { %v2389_v0 = vmul.f32 %v6694_v39, %v2388_v26  ;;  %v6696_v12 = vpop.eup %6695  ;;  %v6335_v26 = vld [vmem:[%s12550_s5 + $0xd4] ss:$24 sps:$4 sm:$0xff]   ;;  %v10038_v39 = vld [vmem:[%s12551_s6 + $0xc4] ss:$24 sps:$4 sm:$0xff]  }
 0x9e6   :  { %v2392_v20 = vsub.f32 1.0, %v6696_v12  ;;  %v2394_v51 = vmul.f32 %v6696_v12, %v9615_v61  ;;  %v10061_v12 = vld [vmem:[%s12551_s6 + $0xf4] ss:$24 sps:$4 sm:$0xff]  }
 0x9e7   :  { %v2390_v48 = vadd.f32 %v2389_v0, %v13329_v49  ;;  %v6333_v0 = vld [vmem:[%s12550_s5 + $0xd0] ss:$24 sps:$4 sm:$0xff]   ;;  %v10048_v49 = vld [vmem:[%s12551_s6 + $0xc0] ss:$24 sps:$4 sm:$0xff]  }
 0x9e9   :  { %6697 = vtanh.f32 %v2390_v48  ;;  %v10053_v48 = vpack.c.bf16 %v9411_v21, %v9180_v55  ;;  %v6339_v55 = vld [vmem:[%s12550_s5 + $0x100] ss:$24 sps:$4 sm:$0xff]   ;;  %v10076_v21 = vld [vmem:[%s12551_s6 + $0xf0] ss:$24 sps:$4 sm:$0xff]  }
 0x9ea   :  { %6699 = vpow2.f32 %v5794_v4  ;;  %v6341_v4 = vld [vmem:[%s12550_s5 + $0x104] ss:$24 sps:$4 sm:$0xff]  }
 0x9f3   :  { %v6698_v38 = vpop.eup %6697 }
 0x9f4   :  { %v2393_v46 = vmul.f32 %v6698_v38, %v2392_v20  ;;  %v6700_v27 = vpop.eup %6699  ;;  %v13338_v20 = vld [vmem:[#allocation40_spill] sm:$0xff] }
 0x9f5   :  { %v2400_v42 = vadd.f32 1.0, %v6700_v27  ;;  %v13339_v38 = vld [vmem:[#allocation88_spill] sm:$0xff] }
 0x9f6   :  { %v9934_v37 = vadd.f32 %v2394_v51, %v2393_v46  ;;  %v10067_v46 = vpack.c.bf16 %v13339_v38, %v13338_v20  ;;  %v6347_v51 = vld [vmem:[%s12550_s5 + $0x134] ss:$24 sps:$4 sm:$0xff]   ;;  %v10086_v27 = vld [vmem:[%s12551_s6 + $0x124] ss:$24 sps:$4 sm:$0xff]   ;;  %v10283_v38 = vld [vmem:[%s12551_s6 + $0x8] ss:$24 sps:$4 sm:$0xff]  }
 0x9f7   :  { %6701 = vrcp.f32 %v2400_v42  ;;  %v6345_v42 = vld [vmem:[%s12550_s5 + $0x130] ss:$24 sps:$4 sm:$0xff]   ;;  %v10277_v20 = vld [vmem:[%s12551_s6 + $0x14] ss:$24 sps:$4 sm:$0xff]  }
 0x9f8   :  { %13345 = vst [vmem:[#allocation15_spill] sm:$0xff] %v10277_v20 }
 0xa01   :  { %v6702_v28 = vpop.eup %6701 }
 0xa08   :  { %v2361_v50 = vpop.f32.mrb[60].mxu0 }
 0xa09   :  { %v2403_v11 = vadd.f32 %v2361_v50, %v13330_v54  ;;  %v2363_v47 = vpop.f32.mrb[61].mxu0  ;;  %v10096_v50 = vld [vmem:[%s12551_s6 + $0x120] ss:$24 sps:$4 sm:$0xff]   ;;  %v10101_v54 = vpack.c.bf16 %v9934_v37, %v9615_v61  ;;  %v10120_v37 = vld [vmem:[%s12551_s6 + $0x150] ss:$24 sps:$4 sm:$0xff]  }
 0xa0a   :  { %v2410_v36 = vadd.f32 %v7064_v13, %v2363_v47  ;;  %v2365_v43 = vpop.f32.mrb[62].mxu0  ;;  %v10109_v47 = vld [vmem:[%s12551_s6 + $0x154] ss:$24 sps:$4 sm:$0xff]   ;;  %v6351_v61 = vld [vmem:[%s12550_s5 + $0x160] ss:$24 sps:$4 sm:$0xff]  }
 0xa0b   :  { %v5795_v24 = vmul.f32 -1.442695, %v2403_v11  ;;  %v2366_v9 = vpop.f32.mrb[63].mxu0  ;;  %v6353_v11 = vld [vmem:[%s12550_s5 + $0x164] ss:$24 sps:$4 sm:$0xff]   ;;  %v13340_v43 = vmov 0.0|0.0  }
 0xa0c   :  { %v2411_v40 = vmul.f32 %v6702_v28, %v2410_v36  ;;  %v6359_v13 = vld [vmem:[%s12550_s5 + $0x194] ss:$24 sps:$4 sm:$0xff]   ;;  %v10129_v36 = vld [vmem:[%s12551_s6 + $0x184] ss:$24 sps:$4 sm:$0xff]   ;;  %v6357_v28 = vld [vmem:[%s12550_s5 + $0x190] ss:$24 sps:$4 sm:$0xff]  }
 0xa0d   :  { %6703 = vpow2.f32 %v5795_v24  ;;  %v10140_v24 = vld [vmem:[%s12551_s6 + $0x180] ss:$24 sps:$4 sm:$0xff]   ;;  %v6365_v9 = vld [vmem:[%s12550_s5 + $0x1c4] ss:$24 sps:$4 sm:$0xff]  }
 0xa0e   :  { %v2412_v62 = vadd.f32 %v2411_v40, %v13331_v59  ;;  %v10149_v40 = vld [vmem:[%s12551_s6 + $0x1b4] ss:$24 sps:$4 sm:$0xff]   ;;  %v6363_v59 = vld [vmem:[%s12550_s5 + $0x1c0] ss:$24 sps:$4 sm:$0xff]  }
 0xa17   :  { %v6704_v22 = vpop.eup %6703 }
 0xa18   :  { %v2407_v44 = vadd.f32 1.0, %v6704_v22  ;;  %v6371_v22 = vld [vmem:[%s12550_s5 + $0x1f4] ss:$24 sps:$4 sm:$0xff]  }
 0xa1a   :  { %6705 = vrcp.f32 %v2407_v44  ;;  %v10167_v44 = vld [vmem:[%s12551_s6 + $0x1e4] ss:$24 sps:$4 sm:$0xff]  }
 0xa1b   :  { %6707 = vtanh.f32 %v2412_v62  ;;  %v10158_v62 = vld [vmem:[%s12551_s6 + $0x1b0] ss:$24 sps:$4 sm:$0xff]  }
 0xa24   :  { %v6706_v45 = vpop.eup %6705 }
 0xa25   :  { %v2414_v52 = vsub.f32 1.0, %v6706_v45  ;;  %v6708_v53 = vpop.eup %6707  ;;  %v2416_v1 = vmul.f32 %v6706_v45, %v9621_v5  ;;  %v6369_v45 = vld [vmem:[%s12550_s5 + $0x1f0] ss:$24 sps:$4 sm:$0xff]  }
 0xa27   :  { %v2415_v60 = vmul.f32 %v6708_v53, %v2414_v52  ;;  %v10176_v52 = vld [vmem:[%s12551_s6 + $0x1e0] ss:$24 sps:$4 sm:$0xff]   ;;  %v6377_v53 = vld [vmem:[%s12550_s5 + $0x224] ss:$24 sps:$4 sm:$0xff]  }
 0xa29   :  { %v2417_v2 = vadd.f32 %v2416_v1, %v2415_v60  ;;  %v10185_v60 = vld [vmem:[%s12551_s6 + $0x214] ss:$24 sps:$4 sm:$0xff]   ;;  %v6375_v1 = vld [vmem:[%s12550_s5 + $0x220] ss:$24 sps:$4 sm:$0xff]  }
 0xa2b   :  { %v9943_v23 = vpack.c.bf16 %v9621_v5, %v2417_v2  ;;  %v6317_v5 = vld [vmem:[%s12550_s5 + $0x44] ss:$24 sps:$4 sm:$0xff]   ;;  %v10194_v2 = vld [vmem:[%s12551_s6 + $0x210] ss:$24 sps:$4 sm:$0xff]  }
 0xa2d   :  { %3084 = vmatprep.mubr.bf16.mxu1 %v9943_v23  ;;  %3157 = vmatprep.mubr.bf16.mxu0 %v9943_v23 }
 0xa2e   :  { %3085 = vmatmul.mubr.bf16.vlgmr.msra.gmra.mrb[80].mxu1 %v9955_v16  ;;  %3158 = vmatmul.mubr.bf16.vlgmr.msra.gmra.mrb[64].mxu0 %v9955_v16 }
 0xa2f   :  { %3199 = vmatpush1.bf16.msra.mxu1 %v6309_v18  ;;  %3910 = vmatpush1.bf16.msra.mxu0 %v9951_v33  ;;  %v10203_v18 = vld [vmem:[%s12551_s6 + $0x244] ss:$24 sps:$4 sm:$0xff]  }
 0xa30   :  { %3094 = vmatprep.mubr.bf16.mxu1 %v9971_v29  ;;  %3167 = vmatprep.mubr.bf16.mxu0 %v9971_v29 }
 0xa31   :  { %3200 = vmatprep.subr.bf16.mxu1 %v6317_v5  ;;  %3911 = vmatprep.subr.bf16.mxu0 %v9965_v41  ;;  %v6389_v5 = vld [vmem:[%s12550_s5 + $0x284] ss:$24 sps:$4 sm:$0xff]  }
 0xa33   :  { %3201 = vmatpush1.bf16.msra.mxu1 %v6315_v6  ;;  %3912 = vmatpush1.bf16.msra.mxu0 %v9980_v25  ;;  %v10221_v6 = vld [vmem:[%s12551_s6 + $0x274] ss:$24 sps:$4 sm:$0xff]  }
 0xa34   :  { %3202 = vmatprep.subr.bf16.mxu1 %v6323_v14  ;;  %3913 = vmatprep.subr.bf16.mxu0 %v9990_v10  ;;  %v6387_v14 = vld [vmem:[%s12550_s5 + $0x280] ss:$24 sps:$4 sm:$0xff]  }
 0xa36   :  { %3095 = vmatmul.mubr.bf16.gmra.mrb[84].mxu1 %v10005_v3  ;;  %3168 = vmatmul.mubr.bf16.gmra.mrb[68].mxu0 %v10005_v3 }
 0xa37   :  { %3203 = vmatpush1.bf16.msra.mxu1 %v6321_v31  ;;  %3914 = vmatpush1.bf16.msra.mxu0 %v10000_v8  ;;  %v10230_v31 = vld [vmem:[%s12551_s6 + $0x270] ss:$24 sps:$4 sm:$0xff]  }
 0xa38   :  { %3104 = vmatprep.mubr.bf16.mxu1 %v10019_v58  ;;  %3177 = vmatprep.mubr.bf16.mxu0 %v10019_v58 }
 0xa39   :  { %3204 = vmatprep.subr.bf16.mxu1 %v6329_v7  ;;  %3915 = vmatprep.subr.bf16.mxu0 %v10013_v19  ;;  %v6393_v7 = vld [vmem:[%s12550_s5 + $0x2b0] ss:$24 sps:$4 sm:$0xff]  }
 0xa3b   :  { %3205 = vmatpush1.bf16.msra.mxu1 %v6327_v30  ;;  %3916 = vmatpush1.bf16.msra.mxu0 %v10028_v32  ;;  %v10257_v30 = vld [vmem:[%s12551_s6 + $0x2d4] ss:$24 sps:$4 sm:$0xff]  }
 0xa3c   :  { %3206 = vmatprep.subr.bf16.mxu1 %v6335_v26  ;;  %3917 = vmatprep.subr.bf16.mxu0 %v10038_v39  ;;  %13343 = vst [vmem:[#allocation12_spill] sm:$0xff] %v10257_v30  ;;  %v6399_v26 = vld [vmem:[%s12550_s5 + $0x2e0] ss:$24 sps:$4 sm:$0xff]  }
 0xa3e   :  { %3105 = vmatmul.mubr.bf16.gmra.mrb[88].mxu1 %v10053_v48  ;;  %3178 = vmatmul.mubr.bf16.gmra.mrb[72].mxu0 %v10053_v48 }
 0xa3f   :  { %3207 = vmatpush1.bf16.msra.mxu1 %v6333_v0  ;;  %3918 = vmatpush1.bf16.msra.mxu0 %v10048_v49  ;;  %v10266_v0 = vld [vmem:[%s12551_s6 + $0x2d0] ss:$24 sps:$4 sm:$0xff]  }
 0xa40   :  { %3114 = vmatprep.mubr.bf16.mxu1 %v10067_v46  ;;  %3187 = vmatprep.mubr.bf16.mxu0 %v10067_v46  ;;  %13344 = vst [vmem:[#allocation14_spill] sm:$0xff] %v10266_v0 }
 0xa41   :  { %3208 = vmatprep.subr.bf16.mxu1 %v6341_v4  ;;  %3919 = vmatprep.subr.bf16.mxu0 %v10061_v12  ;;  %v10272_v4 = vld [vmem:[%s12551_s6 + $0xc] ss:$24 sps:$4 sm:$0xff]  }
 0xa43   :  { %3209 = vmatpush1.bf16.msra.mxu1 %v6339_v55  ;;  %3920 = vmatpush1.bf16.msra.mxu0 %v10076_v21  ;;  %v10290_v55 = vld [vmem:[%s12551_s6 + $0x10] ss:$24 sps:$4 sm:$0xff]  }
 0xa44   :  { %3210 = vmatprep.subr.bf16.mxu1 %v6347_v51  ;;  %3921 = vmatprep.subr.bf16.mxu0 %v10086_v27  ;;  %13346 = vst [vmem:[#allocation18_spill] sm:$0xff] %v10290_v55  ;;  %v10295_v51 = vld [vmem:[%s12551_s6 + $0x3c] ss:$24 sps:$4 sm:$0xff]  }
 0xa46   :  { %3115 = vmatmul.mubr.bf16.gmra.mrb[92].mxu1 %v10101_v54  ;;  %3188 = vmatmul.mubr.bf16.gmra.mrb[76].mxu0 %v10101_v54 }
 0xa47   :  { %3211 = vmatpush1.bf16.msra.mxu1 %v6345_v42  ;;  %3922 = vmatpush1.bf16.msra.mxu0 %v10096_v50  ;;  %v10300_v42 = vld [vmem:[%s12551_s6 + $0x44] ss:$24 sps:$4 sm:$0xff]  }
 0xa48   :  { %3230 = vmatprep.mubr.bf16.mxu1 %v9943_v23  ;;  %3212 = vmatprep.subr.bf16.mxu1 %v6353_v11  ;;  %v6383_v23 = vld [vmem:[%s12550_s5 + $0x254] ss:$24 sps:$4 sm:$0xff]   ;;  %13347 = vst [vmem:[#allocation19_spill] sm:$0xff] %v10300_v42  ;;  %v10309_v11 = vld [vmem:[%s12551_s6 + $0x38] ss:$24 sps:$4 sm:$0xff]  }
 0xa49   :  { %3923 = vmatprep.subr.bf16.mxu0 %v10109_v47  ;;  %3941 = vmatprep.mubr.bf16.mxu0 %v13340_v43 }
 0xa4b   :  { %3213 = vmatpush1.bf16.msra.mxu1 %v6351_v61  ;;  %3924 = vmatpush1.bf16.msra.mxu0 %v10120_v37  ;;  %v10316_v61 = vld [vmem:[%s12551_s6 + $0x40] ss:$24 sps:$4 sm:$0xff]  }
 0xa4c   :  { %3214 = vmatprep.subr.bf16.mxu1 %v6359_v13  ;;  %3925 = vmatprep.subr.bf16.mxu0 %v10129_v36  ;;  %13348 = vst [vmem:[#allocation35_spill] sm:$0xff] %v10316_v61  ;;  %v10334_v13 = vld [vmem:[%s12551_s6 + $0x68] ss:$24 sps:$4 sm:$0xff]  }
 0xa4f   :  { %3215 = vmatpush1.bf16.msra.mxu1 %v6357_v28  ;;  %3926 = vmatpush1.bf16.msra.mxu0 %v10140_v24  ;;  %v10341_v28 = vld [vmem:[%s12551_s6 + $0x70] ss:$24 sps:$4 sm:$0xff]  }
 0xa50   :  { %3216 = vmatprep.subr.bf16.mxu1 %v6365_v9  ;;  %3927 = vmatprep.subr.bf16.mxu0 %v10149_v40  ;;  %13350 = vst [vmem:[#allocation22_spill] sm:$0xff] %v10341_v28  ;;  %v10346_v9 = vld [vmem:[%s12551_s6 + $0x9c] ss:$24 sps:$4 sm:$0xff]  }
 0xa53   :  { %3217 = vmatpush1.bf16.msra.mxu1 %v6363_v59  ;;  %3928 = vmatpush1.bf16.msra.mxu0 %v10158_v62  ;;  %v10352_v59 = vld [vmem:[%s12551_s6 + $0xa4] ss:$24 sps:$4 sm:$0xff]  }
 0xa54   :  { %3218 = vmatprep.subr.bf16.mxu1 %v6371_v22  ;;  %3929 = vmatprep.subr.bf16.mxu0 %v10167_v44  ;;  %13351 = vst [vmem:[#allocation36_spill] sm:$0xff] %v10352_v59  ;;  %v10360_v22 = vld [vmem:[%s12551_s6 + $0x98] ss:$24 sps:$4 sm:$0xff]  }
 0xa57   :  { %3219 = vmatpush1.bf16.msra.mxu1 %v6369_v45  ;;  %3930 = vmatpush1.bf16.msra.mxu0 %v10176_v52  ;;  %v10367_v45 = vld [vmem:[%s12551_s6 + $0xa0] ss:$24 sps:$4 sm:$0xff]  }
 0xa58   :  { %3220 = vmatprep.subr.bf16.mxu1 %v6377_v53  ;;  %3931 = vmatprep.subr.bf16.mxu0 %v10185_v60  ;;  %13352 = vst [vmem:[#allocation37_spill] sm:$0xff] %v10367_v45  ;;  %v10384_v53 = vld [vmem:[%s12551_s6 + $0xc8] ss:$24 sps:$4 sm:$0xff]  }
 0xa59   :  { %13355 = vst [vmem:[#allocation38_spill] sm:$0xff] %v10384_v53 }
 0xa5b   :  { %3221 = vmatpush1.bf16.msra.mxu1 %v6375_v1  ;;  %3932 = vmatpush1.bf16.msra.mxu0 %v10194_v2  ;;  %v10391_v1 = vld [vmem:[%s12551_s6 + $0xd0] ss:$24 sps:$4 sm:$0xff]  }
 0xa5c   :  { %3222 = vmatprep.subr.bf16.mxu1 %v6383_v23  ;;  %3933 = vmatprep.subr.bf16.mxu0 %v10203_v18  ;;  %13356 = vst [vmem:[#allocation39_spill] sm:$0xff] %v10391_v1  ;;  %v10396_v23 = vld [vmem:[%s12551_s6 + $0xfc] ss:$24 sps:$4 sm:$0xff]  }
 0xa5d   :  { %13357 = vst [vmem:[#allocation25_spill] sm:$0xff] %v10396_v23 }
 0xa5f   :  { %3223 = vmatpush1.bf16.msra.mxu1 %v6381_v56  ;;  %3934 = vmatpush1.bf16.msra.mxu0 %v10212_v15  ;;  %v10402_v56 = vld [vmem:[%s12551_s6 + $0x104] ss:$24 sps:$4 sm:$0xff]  }
 0xa60   :  { %3224 = vmatprep.subr.bf16.mxu1 %v6389_v5  ;;  %3935 = vmatprep.subr.bf16.mxu0 %v10221_v6  ;;  %13358 = vst [vmem:[#allocation57_spill] sm:$0xff] %v10402_v56  ;;  %v10410_v5 = vld [vmem:[%s12551_s6 + $0xf8] ss:$24 sps:$4 sm:$0xff]  }
 0xa61   :  { %13359 = vst [vmem:[#allocation59_spill] sm:$0xff] %v10410_v5 }
 0xa63   :  { %3225 = vmatpush1.bf16.msra.mxu1 %v6387_v14  ;;  %3936 = vmatpush1.bf16.msra.mxu0 %v10230_v31  ;;  %v10417_v14 = vld [vmem:[%s12551_s6 + $0x100] ss:$24 sps:$4 sm:$0xff]  }
 0xa64   :  { %3226 = vmatprep.subr.bf16.mxu1 %v6395_v57  ;;  %3937 = vmatprep.subr.bf16.mxu0 %v10239_v63  ;;  %13360 = vst [vmem:[#allocation79_spill] sm:$0xff] %v10417_v14  ;;  %v10434_v57 = vld [vmem:[%s12551_s6 + $0x128] ss:$24 sps:$4 sm:$0xff]   ;;  %v10646_v63 = vld [vmem:[%s12551_s6 + $0x2e4] ss:$24 sps:$4 sm:$0xff]  }
 0xa65   :  { %13363 = vst [vmem:[#allocation60_spill] sm:$0xff] %v10434_v57 }
 0xa67   :  { %3227 = vmatpush1.bf16.msra.mxu1 %v6393_v7  ;;  %3938 = vmatpush1.bf16.msra.mxu0 %v10248_v34  ;;  %v10441_v7 = vld [vmem:[%s12551_s6 + $0x130] ss:$24 sps:$4 sm:$0xff]   ;;  %v10640_v34 = vld [vmem:[%s12551_s6 + $0x2dc] ss:$24 sps:$4 sm:$0xff]  }
 0xa68   :  { %3228 = vmatprep.subr.bf16.mxu1 %v6401_v35  ;;  %3939 = vmatprep.subr.bf16.mxu0 %v10257_v30  ;;  %13364 = vst [vmem:[#allocation28_spill] sm:$0xff] %v10441_v7  ;;  %v10446_v35 = vld [vmem:[%s12551_s6 + $0x15c] ss:$24 sps:$4 sm:$0xff]   ;;  %13396 = vst [vmem:[#allocation61_spill] sm:$0xff] %v10640_v34 }
 0xa69   :  { %13365 = vst [vmem:[#allocation29_spill] sm:$0xff] %v10446_v35  ;;  %v10622_v30 = vld [vmem:[%s12551_s6 + $0x2b4] ss:$24 sps:$4 sm:$0xff]  }
 0xa6a   :  { %13394 = vst [vmem:[#allocation93_spill] sm:$0xff] %v10622_v30 }
 0xa6b   :  { %3229 = vmatpush1.bf16.msra.mxu1 %v6399_v26  ;;  %3940 = vmatpush1.bf16.msra.mxu0 %v10266_v0  ;;  %v10452_v26 = vld [vmem:[%s12551_s6 + $0x164] ss:$24 sps:$4 sm:$0xff]  }
 0xa6c   :  { %3950 = vmatprep.subr.bf16.mxu1 %v10272_v4  ;;  %3991 = vmatprep.subr.bf16.mxu0 %v10277_v20  ;;  %13366 = vst [vmem:[#allocation66_spill] sm:$0xff] %v10452_v26  ;;  %v10598_v20 = vld [vmem:[%s12551_s6 + $0x284] ss:$24 sps:$4 sm:$0xff]  }
 0xa6d   :  { %13390 = vst [vmem:[#allocation89_spill] sm:$0xff] %v10598_v20  ;;  %v10616_v0 = vld [vmem:[%s12551_s6 + $0x2ac] ss:$24 sps:$4 sm:$0xff]  }
 0xa6e   :  { %3231 = vmatmul.mubr.bf16.vlgmr.msra.gmra.mrb[96].mxu1 %v9955_v16  ;;  %3942 = vmatmul.mubr.bf16.vlgmr.msra.gmra.mrb[80].mxu0 %v13340_v43  ;;  %v10321_v16 = vld [vmem:[%s12551_s6 + $0x6c] ss:$24 sps:$4 sm:$0xff]   ;;  %13393 = vst [vmem:[#allocation92_spill] sm:$0xff] %v10616_v0 }
 0xa6f   :  { %3240 = vmatprep.mubr.bf16.mxu1 %v9971_v29  ;;  %3951 = vmatpush1.bf16.msra.mxu1 %v10283_v38  ;;  %v10327_v29 = vld [vmem:[%s12551_s6 + $0x74] ss:$24 sps:$4 sm:$0xff]  }
 0xa70   :  { %3992 = vmatpush1.bf16.msra.mxu0 %v10290_v55  ;;  %3952 = vmatprep.subr.bf16.mxu1 %v10295_v51  ;;  %13349 = vst [vmem:[#allocation21_spill] sm:$0xff] %v10327_v29  ;;  %v10592_v55 = vld [vmem:[%s12551_s6 + $0x27c] ss:$24 sps:$4 sm:$0xff]  }
 0xa71   :  { %3993 = vmatprep.subr.bf16.mxu0 %v10300_v42  ;;  %4023 = vmatprep.mubr.bf16.mxu0 %v13340_v43  ;;  %v10574_v42 = vld [vmem:[%s12551_s6 + $0x254] ss:$24 sps:$4 sm:$0xff]   ;;  %13389 = vst [vmem:[#allocation72_spill] sm:$0xff] %v10592_v55 }
 0xa72   :  { %13386 = vst [vmem:[#allocation85_spill] sm:$0xff] %v10574_v42 }
 0xa73   :  { %3953 = vmatpush1.bf16.msra.mxu1 %v10309_v11 }
 0xa74   :  { %3994 = vmatpush1.bf16.msra.mxu0 %v10316_v61  ;;  %3954 = vmatprep.subr.bf16.mxu1 %v10321_v16  ;;  %v10568_v61 = vld [vmem:[%s12551_s6 + $0x24c] ss:$24 sps:$4 sm:$0xff]  }
 0xa75   :  { %3995 = vmatprep.subr.bf16.mxu0 %v10327_v29  ;;  %v10550_v29 = vld [vmem:[%s12551_s6 + $0x224] ss:$24 sps:$4 sm:$0xff]   ;;  %13385 = vst [vmem:[#allocation46_spill] sm:$0xff] %v10568_v61 }
 0xa76   :  { %3241 = vmatmul.mubr.bf16.gmra.mrb[100].mxu1 %v10005_v3  ;;  %v10372_v3 = vld [vmem:[%s12551_s6 + $0xcc] ss:$24 sps:$4 sm:$0xff]   ;;  %13382 = vst [vmem:[#allocation101_spill] sm:$0xff] %v10550_v29 }
 0xa77   :  { %3250 = vmatprep.mubr.bf16.mxu1 %v10019_v58  ;;  %3955 = vmatpush1.bf16.msra.mxu1 %v10334_v13  ;;  %13353 = vst [vmem:[#allocation23_spill] sm:$0xff] %v10372_v3  ;;  %v10378_v58 = vld [vmem:[%s12551_s6 + $0xd4] ss:$24 sps:$4 sm:$0xff]  }
 0xa78   :  { %3996 = vmatpush1.bf16.msra.mxu0 %v10341_v28  ;;  %3956 = vmatprep.subr.bf16.mxu1 %v10346_v9  ;;  %13354 = vst [vmem:[#allocation24_spill] sm:$0xff] %v10378_v58  ;;  %v10544_v28 = vld [vmem:[%s12551_s6 + $0x21c] ss:$24 sps:$4 sm:$0xff]  }
 0xa79   :  { %3997 = vmatprep.subr.bf16.mxu0 %v10352_v59  ;;  %v10526_v59 = vld [vmem:[%s12551_s6 + $0x1f4] ss:$24 sps:$4 sm:$0xff]   ;;  %13381 = vst [vmem:[#allocation17_spill] sm:$0xff] %v10544_v28 }
 0xa7a   :  { %13378 = vst [vmem:[#allocation99_spill] sm:$0xff] %v10526_v59 }
 0xa7b   :  { %3957 = vmatpush1.bf16.msra.mxu1 %v10360_v22 }
 0xa7c   :  { %3998 = vmatpush1.bf16.msra.mxu0 %v10367_v45  ;;  %3958 = vmatprep.subr.bf16.mxu1 %v10372_v3  ;;  %v10520_v45 = vld [vmem:[%s12551_s6 + $0x1ec] ss:$24 sps:$4 sm:$0xff]  }
 0xa7d   :  { %3999 = vmatprep.subr.bf16.mxu0 %v10378_v58  ;;  %v10502_v58 = vld [vmem:[%s12551_s6 + $0x1c4] ss:$24 sps:$4 sm:$0xff]   ;;  %13377 = vst [vmem:[#allocation13_spill] sm:$0xff] %v10520_v45 }
 0xa7e   :  { %3251 = vmatmul.mubr.bf16.gmra.mrb[104].mxu1 %v10053_v48  ;;  %v10422_v48 = vld [vmem:[%s12551_s6 + $0x12c] ss:$24 sps:$4 sm:$0xff]   ;;  %13374 = vst [vmem:[#allocation97_spill] sm:$0xff] %v10502_v58 }
 0xa7f   :  { %3260 = vmatprep.mubr.bf16.mxu1 %v10067_v46  ;;  %3959 = vmatpush1.bf16.msra.mxu1 %v10384_v53  ;;  %13361 = vst [vmem:[#allocation80_spill] sm:$0xff] %v10422_v48  ;;  %v10428_v46 = vld [vmem:[%s12551_s6 + $0x134] ss:$24 sps:$4 sm:$0xff]  }
 0xa80   :  { %4000 = vmatpush1.bf16.msra.mxu0 %v10391_v1  ;;  %3960 = vmatprep.subr.bf16.mxu1 %v10396_v23  ;;  %13362 = vst [vmem:[#allocation58_spill] sm:$0xff] %v10428_v46  ;;  %v10496_v1 = vld [vmem:[%s12551_s6 + $0x1bc] ss:$24 sps:$4 sm:$0xff]  }
 0xa81   :  { %4001 = vmatprep.subr.bf16.mxu0 %v10402_v56  ;;  %v10478_v56 = vld [vmem:[%s12551_s6 + $0x194] ss:$24 sps:$4 sm:$0xff]   ;;  %13373 = vst [vmem:[#allocation33_spill] sm:$0xff] %v10496_v1 }
 0xa82   :  { %13370 = vst [vmem:[#allocation95_spill] sm:$0xff] %v10478_v56 }
 0xa83   :  { %3961 = vmatpush1.bf16.msra.mxu1 %v10410_v5 }
 0xa84   :  { %4002 = vmatpush1.bf16.msra.mxu0 %v10417_v14  ;;  %3962 = vmatprep.subr.bf16.mxu1 %v10422_v48  ;;  %v10459_v14 = vld [vmem:[%s12551_s6 + $0x158] ss:$24 sps:$4 sm:$0xff]  }
 0xa85   :  { %4003 = vmatprep.subr.bf16.mxu0 %v10428_v46  ;;  %13367 = vst [vmem:[#allocation68_spill] sm:$0xff] %v10459_v14  ;;  %v10467_v46 = vld [vmem:[%s12551_s6 + $0x160] ss:$24 sps:$4 sm:$0xff]  }
 0xa86   :  { %3261 = vmatmul.mubr.bf16.gmra.mrb[108].mxu1 %v10101_v54  ;;  %13368 = vst [vmem:[#allocation30_spill] sm:$0xff] %v10467_v46  ;;  %v10472_v54 = vld [vmem:[%s12551_s6 + $0x18c] ss:$24 sps:$4 sm:$0xff]  }
 0xa87   :  { %3963 = vmatpush1.bf16.msra.mxu1 %v10434_v57  ;;  %3982 = vmatprep.mubr.bf16.mxu1 %v13340_v43  ;;  %13369 = vst [vmem:[#allocation31_spill] sm:$0xff] %v10472_v54 }
 0xa88   :  { %4004 = vmatpush1.bf16.msra.mxu0 %v10441_v7  ;;  %3964 = vmatprep.subr.bf16.mxu1 %v10446_v35  ;;  %v10484_v7 = vld [vmem:[%s12551_s6 + $0x188] ss:$24 sps:$4 sm:$0xff]  }
 0xa89   :  { %4005 = vmatprep.subr.bf16.mxu0 %v10452_v26  ;;  %13371 = vst [vmem:[#allocation96_spill] sm:$0xff] %v10484_v7  ;;  %v10491_v26 = vld [vmem:[%s12551_s6 + $0x190] ss:$24 sps:$4 sm:$0xff]  }
 0xa8a   :  { %13372 = vst [vmem:[#allocation32_spill] sm:$0xff] %v10491_v26 }
 0xa8b   :  { %3965 = vmatpush1.bf16.msra.mxu1 %v10459_v14 }
 0xa8c   :  { %4006 = vmatpush1.bf16.msra.mxu0 %v10467_v46  ;;  %3966 = vmatprep.subr.bf16.mxu1 %v10472_v54  ;;  %v10508_v46 = vld [vmem:[%s12551_s6 + $0x1b8] ss:$24 sps:$4 sm:$0xff]  }
 0xa8d   :  { %4007 = vmatprep.subr.bf16.mxu0 %v10478_v56  ;;  %13375 = vst [vmem:[#allocation98_spill] sm:$0xff] %v10508_v46  ;;  %v10515_v56 = vld [vmem:[%s12551_s6 + $0x1c0] ss:$24 sps:$4 sm:$0xff]  }
 0xa8e   :  { %13376 = vst [vmem:[#allocation34_spill] sm:$0xff] %v10515_v56 }
 0xa8f   :  { %3967 = vmatpush1.bf16.msra.mxu1 %v10484_v7 }
 0xa90   :  { %4008 = vmatpush1.bf16.msra.mxu0 %v10491_v26  ;;  %3968 = vmatprep.subr.bf16.mxu1 %v10496_v1  ;;  %v10532_v26 = vld [vmem:[%s12551_s6 + $0x1e8] ss:$24 sps:$4 sm:$0xff]  }
 0xa91   :  { %4009 = vmatprep.subr.bf16.mxu0 %v10502_v58  ;;  %13379 = vst [vmem:[#allocation100_spill] sm:$0xff] %v10532_v26  ;;  %v10539_v58 = vld [vmem:[%s12551_s6 + $0x1f0] ss:$24 sps:$4 sm:$0xff]  }
 0xa92   :  { %13380 = vst [vmem:[#allocation16_spill] sm:$0xff] %v10539_v58 }
 0xa93   :  { %3969 = vmatpush1.bf16.msra.mxu1 %v10508_v46 }
 0xa94   :  { %4010 = vmatpush1.bf16.msra.mxu0 %v10515_v56  ;;  %3970 = vmatprep.subr.bf16.mxu1 %v10520_v45  ;;  %v10556_v56 = vld [vmem:[%s12551_s6 + $0x218] ss:$24 sps:$4 sm:$0xff]  }
 0xa95   :  { %4011 = vmatprep.subr.bf16.mxu0 %v10526_v59  ;;  %13383 = vst [vmem:[#allocation20_spill] sm:$0xff] %v10556_v56  ;;  %v10563_v59 = vld [vmem:[%s12551_s6 + $0x220] ss:$24 sps:$4 sm:$0xff]  }
 0xa96   :  { %13384 = vst [vmem:[#allocation45_spill] sm:$0xff] %v10563_v59 }
 0xa97   :  { %3971 = vmatpush1.bf16.msra.mxu1 %v10532_v26 }
 0xa98   :  { %4012 = vmatpush1.bf16.msra.mxu0 %v10539_v58  ;;  %3972 = vmatprep.subr.bf16.mxu1 %v10544_v28  ;;  %v10580_v58 = vld [vmem:[%s12551_s6 + $0x248] ss:$24 sps:$4 sm:$0xff]  }
 0xa99   :  { %4013 = vmatprep.subr.bf16.mxu0 %v10550_v29  ;;  %13387 = vst [vmem:[#allocation74_spill] sm:$0xff] %v10580_v58  ;;  %v10587_v29 = vld [vmem:[%s12551_s6 + $0x250] ss:$24 sps:$4 sm:$0xff]  }
 0xa9a   :  { %13388 = vst [vmem:[#allocation71_spill] sm:$0xff] %v10587_v29 }
 0xa9b   :  { %3973 = vmatpush1.bf16.msra.mxu1 %v10556_v56 }
 0xa9c   :  { %4014 = vmatpush1.bf16.msra.mxu0 %v10563_v59  ;;  %3974 = vmatprep.subr.bf16.mxu1 %v10568_v61  ;;  %v10604_v59 = vld [vmem:[%s12551_s6 + $0x278] ss:$24 sps:$4 sm:$0xff]  }
 0xa9d   :  { %4015 = vmatprep.subr.bf16.mxu0 %v10574_v42  ;;  %13391 = vst [vmem:[#allocation90_spill] sm:$0xff] %v10604_v59  ;;  %v10611_v42 = vld [vmem:[%s12551_s6 + $0x280] ss:$24 sps:$4 sm:$0xff]  }
 0xa9e   :  { %13392 = vst [vmem:[#allocation91_spill] sm:$0xff] %v10611_v42 }
 0xa9f   :  { %3975 = vmatpush1.bf16.msra.mxu1 %v10580_v58 }
 0xaa0   :  { %4016 = vmatpush1.bf16.msra.mxu0 %v10587_v29  ;;  %3976 = vmatprep.subr.bf16.mxu1 %v10592_v55  ;;  %v10628_v29 = vld [vmem:[%s12551_s6 + $0x2a8] ss:$24 sps:$4 sm:$0xff]  }
 0xaa1   :  { %4017 = vmatprep.subr.bf16.mxu0 %v10598_v20  ;;  %13395 = vst [vmem:[#allocation94_spill] sm:$0xff] %v10628_v29  ;;  %v10635_v20 = vld [vmem:[%s12551_s6 + $0x2b0] ss:$24 sps:$4 sm:$0xff]  }
 0xaa3   :  { %3977 = vmatpush1.bf16.msra.mxu1 %v10604_v59 }
 0xaa4   :  { %4018 = vmatpush1.bf16.msra.mxu0 %v10611_v42  ;;  %3978 = vmatprep.subr.bf16.mxu1 %v10616_v0  ;;  %v10652_v42 = vld [vmem:[%s12551_s6 + $0x2d8] ss:$24 sps:$4 sm:$0xff]  }
 0xaa5   :  { %4019 = vmatprep.subr.bf16.mxu0 %v10622_v30  ;;  %13397 = vst [vmem:[#allocation62_spill] sm:$0xff] %v10652_v42  ;;  %v10659_v30 = vld [vmem:[%s12551_s6 + $0x2e0] ss:$24 sps:$4 sm:$0xff]  }
 0xaa7   :  { %3979 = vmatpush1.bf16.msra.mxu1 %v10628_v29 }
 0xaa8   :  { %4020 = vmatpush1.bf16.msra.mxu0 %v10635_v20  ;;  %3980 = vmatprep.subr.bf16.mxu1 %v10640_v34 }
 0xaa9   :  { %4021 = vmatprep.subr.bf16.mxu0 %v10646_v63 }
 0xaab   :  { %3981 = vmatpush1.bf16.msra.mxu1 %v10652_v42 }
 0xaac   :  { %4022 = vmatpush1.bf16.msra.mxu0 %v10659_v30  ;;  %4086 = vmatprep.subr.bf16.mxu1 %v9923_v17 }
 0xaad   :  { %4127 = vmatprep.subr.bf16.mxu0 %v10272_v4 }
 0xaae   :  { %3983 = vmatmul.mubr.bf16.vlgmr.msra.gmra.mrb[112].mxu1 %v13340_v43 }
 0xaaf   :  { %4024 = vmatmul.mubr.bf16.vlgmr.msra.gmra.mrb[84].mxu0 %v13340_v43  ;;  %4087 = vmatpush1.bf16.msra.mxu1 %v9951_v33  ;;  %v13398_v33 = vld [vmem:[#allocation10_spill] sm:$0xff]  ;;  %v10735_v43 = vld [vmem:[%s12552_s7] sm:$0x3f] }
 0xab0   :  { %4128 = vmatpush1.bf16.msra.mxu0 %v10283_v38  ;;  %4088 = vmatprep.subr.bf16.mxu1 %v9965_v41  ;;  %v13399_v41 = vld [vmem:[#allocation11_spill] sm:$0xff] }
 0xab1   :  { %4129 = vmatprep.subr.bf16.mxu0 %v10295_v51 }
 0xab3   :  { %4089 = vmatpush1.bf16.msra.mxu1 %v9980_v25  ;;  %v13400_v25 = vld [vmem:[#allocation12_spill] sm:$0xff] }
 0xab4   :  { %4130 = vmatpush1.bf16.msra.mxu0 %v10309_v11  ;;  %4090 = vmatprep.subr.bf16.mxu1 %v9990_v10  ;;  %v13401_v10 = vld [vmem:[#allocation14_spill] sm:$0xff] }
 0xab5   :  { %4131 = vmatprep.subr.bf16.mxu0 %v10321_v16 }
 0xab7   :  { %4091 = vmatpush1.bf16.msra.mxu1 %v10000_v8  ;;  %v13402_v8 = vld [vmem:[#allocation15_spill] sm:$0xff] }
 0xab8   :  { %4132 = vmatpush1.bf16.msra.mxu0 %v10334_v13  ;;  %4092 = vmatprep.subr.bf16.mxu1 %v10013_v19 }
 0xab9   :  { %4133 = vmatprep.subr.bf16.mxu0 %v10346_v9 }
 0xabb   :  { %4093 = vmatpush1.bf16.msra.mxu1 %v10028_v32 }
 0xabc   :  { %4134 = vmatpush1.bf16.msra.mxu0 %v10360_v22  ;;  %4094 = vmatprep.subr.bf16.mxu1 %v10038_v39 }
 0xabd   :  { %4135 = vmatprep.subr.bf16.mxu0 %v10372_v3 }
 0xabf   :  { %4095 = vmatpush1.bf16.msra.mxu1 %v10048_v49 }
 0xac0   :  { %4136 = vmatpush1.bf16.msra.mxu0 %v10384_v53  ;;  %4096 = vmatprep.subr.bf16.mxu1 %v10061_v12 }
 0xac1   :  { %4137 = vmatprep.subr.bf16.mxu0 %v10396_v23 }
 0xac3   :  { %4097 = vmatpush1.bf16.msra.mxu1 %v10076_v21 }
 0xac4   :  { %4138 = vmatpush1.bf16.msra.mxu0 %v10410_v5  ;;  %4098 = vmatprep.subr.bf16.mxu1 %v10086_v27 }
 0xac5   :  { %4139 = vmatprep.subr.bf16.mxu0 %v10422_v48 }
 0xac7   :  { %4099 = vmatpush1.bf16.msra.mxu1 %v10096_v50 }
 0xac8   :  { %4140 = vmatpush1.bf16.msra.mxu0 %v10434_v57  ;;  %4100 = vmatprep.subr.bf16.mxu1 %v10109_v47 }
 0xac9   :  { %4141 = vmatprep.subr.bf16.mxu0 %v10446_v35 }
 0xacb   :  { %4101 = vmatpush1.bf16.msra.mxu1 %v10120_v37 }
 0xacc   :  { %4142 = vmatpush1.bf16.msra.mxu0 %v10459_v14  ;;  %4102 = vmatprep.subr.bf16.mxu1 %v10129_v36 }
 0xacd   :  { %4143 = vmatprep.subr.bf16.mxu0 %v10472_v54 }
 0xacf   :  { %4103 = vmatpush1.bf16.msra.mxu1 %v10140_v24 }
 0xad0   :  { %4144 = vmatpush1.bf16.msra.mxu0 %v10484_v7  ;;  %4104 = vmatprep.subr.bf16.mxu1 %v10149_v40 }
 0xad1   :  { %4145 = vmatprep.subr.bf16.mxu0 %v10496_v1 }
 0xad3   :  { %4105 = vmatpush1.bf16.msra.mxu1 %v10158_v62 }
 0xad4   :  { %4146 = vmatpush1.bf16.msra.mxu0 %v10508_v46  ;;  %4106 = vmatprep.subr.bf16.mxu1 %v10167_v44 }
 0xad5   :  { %4147 = vmatprep.subr.bf16.mxu0 %v10520_v45 }
 0xad7   :  { %4107 = vmatpush1.bf16.msra.mxu1 %v10176_v52 }
 0xad8   :  { %4148 = vmatpush1.bf16.msra.mxu0 %v10532_v26  ;;  %4108 = vmatprep.subr.bf16.mxu1 %v10185_v60  ;;  %v13407_v26 = vld [vmem:[#allocation44_spill] sm:$0xff] }
 0xad9   :  { %4149 = vmatprep.subr.bf16.mxu0 %v10544_v28  ;;  %v2549_v45 = vrot.slane %v10735_v43, %v13407_v26 }
 0xadb   :  { %4109 = vmatpush1.bf16.msra.mxu1 %v10194_v2 }
 0xadc   :  { %4150 = vmatpush1.bf16.msra.mxu0 %v10556_v56  ;;  %4110 = vmatprep.subr.bf16.mxu1 %v10203_v18 }
 0xadd   :  { %4151 = vmatprep.subr.bf16.mxu0 %v10568_v61 }
 0xadf   :  { %4111 = vmatpush1.bf16.msra.mxu1 %v10212_v15 }
 0xae0   :  { %4152 = vmatpush1.bf16.msra.mxu0 %v10580_v58  ;;  %4112 = vmatprep.subr.bf16.mxu1 %v10221_v6  ;;  %v13405_v58 = vld [vmem:[#allocation43_spill] sm:$0xff] }
 0xae1   :  { %4153 = vmatprep.subr.bf16.mxu0 %v10592_v55 }
 0xae3   :  { %4113 = vmatpush1.bf16.msra.mxu1 %v10230_v31 }
 0xae4   :  { %4154 = vmatpush1.bf16.msra.mxu0 %v10604_v59  ;;  %4114 = vmatprep.subr.bf16.mxu1 %v13398_v33 }
 0xae5   :  { %4155 = vmatprep.subr.bf16.mxu0 %v10616_v0  ;;  %v13403_v0 = vld [vmem:[#allocation42_spill] sm:$0xff] }
 0xae6   :  { %v13404_v59 = vsub.s32 3, %v13403_v0 }
 0xae7   :  { %4115 = vmatpush1.bf16.msra.mxu1 %v13399_v41 }
 0xae8   :  { %4156 = vmatpush1.bf16.msra.mxu0 %v10628_v29  ;;  %4116 = vmatprep.subr.bf16.mxu1 %v13400_v25  ;;  %v10740_v29 = vrot.slane %v10735_v43, %v13404_v59 }
 0xae9   :  { %4157 = vmatprep.subr.bf16.mxu0 %v10640_v34 }
 0xaeb   :  { %4117 = vmatpush1.bf16.msra.mxu1 %v13401_v10 }
 0xaec   :  { %4158 = vmatpush1.bf16.msra.mxu0 %v10652_v42  ;;  %4168 = vmatprep.subr.bf16.mxu1 %v13402_v8  ;;  %v10748_v42 = vrot.slane %v10735_v43, %v13405_v58 }
 0xaed   :  { %4263 = vmatprep.subr.bf16.mxu0 %v9923_v17  ;;  %v13406_v17 = vsub.s32 2, %v13403_v0 }
 0xaef   :  { %v10753_v61 = vrot.slane %v10735_v43, %v13406_v17 }
 0xb01   :  { %v10742_v55 = vpop.f32.mrb[80].mxu1  ;;  %v10744_v34 = vpop.f32.mrb[64].mxu0 }
 0xb02   :  { %v3088_v56 = vpop.f32.mrb[81].mxu1  ;;  %v3161_v28 = vpop.f32.mrb[65].mxu0 }
 0xb03   :  { %v10758_v59 = vadd.f32 %v3161_v28, %v10740_v29  ;;  %v3090_v46 = vpop.f32.mrb[82].mxu1  ;;  %v3163_v1 = vpop.f32.mrb[66].mxu0 }
 0xb04   :  { %v10761_v7 = vadd.f32 %v3090_v46, %v10748_v42  ;;  %v10764_v58 = vadd.f32 %v3163_v1, %v10753_v61  ;;  %v3092_v54 = vpop.f32.mrb[83].mxu1  ;;  %v3165_v14 = vpop.f32.mrb[67].mxu0 }
 0xb05   :  { %13408 = vst [vmem:[#allocation77_spill] sm:$0xff] %v10758_v59  ;;  %v10766_v17 = vadd.f32 %v3092_v54, %v2549_v45  ;;  %v10769_v35 = vadd.f32 %v3165_v14, %v10740_v29 }
 0xb06   :  { %13409 = vst [vmem:[#allocation82_spill] sm:$0xff] %v10761_v7  ;;  %13410 = vst [vmem:[#allocation55_spill] sm:$0xff] %v10764_v58 }
 0xb07   :  { %13411 = vst [vmem:[#allocation56_spill] sm:$0xff] %v10766_v17  ;;  %13412 = vst [vmem:[#allocation81_spill] sm:$0xff] %v10769_v35 }
 0xb09   :  { %v3096_v57 = vpop.f32.mrb[84].mxu1  ;;  %v3169_v26 = vpop.f32.mrb[68].mxu0 }
 0xb0a   :  { %v10772_v28 = vadd.f32 %v3096_v57, %v10748_v42  ;;  %v10775_v59 = vadd.f32 %v3169_v26, %v10753_v61  ;;  %v3098_v46 = vpop.f32.mrb[85].mxu1  ;;  %v3171_v7 = vpop.f32.mrb[69].mxu0 }
 0xb0b   :  { %v10777_v48 = vadd.f32 %v3098_v46, %v2549_v45  ;;  %v10780_v1 = vadd.f32 %v3171_v7, %v10740_v29  ;;  %v3100_v54 = vpop.f32.mrb[86].mxu1  ;;  %v3173_v58 = vpop.f32.mrb[70].mxu0 }
 0xb0c   :  { %13413 = vst [vmem:[#allocation78_spill] sm:$0xff] %v10772_v28  ;;  %13414 = vst [vmem:[#allocation63_spill] sm:$0xff] %v10775_v59  ;;  %v10783_v14 = vadd.f32 %v3100_v54, %v10748_v42  ;;  %v10786_v35 = vadd.f32 %v3173_v58, %v10753_v61  ;;  %v3102_v57 = vpop.f32.mrb[87].mxu1  ;;  %v3175_v28 = vpop.f32.mrb[71].mxu0 }
 0xb0d   :  { %13415 = vst [vmem:[#allocation64_spill] sm:$0xff] %v10777_v48  ;;  %13416 = vst [vmem:[#allocation41_spill] sm:$0xff] %v10780_v1  ;;  %v10788_v17 = vadd.f32 %v3102_v57, %v2549_v45  ;;  %v10791_v26 = vadd.f32 %v3175_v28, %v10740_v29 }
 0xb0e   :  { %13417 = vst [vmem:[#allocation83_spill] sm:$0xff] %v10783_v14  ;;  %13418 = vst [vmem:[#allocation27_spill] sm:$0xff] %v10786_v35 }
 0xb0f   :  { %13419 = vst [vmem:[#allocation76_spill] sm:$0xff] %v10788_v17  ;;  %13420 = vst [vmem:[#allocation5_spill] sm:$0xff] %v10791_v26 }
 0xb11   :  { %v3106_v46 = vpop.f32.mrb[88].mxu1  ;;  %v3179_v59 = vpop.f32.mrb[72].mxu0 }
 0xb12   :  { %v10794_v7 = vadd.f32 %v3106_v46, %v10748_v42  ;;  %v10797_v1 = vadd.f32 %v3179_v59, %v10753_v61  ;;  %v3108_v54 = vpop.f32.mrb[89].mxu1  ;;  %v3181_v14 = vpop.f32.mrb[73].mxu0 }
 0xb13   :  { %v10799_v48 = vadd.f32 %v3108_v54, %v2549_v45  ;;  %v10802_v58 = vadd.f32 %v3181_v14, %v10740_v29  ;;  %v3110_v57 = vpop.f32.mrb[90].mxu1  ;;  %v3183_v35 = vpop.f32.mrb[74].mxu0 }
 0xb14   :  { %13421 = vst [vmem:[#allocation6_spill] sm:$0xff] %v10794_v7  ;;  %13422 = vst [vmem:[#allocation7_spill] sm:$0xff] %v10797_v1  ;;  %v10805_v28 = vadd.f32 %v3110_v57, %v10748_v42  ;;  %v10808_v26 = vadd.f32 %v3183_v35, %v10753_v61  ;;  %v3112_v46 = vpop.f32.mrb[91].mxu1  ;;  %v3185_v7 = vpop.f32.mrb[75].mxu0 }
 0xb15   :  { %13423 = vst [vmem:[#allocation8_spill] sm:$0xff] %v10799_v48  ;;  %13424 = vst [vmem:[#allocation9_spill] sm:$0xff] %v10802_v58  ;;  %v10810_v17 = vadd.f32 %v3112_v46, %v2549_v45  ;;  %v10813_v59 = vadd.f32 %v3185_v7, %v10740_v29 }
 0xb16   :  { %13425 = vst [vmem:[#allocation65_spill] sm:$0xff] %v10805_v28  ;;  %13426 = vst [vmem:[#allocation67_spill] sm:$0xff] %v10808_v26 }
 0xb17   :  { %13427 = vst [vmem:[#allocation75_spill] sm:$0xff] %v10810_v17  ;;  %13428 = vst [vmem:[#allocation84_spill] sm:$0xff] %v10813_v59 }
 0xb19   :  { %v3116_v54 = vpop.f32.mrb[92].mxu1  ;;  %v3189_v1 = vpop.f32.mrb[76].mxu0 }
 0xb1a   :  { %v10816_v14 = vadd.f32 %v3116_v54, %v10748_v42  ;;  %v10819_v48 = vadd.f32 %v3189_v1, %v10753_v61  ;;  %v3118_v57 = vpop.f32.mrb[93].mxu1  ;;  %v3191_v28 = vpop.f32.mrb[77].mxu0  ;;  %v13436_v1 = vsub.s32 4, %v13403_v0 }
 0xb1b   :  { %v10821_v58 = vadd.f32 %v3118_v57, %v2549_v45  ;;  %v10824_v35 = vadd.f32 %v3191_v28, %v10740_v29  ;;  %v3120_v46 = vpop.f32.mrb[94].mxu1  ;;  %v3193_v26 = vpop.f32.mrb[78].mxu0 }
 0xb1c   :  { %13429 = vst [vmem:[#allocation50_spill] sm:$0xff] %v10816_v14  ;;  %13430 = vst [vmem:[#allocation52_spill] sm:$0xff] %v10819_v48  ;;  %v10827_v7 = vadd.f32 %v3120_v46, %v10748_v42  ;;  %v10830_v17 = vadd.f32 %v3193_v26, %v10753_v61  ;;  %v3122_v54 = vpop.f32.mrb[95].mxu1  ;;  %v3195_v14 = vpop.f32.mrb[79].mxu0  ;;  %v2561_v57 = vrot.slane %v10735_v43, %v13436_v1  ;;  %v13437_v48 = vsub.s32 5, %v13403_v0 }
 0xb1d   :  { %13431 = vst [vmem:[#allocation69_spill] sm:$0xff] %v10821_v58  ;;  %13432 = vst [vmem:[#allocation70_spill] sm:$0xff] %v10824_v35  ;;  %v10832_v59 = vadd.f32 %v3122_v54, %v2549_v45  ;;  %v3087_v46 = vadd.f32 %v10742_v55, %v10748_v42 }
 0xb1e   :  { %13433 = vst [vmem:[#allocation73_spill] sm:$0xff] %v10827_v7  ;;  %13434 = vst [vmem:[#allocation86_spill] sm:$0xff] %v10830_v17  ;;  %v10840_v28 = vrot.slane %v10735_v43, %v13437_v48  ;;  %v3089_v7 = vadd.f32 %v3088_v56, %v2549_v45 }
 0xb1f   :  { %13435 = vst [vmem:[#allocation47_spill] sm:$0xff] %v10832_v59 }
 0xb41   :  { %v3232_v58 = vpop.f32.mrb[96].mxu1  ;;  %v3943_v26 = vpop.f32.mrb[80].mxu0 }
 0xb42   :  { %v10844_v17 = vadd.f32 %v3232_v58, %v2561_v57  ;;  %v4038_v35 = vadd.f32 %v3943_v26, %v3087_v46  ;;  %v3234_v54 = vpop.f32.mrb[97].mxu1  ;;  %v3945_v59 = vpop.f32.mrb[81].mxu0 }
 0xb43   :  { %v10847_v5 = vadd.f32 %v3234_v54, %v10840_v28  ;;  %v4045_v1 = vadd.f32 %v3945_v59, %v3089_v7  ;;  %v3236_v23 = vpop.f32.mrb[98].mxu1  ;;  %v3947_v0 = vpop.f32.mrb[82].mxu0 }
 0xb44   :  { %13438 = vst [vmem:[#allocation48_spill] sm:$0xff] %v10844_v17  ;;  %v10849_v53 = vadd.f32 %v3236_v23, %v2561_v57  ;;  %v3238_v48 = vpop.f32.mrb[99].mxu1  ;;  %v3948_v43 = vpop.f32.mrb[83].mxu0 }
 0xb45   :  { %13439 = vst [vmem:[#allocation87_spill] sm:$0xff] %v10847_v5  ;;  %v10852_v55 = vadd.f32 %v3238_v48, %v10840_v28 }
 0xb46   :  { %13440 = vst [vmem:[#allocation26_spill] sm:$0xff] %v10849_v53 }
 0xb47   :  { %13441 = vst [vmem:[#allocation49_spill] sm:$0xff] %v10852_v55 }
 0xb49   :  { %v3242_v42 = vpop.f32.mrb[100].mxu1 }
 0xb4a   :  { %v10854_v45 = vadd.f32 %v3242_v42, %v2561_v57  ;;  %v3244_v56 = vpop.f32.mrb[101].mxu1 }
 0xb4b   :  { %v10857_v58 = vadd.f32 %v3244_v56, %v10840_v28  ;;  %v3246_v46 = vpop.f32.mrb[102].mxu1 }
 0xb4c   :  { %13442 = vst [vmem:[#allocation53_spill] sm:$0xff] %v10854_v45  ;;  %v10859_v26 = vadd.f32 %v3246_v46, %v2561_v57  ;;  %v3248_v59 = vpop.f32.mrb[103].mxu1 }
 0xb4d   :  { %13443 = vst [vmem:[#allocation54_spill] sm:$0xff] %v10857_v58  ;;  %v10862_v7 = vadd.f32 %v3248_v59, %v10840_v28  ;;  %v5990_v58 = vmul.f32 -1.442695, %v4038_v35 }
 0xb4e   :  { %13444 = vst [vmem:[#allocation51_spill] sm:$0xff] %v10859_v26  ;;  %v3196_v26 = vadd.f32 %v3195_v14, %v10740_v29 }
 0xb4f   :  { %13445 = vst [vmem:[#allocation40_spill] sm:$0xff] %v10862_v7  ;;  %6709 = vpow2.f32 %v5990_v58 }
 0xb51   :  { %v3252_v23 = vpop.f32.mrb[104].mxu1 }
 0xb52   :  { %v10864_v54 = vadd.f32 %v3252_v23, %v2561_v57  ;;  %v3254_v0 = vpop.f32.mrb[105].mxu1 }
 0xb53   :  { %v10867_v48 = vadd.f32 %v3254_v0, %v10840_v28  ;;  %v3256_v43 = vpop.f32.mrb[106].mxu1  ;;  %v5991_v0 = vmul.f32 -1.442695, %v4045_v1 }
 0xb54   :  { %13446 = vst [vmem:[#allocation88_spill] sm:$0xff] %v10864_v54  ;;  %v10869_v42 = vadd.f32 %v3256_v43, %v2561_v57  ;;  %v3258_v5 = vpop.f32.mrb[107].mxu1 }
 0xb55   :  { %13447 = vst [vmem:[#allocation10_spill] sm:$0xff] %v10867_v48  ;;  %v10872_v56 = vadd.f32 %v3258_v5, %v10840_v28  ;;  %6711 = vpow2.f32 %v5991_v0  ;;  %v10882_v5 = vld [vmem:[%s12553_s8] ss:$0 sm:$0xff] }
 0xb56   :  { %13448 = vst [vmem:[#allocation11_spill] sm:$0xff] %v10869_v42  ;;  %13452 = vst [vmem:[#allocation42_spill] sm:$0xff] %v10882_v5  ;;  %v3160_v42 = vadd.f32 %v10744_v34, %v10753_v61  ;;  %v10893_v61 = vld [vmem:[%s12553_s8 + $0x1] ss:$0 sm:$0xff] }
 0xb57   :  { %13449 = vst [vmem:[#allocation12_spill] sm:$0xff] %v10872_v56 }
 0xb59   :  { %v3262_v46 = vpop.f32.mrb[108].mxu1  ;;  %v6710_v45 = vpop.eup %6709 }
 0xb5a   :  { %v10874_v17 = vadd.f32 %v3262_v46, %v2561_v57  ;;  %v3264_v55 = vpop.f32.mrb[109].mxu1  ;;  %v4042_v43 = vadd.f32 1.0, %v6710_v45 }
 0xb5b   :  { %v10877_v59 = vadd.f32 %v3264_v55, %v10840_v28  ;;  %v3266_v23 = vpop.f32.mrb[110].mxu1 }
 0xb5c   :  { %13450 = vst [vmem:[#allocation14_spill] sm:$0xff] %v10874_v17  ;;  %v3268_v53 = vpop.f32.mrb[111].mxu1  ;;  %6713 = vrcp.f32 %v4042_v43  ;;  %v3267_v55 = vadd.f32 %v3266_v23, %v2561_v57 }
 0xb5d   :  { %13451 = vst [vmem:[#allocation15_spill] sm:$0xff] %v10877_v59 }
 0xb5f   :  { %v6712_v7 = vpop.eup %6711 }
 0xb60   :  { %v4049_v46 = vadd.f32 1.0, %v6712_v7 }
 0xb62   :  { %6715 = vrcp.f32 %v4049_v46 }
 0xb66   :  { %v6714_v1 = vpop.eup %6713 }
 0xb81   :  { %v3984_v48 = vpop.f32.mrb[112].mxu1 }
 0xb82   :  { %v4052_v54 = vadd.f32 %v10882_v5, %v3984_v48  ;;  %v4025_v35 = vpop.f32.mrb[84].mxu0  ;;  %v3986_v58 = vpop.f32.mrb[113].mxu1 }
 0xb83   :  { %v4067_v56 = vadd.f32 %v4025_v35, %v3267_v55  ;;  %v4060_v0 = vadd.f32 %v3986_v58, %v3196_v26  ;;  %v3988_v45 = vpop.f32.mrb[114].mxu1  ;;  %v4027_v43 = vpop.f32.mrb[85].mxu0 }
 0xb84   :  { %v4053_v59 = vmul.f32 %v6714_v1, %v4052_v54  ;;  %v3989_v17 = vpop.f32.mrb[115].mxu1  ;;  %v4029_v7 = vpop.f32.mrb[86].mxu0 }
 0xb85   :  { %v5992_v3 = vmul.f32 -1.442695, %v4060_v0  ;;  %v4030_v29 = vpop.f32.mrb[87].mxu0  ;;  %v5993_v57 = vmul.f32 -1.442695, %v4067_v56  ;;  %v6716_v48 = vpop.eup %6715 }
 0xb86   :  { %v4054_v14 = vadd.f32 %v4053_v59, %v3160_v42  ;;  %v4056_v23 = vsub.f32 1.0, %v6716_v48  ;;  %v4058_v58 = vmul.f32 0.0, %v6716_v48  ;;  %v3269_v42 = vadd.f32 %v3268_v53, %v10840_v28  ;;  %v13455_v53 = vld [vmem:[#allocation18_spill] sm:$0xff]  ;;  %v13456_v28 = vld [vmem:[#allocation19_spill] sm:$0xff]  ;;  %v10912_v48 = vld [vmem:[%s12551_s6] ss:$24 sps:$4 sm:$0xff]  }
 0xb88   :  { %6717 = vtanh.f32 %v4054_v14 }
 0xb89   :  { %6719 = vpow2.f32 %v5992_v3  ;;  %v4074_v3 = vadd.f32 %v10893_v61, %v4027_v43 }
 0xb8a   :  { %6721 = vpow2.f32 %v5993_v57 }
 0xb92   :  { %v6718_v55 = vpop.eup %6717 }
 0xb93   :  { %v6720_v26 = vpop.eup %6719  ;;  %v4057_v35 = vmul.f32 %v6718_v55, %v4056_v23  ;;  %v10918_v23 = vld [vmem:[%s12551_s6 + $0x34] ss:$24 sps:$4 sm:$0xff]  }
 0xb94   :  { %v4064_v45 = vadd.f32 1.0, %v6720_v26  ;;  %v6722_v34 = vpop.eup %6721  ;;  %v13457_v55 = vld [vmem:[#allocation35_spill] sm:$0xff]  ;;  %v13458_v26 = vld [vmem:[#allocation21_spill] sm:$0xff] }
 0xb95   :  { %v10888_v5 = vadd.f32 %v4058_v58, %v4057_v35  ;;  %v4071_v17 = vadd.f32 1.0, %v6722_v34  ;;  %v10926_v35 = vld [vmem:[%s12551_s6 + $0x30] ss:$24 sps:$4 sm:$0xff]   ;;  %v10932_v58 = vld [vmem:[%s12551_s6 + $0x64] ss:$24 sps:$4 sm:$0xff]  }
 0xb96   :  { %6723 = vrcp.f32 %v4064_v45  ;;  %v13459_v45 = vld [vmem:[#allocation22_spill] sm:$0xff]  ;;  %v13460_v34 = vld [vmem:[#allocation36_spill] sm:$0xff] }
 0xb97   :  { %13453 = vst [vmem:[#allocation102_spill] sm:$0xff] %v10888_v5  ;;  %6725 = vrcp.f32 %v4071_v17  ;;  %v10903_v43 = vpack.c.bf16 %v10888_v5, %v10888_v5  ;;  %v10940_v17 = vld [vmem:[%s12551_s6 + $0x60] ss:$24 sps:$4 sm:$0xff]  }
 0xba0   :  { %v6724_v54 = vpop.eup %6723 }
 0xba1   :  { %v4075_v56 = vmul.f32 %v6724_v54, %v4074_v3  ;;  %v6726_v46 = vpop.eup %6725  ;;  %v13461_v3 = vld [vmem:[#allocation37_spill] sm:$0xff]  ;;  %v13462_v54 = vld [vmem:[#allocation24_spill] sm:$0xff] }
 0xba2   :  { %v4078_v1 = vsub.f32 1.0, %v6726_v46  ;;  %v4080_v29 = vmul.f32 0.0, %v6726_v46  ;;  %v13466_v46 = vld [vmem:[#allocation58_spill] sm:$0xff] }
 0xba3   :  { %v4076_v59 = vadd.f32 %v4075_v56, %v3269_v42  ;;  %v13463_v42 = vld [vmem:[#allocation39_spill] sm:$0xff]  ;;  %v13464_v56 = vld [vmem:[#allocation57_spill] sm:$0xff] }
 0xba5   :  { %6727 = vtanh.f32 %v4076_v59  ;;  %v13465_v59 = vld [vmem:[#allocation79_spill] sm:$0xff] }
 0xbaf   :  { %v6728_v0 = vpop.eup %6727 }
 0xbb0   :  { %v4079_v7 = vmul.f32 %v6728_v0, %v4078_v1  ;;  %v13502_v1 = vld [vmem:[#allocation90_spill] sm:$0xff]  ;;  %v13503_v0 = vld [vmem:[#allocation92_spill] sm:$0xff] }
 0xbb2   :  { %v10897_v14 = vadd.f32 %v4080_v29, %v4079_v7  ;;  %v13504_v7 = vld [vmem:[#allocation94_spill] sm:$0xff]  ;;  %v13505_v29 = vld [vmem:[#allocation61_spill] sm:$0xff] }
 0xbb4   :  { %13454 = vst [vmem:[#allocation103_spill] sm:$0xff] %v10897_v14  ;;  %v4085_v57 = vpack.c.bf16 %v10897_v14, %v10897_v14 }
 0xbb6   :  { %4118 = vmatprep.mubr.bf16.mxu1 %v4085_v57  ;;  %4159 = vmatprep.mubr.bf16.mxu0 %v4085_v57 }
 0xbb7   :  { %4119 = vmatmul.mubr.bf16.vlgmr.msra.gmra.mrb[116].mxu1 %v10903_v43  ;;  %4160 = vmatmul.mubr.bf16.vlgmr.msra.gmra.mrb[88].mxu0 %v10903_v43 }
 0xbb8   :  { %4169 = vmatpush1.bf16.msra.mxu1 %v13455_v53  ;;  %4200 = vmatprep.mubr.bf16.mxu1 %v4085_v57  ;;  %v13506_v57 = vld [vmem:[#allocation62_spill] sm:$0xff] }
 0xbb9   :  { %4170 = vmatprep.subr.bf16.mxu1 %v13456_v28  ;;  %4264 = vmatpush1.bf16.msra.mxu0 %v10912_v48 }
 0xbba   :  { %4265 = vmatprep.subr.bf16.mxu0 %v10918_v23 }
 0xbbc   :  { %4171 = vmatpush1.bf16.msra.mxu1 %v13457_v55  ;;  %v13508_v55 = vld [vmem:[#allocation82_spill] sm:$0xff] }
 0xbbd   :  { %4172 = vmatprep.subr.bf16.mxu1 %v13458_v26  ;;  %4266 = vmatpush1.bf16.msra.mxu0 %v10926_v35 }
 0xbbe   :  { %4267 = vmatprep.subr.bf16.mxu0 %v10932_v58 }
 0xbc0   :  { %4173 = vmatpush1.bf16.msra.mxu1 %v13459_v45 }
 0xbc1   :  { %4174 = vmatprep.subr.bf16.mxu1 %v13460_v34  ;;  %4268 = vmatpush1.bf16.msra.mxu0 %v10940_v17 }
 0xbc2   :  { %4269 = vmatprep.subr.bf16.mxu0 %v10013_v19  ;;  %v13467_v19 = vld [vmem:[#allocation28_spill] sm:$0xff] }
 0xbc4   :  { %4175 = vmatpush1.bf16.msra.mxu1 %v13461_v3  ;;  %v13509_v3 = vld [vmem:[#allocation56_spill] sm:$0xff] }
 0xbc5   :  { %4176 = vmatprep.subr.bf16.mxu1 %v13462_v54  ;;  %4270 = vmatpush1.bf16.msra.mxu0 %v10028_v32  ;;  %v13468_v32 = vld [vmem:[#allocation66_spill] sm:$0xff] }
 0xbc6   :  { %4271 = vmatprep.subr.bf16.mxu0 %v10038_v39  ;;  %v13469_v39 = vld [vmem:[#allocation30_spill] sm:$0xff] }
 0xbc8   :  { %4177 = vmatpush1.bf16.msra.mxu1 %v13463_v42  ;;  %v13510_v42 = vld [vmem:[#allocation70_spill] sm:$0xff] }
 0xbc9   :  { %4178 = vmatprep.subr.bf16.mxu1 %v13464_v56  ;;  %4272 = vmatpush1.bf16.msra.mxu0 %v10048_v49  ;;  %v13470_v49 = vld [vmem:[#allocation95_spill] sm:$0xff] }
 0xbca   :  { %4273 = vmatprep.subr.bf16.mxu0 %v10061_v12  ;;  %v13471_v12 = vld [vmem:[#allocation32_spill] sm:$0xff] }
 0xbcc   :  { %4179 = vmatpush1.bf16.msra.mxu1 %v13465_v59 }
 0xbcd   :  { %4180 = vmatprep.subr.bf16.mxu1 %v13466_v46  ;;  %4274 = vmatpush1.bf16.msra.mxu0 %v10076_v21  ;;  %v13472_v21 = vld [vmem:[#allocation97_spill] sm:$0xff] }
 0xbce   :  { %4275 = vmatprep.subr.bf16.mxu0 %v10086_v27  ;;  %v13473_v27 = vld [vmem:[#allocation34_spill] sm:$0xff] }
 0xbd0   :  { %4181 = vmatpush1.bf16.msra.mxu1 %v13467_v19 }
 0xbd1   :  { %4182 = vmatprep.subr.bf16.mxu1 %v13468_v32  ;;  %4276 = vmatpush1.bf16.msra.mxu0 %v10096_v50  ;;  %v13474_v50 = vld [vmem:[#allocation99_spill] sm:$0xff] }
 0xbd2   :  { %4277 = vmatprep.subr.bf16.mxu0 %v10109_v47  ;;  %v13475_v47 = vld [vmem:[#allocation16_spill] sm:$0xff] }
 0xbd4   :  { %4183 = vmatpush1.bf16.msra.mxu1 %v13469_v39 }
 0xbd5   :  { %4184 = vmatprep.subr.bf16.mxu1 %v13470_v49  ;;  %4278 = vmatpush1.bf16.msra.mxu0 %v10120_v37  ;;  %v13476_v37 = vld [vmem:[#allocation101_spill] sm:$0xff] }
 0xbd6   :  { %4279 = vmatprep.subr.bf16.mxu0 %v10129_v36  ;;  %v13477_v36 = vld [vmem:[#allocation45_spill] sm:$0xff] }
 0xbd8   :  { %4185 = vmatpush1.bf16.msra.mxu1 %v13471_v12 }
 0xbd9   :  { %4186 = vmatprep.subr.bf16.mxu1 %v13472_v21  ;;  %4280 = vmatpush1.bf16.msra.mxu0 %v10140_v24  ;;  %v13478_v24 = vld [vmem:[#allocation85_spill] sm:$0xff] }
 0xbda   :  { %4281 = vmatprep.subr.bf16.mxu0 %v10149_v40  ;;  %v13479_v40 = vld [vmem:[#allocation71_spill] sm:$0xff] }
 0xbdc   :  { %4187 = vmatpush1.bf16.msra.mxu1 %v13473_v27 }
 0xbdd   :  { %4188 = vmatprep.subr.bf16.mxu1 %v13474_v50  ;;  %4282 = vmatpush1.bf16.msra.mxu0 %v10158_v62  ;;  %v13480_v62 = vld [vmem:[#allocation89_spill] sm:$0xff] }
 0xbde   :  { %4283 = vmatprep.subr.bf16.mxu0 %v10167_v44  ;;  %v13481_v44 = vld [vmem:[#allocation91_spill] sm:$0xff] }
 0xbe0   :  { %4189 = vmatpush1.bf16.msra.mxu1 %v13475_v47 }
 0xbe1   :  { %4190 = vmatprep.subr.bf16.mxu1 %v13476_v37  ;;  %4284 = vmatpush1.bf16.msra.mxu0 %v10176_v52  ;;  %v13482_v52 = vld [vmem:[#allocation93_spill] sm:$0xff] }
 0xbe2   :  { %4285 = vmatprep.subr.bf16.mxu0 %v10185_v60  ;;  %v13483_v60 = vld [vmem:[#allocation23_spill] sm:$0xff] }
 0xbe4   :  { %4191 = vmatpush1.bf16.msra.mxu1 %v13477_v36 }
 0xbe5   :  { %4192 = vmatprep.subr.bf16.mxu1 %v13478_v24  ;;  %4286 = vmatpush1.bf16.msra.mxu0 %v10194_v2  ;;  %v13484_v2 = vld [vmem:[#allocation38_spill] sm:$0xff] }
 0xbe6   :  { %4287 = vmatprep.subr.bf16.mxu0 %v10203_v18  ;;  %v13485_v18 = vld [vmem:[#allocation25_spill] sm:$0xff] }
 0xbe8   :  { %4193 = vmatpush1.bf16.msra.mxu1 %v13479_v40 }
 0xbe9   :  { %4194 = vmatprep.subr.bf16.mxu1 %v13480_v62  ;;  %4288 = vmatpush1.bf16.msra.mxu0 %v10212_v15  ;;  %v13486_v15 = vld [vmem:[#allocation59_spill] sm:$0xff] }
 0xbea   :  { %4289 = vmatprep.subr.bf16.mxu0 %v10221_v6  ;;  %v13487_v6 = vld [vmem:[#allocation80_spill] sm:$0xff] }
 0xbec   :  { %4195 = vmatpush1.bf16.msra.mxu1 %v13481_v44 }
 0xbed   :  { %4196 = vmatprep.subr.bf16.mxu1 %v13482_v52  ;;  %4290 = vmatpush1.bf16.msra.mxu0 %v10230_v31  ;;  %v13488_v31 = vld [vmem:[#allocation60_spill] sm:$0xff] }
 0xbee   :  { %4291 = vmatprep.subr.bf16.mxu0 %v13398_v33  ;;  %v13497_v33 = vld [vmem:[#allocation17_spill] sm:$0xff] }
 0xbf0   :  { %4197 = vmatpush1.bf16.msra.mxu1 %v10635_v20 }
 0xbf1   :  { %4198 = vmatprep.subr.bf16.mxu1 %v10646_v63  ;;  %4292 = vmatpush1.bf16.msra.mxu0 %v13399_v41  ;;  %v13498_v41 = vld [vmem:[#allocation20_spill] sm:$0xff] }
 0xbf2   :  { %4293 = vmatprep.subr.bf16.mxu0 %v13400_v25  ;;  %v13499_v25 = vld [vmem:[#allocation46_spill] sm:$0xff] }
 0xbf4   :  { %4199 = vmatpush1.bf16.msra.mxu1 %v10659_v30 }
 0xbf5   :  { %4304 = vmatprep.subr.bf16.mxu1 %v10272_v4  ;;  %4294 = vmatpush1.bf16.msra.mxu0 %v13401_v10  ;;  %v13489_v4 = vld [vmem:[#allocation29_spill] sm:$0xff]  ;;  %v13500_v10 = vld [vmem:[#allocation74_spill] sm:$0xff] }
 0xbf6   :  { %4345 = vmatprep.subr.bf16.mxu0 %v13402_v8  ;;  %v13501_v8 = vld [vmem:[#allocation72_spill] sm:$0xff] }
 0xbf7   :  { %4201 = vmatmul.mubr.bf16.vlgmr.msra.gmra.mrb[120].mxu1 %v10903_v43  ;;  %v11031_v43 = vld [vmem:[%s12551_s6 + $0x4] ss:$24 sps:$4 sm:$0xff]  }
 0xbf8   :  { %4305 = vmatpush1.bf16.msra.mxu1 %v10283_v38  ;;  %v13490_v38 = vld [vmem:[#allocation68_spill] sm:$0xff]  ;;  %13507 = vst [vmem:[#allocation18_spill] sm:$0xff] %v11031_v43 }
 0xbf9   :  { %4306 = vmatprep.subr.bf16.mxu1 %v10295_v51  ;;  %v13491_v51 = vld [vmem:[#allocation31_spill] sm:$0xff] }
 0xbfc   :  { %4307 = vmatpush1.bf16.msra.mxu1 %v10309_v11  ;;  %v13492_v11 = vld [vmem:[#allocation96_spill] sm:$0xff] }
 0xbfd   :  { %4308 = vmatprep.subr.bf16.mxu1 %v10321_v16  ;;  %v13493_v16 = vld [vmem:[#allocation33_spill] sm:$0xff] }
 0xc00   :  { %4309 = vmatpush1.bf16.msra.mxu1 %v10334_v13  ;;  %v13494_v13 = vld [vmem:[#allocation98_spill] sm:$0xff] }
 0xc01   :  { %4310 = vmatprep.subr.bf16.mxu1 %v10346_v9  ;;  %v13495_v9 = vld [vmem:[#allocation13_spill] sm:$0xff] }
 0xc04   :  { %4311 = vmatpush1.bf16.msra.mxu1 %v10360_v22  ;;  %v13496_v22 = vld [vmem:[#allocation100_spill] sm:$0xff] }
 0xc05   :  { %4312 = vmatprep.subr.bf16.mxu1 %v13483_v60 }
 0xc08   :  { %4313 = vmatpush1.bf16.msra.mxu1 %v13484_v2 }
 0xc09   :  { %4314 = vmatprep.subr.bf16.mxu1 %v13485_v18 }
 0xc0c   :  { %4315 = vmatpush1.bf16.msra.mxu1 %v13486_v15 }
 0xc0d   :  { %4316 = vmatprep.subr.bf16.mxu1 %v13487_v6 }
 0xc10   :  { %4317 = vmatpush1.bf16.msra.mxu1 %v13488_v31 }
 0xc11   :  { %4318 = vmatprep.subr.bf16.mxu1 %v13489_v4 }
 0xc14   :  { %4319 = vmatpush1.bf16.msra.mxu1 %v13490_v38 }
 0xc15   :  { %4320 = vmatprep.subr.bf16.mxu1 %v13491_v51 }
 0xc18   :  { %4321 = vmatpush1.bf16.msra.mxu1 %v13492_v11 }
 0xc19   :  { %4322 = vmatprep.subr.bf16.mxu1 %v13493_v16  ;;  %v13511_v16 = vld [vmem:[#allocation42_spill] sm:$0xff] }
 0xc1c   :  { %4323 = vmatpush1.bf16.msra.mxu1 %v13494_v13 }
 0xc1d   :  { %4324 = vmatprep.subr.bf16.mxu1 %v13495_v9 }
 0xc20   :  { %4325 = vmatpush1.bf16.msra.mxu1 %v13496_v22 }
 0xc21   :  { %4326 = vmatprep.subr.bf16.mxu1 %v13497_v33  ;;  %v13512_v33 = vld [vmem:[#allocation55_spill] sm:$0xff] }
 0xc24   :  { %4327 = vmatpush1.bf16.msra.mxu1 %v13498_v41 }
 0xc25   :  { %4328 = vmatprep.subr.bf16.mxu1 %v13499_v25 }
 0xc28   :  { %4329 = vmatpush1.bf16.msra.mxu1 %v13500_v10 }
 0xc29   :  { %4330 = vmatprep.subr.bf16.mxu1 %v13501_v8 }
 0xc2c   :  { %4331 = vmatpush1.bf16.msra.mxu1 %v13502_v1 }
 0xc2d   :  { %4332 = vmatprep.subr.bf16.mxu1 %v13503_v0 }
 0xc30   :  { %4333 = vmatpush1.bf16.msra.mxu1 %v13504_v7 }
 0xc31   :  { %4334 = vmatprep.subr.bf16.mxu1 %v13505_v29 }
 0xc34   :  { %4335 = vmatpush1.bf16.msra.mxu1 %v13506_v57 }
 0xc35   :  { %4440 = vmatprep.subr.bf16.mxu1 %v11031_v43 }
 0xc8a   :  { %v4120_v53 = vpop.f32.mrb[116].mxu1  ;;  %v4161_v28 = vpop.f32.mrb[88].mxu0 }
 0xc8b   :  { %v4215_v26 = vadd.f32 %v4120_v53, %v13508_v55  ;;  %v4122_v45 = vpop.f32.mrb[117].mxu1  ;;  %v4163_v34 = vpop.f32.mrb[89].mxu0  ;;  %v4229_v13 = vadd.f32 %v13511_v16, %v4161_v28 }
 0xc8c   :  { %v4222_v54 = vadd.f32 %v4122_v45, %v13509_v3  ;;  %v4237_v56 = vadd.f32 %v4163_v34, %v13510_v42  ;;  %v4124_v60 = vpop.f32.mrb[118].mxu1  ;;  %v4165_v2 = vpop.f32.mrb[90].mxu0  ;;  %v13514_v34 = vld [vmem:[#allocation14_spill] sm:$0xff] }
 0xc8d   :  { %v5994_v18 = vmul.f32 -1.442695, %v4215_v26  ;;  %v4125_v15 = vpop.f32.mrb[119].mxu1  ;;  %v4166_v6 = vpop.f32.mrb[91].mxu0 }
 0xc8e   :  { %v5995_v31 = vmul.f32 -1.442695, %v4222_v54  ;;  %v5996_v25 = vmul.f32 -1.442695, %v4237_v56  ;;  %v13515_v6 = vld [vmem:[#allocation15_spill] sm:$0xff] }
 0xc8f   :  { %6729 = vpow2.f32 %v5994_v18 }
 0xc90   :  { %6731 = vpow2.f32 %v5995_v31 }
 0xc99   :  { %v6730_v4 = vpop.eup %6729 }
 0xc9a   :  { %v4219_v38 = vadd.f32 1.0, %v6730_v4  ;;  %v6732_v51 = vpop.eup %6731 }
 0xc9b   :  { %v4226_v11 = vadd.f32 1.0, %v6732_v51 }
 0xc9c   :  { %6733 = vrcp.f32 %v4219_v38 }
 0xc9d   :  { %6735 = vrcp.f32 %v4226_v11 }
 0xca6   :  { %v6734_v9 = vpop.eup %6733 }
 0xca7   :  { %v4230_v22 = vmul.f32 %v6734_v9, %v4229_v13  ;;  %v6736_v10 = vpop.eup %6735 }
 0xca8   :  { %v4233_v8 = vsub.f32 1.0, %v6736_v10  ;;  %v4235_v53 = vmul.f32 %v6736_v10, %v10888_v5  ;;  %v11059_v10 = vld [vmem:[%s12551_s6 + $0x10] ss:$24 sps:$4 sm:$0xff]  }
 0xca9   :  { %v4231_v41 = vadd.f32 %v4230_v22, %v13512_v33  ;;  %v11386_v5 = vld [vmem:[%s12551_s6 + $0x128] ss:$24 sps:$4 sm:$0xff]  }
 0xcaa   :  { %13543 = vst [vmem:[#allocation38_spill] sm:$0xff] %v11386_v5 }
 0xcab   :  { %6737 = vtanh.f32 %v4231_v41 }
 0xcac   :  { %6739 = vpow2.f32 %v5996_v25 }
 0xcb5   :  { %v6738_v1 = vpop.eup %6737 }
 0xcb6   :  { %v4234_v0 = vmul.f32 %v6738_v1, %v4233_v8  ;;  %v6740_v26 = vpop.eup %6739  ;;  %v11065_v8 = vld [vmem:[%s12551_s6 + $0x44] ss:$24 sps:$4 sm:$0xff]   ;;  %v11073_v1 = vld [vmem:[%s12551_s6 + $0x40] ss:$24 sps:$4 sm:$0xff]  }
 0xcb7   :  { %v4241_v45 = vadd.f32 1.0, %v6740_v26  ;;  %v11093_v26 = vld [vmem:[%s12551_s6 + $0xa4] ss:$24 sps:$4 sm:$0xff]  }
 0xcb8   :  { %v11040_v55 = vadd.f32 %v4235_v53, %v4234_v0  ;;  %v11079_v0 = vld [vmem:[%s12551_s6 + $0x74] ss:$24 sps:$4 sm:$0xff]   ;;  %v11087_v53 = vld [vmem:[%s12551_s6 + $0x70] ss:$24 sps:$4 sm:$0xff]  }
 0xcb9   :  { %6741 = vrcp.f32 %v4241_v45  ;;  %v11100_v45 = vld [vmem:[%s12551_s6 + $0x94] ss:$24 sps:$4 sm:$0xff]  }
 0xcba   :  { %13513 = vst [vmem:[#allocation19_spill] sm:$0xff] %v11040_v55  ;;  %v11052_v25 = vpack.c.bf16 %v11040_v55, %v11040_v55 }
 0xcc3   :  { %v6742_v56 = vpop.eup %6741 }
 0xcca   :  { %v4202_v28 = vpop.f32.mrb[120].mxu1 }
 0xccb   :  { %v4244_v3 = vadd.f32 %v4202_v28, %v13514_v34  ;;  %v4204_v54 = vpop.f32.mrb[121].mxu1  ;;  %v11106_v28 = vld [vmem:[%s12551_s6 + $0xa0] ss:$24 sps:$4 sm:$0xff]   ;;  %v11112_v34 = vld [vmem:[%s12551_s6 + $0xd4] ss:$24 sps:$4 sm:$0xff]  }
 0xccc   :  { %v4251_v42 = vadd.f32 %v10893_v61, %v4204_v54  ;;  %v4206_v60 = vpop.f32.mrb[122].mxu1  ;;  %v11124_v54 = vld [vmem:[%s12551_s6 + $0xc4] ss:$24 sps:$4 sm:$0xff]  }
 0xccd   :  { %v5997_v2 = vmul.f32 -1.442695, %v4244_v3  ;;  %v4207_v18 = vpop.f32.mrb[123].mxu1  ;;  %v11118_v3 = vld [vmem:[%s12551_s6 + $0x90] ss:$24 sps:$4 sm:$0xff]  }
 0xcce   :  { %v4252_v15 = vmul.f32 %v6742_v56, %v4251_v42  ;;  %v11130_v42 = vld [vmem:[%s12551_s6 + $0xd0] ss:$24 sps:$4 sm:$0xff]   ;;  %v11136_v60 = vld [vmem:[%s12551_s6 + $0x104] ss:$24 sps:$4 sm:$0xff]   ;;  %v11142_v56 = vld [vmem:[%s12551_s6 + $0xc0] ss:$24 sps:$4 sm:$0xff]  }
 0xccf   :  { %6743 = vpow2.f32 %v5997_v2  ;;  %v11148_v2 = vld [vmem:[%s12551_s6 + $0xf4] ss:$24 sps:$4 sm:$0xff]   ;;  %v11156_v18 = vld [vmem:[%s12551_s6 + $0xf0] ss:$24 sps:$4 sm:$0xff]  }
 0xcd0   :  { %v4253_v31 = vadd.f32 %v4252_v15, %v13515_v6  ;;  %v11162_v15 = vld [vmem:[%s12551_s6 + $0x124] ss:$24 sps:$4 sm:$0xff]   ;;  %v11307_v6 = vld [vmem:[%s12551_s6 + $0x14] ss:$24 sps:$4 sm:$0xff]  }
 0xcd1   :  { %13530 = vst [vmem:[#allocation32_spill] sm:$0xff] %v11307_v6 }
 0xcd9   :  { %v6744_v4 = vpop.eup %6743 }
 0xcda   :  { %v4248_v38 = vadd.f32 1.0, %v6744_v4  ;;  %v11326_v4 = vld [vmem:[%s12551_s6 + $0x38] ss:$24 sps:$4 sm:$0xff]  }
 0xcdb   :  { %13533 = vst [vmem:[#allocation99_spill] sm:$0xff] %v11326_v4 }
 0xcdc   :  { %6745 = vrcp.f32 %v4248_v38  ;;  %v11332_v38 = vld [vmem:[%s12551_s6 + $0x6c] ss:$24 sps:$4 sm:$0xff]  }
 0xcdd   :  { %6747 = vtanh.f32 %v4253_v31  ;;  %v11320_v31 = vld [vmem:[%s12551_s6 + $0x3c] ss:$24 sps:$4 sm:$0xff]   ;;  %13534 = vst [vmem:[#allocation16_spill] sm:$0xff] %v11332_v38 }
 0xcde   :  { %13532 = vst [vmem:[#allocation34_spill] sm:$0xff] %v11320_v31 }
 0xce6   :  { %v6746_v51 = vpop.eup %6745 }
 0xce7   :  { %v4255_v11 = vsub.f32 1.0, %v6746_v51  ;;  %v6748_v13 = vpop.eup %6747  ;;  %v4257_v22 = vmul.f32 %v6746_v51, %v10897_v14  ;;  %v11338_v51 = vld [vmem:[%s12551_s6 + $0x68] ss:$24 sps:$4 sm:$0xff]   ;;  %v11380_v14 = vld [vmem:[%s12551_s6 + $0x12c] ss:$24 sps:$4 sm:$0xff]  }
 0xce8   :  { %13535 = vst [vmem:[#allocation101_spill] sm:$0xff] %v11338_v51  ;;  %13542 = vst [vmem:[#allocation23_spill] sm:$0xff] %v11380_v14 }
 0xce9   :  { %v4256_v9 = vmul.f32 %v6748_v13, %v4255_v11  ;;  %v11344_v11 = vld [vmem:[%s12551_s6 + $0x9c] ss:$24 sps:$4 sm:$0xff]   ;;  %v11350_v13 = vld [vmem:[%s12551_s6 + $0x98] ss:$24 sps:$4 sm:$0xff]  }
 0xcea   :  { %13536 = vst [vmem:[#allocation45_spill] sm:$0xff] %v11344_v11  ;;  %13537 = vst [vmem:[#allocation85_spill] sm:$0xff] %v11350_v13 }
 0xceb   :  { %v11046_v33 = vadd.f32 %v4257_v22, %v4256_v9  ;;  %v11356_v9 = vld [vmem:[%s12551_s6 + $0xcc] ss:$24 sps:$4 sm:$0xff]   ;;  %v11362_v22 = vld [vmem:[%s12551_s6 + $0xc8] ss:$24 sps:$4 sm:$0xff]  }
 0xcec   :  { %13538 = vst [vmem:[#allocation71_spill] sm:$0xff] %v11356_v9  ;;  %13539 = vst [vmem:[#allocation89_spill] sm:$0xff] %v11362_v22 }
 0xced   :  { %13516 = vst [vmem:[#allocation35_spill] sm:$0xff] %v11046_v33  ;;  %v4262_v41 = vpack.c.bf16 %v11046_v33, %v11046_v33 }
 0xcef   :  { %4295 = vmatprep.mubr.bf16.mxu0 %v4262_v41  ;;  %4336 = vmatprep.mubr.bf16.mxu1 %v4262_v41 }
 0xcf0   :  { %4296 = vmatmul.mubr.bf16.vlgmr.msra.gmra.mrb[92].mxu0 %v11052_v25  ;;  %4337 = vmatmul.mubr.bf16.vlgmr.msra.gmra.mrb[124].mxu1 %v11052_v25 }
 0xcf1   :  { %4346 = vmatpush1.bf16.msra.mxu0 %v11059_v10  ;;  %4377 = vmatprep.mubr.bf16.mxu0 %v4262_v41  ;;  %v11368_v41 = vld [vmem:[%s12551_s6 + $0xfc] ss:$24 sps:$4 sm:$0xff]  }
 0xcf2   :  { %4347 = vmatprep.subr.bf16.mxu0 %v11065_v8  ;;  %4441 = vmatpush1.bf16.msra.mxu1 %v10912_v48  ;;  %13540 = vst [vmem:[#allocation91_spill] sm:$0xff] %v11368_v41 }
 0xcf3   :  { %4442 = vmatprep.subr.bf16.mxu1 %v10918_v23 }
 0xcf5   :  { %4348 = vmatpush1.bf16.msra.mxu0 %v11073_v1 }
 0xcf6   :  { %4349 = vmatprep.subr.bf16.mxu0 %v11079_v0  ;;  %4443 = vmatpush1.bf16.msra.mxu1 %v10926_v35 }
 0xcf7   :  { %4444 = vmatprep.subr.bf16.mxu1 %v10932_v58 }
 0xcf9   :  { %4350 = vmatpush1.bf16.msra.mxu0 %v11087_v53 }
 0xcfa   :  { %4351 = vmatprep.subr.bf16.mxu0 %v11093_v26  ;;  %4445 = vmatpush1.bf16.msra.mxu1 %v10940_v17 }
 0xcfb   :  { %4446 = vmatprep.subr.bf16.mxu1 %v11100_v45 }
 0xcfd   :  { %4352 = vmatpush1.bf16.msra.mxu0 %v11106_v28 }
 0xcfe   :  { %4353 = vmatprep.subr.bf16.mxu0 %v11112_v34  ;;  %4447 = vmatpush1.bf16.msra.mxu1 %v11118_v3 }
 0xcff   :  { %4448 = vmatprep.subr.bf16.mxu1 %v11124_v54 }
 0xd01   :  { %4354 = vmatpush1.bf16.msra.mxu0 %v11130_v42 }
 0xd02   :  { %4355 = vmatprep.subr.bf16.mxu0 %v11136_v60  ;;  %4449 = vmatpush1.bf16.msra.mxu1 %v11142_v56 }
 0xd03   :  { %4450 = vmatprep.subr.bf16.mxu1 %v11148_v2 }
 0xd05   :  { %4356 = vmatpush1.bf16.msra.mxu0 %v13465_v59  ;;  %v11170_v59 = vld [vmem:[%s12551_s6 + $0x120] ss:$24 sps:$4 sm:$0xff]  }
 0xd06   :  { %4357 = vmatprep.subr.bf16.mxu0 %v13466_v46  ;;  %4451 = vmatpush1.bf16.msra.mxu1 %v11156_v18  ;;  %v11176_v46 = vld [vmem:[%s12551_s6 + $0x154] ss:$24 sps:$4 sm:$0xff]  }
 0xd07   :  { %4452 = vmatprep.subr.bf16.mxu1 %v11162_v15 }
 0xd09   :  { %4358 = vmatpush1.bf16.msra.mxu0 %v13467_v19  ;;  %v11184_v19 = vld [vmem:[%s12551_s6 + $0x150] ss:$24 sps:$4 sm:$0xff]  }
 0xd0a   :  { %4359 = vmatprep.subr.bf16.mxu0 %v13468_v32  ;;  %4453 = vmatpush1.bf16.msra.mxu1 %v11170_v59  ;;  %v11190_v32 = vld [vmem:[%s12551_s6 + $0x184] ss:$24 sps:$4 sm:$0xff]  }
 0xd0b   :  { %4454 = vmatprep.subr.bf16.mxu1 %v11176_v46 }
 0xd0d   :  { %4360 = vmatpush1.bf16.msra.mxu0 %v13469_v39  ;;  %v11198_v39 = vld [vmem:[%s12551_s6 + $0x180] ss:$24 sps:$4 sm:$0xff]  }
 0xd0e   :  { %4361 = vmatprep.subr.bf16.mxu0 %v13470_v49  ;;  %4455 = vmatpush1.bf16.msra.mxu1 %v11184_v19  ;;  %v11204_v49 = vld [vmem:[%s12551_s6 + $0x1b4] ss:$24 sps:$4 sm:$0xff]  }
 0xd0f   :  { %4456 = vmatprep.subr.bf16.mxu1 %v11190_v32 }
 0xd11   :  { %4362 = vmatpush1.bf16.msra.mxu0 %v13471_v12  ;;  %v11212_v12 = vld [vmem:[%s12551_s6 + $0x1b0] ss:$24 sps:$4 sm:$0xff]  }
 0xd12   :  { %4363 = vmatprep.subr.bf16.mxu0 %v13472_v21  ;;  %4457 = vmatpush1.bf16.msra.mxu1 %v11198_v39  ;;  %v11218_v21 = vld [vmem:[%s12551_s6 + $0x1e4] ss:$24 sps:$4 sm:$0xff]  }
 0xd13   :  { %4458 = vmatprep.subr.bf16.mxu1 %v11204_v49  ;;  %13517 = vst [vmem:[#allocation21_spill] sm:$0xff] %v11218_v21 }
 0xd15   :  { %4364 = vmatpush1.bf16.msra.mxu0 %v13473_v27  ;;  %v11226_v27 = vld [vmem:[%s12551_s6 + $0x1e0] ss:$24 sps:$4 sm:$0xff]  }
 0xd16   :  { %4365 = vmatprep.subr.bf16.mxu0 %v13474_v50  ;;  %4459 = vmatpush1.bf16.msra.mxu1 %v11212_v12  ;;  %13518 = vst [vmem:[#allocation22_spill] sm:$0xff] %v11226_v27  ;;  %v11232_v50 = vld [vmem:[%s12551_s6 + $0x214] ss:$24 sps:$4 sm:$0xff]  }
 0xd17   :  { %4460 = vmatprep.subr.bf16.mxu1 %v11218_v21  ;;  %13519 = vst [vmem:[#allocation36_spill] sm:$0xff] %v11232_v50 }
 0xd19   :  { %4366 = vmatpush1.bf16.msra.mxu0 %v13475_v47  ;;  %v11240_v47 = vld [vmem:[%s12551_s6 + $0x210] ss:$24 sps:$4 sm:$0xff]  }
 0xd1a   :  { %4367 = vmatprep.subr.bf16.mxu0 %v13476_v37  ;;  %4461 = vmatpush1.bf16.msra.mxu1 %v11226_v27  ;;  %13520 = vst [vmem:[#allocation37_spill] sm:$0xff] %v11240_v47  ;;  %v11246_v37 = vld [vmem:[%s12551_s6 + $0x244] ss:$24 sps:$4 sm:$0xff]  }
 0xd1b   :  { %4462 = vmatprep.subr.bf16.mxu1 %v11232_v50  ;;  %13521 = vst [vmem:[#allocation24_spill] sm:$0xff] %v11246_v37 }
 0xd1d   :  { %4368 = vmatpush1.bf16.msra.mxu0 %v13477_v36  ;;  %v11254_v36 = vld [vmem:[%s12551_s6 + $0x240] ss:$24 sps:$4 sm:$0xff]  }
 0xd1e   :  { %4369 = vmatprep.subr.bf16.mxu0 %v13478_v24  ;;  %4463 = vmatpush1.bf16.msra.mxu1 %v11240_v47  ;;  %13522 = vst [vmem:[#allocation39_spill] sm:$0xff] %v11254_v36  ;;  %v11260_v24 = vld [vmem:[%s12551_s6 + $0x274] ss:$24 sps:$4 sm:$0xff]  }
 0xd1f   :  { %4464 = vmatprep.subr.bf16.mxu1 %v11246_v37  ;;  %13523 = vst [vmem:[#allocation57_spill] sm:$0xff] %v11260_v24 }
 0xd21   :  { %4370 = vmatpush1.bf16.msra.mxu0 %v13479_v40  ;;  %v11268_v40 = vld [vmem:[%s12551_s6 + $0x270] ss:$24 sps:$4 sm:$0xff]  }
 0xd22   :  { %4371 = vmatprep.subr.bf16.mxu0 %v13480_v62  ;;  %4465 = vmatpush1.bf16.msra.mxu1 %v11254_v36  ;;  %13524 = vst [vmem:[#allocation79_spill] sm:$0xff] %v11268_v40  ;;  %v11274_v62 = vld [vmem:[%s12551_s6 + $0x2a4] ss:$24 sps:$4 sm:$0xff]  }
 0xd23   :  { %4466 = vmatprep.subr.bf16.mxu1 %v11260_v24  ;;  %13525 = vst [vmem:[#allocation58_spill] sm:$0xff] %v11274_v62 }
 0xd25   :  { %4372 = vmatpush1.bf16.msra.mxu0 %v13481_v44  ;;  %v11282_v44 = vld [vmem:[%s12551_s6 + $0x2a0] ss:$24 sps:$4 sm:$0xff]  }
 0xd26   :  { %4373 = vmatprep.subr.bf16.mxu0 %v13482_v52  ;;  %4467 = vmatpush1.bf16.msra.mxu1 %v11268_v40  ;;  %13526 = vst [vmem:[#allocation28_spill] sm:$0xff] %v11282_v44  ;;  %v11288_v52 = vld [vmem:[%s12551_s6 + $0x2d4] ss:$24 sps:$4 sm:$0xff]  }
 0xd27   :  { %4468 = vmatprep.subr.bf16.mxu1 %v11274_v62  ;;  %13527 = vst [vmem:[#allocation66_spill] sm:$0xff] %v11288_v52 }
 0xd29   :  { %4374 = vmatpush1.bf16.msra.mxu0 %v10635_v20  ;;  %v11301_v20 = vld [vmem:[%s12551_s6 + $0x2d0] ss:$24 sps:$4 sm:$0xff]  }
 0xd2a   :  { %4375 = vmatprep.subr.bf16.mxu0 %v10646_v63  ;;  %4469 = vmatpush1.bf16.msra.mxu1 %v11282_v44  ;;  %v11295_v63 = vld [vmem:[%s12551_s6 + $0xc] ss:$24 sps:$4 sm:$0xff]   ;;  %13529 = vst [vmem:[#allocation95_spill] sm:$0xff] %v11301_v20 }
 0xd2b   :  { %4470 = vmatprep.subr.bf16.mxu1 %v11288_v52  ;;  %13528 = vst [vmem:[#allocation30_spill] sm:$0xff] %v11295_v63 }
 0xd2d   :  { %4376 = vmatpush1.bf16.msra.mxu0 %v10659_v30  ;;  %v11314_v30 = vld [vmem:[%s12551_s6 + $0x8] ss:$24 sps:$4 sm:$0xff]  }
 0xd2e   :  { %4481 = vmatprep.subr.bf16.mxu0 %v11295_v63  ;;  %4471 = vmatpush1.bf16.msra.mxu1 %v11301_v20  ;;  %13531 = vst [vmem:[#allocation97_spill] sm:$0xff] %v11314_v30 }
 0xd2f   :  { %4522 = vmatprep.subr.bf16.mxu1 %v11307_v6 }
 0xd30   :  { %4378 = vmatmul.mubr.bf16.vlgmr.msra.gmra.mrb[96].mxu0 %v11052_v25  ;;  %v11374_v25 = vld [vmem:[%s12551_s6 + $0xf8] ss:$24 sps:$4 sm:$0xff]  }
 0xd31   :  { %4482 = vmatpush1.bf16.msra.mxu0 %v11314_v30  ;;  %13541 = vst [vmem:[#allocation93_spill] sm:$0xff] %v11374_v25 }
 0xd32   :  { %4483 = vmatprep.subr.bf16.mxu0 %v11320_v31 }
 0xd35   :  { %4484 = vmatpush1.bf16.msra.mxu0 %v11326_v4 }
 0xd36   :  { %4485 = vmatprep.subr.bf16.mxu0 %v11332_v38  ;;  %v13561_v38 = vld [vmem:[#allocation84_spill] sm:$0xff] }
 0xd39   :  { %4486 = vmatpush1.bf16.msra.mxu0 %v11338_v51 }
 0xd3a   :  { %4487 = vmatprep.subr.bf16.mxu0 %v11344_v11  ;;  %v13560_v11 = vld [vmem:[#allocation64_spill] sm:$0xff] }
 0xd3d   :  { %4488 = vmatpush1.bf16.msra.mxu0 %v11350_v13 }
 0xd3e   :  { %4489 = vmatprep.subr.bf16.mxu0 %v11356_v9 }
 0xd41   :  { %4490 = vmatpush1.bf16.msra.mxu0 %v11362_v22  ;;  %v13559_v22 = vld [vmem:[#allocation78_spill] sm:$0xff] }
 0xd42   :  { %4491 = vmatprep.subr.bf16.mxu0 %v11368_v41  ;;  %v11392_v41 = vld [vmem:[%s12551_s6 + $0x15c] ss:$24 sps:$4 sm:$0xff]  }
 0xd43   :  { %13544 = vst [vmem:[#allocation25_spill] sm:$0xff] %v11392_v41 }
 0xd45   :  { %4492 = vmatpush1.bf16.msra.mxu0 %v11374_v25  ;;  %v11398_v25 = vld [vmem:[%s12551_s6 + $0x158] ss:$24 sps:$4 sm:$0xff]  }
 0xd46   :  { %4493 = vmatprep.subr.bf16.mxu0 %v11380_v14  ;;  %13545 = vst [vmem:[#allocation59_spill] sm:$0xff] %v11398_v25  ;;  %v11404_v14 = vld [vmem:[%s12551_s6 + $0x18c] ss:$24 sps:$4 sm:$0xff]  }
 0xd47   :  { %13546 = vst [vmem:[#allocation80_spill] sm:$0xff] %v11404_v14 }
 0xd49   :  { %4494 = vmatpush1.bf16.msra.mxu0 %v11386_v5  ;;  %v11410_v5 = vld [vmem:[%s12551_s6 + $0x188] ss:$24 sps:$4 sm:$0xff]  }
 0xd4a   :  { %4495 = vmatprep.subr.bf16.mxu0 %v11392_v41  ;;  %13547 = vst [vmem:[#allocation60_spill] sm:$0xff] %v11410_v5  ;;  %v11416_v41 = vld [vmem:[%s12551_s6 + $0x1bc] ss:$24 sps:$4 sm:$0xff]  }
 0xd4b   :  { %13548 = vst [vmem:[#allocation29_spill] sm:$0xff] %v11416_v41 }
 0xd4d   :  { %4496 = vmatpush1.bf16.msra.mxu0 %v11398_v25  ;;  %v11422_v25 = vld [vmem:[%s12551_s6 + $0x1b8] ss:$24 sps:$4 sm:$0xff]  }
 0xd4e   :  { %4497 = vmatprep.subr.bf16.mxu0 %v11404_v14  ;;  %13549 = vst [vmem:[#allocation68_spill] sm:$0xff] %v11422_v25  ;;  %v11428_v14 = vld [vmem:[%s12551_s6 + $0x1ec] ss:$24 sps:$4 sm:$0xff]  }
 0xd4f   :  { %13550 = vst [vmem:[#allocation31_spill] sm:$0xff] %v11428_v14 }
 0xd51   :  { %4498 = vmatpush1.bf16.msra.mxu0 %v11410_v5  ;;  %v11434_v5 = vld [vmem:[%s12551_s6 + $0x1e8] ss:$24 sps:$4 sm:$0xff]  }
 0xd52   :  { %4499 = vmatprep.subr.bf16.mxu0 %v11416_v41  ;;  %13551 = vst [vmem:[#allocation96_spill] sm:$0xff] %v11434_v5  ;;  %v11440_v41 = vld [vmem:[%s12551_s6 + $0x21c] ss:$24 sps:$4 sm:$0xff]  }
 0xd53   :  { %13552 = vst [vmem:[#allocation33_spill] sm:$0xff] %v11440_v41 }
 0xd55   :  { %4500 = vmatpush1.bf16.msra.mxu0 %v11422_v25  ;;  %v11446_v25 = vld [vmem:[%s12551_s6 + $0x218] ss:$24 sps:$4 sm:$0xff]  }
 0xd56   :  { %4501 = vmatprep.subr.bf16.mxu0 %v11428_v14  ;;  %13553 = vst [vmem:[#allocation98_spill] sm:$0xff] %v11446_v25  ;;  %v11452_v14 = vld [vmem:[%s12551_s6 + $0x24c] ss:$24 sps:$4 sm:$0xff]  }
 0xd57   :  { %13554 = vst [vmem:[#allocation13_spill] sm:$0xff] %v11452_v14 }
 0xd59   :  { %4502 = vmatpush1.bf16.msra.mxu0 %v11434_v5  ;;  %v11458_v5 = vld [vmem:[%s12551_s6 + $0x248] ss:$24 sps:$4 sm:$0xff]  }
 0xd5a   :  { %4503 = vmatprep.subr.bf16.mxu0 %v11440_v41  ;;  %13555 = vst [vmem:[#allocation100_spill] sm:$0xff] %v11458_v5  ;;  %v11464_v41 = vld [vmem:[%s12551_s6 + $0x27c] ss:$24 sps:$4 sm:$0xff]  }
 0xd5b   :  { %13556 = vst [vmem:[#allocation17_spill] sm:$0xff] %v11464_v41 }
 0xd5d   :  { %4504 = vmatpush1.bf16.msra.mxu0 %v11446_v25  ;;  %v11470_v25 = vld [vmem:[%s12551_s6 + $0x278] ss:$24 sps:$4 sm:$0xff]  }
 0xd5e   :  { %4505 = vmatprep.subr.bf16.mxu0 %v11452_v14  ;;  %13557 = vst [vmem:[#allocation20_spill] sm:$0xff] %v11470_v25  ;;  %v11476_v14 = vld [vmem:[%s12551_s6 + $0x2ac] ss:$24 sps:$4 sm:$0xff]  }
 0xd5f   :  { %13558 = vst [vmem:[#allocation46_spill] sm:$0xff] %v11476_v14 }
 0xd61   :  { %4506 = vmatpush1.bf16.msra.mxu0 %v11458_v5 }
 0xd62   :  { %4507 = vmatprep.subr.bf16.mxu0 %v11464_v41 }
 0xd65   :  { %4508 = vmatpush1.bf16.msra.mxu0 %v11470_v25 }
 0xd66   :  { %4509 = vmatprep.subr.bf16.mxu0 %v11476_v14 }
 0xd69   :  { %4510 = vmatpush1.bf16.msra.mxu0 %v13504_v7 }
 0xd6a   :  { %4511 = vmatprep.subr.bf16.mxu0 %v13505_v29 }
 0xd6d   :  { %4512 = vmatpush1.bf16.msra.mxu0 %v13506_v57 }
 0xd6e   :  { %4617 = vmatprep.subr.bf16.mxu0 %v11031_v43 }
 0xdc3   :  { %v4297_v41 = vpop.f32.mrb[92].mxu0  ;;  %v4338_v5 = vpop.f32.mrb[124].mxu1 }
 0xdc4   :  { %v4392_v9 = vadd.f32 %v4297_v41, %v13559_v22  ;;  %v4299_v25 = vpop.f32.mrb[93].mxu0  ;;  %v4340_v13 = vpop.f32.mrb[125].mxu1  ;;  %v4406_v22 = vadd.f32 %v13511_v16, %v4338_v5 }
 0xdc5   :  { %v4399_v51 = vadd.f32 %v4299_v25, %v13560_v11  ;;  %v4414_v4 = vadd.f32 %v4340_v13, %v13561_v38  ;;  %v4301_v31 = vpop.f32.mrb[94].mxu0  ;;  %v4342_v14 = vpop.f32.mrb[126].mxu1  ;;  %v13562_v11 = vld [vmem:[#allocation63_spill] sm:$0xff] }
 0xdc6   :  { %v5998_v30 = vmul.f32 -1.442695, %v4392_v9  ;;  %v4302_v7 = vpop.f32.mrb[95].mxu0  ;;  %v4343_v6 = vpop.f32.mrb[127].mxu1  ;;  %v13564_v25 = vld [vmem:[#allocation11_spill] sm:$0xff] }
 0xdc7   :  { %v5999_v29 = vmul.f32 -1.442695, %v4399_v51  ;;  %v6000_v14 = vmul.f32 -1.442695, %v4414_v4 }
 0xdc8   :  { %6749 = vpow2.f32 %v5998_v30 }
 0xdc9   :  { %6751 = vpow2.f32 %v5999_v29 }
 0xdd2   :  { %v6750_v57 = vpop.eup %6749 }
 0xdd3   :  { %v4396_v43 = vadd.f32 1.0, %v6750_v57  ;;  %v6752_v20 = vpop.eup %6751 }
 0xdd4   :  { %v4403_v63 = vadd.f32 1.0, %v6752_v20 }
 0xdd5   :  { %6753 = vrcp.f32 %v4396_v43 }
 0xdd6   :  { %6755 = vrcp.f32 %v4403_v63 }
 0xddf   :  { %v6754_v41 = vpop.eup %6753 }
 0xde0   :  { %v4407_v52 = vmul.f32 %v6754_v41, %v4406_v22  ;;  %v6756_v31 = vpop.eup %6755 }
 0xde1   :  { %v4410_v6 = vsub.f32 1.0, %v6756_v31  ;;  %v4412_v13 = vmul.f32 %v6756_v31, %v11040_v55  ;;  %v11660_v55 = vld [vmem:[%s12551_s6 + $0x2e4] ss:$24 sps:$4 sm:$0xff]  }
 0xde2   :  { %v4408_v38 = vadd.f32 %v4407_v52, %v13562_v11  ;;  %v13565_v11 = vld [vmem:[#allocation12_spill] sm:$0xff]  ;;  %13576 = vst [vmem:[#allocation55_spill] sm:$0xff] %v11660_v55 }
 0xde4   :  { %6757 = vtanh.f32 %v4408_v38 }
 0xde5   :  { %6759 = vpow2.f32 %v6000_v14 }
 0xdee   :  { %v6758_v30 = vpop.eup %6757 }
 0xdef   :  { %v4411_v51 = vmul.f32 %v6758_v30, %v4410_v6  ;;  %v6760_v43 = vpop.eup %6759 }
 0xdf0   :  { %v4418_v20 = vadd.f32 1.0, %v6760_v43 }
 0xdf1   :  { %v11489_v9 = vadd.f32 %v4412_v13, %v4411_v51 }
 0xdf2   :  { %6761 = vrcp.f32 %v4418_v20 }
 0xdf3   :  { %13563 = vst [vmem:[#allocation74_spill] sm:$0xff] %v11489_v9 }
 0xdfc   :  { %v6762_v4 = vpop.eup %6761 }
 0xe03   :  { %v4379_v5 = vpop.f32.mrb[96].mxu0 }
 0xe04   :  { %v4421_v7 = vadd.f32 %v4379_v5, %v13564_v25  ;;  %v4381_v63 = vpop.f32.mrb[97].mxu0  ;;  %v11501_v25 = vpack.c.bf16 %v11489_v9, %v11489_v9 }
 0xe05   :  { %v4428_v52 = vadd.f32 %v10893_v61, %v4381_v63  ;;  %v4383_v29 = vpop.f32.mrb[98].mxu0  ;;  %v11534_v63 = vld [vmem:[%s12551_s6 + $0x134] ss:$24 sps:$4 sm:$0xff]  }
 0xe06   :  { %v6001_v57 = vmul.f32 -1.442695, %v4421_v7  ;;  %v4384_v22 = vpop.f32.mrb[99].mxu0  ;;  %v11528_v7 = vld [vmem:[%s12551_s6 + $0x100] ss:$24 sps:$4 sm:$0xff]  }
 0xe07   :  { %v4429_v41 = vmul.f32 %v6762_v4, %v4428_v52  ;;  %v11542_v52 = vld [vmem:[%s12551_s6 + $0x130] ss:$24 sps:$4 sm:$0xff]   ;;  %v11548_v29 = vld [vmem:[%s12551_s6 + $0x164] ss:$24 sps:$4 sm:$0xff]   ;;  %v11556_v4 = vld [vmem:[%s12551_s6 + $0x160] ss:$24 sps:$4 sm:$0xff]  }
 0xe08   :  { %6763 = vpow2.f32 %v6001_v57  ;;  %v11562_v57 = vld [vmem:[%s12551_s6 + $0x194] ss:$24 sps:$4 sm:$0xff]   ;;  %v11570_v22 = vld [vmem:[%s12551_s6 + $0x190] ss:$24 sps:$4 sm:$0xff]  }
 0xe09   :  { %v4430_v38 = vadd.f32 %v4429_v41, %v13565_v11  ;;  %v11576_v41 = vld [vmem:[%s12551_s6 + $0x1c4] ss:$24 sps:$4 sm:$0xff]   ;;  %v11584_v11 = vld [vmem:[%s12551_s6 + $0x1c0] ss:$24 sps:$4 sm:$0xff]  }
 0xe12   :  { %v6764_v14 = vpop.eup %6763 }
 0xe13   :  { %v4425_v31 = vadd.f32 1.0, %v6764_v14  ;;  %v11598_v14 = vld [vmem:[%s12551_s6 + $0x1f0] ss:$24 sps:$4 sm:$0xff]  }
 0xe14   :  { %13567 = vst [vmem:[#allocation90_spill] sm:$0xff] %v11598_v14 }
 0xe15   :  { %6765 = vrcp.f32 %v4425_v31  ;;  %v11604_v31 = vld [vmem:[%s12551_s6 + $0x224] ss:$24 sps:$4 sm:$0xff]  }
 0xe16   :  { %6767 = vtanh.f32 %v4430_v38  ;;  %v11590_v38 = vld [vmem:[%s12551_s6 + $0x1f4] ss:$24 sps:$4 sm:$0xff]   ;;  %13568 = vst [vmem:[#allocation92_spill] sm:$0xff] %v11604_v31 }
 0xe1f   :  { %v6766_v6 = vpop.eup %6765 }
 0xe20   :  { %v4432_v30 = vsub.f32 1.0, %v6766_v6  ;;  %v6768_v51 = vpop.eup %6767  ;;  %v4434_v43 = vmul.f32 %v6766_v6, %v11046_v33  ;;  %v11612_v6 = vld [vmem:[%s12551_s6 + $0x220] ss:$24 sps:$4 sm:$0xff]   ;;  %v11654_v33 = vld [vmem:[%s12551_s6 + $0x2b0] ss:$24 sps:$4 sm:$0xff]  }
 0xe21   :  { %13569 = vst [vmem:[#allocation94_spill] sm:$0xff] %v11612_v6  ;;  %13575 = vst [vmem:[#allocation42_spill] sm:$0xff] %v11654_v33 }
 0xe22   :  { %v4433_v13 = vmul.f32 %v6768_v51, %v4432_v30  ;;  %v11618_v30 = vld [vmem:[%s12551_s6 + $0x254] ss:$24 sps:$4 sm:$0xff]   ;;  %v11626_v51 = vld [vmem:[%s12551_s6 + $0x250] ss:$24 sps:$4 sm:$0xff]  }
 0xe23   :  { %13570 = vst [vmem:[#allocation61_spill] sm:$0xff] %v11618_v30  ;;  %13571 = vst [vmem:[#allocation62_spill] sm:$0xff] %v11626_v51 }
 0xe24   :  { %v11495_v20 = vadd.f32 %v4434_v43, %v4433_v13  ;;  %v11632_v13 = vld [vmem:[%s12551_s6 + $0x284] ss:$24 sps:$4 sm:$0xff]   ;;  %v11640_v43 = vld [vmem:[%s12551_s6 + $0x280] ss:$24 sps:$4 sm:$0xff]  }
 0xe25   :  { %13572 = vst [vmem:[#allocation82_spill] sm:$0xff] %v11632_v13  ;;  %13573 = vst [vmem:[#allocation56_spill] sm:$0xff] %v11640_v43 }
 0xe26   :  { %13566 = vst [vmem:[#allocation72_spill] sm:$0xff] %v11495_v20  ;;  %v4439_v5 = vpack.c.bf16 %v11495_v20, %v11495_v20 }
 0xe28   :  { %4472 = vmatprep.mubr.bf16.mxu1 %v4439_v5  ;;  %4513 = vmatprep.mubr.bf16.mxu0 %v4439_v5 }
 0xe29   :  { %4473 = vmatmul.mubr.bf16.vlgmr.msra.gmra.mrb[128].mxu1 %v11501_v25  ;;  %4514 = vmatmul.mubr.bf16.vlgmr.msra.gmra.mrb[100].mxu0 %v11501_v25 }
 0xe2a   :  { %4523 = vmatpush1.bf16.msra.mxu1 %v11059_v10  ;;  %4554 = vmatprep.mubr.bf16.mxu1 %v4439_v5  ;;  %v11646_v5 = vld [vmem:[%s12551_s6 + $0x2b4] ss:$24 sps:$4 sm:$0xff]  }
 0xe2b   :  { %4524 = vmatprep.subr.bf16.mxu1 %v11065_v8  ;;  %4618 = vmatpush1.bf16.msra.mxu0 %v10912_v48  ;;  %13574 = vst [vmem:[#allocation70_spill] sm:$0xff] %v11646_v5 }
 0xe2c   :  { %4619 = vmatprep.subr.bf16.mxu0 %v10918_v23 }
 0xe2e   :  { %4525 = vmatpush1.bf16.msra.mxu1 %v11073_v1 }
 0xe2f   :  { %4526 = vmatprep.subr.bf16.mxu1 %v11079_v0  ;;  %4620 = vmatpush1.bf16.msra.mxu0 %v10926_v35 }
 0xe30   :  { %4621 = vmatprep.subr.bf16.mxu0 %v10932_v58 }
 0xe32   :  { %4527 = vmatpush1.bf16.msra.mxu1 %v11087_v53 }
 0xe33   :  { %4528 = vmatprep.subr.bf16.mxu1 %v11093_v26  ;;  %4622 = vmatpush1.bf16.msra.mxu0 %v10940_v17 }
 0xe34   :  { %4623 = vmatprep.subr.bf16.mxu0 %v11100_v45 }
 0xe36   :  { %4529 = vmatpush1.bf16.msra.mxu1 %v11106_v28 }
 0xe37   :  { %4530 = vmatprep.subr.bf16.mxu1 %v11112_v34  ;;  %4624 = vmatpush1.bf16.msra.mxu0 %v11118_v3 }
 0xe38   :  { %4625 = vmatprep.subr.bf16.mxu0 %v11124_v54 }
 0xe3a   :  { %4531 = vmatpush1.bf16.msra.mxu1 %v11130_v42 }
 0xe3b   :  { %4532 = vmatprep.subr.bf16.mxu1 %v11136_v60  ;;  %4626 = vmatpush1.bf16.msra.mxu0 %v11142_v56 }
 0xe3c   :  { %4627 = vmatprep.subr.bf16.mxu0 %v11148_v2 }
 0xe3e   :  { %4533 = vmatpush1.bf16.msra.mxu1 %v11528_v7 }
 0xe3f   :  { %4534 = vmatprep.subr.bf16.mxu1 %v11534_v63  ;;  %4628 = vmatpush1.bf16.msra.mxu0 %v11156_v18 }
 0xe40   :  { %4629 = vmatprep.subr.bf16.mxu0 %v11162_v15 }
 0xe42   :  { %4535 = vmatpush1.bf16.msra.mxu1 %v11542_v52 }
 0xe43   :  { %4536 = vmatprep.subr.bf16.mxu1 %v11548_v29  ;;  %4630 = vmatpush1.bf16.msra.mxu0 %v11170_v59 }
 0xe44   :  { %4631 = vmatprep.subr.bf16.mxu0 %v11176_v46 }
 0xe46   :  { %4537 = vmatpush1.bf16.msra.mxu1 %v11556_v4 }
 0xe47   :  { %4538 = vmatprep.subr.bf16.mxu1 %v11562_v57  ;;  %4632 = vmatpush1.bf16.msra.mxu0 %v11184_v19 }
 0xe48   :  { %4633 = vmatprep.subr.bf16.mxu0 %v11190_v32 }
 0xe4a   :  { %4539 = vmatpush1.bf16.msra.mxu1 %v11570_v22 }
 0xe4b   :  { %4540 = vmatprep.subr.bf16.mxu1 %v11576_v41  ;;  %4634 = vmatpush1.bf16.msra.mxu0 %v11198_v39 }
 0xe4c   :  { %4635 = vmatprep.subr.bf16.mxu0 %v11204_v49 }
 0xe4e   :  { %4541 = vmatpush1.bf16.msra.mxu1 %v11584_v11 }
 0xe4f   :  { %4542 = vmatprep.subr.bf16.mxu1 %v11590_v38  ;;  %4636 = vmatpush1.bf16.msra.mxu0 %v11212_v12 }
 0xe50   :  { %4637 = vmatprep.subr.bf16.mxu0 %v11218_v21 }
 0xe52   :  { %4543 = vmatpush1.bf16.msra.mxu1 %v11598_v14 }
 0xe53   :  { %4544 = vmatprep.subr.bf16.mxu1 %v11604_v31  ;;  %4638 = vmatpush1.bf16.msra.mxu0 %v11226_v27 }
 0xe54   :  { %4639 = vmatprep.subr.bf16.mxu0 %v11232_v50 }
 0xe56   :  { %4545 = vmatpush1.bf16.msra.mxu1 %v11612_v6 }
 0xe57   :  { %4546 = vmatprep.subr.bf16.mxu1 %v11618_v30  ;;  %4640 = vmatpush1.bf16.msra.mxu0 %v11240_v47 }
 0xe58   :  { %4641 = vmatprep.subr.bf16.mxu0 %v11246_v37 }
 0xe5a   :  { %4547 = vmatpush1.bf16.msra.mxu1 %v11626_v51  ;;  %v13616_v51 = vld [vmem:[#allocation9_spill] sm:$0xff] }
 0xe5b   :  { %4548 = vmatprep.subr.bf16.mxu1 %v11632_v13  ;;  %4642 = vmatpush1.bf16.msra.mxu0 %v11254_v36  ;;  %v13586_v36 = vld [vmem:[#allocation101_spill] sm:$0xff] }
 0xe5c   :  { %4643 = vmatprep.subr.bf16.mxu0 %v11260_v24  ;;  %v13585_v24 = vld [vmem:[#allocation16_spill] sm:$0xff]  ;;  %v13587_v13 = vld [vmem:[#allocation45_spill] sm:$0xff] }
 0xe5e   :  { %4549 = vmatpush1.bf16.msra.mxu1 %v11640_v43  ;;  %v13581_v43 = vld [vmem:[#allocation32_spill] sm:$0xff] }
 0xe5f   :  { %4550 = vmatprep.subr.bf16.mxu1 %v11646_v5  ;;  %4644 = vmatpush1.bf16.msra.mxu0 %v11268_v40  ;;  %v13577_v5 = vld [vmem:[#allocation66_spill] sm:$0xff] }
 0xe60   :  { %4645 = vmatprep.subr.bf16.mxu0 %v11274_v62  ;;  %v11668_v62 = vld [vmem:[%s12551_s6 + $0x2e0] ss:$24 sps:$4 sm:$0xff]   ;;  %v13579_v40 = vld [vmem:[#allocation30_spill] sm:$0xff] }
 0xe61   :  { %13578 = vst [vmem:[#allocation14_spill] sm:$0xff] %v11668_v62 }
 0xe62   :  { %4551 = vmatpush1.bf16.msra.mxu1 %v11654_v33  ;;  %v13580_v33 = vld [vmem:[#allocation95_spill] sm:$0xff] }
 0xe63   :  { %4552 = vmatprep.subr.bf16.mxu1 %v11660_v55  ;;  %4646 = vmatpush1.bf16.msra.mxu0 %v11282_v44  ;;  %v13582_v55 = vld [vmem:[#allocation97_spill] sm:$0xff]  ;;  %v13583_v44 = vld [vmem:[#allocation34_spill] sm:$0xff] }
 0xe64   :  { %4647 = vmatprep.subr.bf16.mxu0 %v13577_v5  ;;  %v13584_v5 = vld [vmem:[#allocation99_spill] sm:$0xff] }
 0xe66   :  { %4553 = vmatpush1.bf16.msra.mxu1 %v11668_v62  ;;  %v13588_v62 = vld [vmem:[#allocation85_spill] sm:$0xff] }
 0xe67   :  { %4658 = vmatprep.subr.bf16.mxu1 %v13579_v40  ;;  %4648 = vmatpush1.bf16.msra.mxu0 %v13580_v33  ;;  %v13589_v40 = vld [vmem:[#allocation71_spill] sm:$0xff]  ;;  %v13590_v33 = vld [vmem:[#allocation89_spill] sm:$0xff] }
 0xe68   :  { %4699 = vmatprep.subr.bf16.mxu0 %v13581_v43  ;;  %v13591_v43 = vld [vmem:[#allocation91_spill] sm:$0xff] }
 0xe69   :  { %4555 = vmatmul.mubr.bf16.vlgmr.msra.gmra.mrb[132].mxu1 %v11501_v25  ;;  %v13592_v25 = vld [vmem:[#allocation93_spill] sm:$0xff] }
 0xe6a   :  { %4659 = vmatpush1.bf16.msra.mxu1 %v13582_v55  ;;  %v13593_v55 = vld [vmem:[#allocation23_spill] sm:$0xff] }
 0xe6b   :  { %4660 = vmatprep.subr.bf16.mxu1 %v13583_v44  ;;  %v13594_v44 = vld [vmem:[#allocation38_spill] sm:$0xff] }
 0xe6e   :  { %4661 = vmatpush1.bf16.msra.mxu1 %v13584_v5  ;;  %v13595_v5 = vld [vmem:[#allocation25_spill] sm:$0xff] }
 0xe6f   :  { %4662 = vmatprep.subr.bf16.mxu1 %v13585_v24  ;;  %v13596_v24 = vld [vmem:[#allocation59_spill] sm:$0xff] }
 0xe72   :  { %4663 = vmatpush1.bf16.msra.mxu1 %v13586_v36  ;;  %v13597_v36 = vld [vmem:[#allocation80_spill] sm:$0xff] }
 0xe73   :  { %4664 = vmatprep.subr.bf16.mxu1 %v13587_v13  ;;  %v13598_v13 = vld [vmem:[#allocation60_spill] sm:$0xff] }
 0xe76   :  { %4665 = vmatpush1.bf16.msra.mxu1 %v13588_v62  ;;  %v13599_v62 = vld [vmem:[#allocation29_spill] sm:$0xff] }
 0xe77   :  { %4666 = vmatprep.subr.bf16.mxu1 %v13589_v40  ;;  %v13600_v40 = vld [vmem:[#allocation68_spill] sm:$0xff] }
 0xe7a   :  { %4667 = vmatpush1.bf16.msra.mxu1 %v13590_v33  ;;  %v13601_v33 = vld [vmem:[#allocation31_spill] sm:$0xff] }
 0xe7b   :  { %4668 = vmatprep.subr.bf16.mxu1 %v13591_v43  ;;  %v13602_v43 = vld [vmem:[#allocation96_spill] sm:$0xff] }
 0xe7e   :  { %4669 = vmatpush1.bf16.msra.mxu1 %v13592_v25  ;;  %v13603_v25 = vld [vmem:[#allocation33_spill] sm:$0xff] }
 0xe7f   :  { %4670 = vmatprep.subr.bf16.mxu1 %v13593_v55  ;;  %v13604_v55 = vld [vmem:[#allocation98_spill] sm:$0xff] }
 0xe82   :  { %4671 = vmatpush1.bf16.msra.mxu1 %v13594_v44  ;;  %v13605_v44 = vld [vmem:[#allocation13_spill] sm:$0xff] }
 0xe83   :  { %4672 = vmatprep.subr.bf16.mxu1 %v13595_v5  ;;  %v13606_v5 = vld [vmem:[#allocation100_spill] sm:$0xff] }
 0xe86   :  { %4673 = vmatpush1.bf16.msra.mxu1 %v13596_v24  ;;  %v13607_v24 = vld [vmem:[#allocation17_spill] sm:$0xff] }
 0xe87   :  { %4674 = vmatprep.subr.bf16.mxu1 %v13597_v36  ;;  %v13608_v36 = vld [vmem:[#allocation20_spill] sm:$0xff] }
 0xe8a   :  { %4675 = vmatpush1.bf16.msra.mxu1 %v13598_v13  ;;  %v13609_v13 = vld [vmem:[#allocation46_spill] sm:$0xff] }
 0xe8b   :  { %4676 = vmatprep.subr.bf16.mxu1 %v13599_v62 }
 0xe8e   :  { %4677 = vmatpush1.bf16.msra.mxu1 %v13600_v40  ;;  %v13615_v40 = vld [vmem:[#allocation76_spill] sm:$0xff] }
 0xe8f   :  { %4678 = vmatprep.subr.bf16.mxu1 %v13601_v33  ;;  %v11706_v33 = vld [vmem:[%s12551_s6 + $0x2a8] ss:$24 sps:$4 sm:$0xff]  }
 0xe90   :  { %13610 = vst [vmem:[#allocation15_spill] sm:$0xff] %v11706_v33 }
 0xe92   :  { %4679 = vmatpush1.bf16.msra.mxu1 %v13602_v43 }
 0xe93   :  { %4680 = vmatprep.subr.bf16.mxu1 %v13603_v25 }
 0xe96   :  { %4681 = vmatpush1.bf16.msra.mxu1 %v13604_v55  ;;  %v11712_v55 = vld [vmem:[%s12551_s6 + $0x2dc] ss:$24 sps:$4 sm:$0xff]  }
 0xe97   :  { %4682 = vmatprep.subr.bf16.mxu1 %v13605_v44  ;;  %13611 = vst [vmem:[#allocation78_spill] sm:$0xff] %v11712_v55  ;;  %v13614_v44 = vld [vmem:[#allocation83_spill] sm:$0xff] }
 0xe9a   :  { %4683 = vmatpush1.bf16.msra.mxu1 %v13606_v5 }
 0xe9b   :  { %4684 = vmatprep.subr.bf16.mxu1 %v13607_v24 }
 0xe9e   :  { %4685 = vmatpush1.bf16.msra.mxu1 %v13608_v36  ;;  %v11718_v36 = vld [vmem:[%s12551_s6 + $0x2d8] ss:$24 sps:$4 sm:$0xff]  }
 0xe9f   :  { %4686 = vmatprep.subr.bf16.mxu1 %v13609_v13  ;;  %13612 = vst [vmem:[#allocation64_spill] sm:$0xff] %v11718_v36  ;;  %v13613_v13 = vld [vmem:[#allocation18_spill] sm:$0xff] }
 0xea2   :  { %4687 = vmatpush1.bf16.msra.mxu1 %v11706_v33 }
 0xea3   :  { %4688 = vmatprep.subr.bf16.mxu1 %v11712_v55 }
 0xea6   :  { %4689 = vmatpush1.bf16.msra.mxu1 %v11718_v36 }
 0xea7   :  { %4794 = vmatprep.subr.bf16.mxu1 %v13613_v13 }
 0xefc   :  { %v4474_v24 = vpop.f32.mrb[128].mxu1  ;;  %v4515_v5 = vpop.f32.mrb[100].mxu0 }
 0xefd   :  { %v4569_v33 = vadd.f32 %v4474_v24, %v13614_v44  ;;  %v4476_v25 = vpop.f32.mrb[129].mxu1  ;;  %v4517_v43 = vpop.f32.mrb[101].mxu0  ;;  %v4583_v24 = vadd.f32 %v13511_v16, %v4515_v5 }
 0xefe   :  { %v4576_v62 = vadd.f32 %v4476_v25, %v13615_v40  ;;  %v4591_v37 = vadd.f32 %v4517_v43, %v13616_v51  ;;  %v4478_v55 = vpop.f32.mrb[130].mxu1  ;;  %v4519_v47 = vpop.f32.mrb[102].mxu0  ;;  %v13617_v40 = vld [vmem:[#allocation27_spill] sm:$0xff] }
 0xeff   :  { %v6002_v30 = vmul.f32 -1.442695, %v4569_v33  ;;  %v4479_v6 = vpop.f32.mrb[131].mxu1  ;;  %v4520_v50 = vpop.f32.mrb[103].mxu0 }
 0xf00   :  { %v6003_v27 = vmul.f32 -1.442695, %v4576_v62  ;;  %v6004_v55 = vmul.f32 -1.442695, %v4591_v37 }
 0xf01   :  { %6769 = vpow2.f32 %v6002_v30  ;;  %v13619_v30 = vld [vmem:[#allocation88_spill] sm:$0xff] }
 0xf02   :  { %6771 = vpow2.f32 %v6003_v27 }
 0xf0b   :  { %v6770_v36 = vpop.eup %6769 }
 0xf0c   :  { %v4573_v13 = vadd.f32 1.0, %v6770_v36  ;;  %v6772_v31 = vpop.eup %6771 }
 0xf0d   :  { %v4580_v14 = vadd.f32 1.0, %v6772_v31 }
 0xf0e   :  { %6773 = vrcp.f32 %v4573_v13 }
 0xf0f   :  { %6775 = vrcp.f32 %v4580_v14 }
 0xf18   :  { %v6774_v44 = vpop.eup %6773 }
 0xf19   :  { %v4584_v21 = vmul.f32 %v6774_v44, %v4583_v24  ;;  %v6776_v33 = vpop.eup %6775  ;;  %v13620_v44 = vld [vmem:[#allocation10_spill] sm:$0xff] }
 0xf1a   :  { %v4587_v50 = vsub.f32 1.0, %v6776_v33  ;;  %v4589_v27 = vmul.f32 %v6776_v33, %v11489_v9  ;;  %v13647_v9 = vld [vmem:[#allocation34_spill] sm:$0xff] }
 0xf1b   :  { %v4585_v51 = vadd.f32 %v4584_v21, %v13617_v40 }
 0xf1d   :  { %6777 = vtanh.f32 %v4585_v51 }
 0xf1e   :  { %6779 = vpow2.f32 %v6004_v55 }
 0xf27   :  { %v6778_v47 = vpop.eup %6777 }
 0xf28   :  { %v4588_v62 = vmul.f32 %v6778_v47, %v4587_v50  ;;  %v6780_v6 = vpop.eup %6779 }
 0xf29   :  { %v4595_v31 = vadd.f32 1.0, %v6780_v6 }
 0xf2a   :  { %v11728_v36 = vadd.f32 %v4589_v27, %v4588_v62 }
 0xf2b   :  { %6781 = vrcp.f32 %v4595_v31 }
 0xf2c   :  { %13618 = vst [vmem:[#allocation84_spill] sm:$0xff] %v11728_v36  ;;  %v11740_v31 = vpack.c.bf16 %v11728_v36, %v11728_v36 }
 0xf35   :  { %v6782_v37 = vpop.eup %6781 }
 0xf3c   :  { %v4556_v16 = vpop.f32.mrb[132].mxu1 }
 0xf3d   :  { %v4598_v13 = vadd.f32 %v4556_v16, %v13619_v30  ;;  %v4558_v14 = vpop.f32.mrb[133].mxu1  ;;  %v13626_v16 = vld [vmem:[#allocation94_spill] sm:$0xff]  ;;  %v13627_v30 = vld [vmem:[#allocation61_spill] sm:$0xff] }
 0xf3e   :  { %v4605_v21 = vadd.f32 %v10893_v61, %v4558_v14  ;;  %v4560_v43 = vpop.f32.mrb[134].mxu1  ;;  %v13629_v14 = vld [vmem:[#allocation24_spill] sm:$0xff] }
 0xf3f   :  { %v6005_v5 = vmul.f32 -1.442695, %v4598_v13  ;;  %v4561_v25 = vpop.f32.mrb[135].mxu1  ;;  %v13628_v13 = vld [vmem:[#allocation37_spill] sm:$0xff]  ;;  %v13631_v43 = vld [vmem:[#allocation82_spill] sm:$0xff] }
 0xf40   :  { %v4606_v24 = vmul.f32 %v6782_v37, %v4605_v21  ;;  %v13630_v21 = vld [vmem:[#allocation62_spill] sm:$0xff]  ;;  %v13632_v37 = vld [vmem:[#allocation39_spill] sm:$0xff]  ;;  %v13634_v25 = vld [vmem:[#allocation56_spill] sm:$0xff] }
 0xf41   :  { %6783 = vpow2.f32 %v6005_v5  ;;  %v13633_v5 = vld [vmem:[#allocation57_spill] sm:$0xff] }
 0xf42   :  { %v4607_v40 = vadd.f32 %v4606_v24, %v13620_v44  ;;  %v13635_v24 = vld [vmem:[#allocation70_spill] sm:$0xff]  ;;  %v13636_v44 = vld [vmem:[#allocation79_spill] sm:$0xff] }
 0xf4b   :  { %v6784_v51 = vpop.eup %6783 }
 0xf4c   :  { %v4602_v55 = vadd.f32 1.0, %v6784_v51  ;;  %v13638_v51 = vld [vmem:[#allocation42_spill] sm:$0xff] }
 0xf4e   :  { %6785 = vrcp.f32 %v4602_v55  ;;  %v13639_v55 = vld [vmem:[#allocation55_spill] sm:$0xff] }
 0xf4f   :  { %6787 = vtanh.f32 %v4607_v40  ;;  %v13637_v40 = vld [vmem:[#allocation58_spill] sm:$0xff] }
 0xf58   :  { %v6786_v33 = vpop.eup %6785 }
 0xf59   :  { %v4609_v50 = vsub.f32 1.0, %v6786_v33  ;;  %v6788_v47 = vpop.eup %6787  ;;  %v4611_v27 = vmul.f32 %v6786_v33, %v11495_v20  ;;  %v13640_v33 = vld [vmem:[#allocation28_spill] sm:$0xff]  ;;  %v13646_v20 = vld [vmem:[#allocation97_spill] sm:$0xff] }
 0xf5b   :  { %v4610_v62 = vmul.f32 %v6788_v47, %v4609_v50  ;;  %v13641_v50 = vld [vmem:[#allocation66_spill] sm:$0xff] }
 0xf5c   :  { %v13642_v47 = vld [vmem:[#allocation14_spill] sm:$0xff] }
 0xf5d   :  { %v11734_v6 = vadd.f32 %v4611_v27, %v4610_v62  ;;  %v13643_v62 = vld [vmem:[#allocation30_spill] sm:$0xff]  ;;  %v13644_v27 = vld [vmem:[#allocation95_spill] sm:$0xff] }
 0xf5f   :  { %v4616_v61 = vpack.c.bf16 %v11734_v6, %v11734_v6 }
 0xf61   :  { %4649 = vmatprep.mubr.bf16.mxu0 %v4616_v61  ;;  %4690 = vmatprep.mubr.bf16.mxu1 %v4616_v61 }
 0xf62   :  { %4650 = vmatmul.mubr.bf16.vlgmr.msra.gmra.mrb[104].mxu0 %v11740_v31  ;;  %4691 = vmatmul.mubr.bf16.vlgmr.msra.gmra.mrb[136].mxu1 %v11740_v31 }
 0xf63   :  { %4700 = vmatpush1.bf16.msra.mxu0 %v11059_v10  ;;  %4731 = vmatprep.mubr.bf16.mxu0 %v4616_v61  ;;  %v13645_v61 = vld [vmem:[#allocation32_spill] sm:$0xff] }
 0xf64   :  { %4701 = vmatprep.subr.bf16.mxu0 %v11065_v8  ;;  %4795 = vmatpush1.bf16.msra.mxu1 %v10912_v48  ;;  %v13621_v48 = vld [vmem:[#allocation21_spill] sm:$0xff] }
 0xf65   :  { %4796 = vmatprep.subr.bf16.mxu1 %v10918_v23  ;;  %v13622_v23 = vld [vmem:[#allocation90_spill] sm:$0xff] }
 0xf67   :  { %4702 = vmatpush1.bf16.msra.mxu0 %v11073_v1 }
 0xf68   :  { %4703 = vmatprep.subr.bf16.mxu0 %v11079_v0  ;;  %4797 = vmatpush1.bf16.msra.mxu1 %v10926_v35  ;;  %v13623_v35 = vld [vmem:[#allocation92_spill] sm:$0xff] }
 0xf69   :  { %4798 = vmatprep.subr.bf16.mxu1 %v10932_v58  ;;  %v13624_v58 = vld [vmem:[#allocation22_spill] sm:$0xff] }
 0xf6b   :  { %4704 = vmatpush1.bf16.msra.mxu0 %v11087_v53 }
 0xf6c   :  { %4705 = vmatprep.subr.bf16.mxu0 %v11093_v26  ;;  %4799 = vmatpush1.bf16.msra.mxu1 %v10940_v17  ;;  %v13625_v17 = vld [vmem:[#allocation36_spill] sm:$0xff] }
 0xf6d   :  { %4800 = vmatprep.subr.bf16.mxu1 %v11100_v45 }
 0xf6f   :  { %4706 = vmatpush1.bf16.msra.mxu0 %v11106_v28 }
 0xf70   :  { %4707 = vmatprep.subr.bf16.mxu0 %v11112_v34  ;;  %4801 = vmatpush1.bf16.msra.mxu1 %v11118_v3 }
 0xf71   :  { %4802 = vmatprep.subr.bf16.mxu1 %v11124_v54 }
 0xf73   :  { %4708 = vmatpush1.bf16.msra.mxu0 %v11130_v42 }
 0xf74   :  { %4709 = vmatprep.subr.bf16.mxu0 %v11136_v60  ;;  %4803 = vmatpush1.bf16.msra.mxu1 %v11142_v56 }
 0xf75   :  { %4804 = vmatprep.subr.bf16.mxu1 %v11148_v2 }
 0xf77   :  { %4710 = vmatpush1.bf16.msra.mxu0 %v11528_v7 }
 0xf78   :  { %4711 = vmatprep.subr.bf16.mxu0 %v11534_v63  ;;  %4805 = vmatpush1.bf16.msra.mxu1 %v11156_v18 }
 0xf79   :  { %4806 = vmatprep.subr.bf16.mxu1 %v11162_v15 }
 0xf7b   :  { %4712 = vmatpush1.bf16.msra.mxu0 %v11542_v52 }
 0xf7c   :  { %4713 = vmatprep.subr.bf16.mxu0 %v11548_v29  ;;  %4807 = vmatpush1.bf16.msra.mxu1 %v11170_v59 }
 0xf7d   :  { %4808 = vmatprep.subr.bf16.mxu1 %v11176_v46 }
 0xf7f   :  { %4714 = vmatpush1.bf16.msra.mxu0 %v11556_v4 }
 0xf80   :  { %4715 = vmatprep.subr.bf16.mxu0 %v11562_v57  ;;  %4809 = vmatpush1.bf16.msra.mxu1 %v11184_v19 }
 0xf81   :  { %4810 = vmatprep.subr.bf16.mxu1 %v11190_v32 }
 0xf83   :  { %4716 = vmatpush1.bf16.msra.mxu0 %v11570_v22 }
 0xf84   :  { %4717 = vmatprep.subr.bf16.mxu0 %v11576_v41  ;;  %4811 = vmatpush1.bf16.msra.mxu1 %v11198_v39 }
 0xf85   :  { %4812 = vmatprep.subr.bf16.mxu1 %v11204_v49 }
 0xf87   :  { %4718 = vmatpush1.bf16.msra.mxu0 %v11584_v11 }
 0xf88   :  { %4719 = vmatprep.subr.bf16.mxu0 %v11590_v38  ;;  %4813 = vmatpush1.bf16.msra.mxu1 %v11212_v12 }
 0xf89   :  { %4814 = vmatprep.subr.bf16.mxu1 %v13621_v48 }
 0xf8b   :  { %4720 = vmatpush1.bf16.msra.mxu0 %v13622_v23 }
 0xf8c   :  { %4721 = vmatprep.subr.bf16.mxu0 %v13623_v35  ;;  %4815 = vmatpush1.bf16.msra.mxu1 %v13624_v58 }
 0xf8d   :  { %4816 = vmatprep.subr.bf16.mxu1 %v13625_v17 }
 0xf8f   :  { %4722 = vmatpush1.bf16.msra.mxu0 %v13626_v16 }
 0xf90   :  { %4723 = vmatprep.subr.bf16.mxu0 %v13627_v30  ;;  %4817 = vmatpush1.bf16.msra.mxu1 %v13628_v13 }
 0xf91   :  { %4818 = vmatprep.subr.bf16.mxu1 %v13629_v14 }
 0xf93   :  { %4724 = vmatpush1.bf16.msra.mxu0 %v13630_v21 }
 0xf94   :  { %4725 = vmatprep.subr.bf16.mxu0 %v13631_v43  ;;  %4819 = vmatpush1.bf16.msra.mxu1 %v13632_v37 }
 0xf95   :  { %4820 = vmatprep.subr.bf16.mxu1 %v13633_v5 }
 0xf97   :  { %4726 = vmatpush1.bf16.msra.mxu0 %v13634_v25  ;;  %v13680_v25 = vld [vmem:[#allocation5_spill] sm:$0xff] }
 0xf98   :  { %4727 = vmatprep.subr.bf16.mxu0 %v13635_v24  ;;  %4821 = vmatpush1.bf16.msra.mxu1 %v13636_v44  ;;  %v13679_v24 = vld [vmem:[#allocation8_spill] sm:$0xff] }
 0xf99   :  { %4822 = vmatprep.subr.bf16.mxu1 %v13637_v40  ;;  %v13678_v40 = vld [vmem:[#allocation6_spill] sm:$0xff] }
 0xf9b   :  { %4728 = vmatpush1.bf16.msra.mxu0 %v13638_v51  ;;  %v13648_v51 = vld [vmem:[#allocation99_spill] sm:$0xff] }
 0xf9c   :  { %4729 = vmatprep.subr.bf16.mxu0 %v13639_v55  ;;  %4823 = vmatpush1.bf16.msra.mxu1 %v13640_v33  ;;  %v13649_v55 = vld [vmem:[#allocation16_spill] sm:$0xff]  ;;  %v13650_v33 = vld [vmem:[#allocation101_spill] sm:$0xff] }
 0xf9d   :  { %4824 = vmatprep.subr.bf16.mxu1 %v13641_v50  ;;  %v13651_v50 = vld [vmem:[#allocation45_spill] sm:$0xff] }
 0xf9f   :  { %4730 = vmatpush1.bf16.msra.mxu0 %v13642_v47  ;;  %v13652_v47 = vld [vmem:[#allocation85_spill] sm:$0xff] }
 0xfa0   :  { %4835 = vmatprep.subr.bf16.mxu0 %v13643_v62  ;;  %4825 = vmatpush1.bf16.msra.mxu1 %v13644_v27  ;;  %v13653_v62 = vld [vmem:[#allocation71_spill] sm:$0xff]  ;;  %v13654_v27 = vld [vmem:[#allocation89_spill] sm:$0xff] }
 0xfa1   :  { %4876 = vmatprep.subr.bf16.mxu1 %v13645_v61  ;;  %v13655_v61 = vld [vmem:[#allocation91_spill] sm:$0xff] }
 0xfa2   :  { %4732 = vmatmul.mubr.bf16.vlgmr.msra.gmra.mrb[108].mxu0 %v11740_v31  ;;  %v13656_v31 = vld [vmem:[#allocation93_spill] sm:$0xff] }
 0xfa3   :  { %4836 = vmatpush1.bf16.msra.mxu0 %v13646_v20  ;;  %v13657_v20 = vld [vmem:[#allocation23_spill] sm:$0xff] }
 0xfa4   :  { %4837 = vmatprep.subr.bf16.mxu0 %v13647_v9  ;;  %v13658_v9 = vld [vmem:[#allocation38_spill] sm:$0xff] }
 0xfa7   :  { %4838 = vmatpush1.bf16.msra.mxu0 %v13648_v51  ;;  %v13659_v51 = vld [vmem:[#allocation25_spill] sm:$0xff] }
 0xfa8   :  { %4839 = vmatprep.subr.bf16.mxu0 %v13649_v55  ;;  %v13660_v55 = vld [vmem:[#allocation59_spill] sm:$0xff] }
 0xfab   :  { %4840 = vmatpush1.bf16.msra.mxu0 %v13650_v33  ;;  %v13661_v33 = vld [vmem:[#allocation80_spill] sm:$0xff] }
 0xfac   :  { %4841 = vmatprep.subr.bf16.mxu0 %v13651_v50  ;;  %v13662_v50 = vld [vmem:[#allocation60_spill] sm:$0xff] }
 0xfaf   :  { %4842 = vmatpush1.bf16.msra.mxu0 %v13652_v47  ;;  %v13663_v47 = vld [vmem:[#allocation29_spill] sm:$0xff] }
 0xfb0   :  { %4843 = vmatprep.subr.bf16.mxu0 %v13653_v62  ;;  %v13664_v62 = vld [vmem:[#allocation68_spill] sm:$0xff] }
 0xfb3   :  { %4844 = vmatpush1.bf16.msra.mxu0 %v13654_v27  ;;  %v13665_v27 = vld [vmem:[#allocation31_spill] sm:$0xff] }
 0xfb4   :  { %4845 = vmatprep.subr.bf16.mxu0 %v13655_v61  ;;  %v13666_v61 = vld [vmem:[#allocation96_spill] sm:$0xff] }
 0xfb7   :  { %4846 = vmatpush1.bf16.msra.mxu0 %v13656_v31  ;;  %v13667_v31 = vld [vmem:[#allocation33_spill] sm:$0xff] }
 0xfb8   :  { %4847 = vmatprep.subr.bf16.mxu0 %v13657_v20  ;;  %v13668_v20 = vld [vmem:[#allocation98_spill] sm:$0xff] }
 0xfbb   :  { %4848 = vmatpush1.bf16.msra.mxu0 %v13658_v9  ;;  %v13669_v9 = vld [vmem:[#allocation13_spill] sm:$0xff] }
 0xfbc   :  { %4849 = vmatprep.subr.bf16.mxu0 %v13659_v51  ;;  %v13670_v51 = vld [vmem:[#allocation100_spill] sm:$0xff] }
 0xfbf   :  { %4850 = vmatpush1.bf16.msra.mxu0 %v13660_v55  ;;  %v13671_v55 = vld [vmem:[#allocation17_spill] sm:$0xff] }
 0xfc0   :  { %4851 = vmatprep.subr.bf16.mxu0 %v13661_v33  ;;  %v13672_v33 = vld [vmem:[#allocation20_spill] sm:$0xff] }
 0xfc3   :  { %4852 = vmatpush1.bf16.msra.mxu0 %v13662_v50  ;;  %v13673_v50 = vld [vmem:[#allocation46_spill] sm:$0xff] }
 0xfc4   :  { %4853 = vmatprep.subr.bf16.mxu0 %v13663_v47  ;;  %v13674_v47 = vld [vmem:[#allocation15_spill] sm:$0xff] }
 0xfc7   :  { %4854 = vmatpush1.bf16.msra.mxu0 %v13664_v62  ;;  %v13675_v62 = vld [vmem:[#allocation78_spill] sm:$0xff] }
 0xfc8   :  { %4855 = vmatprep.subr.bf16.mxu0 %v13665_v27  ;;  %v13676_v27 = vld [vmem:[#allocation64_spill] sm:$0xff] }
 0xfcb   :  { %4856 = vmatpush1.bf16.msra.mxu0 %v13666_v61  ;;  %v13677_v61 = vld [vmem:[#allocation18_spill] sm:$0xff] }
 0xfcc   :  { %4857 = vmatprep.subr.bf16.mxu0 %v13667_v31 }
 0xfcf   :  { %4858 = vmatpush1.bf16.msra.mxu0 %v13668_v20 }
 0xfd0   :  { %4859 = vmatprep.subr.bf16.mxu0 %v13669_v9 }
 0xfd3   :  { %4860 = vmatpush1.bf16.msra.mxu0 %v13670_v51 }
 0xfd4   :  { %4861 = vmatprep.subr.bf16.mxu0 %v13671_v55 }
 0xfd7   :  { %4862 = vmatpush1.bf16.msra.mxu0 %v13672_v33 }
 0xfd8   :  { %4863 = vmatprep.subr.bf16.mxu0 %v13673_v50 }
 0xfdb   :  { %4864 = vmatpush1.bf16.msra.mxu0 %v13674_v47 }
 0xfdc   :  { %4865 = vmatprep.subr.bf16.mxu0 %v13675_v62 }
 0xfdf   :  { %4866 = vmatpush1.bf16.msra.mxu0 %v13676_v27 }
 0xfe0   :  { %4971 = vmatprep.subr.bf16.mxu0 %v13677_v61 }
0x1035   :  { %v4651_v31 = vpop.f32.mrb[104].mxu0  ;;  %v4692_v20 = vpop.f32.mrb[136].mxu1 }
0x1036   :  { %v4746_v9 = vadd.f32 %v4651_v31, %v13678_v40  ;;  %v4653_v44 = vpop.f32.mrb[105].mxu0  ;;  %v4694_v51 = vpop.f32.mrb[137].mxu1  ;;  %v11847_v40 = vld [vmem:[%s12553_s8] ss:$0 sm:$0xff]  ;;  %v13682_v31 = vld [vmem:[#allocation51_spill] sm:$0xff] }
0x1037   :  { %v4753_v55 = vadd.f32 %v4653_v44, %v13679_v24  ;;  %v4768_v33 = vadd.f32 %v4694_v51, %v13680_v25  ;;  %v4655_v5 = vpop.f32.mrb[106].mxu0  ;;  %v4696_v50 = vpop.f32.mrb[138].mxu1  ;;  %v4760_v25 = vadd.f32 %v11847_v40, %v4692_v20 }
0x1038   :  { %v6006_v37 = vmul.f32 -1.442695, %v4746_v9  ;;  %v4656_v47 = vpop.f32.mrb[107].mxu0  ;;  %v4697_v43 = vpop.f32.mrb[139].mxu1  ;;  %v13681_v9 = vld [vmem:[#allocation7_spill] sm:$0xff] }
0x1039   :  { %v6007_v62 = vmul.f32 -1.442695, %v4753_v55 }
0x103a   :  { %6789 = vpow2.f32 %v6006_v37  ;;  %v6008_v37 = vmul.f32 -1.442695, %v4768_v33  ;;  %v11858_v33 = vld [vmem:[%s12553_s8 + $0x1] ss:$0 sm:$0xff] }
0x103b   :  { %6791 = vpow2.f32 %v6007_v62 }
0x1044   :  { %v6790_v27 = vpop.eup %6789 }
0x1045   :  { %v4750_v61 = vadd.f32 1.0, %v6790_v27  ;;  %v6792_v21 = vpop.eup %6791 }
0x1046   :  { %v4757_v14 = vadd.f32 1.0, %v6792_v21 }
0x1047   :  { %6793 = vrcp.f32 %v4750_v61 }
0x1048   :  { %6795 = vrcp.f32 %v4757_v14 }
0x1051   :  { %v6794_v5 = vpop.eup %6793 }
0x1052   :  { %v4761_v24 = vmul.f32 %v6794_v5, %v4760_v25  ;;  %v6796_v44 = vpop.eup %6795 }
0x1053   :  { %v4764_v51 = vsub.f32 1.0, %v6796_v44  ;;  %v4766_v21 = vmul.f32 %v6796_v44, %v11728_v36  ;;  %v13683_v44 = vld [vmem:[#allocation40_spill] sm:$0xff] }
0x1054   :  { %v4762_v43 = vadd.f32 %v4761_v24, %v13681_v9 }
0x1056   :  { %6797 = vtanh.f32 %v4762_v43 }
0x1057   :  { %6799 = vpow2.f32 %v6008_v37 }
0x1060   :  { %v6798_v55 = vpop.eup %6797 }
0x1061   :  { %v4765_v50 = vmul.f32 %v6798_v55, %v4764_v51  ;;  %v6800_v62 = vpop.eup %6799 }
0x1062   :  { %v4772_v27 = vadd.f32 1.0, %v6800_v62 }
0x1063   :  { %v11852_v47 = vadd.f32 %v4766_v21, %v4765_v50 }
0x1064   :  { %6801 = vrcp.f32 %v4772_v27 }
0x106e   :  { %v6802_v24 = vpop.eup %6801 }
0x1075   :  { %v4733_v20 = vpop.f32.mrb[108].mxu0 }
0x1076   :  { %v4775_v61 = vadd.f32 %v4733_v20, %v13682_v31  ;;  %v4735_v14 = vpop.f32.mrb[109].mxu0 }
0x1077   :  { %v4782_v25 = vadd.f32 %v11858_v33, %v4735_v14  ;;  %v4737_v5 = vpop.f32.mrb[110].mxu0  ;;  %v11869_v14 = vpack.c.bf16 %v11852_v47, %v11852_v47 }
0x1078   :  { %v6009_v9 = vmul.f32 -1.442695, %v4775_v61  ;;  %v4738_v43 = vpop.f32.mrb[111].mxu0  ;;  %v11884_v5 = vld [vmem:[%s12551_s6 + $0x34] ss:$24 sps:$4 sm:$0xff]  }
0x1079   :  { %v4783_v37 = vmul.f32 %v6802_v24, %v4782_v25  ;;  %v11878_v25 = vld [vmem:[%s12551_s6] ss:$24 sps:$4 sm:$0xff]  }
0x107a   :  { %6803 = vpow2.f32 %v6009_v9  ;;  %v13709_v24 = vld [vmem:[#allocation89_spill] sm:$0xff]  ;;  %v13710_v9 = vld [vmem:[#allocation91_spill] sm:$0xff] }
0x107b   :  { %v4784_v51 = vadd.f32 %v4783_v37, %v13683_v44  ;;  %v13711_v43 = vld [vmem:[#allocation93_spill] sm:$0xff]  ;;  %v13712_v37 = vld [vmem:[#allocation23_spill] sm:$0xff]  ;;  %v13713_v44 = vld [vmem:[#allocation38_spill] sm:$0xff] }
0x1084   :  { %v6804_v55 = vpop.eup %6803 }
0x1085   :  { %v4779_v50 = vadd.f32 1.0, %v6804_v55  ;;  %v13715_v55 = vld [vmem:[#allocation59_spill] sm:$0xff] }
0x1087   :  { %6805 = vrcp.f32 %v4779_v50  ;;  %v13716_v50 = vld [vmem:[#allocation80_spill] sm:$0xff] }
0x1088   :  { %6807 = vtanh.f32 %v4784_v51  ;;  %v13714_v51 = vld [vmem:[#allocation25_spill] sm:$0xff] }
0x1091   :  { %v6806_v21 = vpop.eup %6805 }
0x1092   :  { %v4786_v62 = vsub.f32 1.0, %v6806_v21  ;;  %v6808_v27 = vpop.eup %6807  ;;  %v4788_v31 = vmul.f32 %v6806_v21, %v11734_v6  ;;  %v13717_v21 = vld [vmem:[#allocation60_spill] sm:$0xff] }
0x1094   :  { %v4787_v20 = vmul.f32 %v6808_v27, %v4786_v62  ;;  %v13718_v62 = vld [vmem:[#allocation29_spill] sm:$0xff]  ;;  %v13719_v27 = vld [vmem:[#allocation68_spill] sm:$0xff] }
0x1096   :  { %v11863_v36 = vadd.f32 %v4788_v31, %v4787_v20  ;;  %v13720_v20 = vld [vmem:[#allocation31_spill] sm:$0xff]  ;;  %v13721_v31 = vld [vmem:[#allocation96_spill] sm:$0xff] }
0x1098   :  { %v4793_v61 = vpack.c.bf16 %v11863_v36, %v11863_v36 }
0x109a   :  { %4826 = vmatprep.mubr.bf16.mxu1 %v4793_v61  ;;  %4867 = vmatprep.mubr.bf16.mxu0 %v4793_v61 }
0x109b   :  { %4827 = vmatmul.mubr.bf16.vlgmr.msra.gmra.mrb[140].mxu1 %v11869_v14  ;;  %4868 = vmatmul.mubr.bf16.vlgmr.msra.gmra.mrb[112].mxu0 %v11869_v14 }
0x109c   :  { %4877 = vmatpush1.bf16.msra.mxu1 %v11059_v10  ;;  %4908 = vmatprep.mubr.bf16.mxu1 %v4793_v61  ;;  %v11892_v10 = vld [vmem:[%s12551_s6 + $0x30] ss:$24 sps:$4 sm:$0xff]   ;;  %v13722_v61 = vld [vmem:[#allocation33_spill] sm:$0xff] }
0x109d   :  { %4878 = vmatprep.subr.bf16.mxu1 %v11065_v8  ;;  %4972 = vmatpush1.bf16.msra.mxu0 %v11878_v25  ;;  %v11898_v8 = vld [vmem:[%s12551_s6 + $0x64] ss:$24 sps:$4 sm:$0xff]  }
0x109e   :  { %4973 = vmatprep.subr.bf16.mxu0 %v11884_v5 }
0x10a0   :  { %4879 = vmatpush1.bf16.msra.mxu1 %v11073_v1  ;;  %v11906_v1 = vld [vmem:[%s12551_s6 + $0x60] ss:$24 sps:$4 sm:$0xff]  }
0x10a1   :  { %4880 = vmatprep.subr.bf16.mxu1 %v11079_v0  ;;  %4974 = vmatpush1.bf16.msra.mxu0 %v11892_v10  ;;  %v13684_v0 = vld [vmem:[#allocation24_spill] sm:$0xff] }
0x10a2   :  { %4975 = vmatprep.subr.bf16.mxu0 %v11898_v8 }
0x10a4   :  { %4881 = vmatpush1.bf16.msra.mxu1 %v11087_v53  ;;  %v13685_v53 = vld [vmem:[#allocation62_spill] sm:$0xff] }
0x10a5   :  { %4882 = vmatprep.subr.bf16.mxu1 %v11093_v26  ;;  %4976 = vmatpush1.bf16.msra.mxu0 %v11906_v1  ;;  %v13686_v26 = vld [vmem:[#allocation82_spill] sm:$0xff] }
0x10a6   :  { %4977 = vmatprep.subr.bf16.mxu0 %v11100_v45  ;;  %v13687_v45 = vld [vmem:[#allocation39_spill] sm:$0xff] }
0x10a8   :  { %4883 = vmatpush1.bf16.msra.mxu1 %v11106_v28  ;;  %v13688_v28 = vld [vmem:[#allocation57_spill] sm:$0xff] }
0x10a9   :  { %4884 = vmatprep.subr.bf16.mxu1 %v11112_v34  ;;  %4978 = vmatpush1.bf16.msra.mxu0 %v11118_v3  ;;  %v13689_v34 = vld [vmem:[#allocation56_spill] sm:$0xff]  ;;  %v13690_v3 = vld [vmem:[#allocation70_spill] sm:$0xff] }
0x10aa   :  { %4979 = vmatprep.subr.bf16.mxu0 %v11124_v54  ;;  %v13691_v54 = vld [vmem:[#allocation79_spill] sm:$0xff] }
0x10ac   :  { %4885 = vmatpush1.bf16.msra.mxu1 %v11130_v42  ;;  %v13692_v42 = vld [vmem:[#allocation58_spill] sm:$0xff] }
0x10ad   :  { %4886 = vmatprep.subr.bf16.mxu1 %v11136_v60  ;;  %4980 = vmatpush1.bf16.msra.mxu0 %v11142_v56  ;;  %v13693_v60 = vld [vmem:[#allocation42_spill] sm:$0xff]  ;;  %v13694_v56 = vld [vmem:[#allocation55_spill] sm:$0xff] }
0x10ae   :  { %4981 = vmatprep.subr.bf16.mxu0 %v11148_v2  ;;  %v13695_v2 = vld [vmem:[#allocation28_spill] sm:$0xff] }
0x10b0   :  { %4887 = vmatpush1.bf16.msra.mxu1 %v11528_v7 }
0x10b1   :  { %4888 = vmatprep.subr.bf16.mxu1 %v11534_v63  ;;  %4982 = vmatpush1.bf16.msra.mxu0 %v11156_v18  ;;  %v13696_v18 = vld [vmem:[#allocation66_spill] sm:$0xff] }
0x10b2   :  { %4983 = vmatprep.subr.bf16.mxu0 %v11162_v15  ;;  %v13697_v15 = vld [vmem:[#allocation14_spill] sm:$0xff] }
0x10b4   :  { %4889 = vmatpush1.bf16.msra.mxu1 %v11542_v52 }
0x10b5   :  { %4890 = vmatprep.subr.bf16.mxu1 %v11548_v29  ;;  %4984 = vmatpush1.bf16.msra.mxu0 %v11170_v59  ;;  %v13698_v59 = vld [vmem:[#allocation30_spill] sm:$0xff] }
0x10b6   :  { %4985 = vmatprep.subr.bf16.mxu0 %v11176_v46  ;;  %v13699_v46 = vld [vmem:[#allocation95_spill] sm:$0xff] }
0x10b8   :  { %4891 = vmatpush1.bf16.msra.mxu1 %v11556_v4 }
0x10b9   :  { %4892 = vmatprep.subr.bf16.mxu1 %v11562_v57  ;;  %4986 = vmatpush1.bf16.msra.mxu0 %v11184_v19  ;;  %v13700_v19 = vld [vmem:[#allocation32_spill] sm:$0xff] }
0x10ba   :  { %4987 = vmatprep.subr.bf16.mxu0 %v11190_v32  ;;  %v13701_v32 = vld [vmem:[#allocation97_spill] sm:$0xff] }
0x10bc   :  { %4893 = vmatpush1.bf16.msra.mxu1 %v11570_v22 }
0x10bd   :  { %4894 = vmatprep.subr.bf16.mxu1 %v11576_v41  ;;  %4988 = vmatpush1.bf16.msra.mxu0 %v11198_v39  ;;  %v13702_v39 = vld [vmem:[#allocation34_spill] sm:$0xff] }
0x10be   :  { %4989 = vmatprep.subr.bf16.mxu0 %v11204_v49  ;;  %v13703_v49 = vld [vmem:[#allocation99_spill] sm:$0xff] }
0x10c0   :  { %4895 = vmatpush1.bf16.msra.mxu1 %v11584_v11 }
0x10c1   :  { %4896 = vmatprep.subr.bf16.mxu1 %v11590_v38  ;;  %4990 = vmatpush1.bf16.msra.mxu0 %v11212_v12  ;;  %v13704_v12 = vld [vmem:[#allocation16_spill] sm:$0xff] }
0x10c2   :  { %4991 = vmatprep.subr.bf16.mxu0 %v13621_v48  ;;  %v13705_v48 = vld [vmem:[#allocation101_spill] sm:$0xff] }
0x10c4   :  { %4897 = vmatpush1.bf16.msra.mxu1 %v13622_v23 }
0x10c5   :  { %4898 = vmatprep.subr.bf16.mxu1 %v13623_v35  ;;  %4992 = vmatpush1.bf16.msra.mxu0 %v13624_v58  ;;  %v13706_v58 = vld [vmem:[#allocation45_spill] sm:$0xff] }
0x10c6   :  { %4993 = vmatprep.subr.bf16.mxu0 %v13625_v17  ;;  %v13707_v17 = vld [vmem:[#allocation85_spill] sm:$0xff] }
0x10c8   :  { %4899 = vmatpush1.bf16.msra.mxu1 %v13626_v16 }
0x10c9   :  { %4900 = vmatprep.subr.bf16.mxu1 %v13627_v30  ;;  %4994 = vmatpush1.bf16.msra.mxu0 %v13628_v13  ;;  %v13708_v13 = vld [vmem:[#allocation71_spill] sm:$0xff] }
0x10ca   :  { %4995 = vmatprep.subr.bf16.mxu0 %v13684_v0  ;;  %v13724_v0 = vld [vmem:[#allocation13_spill] sm:$0xff] }
0x10cc   :  { %4901 = vmatpush1.bf16.msra.mxu1 %v13685_v53 }
0x10cd   :  { %4902 = vmatprep.subr.bf16.mxu1 %v13686_v26  ;;  %4996 = vmatpush1.bf16.msra.mxu0 %v13687_v45  ;;  %v13725_v45 = vld [vmem:[#allocation100_spill] sm:$0xff] }
0x10ce   :  { %4997 = vmatprep.subr.bf16.mxu0 %v13688_v28  ;;  %v13726_v28 = vld [vmem:[#allocation17_spill] sm:$0xff] }
0x10d0   :  { %4903 = vmatpush1.bf16.msra.mxu1 %v13689_v34 }
0x10d1   :  { %4904 = vmatprep.subr.bf16.mxu1 %v13690_v3  ;;  %4998 = vmatpush1.bf16.msra.mxu0 %v13691_v54  ;;  %v13727_v54 = vld [vmem:[#allocation20_spill] sm:$0xff] }
0x10d2   :  { %4999 = vmatprep.subr.bf16.mxu0 %v13692_v42  ;;  %v13728_v42 = vld [vmem:[#allocation46_spill] sm:$0xff] }
0x10d4   :  { %4905 = vmatpush1.bf16.msra.mxu1 %v13693_v60 }
0x10d5   :  { %4906 = vmatprep.subr.bf16.mxu1 %v13694_v56  ;;  %5000 = vmatpush1.bf16.msra.mxu0 %v13695_v2  ;;  %v13729_v2 = vld [vmem:[#allocation15_spill] sm:$0xff] }
0x10d6   :  { %5001 = vmatprep.subr.bf16.mxu0 %v13696_v18  ;;  %v13730_v18 = vld [vmem:[#allocation78_spill] sm:$0xff] }
0x10d8   :  { %4907 = vmatpush1.bf16.msra.mxu1 %v13697_v15 }
0x10d9   :  { %5012 = vmatprep.subr.bf16.mxu1 %v13698_v59  ;;  %5002 = vmatpush1.bf16.msra.mxu0 %v13699_v46  ;;  %v13731_v59 = vld [vmem:[#allocation64_spill] sm:$0xff] }
0x10da   :  { %5053 = vmatprep.subr.bf16.mxu0 %v13700_v19  ;;  %v7168_v46 = vld [vmem:[%s12551_s6 + $0x4] ss:$24 sps:$4 sm:$0xff]  }
0x10db   :  { %4909 = vmatmul.mubr.bf16.vlgmr.msra.gmra.mrb[144].mxu1 %v11869_v14  ;;  %v13723_v14 = vld [vmem:[#allocation98_spill] sm:$0xff] }
0x10dc   :  { %5013 = vmatpush1.bf16.msra.mxu1 %v13701_v32 }
0x10dd   :  { %5014 = vmatprep.subr.bf16.mxu1 %v13702_v39  ;;  %v13732_v39 = vld [vmem:[#allocation65_spill] sm:$0xff] }
0x10e0   :  { %5015 = vmatpush1.bf16.msra.mxu1 %v13703_v49 }
0x10e1   :  { %5016 = vmatprep.subr.bf16.mxu1 %v13704_v12 }
0x10e4   :  { %5017 = vmatpush1.bf16.msra.mxu1 %v13705_v48 }
0x10e5   :  { %5018 = vmatprep.subr.bf16.mxu1 %v13706_v58  ;;  %v13733_v58 = vld [vmem:[#allocation75_spill] sm:$0xff] }
0x10e8   :  { %5019 = vmatpush1.bf16.msra.mxu1 %v13707_v17 }
0x10e9   :  { %5020 = vmatprep.subr.bf16.mxu1 %v13708_v13  ;;  %v13734_v13 = vld [vmem:[#allocation41_spill] sm:$0xff] }
0x10ec   :  { %5021 = vmatpush1.bf16.msra.mxu1 %v13709_v24 }
0x10ed   :  { %5022 = vmatprep.subr.bf16.mxu1 %v13710_v9 }
0x10f0   :  { %5023 = vmatpush1.bf16.msra.mxu1 %v13711_v43 }
0x10f1   :  { %5024 = vmatprep.subr.bf16.mxu1 %v13712_v37 }
0x10f4   :  { %5025 = vmatpush1.bf16.msra.mxu1 %v13713_v44 }
0x10f5   :  { %5026 = vmatprep.subr.bf16.mxu1 %v13714_v51 }
0x10f8   :  { %5027 = vmatpush1.bf16.msra.mxu1 %v13715_v55 }
0x10f9   :  { %5028 = vmatprep.subr.bf16.mxu1 %v13716_v50 }
0x10fc   :  { %5029 = vmatpush1.bf16.msra.mxu1 %v13717_v21 }
0x10fd   :  { %5030 = vmatprep.subr.bf16.mxu1 %v13718_v62 }
0x1100   :  { %5031 = vmatpush1.bf16.msra.mxu1 %v13719_v27 }
0x1101   :  { %5032 = vmatprep.subr.bf16.mxu1 %v13720_v20 }
0x1104   :  { %5033 = vmatpush1.bf16.msra.mxu1 %v13721_v31 }
0x1105   :  { %5034 = vmatprep.subr.bf16.mxu1 %v13722_v61 }
0x1108   :  { %5035 = vmatpush1.bf16.msra.mxu1 %v13723_v14  ;;  %v13735_v14 = vld [vmem:[#allocation67_spill] sm:$0xff] }
0x1109   :  { %5036 = vmatprep.subr.bf16.mxu1 %v13724_v0 }
0x110c   :  { %5037 = vmatpush1.bf16.msra.mxu1 %v13725_v45 }
0x110d   :  { %5038 = vmatprep.subr.bf16.mxu1 %v13726_v28 }
0x1110   :  { %5039 = vmatpush1.bf16.msra.mxu1 %v13727_v54 }
0x1111   :  { %5040 = vmatprep.subr.bf16.mxu1 %v13728_v42 }
0x1114   :  { %5041 = vmatpush1.bf16.msra.mxu1 %v13729_v2 }
0x1115   :  { %5042 = vmatprep.subr.bf16.mxu1 %v13730_v18 }
0x1118   :  { %5043 = vmatpush1.bf16.msra.mxu1 %v13731_v59 }
0x1119   :  { %5148 = vmatprep.subr.bf16.mxu1 %v7168_v46 }
0x116e   :  { %v4828_v19 = vpop.f32.mrb[140].mxu1  ;;  %v4869_v32 = vpop.f32.mrb[112].mxu0 }
0x116f   :  { %v4923_v49 = vadd.f32 %v4828_v19, %v13732_v39  ;;  %v4830_v12 = vpop.f32.mrb[141].mxu1  ;;  %v4871_v48 = vpop.f32.mrb[113].mxu0  ;;  %v4937_v20 = vadd.f32 %v11847_v40, %v4869_v32 }
0x1170   :  { %v4930_v17 = vadd.f32 %v4830_v12, %v13733_v58  ;;  %v4945_v24 = vadd.f32 %v4871_v48, %v13734_v13  ;;  %v4832_v9 = vpop.f32.mrb[142].mxu1  ;;  %v4873_v43 = vpop.f32.mrb[114].mxu0  ;;  %v13736_v48 = vld [vmem:[#allocation53_spill] sm:$0xff] }
0x1171   :  { %v6010_v37 = vmul.f32 -1.442695, %v4923_v49  ;;  %v4833_v44 = vpop.f32.mrb[143].mxu1  ;;  %v4874_v51 = vpop.f32.mrb[115].mxu0 }
0x1172   :  { %v6011_v55 = vmul.f32 -1.442695, %v4930_v17  ;;  %v6012_v45 = vmul.f32 -1.442695, %v4945_v24  ;;  %v13737_v51 = vld [vmem:[#allocation54_spill] sm:$0xff] }
0x1173   :  { %6809 = vpow2.f32 %v6010_v37 }
0x1174   :  { %6811 = vpow2.f32 %v6011_v55 }
0x117d   :  { %v6810_v50 = vpop.eup %6809 }
0x117e   :  { %v4927_v21 = vadd.f32 1.0, %v6810_v50  ;;  %v6812_v62 = vpop.eup %6811 }
0x117f   :  { %v4934_v27 = vadd.f32 1.0, %v6812_v62 }
0x1180   :  { %6813 = vrcp.f32 %v4927_v21 }
0x1181   :  { %6815 = vrcp.f32 %v4934_v27 }
0x118a   :  { %v6814_v31 = vpop.eup %6813 }
0x118b   :  { %v4938_v61 = vmul.f32 %v6814_v31, %v4937_v20  ;;  %v6816_v28 = vpop.eup %6815 }
0x118c   :  { %v4941_v54 = vsub.f32 1.0, %v6816_v28  ;;  %v4943_v19 = vmul.f32 %v6816_v28, %v11852_v47  ;;  %v12022_v28 = vld [vmem:[%s12551_s6 + $0x10] ss:$24 sps:$4 sm:$0xff]  }
0x118d   :  { %v4939_v0 = vadd.f32 %v4938_v61, %v13735_v14 }
0x118f   :  { %6817 = vtanh.f32 %v4939_v0 }
0x1190   :  { %6819 = vpow2.f32 %v6012_v45 }
0x1199   :  { %v6818_v42 = vpop.eup %6817 }
0x119a   :  { %v4942_v46 = vmul.f32 %v6818_v42, %v4941_v54  ;;  %v6820_v49 = vpop.eup %6819  ;;  %v12028_v54 = vld [vmem:[%s12551_s6 + $0x44] ss:$24 sps:$4 sm:$0xff]   ;;  %v12036_v42 = vld [vmem:[%s12551_s6 + $0x40] ss:$24 sps:$4 sm:$0xff]  }
0x119b   :  { %v4949_v12 = vadd.f32 1.0, %v6820_v49  ;;  %v7179_v49 = vld [vmem:[%s12551_s6 + $0xc4] ss:$24 sps:$4 sm:$0xff]  }
0x119c   :  { %v12003_v39 = vadd.f32 %v4943_v19, %v4942_v46  ;;  %v12042_v46 = vld [vmem:[%s12551_s6 + $0x74] ss:$24 sps:$4 sm:$0xff]  }
0x119d   :  { %6821 = vrcp.f32 %v4949_v12  ;;  %v12072_v19 = vld [vmem:[%s12551_s6 + $0xd4] ss:$24 sps:$4 sm:$0xff]   ;;  %v12084_v12 = vld [vmem:[%s12551_s6 + $0xd0] ss:$24 sps:$4 sm:$0xff]  }
0x119e   :  { %v12015_v45 = vpack.c.bf16 %v12003_v39, %v12003_v39 }
0x11a7   :  { %v6822_v24 = vpop.eup %6821 }
0x11ae   :  { %v4910_v32 = vpop.f32.mrb[144].mxu1 }
0x11af   :  { %v4952_v58 = vadd.f32 %v4910_v32, %v13736_v48  ;;  %v4912_v17 = vpop.f32.mrb[145].mxu1  ;;  %v12090_v32 = vld [vmem:[%s12551_s6 + $0x104] ss:$24 sps:$4 sm:$0xff]   ;;  %v7182_v48 = vld [vmem:[%s12551_s6 + $0xc0] ss:$24 sps:$4 sm:$0xff]  }
0x11b0   :  { %v4959_v13 = vadd.f32 %v11858_v33, %v4912_v17  ;;  %v4914_v9 = vpop.f32.mrb[146].mxu1  ;;  %v7184_v17 = vld [vmem:[%s12551_s6 + $0xf0] ss:$24 sps:$4 sm:$0xff]  }
0x11b1   :  { %v6013_v43 = vmul.f32 -1.442695, %v4952_v58  ;;  %v4915_v37 = vpop.f32.mrb[147].mxu1  ;;  %v7183_v58 = vld [vmem:[%s12551_s6 + $0xf4] ss:$24 sps:$4 sm:$0xff]  }
0x11b2   :  { %v4960_v44 = vmul.f32 %v6822_v24, %v4959_v13  ;;  %v7185_v13 = vld [vmem:[%s12551_s6 + $0x124] ss:$24 sps:$4 sm:$0xff]  }
0x11b3   :  { %6823 = vpow2.f32 %v6013_v43  ;;  %v7204_v9 = vld [vmem:[%s12551_s6 + $0xc] ss:$24 sps:$4 sm:$0xff]   ;;  %v7208_v24 = vld [vmem:[%s12551_s6 + $0x3c] ss:$24 sps:$4 sm:$0xff]   ;;  %v7209_v43 = vld [vmem:[%s12551_s6 + $0x38] ss:$24 sps:$4 sm:$0xff]  }
0x11b4   :  { %v4961_v55 = vadd.f32 %v4960_v44, %v13737_v51  ;;  %v7210_v37 = vld [vmem:[%s12551_s6 + $0x6c] ss:$24 sps:$4 sm:$0xff]   ;;  %v7211_v44 = vld [vmem:[%s12551_s6 + $0x68] ss:$24 sps:$4 sm:$0xff]   ;;  %v7212_v51 = vld [vmem:[%s12551_s6 + $0x9c] ss:$24 sps:$4 sm:$0xff]  }
0x11bd   :  { %v6824_v50 = vpop.eup %6823 }
0x11be   :  { %v4956_v21 = vadd.f32 1.0, %v6824_v50  ;;  %v7214_v50 = vld [vmem:[%s12551_s6 + $0xcc] ss:$24 sps:$4 sm:$0xff]  }
0x11c0   :  { %6825 = vrcp.f32 %v4956_v21  ;;  %v7215_v21 = vld [vmem:[%s12551_s6 + $0xc8] ss:$24 sps:$4 sm:$0xff]  }
0x11c1   :  { %6827 = vtanh.f32 %v4961_v55  ;;  %v7213_v55 = vld [vmem:[%s12551_s6 + $0x98] ss:$24 sps:$4 sm:$0xff]  }
0x11ca   :  { %v6826_v62 = vpop.eup %6825 }
0x11cb   :  { %v4963_v27 = vsub.f32 1.0, %v6826_v62  ;;  %v6828_v20 = vpop.eup %6827  ;;  %v4965_v61 = vmul.f32 %v6826_v62, %v11863_v36  ;;  %v7216_v62 = vld [vmem:[%s12551_s6 + $0xfc] ss:$24 sps:$4 sm:$0xff]  }
0x11cd   :  { %v4964_v31 = vmul.f32 %v6828_v20, %v4963_v27  ;;  %v7217_v27 = vld [vmem:[%s12551_s6 + $0xf8] ss:$24 sps:$4 sm:$0xff]   ;;  %v7218_v20 = vld [vmem:[%s12551_s6 + $0x12c] ss:$24 sps:$4 sm:$0xff]  }
0x11cf   :  { %v12009_v14 = vadd.f32 %v4965_v61, %v4964_v31  ;;  %v7219_v31 = vld [vmem:[%s12551_s6 + $0x128] ss:$24 sps:$4 sm:$0xff]   ;;  %v7220_v61 = vld [vmem:[%s12551_s6 + $0x15c] ss:$24 sps:$4 sm:$0xff]  }
0x11d1   :  { %v4970_v0 = vpack.c.bf16 %v12009_v14, %v12009_v14 }
0x11d3   :  { %5003 = vmatprep.mubr.bf16.mxu0 %v4970_v0  ;;  %5044 = vmatprep.mubr.bf16.mxu1 %v4970_v0 }
0x11d4   :  { %5004 = vmatmul.mubr.bf16.vlgmr.msra.gmra.mrb[116].mxu0 %v12015_v45  ;;  %5045 = vmatmul.mubr.bf16.vlgmr.msra.gmra.mrb[148].mxu1 %v12015_v45 }
0x11d5   :  { %5054 = vmatpush1.bf16.msra.mxu0 %v12022_v28  ;;  %5085 = vmatprep.mubr.bf16.mxu0 %v4970_v0  ;;  %v7221_v0 = vld [vmem:[%s12551_s6 + $0x158] ss:$24 sps:$4 sm:$0xff]  }
0x11d6   :  { %5055 = vmatprep.subr.bf16.mxu0 %v12028_v54  ;;  %5149 = vmatpush1.bf16.msra.mxu1 %v11878_v25  ;;  %v12050_v25 = vld [vmem:[%s12551_s6 + $0x70] ss:$24 sps:$4 sm:$0xff]  }
0x11d7   :  { %5150 = vmatprep.subr.bf16.mxu1 %v11884_v5  ;;  %v12056_v5 = vld [vmem:[%s12551_s6 + $0xa4] ss:$24 sps:$4 sm:$0xff]  }
0x11d9   :  { %5056 = vmatpush1.bf16.msra.mxu0 %v12036_v42 }
0x11da   :  { %5057 = vmatprep.subr.bf16.mxu0 %v12042_v46  ;;  %5151 = vmatpush1.bf16.msra.mxu1 %v11892_v10  ;;  %v7175_v10 = vld [vmem:[%s12551_s6 + $0x94] ss:$24 sps:$4 sm:$0xff]  }
0x11db   :  { %5152 = vmatprep.subr.bf16.mxu1 %v11898_v8  ;;  %v12066_v8 = vld [vmem:[%s12551_s6 + $0xa0] ss:$24 sps:$4 sm:$0xff]  }
0x11dd   :  { %5058 = vmatpush1.bf16.msra.mxu0 %v12050_v25 }
0x11de   :  { %5059 = vmatprep.subr.bf16.mxu0 %v12056_v5  ;;  %5153 = vmatpush1.bf16.msra.mxu1 %v11906_v1  ;;  %v7178_v1 = vld [vmem:[%s12551_s6 + $0x90] ss:$24 sps:$4 sm:$0xff]  }
0x11df   :  { %5154 = vmatprep.subr.bf16.mxu1 %v7175_v10  ;;  %v7223_v10 = vld [vmem:[%s12551_s6 + $0x188] ss:$24 sps:$4 sm:$0xff]  }
0x11e1   :  { %5060 = vmatpush1.bf16.msra.mxu0 %v12066_v8 }
0x11e2   :  { %5061 = vmatprep.subr.bf16.mxu0 %v12072_v19  ;;  %5155 = vmatpush1.bf16.msra.mxu1 %v7178_v1  ;;  %v7224_v1 = vld [vmem:[%s12551_s6 + $0x1bc] ss:$24 sps:$4 sm:$0xff]  }
0x11e3   :  { %5156 = vmatprep.subr.bf16.mxu1 %v7179_v49  ;;  %v7225_v49 = vld [vmem:[%s12551_s6 + $0x1b8] ss:$24 sps:$4 sm:$0xff]  }
0x11e5   :  { %5062 = vmatpush1.bf16.msra.mxu0 %v12084_v12 }
0x11e6   :  { %5063 = vmatprep.subr.bf16.mxu0 %v12090_v32  ;;  %5157 = vmatpush1.bf16.msra.mxu1 %v7182_v48  ;;  %v7226_v48 = vld [vmem:[%s12551_s6 + $0x1ec] ss:$24 sps:$4 sm:$0xff]  }
0x11e7   :  { %5158 = vmatprep.subr.bf16.mxu1 %v7183_v58  ;;  %v7227_v58 = vld [vmem:[%s12551_s6 + $0x1e8] ss:$24 sps:$4 sm:$0xff]  }
0x11e9   :  { %5064 = vmatpush1.bf16.msra.mxu0 %v11528_v7  ;;  %v7186_v7 = vld [vmem:[%s12551_s6 + $0x120] ss:$24 sps:$4 sm:$0xff]  }
0x11ea   :  { %5065 = vmatprep.subr.bf16.mxu0 %v11534_v63  ;;  %5159 = vmatpush1.bf16.msra.mxu1 %v7184_v17  ;;  %v7187_v63 = vld [vmem:[%s12551_s6 + $0x154] ss:$24 sps:$4 sm:$0xff]  }
0x11eb   :  { %5160 = vmatprep.subr.bf16.mxu1 %v7185_v13  ;;  %v7228_v17 = vld [vmem:[%s12551_s6 + $0x21c] ss:$24 sps:$4 sm:$0xff]   ;;  %v7229_v13 = vld [vmem:[%s12551_s6 + $0x218] ss:$24 sps:$4 sm:$0xff]  }
0x11ed   :  { %5066 = vmatpush1.bf16.msra.mxu0 %v11542_v52  ;;  %v7188_v52 = vld [vmem:[%s12551_s6 + $0x150] ss:$24 sps:$4 sm:$0xff]  }
0x11ee   :  { %5067 = vmatprep.subr.bf16.mxu0 %v11548_v29  ;;  %5161 = vmatpush1.bf16.msra.mxu1 %v7186_v7  ;;  %v7189_v29 = vld [vmem:[%s12551_s6 + $0x184] ss:$24 sps:$4 sm:$0xff]  }
0x11ef   :  { %5162 = vmatprep.subr.bf16.mxu1 %v7187_v63  ;;  %v7230_v7 = vld [vmem:[%s12551_s6 + $0x24c] ss:$24 sps:$4 sm:$0xff]   ;;  %v7231_v63 = vld [vmem:[%s12551_s6 + $0x248] ss:$24 sps:$4 sm:$0xff]  }
0x11f1   :  { %5068 = vmatpush1.bf16.msra.mxu0 %v11556_v4  ;;  %v7190_v4 = vld [vmem:[%s12551_s6 + $0x180] ss:$24 sps:$4 sm:$0xff]  }
0x11f2   :  { %5069 = vmatprep.subr.bf16.mxu0 %v11562_v57  ;;  %5163 = vmatpush1.bf16.msra.mxu1 %v7188_v52  ;;  %v7191_v57 = vld [vmem:[%s12551_s6 + $0x1b4] ss:$24 sps:$4 sm:$0xff]  }
0x11f3   :  { %5164 = vmatprep.subr.bf16.mxu1 %v7189_v29  ;;  %v7232_v52 = vld [vmem:[%s12551_s6 + $0x27c] ss:$24 sps:$4 sm:$0xff]   ;;  %v7233_v29 = vld [vmem:[%s12551_s6 + $0x278] ss:$24 sps:$4 sm:$0xff]  }
0x11f5   :  { %5070 = vmatpush1.bf16.msra.mxu0 %v11570_v22  ;;  %v7192_v22 = vld [vmem:[%s12551_s6 + $0x1b0] ss:$24 sps:$4 sm:$0xff]  }
0x11f6   :  { %5071 = vmatprep.subr.bf16.mxu0 %v11576_v41  ;;  %5165 = vmatpush1.bf16.msra.mxu1 %v7190_v4  ;;  %v7193_v41 = vld [vmem:[%s12551_s6 + $0x1e4] ss:$24 sps:$4 sm:$0xff]  }
0x11f7   :  { %5166 = vmatprep.subr.bf16.mxu1 %v7191_v57  ;;  %v7234_v4 = vld [vmem:[%s12551_s6 + $0x2ac] ss:$24 sps:$4 sm:$0xff]  }
0x11f9   :  { %5072 = vmatpush1.bf16.msra.mxu0 %v11584_v11  ;;  %v7194_v11 = vld [vmem:[%s12551_s6 + $0x1e0] ss:$24 sps:$4 sm:$0xff]  }
0x11fa   :  { %5073 = vmatprep.subr.bf16.mxu0 %v11590_v38  ;;  %5167 = vmatpush1.bf16.msra.mxu1 %v7192_v22  ;;  %v7195_v38 = vld [vmem:[%s12551_s6 + $0x214] ss:$24 sps:$4 sm:$0xff]  }
0x11fb   :  { %5168 = vmatprep.subr.bf16.mxu1 %v7193_v41  ;;  %v13738_v41 = vld [vmem:[#allocation50_spill] sm:$0xff] }
0x11fd   :  { %5074 = vmatpush1.bf16.msra.mxu0 %v13622_v23  ;;  %v7196_v23 = vld [vmem:[%s12551_s6 + $0x210] ss:$24 sps:$4 sm:$0xff]  }
0x11fe   :  { %5075 = vmatprep.subr.bf16.mxu0 %v13623_v35  ;;  %5169 = vmatpush1.bf16.msra.mxu1 %v7194_v11  ;;  %v7197_v35 = vld [vmem:[%s12551_s6 + $0x244] ss:$24 sps:$4 sm:$0xff]  }
0x11ff   :  { %5170 = vmatprep.subr.bf16.mxu1 %v7195_v38 }
0x1201   :  { %5076 = vmatpush1.bf16.msra.mxu0 %v13626_v16  ;;  %v7198_v16 = vld [vmem:[%s12551_s6 + $0x240] ss:$24 sps:$4 sm:$0xff]  }
0x1202   :  { %5077 = vmatprep.subr.bf16.mxu0 %v13627_v30  ;;  %5171 = vmatpush1.bf16.msra.mxu1 %v7196_v23  ;;  %v7199_v30 = vld [vmem:[%s12551_s6 + $0x274] ss:$24 sps:$4 sm:$0xff]  }
0x1203   :  { %5172 = vmatprep.subr.bf16.mxu1 %v7197_v35  ;;  %v13739_v35 = vld [vmem:[#allocation69_spill] sm:$0xff] }
0x1205   :  { %5078 = vmatpush1.bf16.msra.mxu0 %v13685_v53  ;;  %v7200_v53 = vld [vmem:[%s12551_s6 + $0x270] ss:$24 sps:$4 sm:$0xff]  }
0x1206   :  { %5079 = vmatprep.subr.bf16.mxu0 %v13686_v26  ;;  %5173 = vmatpush1.bf16.msra.mxu1 %v7198_v16  ;;  %v7201_v26 = vld [vmem:[%s12551_s6 + $0x2a4] ss:$24 sps:$4 sm:$0xff]  }
0x1207   :  { %5174 = vmatprep.subr.bf16.mxu1 %v7199_v30  ;;  %v13740_v30 = vld [vmem:[#allocation81_spill] sm:$0xff] }
0x1209   :  { %5080 = vmatpush1.bf16.msra.mxu0 %v13689_v34  ;;  %v7202_v34 = vld [vmem:[%s12551_s6 + $0x2a0] ss:$24 sps:$4 sm:$0xff]  }
0x120a   :  { %5081 = vmatprep.subr.bf16.mxu0 %v13690_v3  ;;  %5175 = vmatpush1.bf16.msra.mxu1 %v7200_v53  ;;  %v7203_v3 = vld [vmem:[%s12551_s6 + $0x2d4] ss:$24 sps:$4 sm:$0xff]  }
0x120b   :  { %5176 = vmatprep.subr.bf16.mxu1 %v7201_v26 }
0x120d   :  { %5082 = vmatpush1.bf16.msra.mxu0 %v13693_v60  ;;  %v7205_v60 = vld [vmem:[%s12551_s6 + $0x2d0] ss:$24 sps:$4 sm:$0xff]  }
0x120e   :  { %5083 = vmatprep.subr.bf16.mxu0 %v13694_v56  ;;  %5177 = vmatpush1.bf16.msra.mxu1 %v7202_v34  ;;  %v7206_v56 = vld [vmem:[%s12551_s6 + $0x14] ss:$24 sps:$4 sm:$0xff]  }
0x120f   :  { %5178 = vmatprep.subr.bf16.mxu1 %v7203_v3 }
0x1211   :  { %5084 = vmatpush1.bf16.msra.mxu0 %v13697_v15  ;;  %v7207_v15 = vld [vmem:[%s12551_s6 + $0x8] ss:$24 sps:$4 sm:$0xff]  }
0x1212   :  { %5189 = vmatprep.subr.bf16.mxu0 %v7204_v9  ;;  %5179 = vmatpush1.bf16.msra.mxu1 %v7205_v60 }
0x1213   :  { %5230 = vmatprep.subr.bf16.mxu1 %v7206_v56 }
0x1214   :  { %5086 = vmatmul.mubr.bf16.vlgmr.msra.gmra.mrb[120].mxu0 %v12015_v45  ;;  %v7222_v45 = vld [vmem:[%s12551_s6 + $0x18c] ss:$24 sps:$4 sm:$0xff]  }
0x1215   :  { %5190 = vmatpush1.bf16.msra.mxu0 %v7207_v15 }
0x1216   :  { %5191 = vmatprep.subr.bf16.mxu0 %v7208_v24 }
0x1219   :  { %5192 = vmatpush1.bf16.msra.mxu0 %v7209_v43 }
0x121a   :  { %5193 = vmatprep.subr.bf16.mxu0 %v7210_v37 }
0x121d   :  { %5194 = vmatpush1.bf16.msra.mxu0 %v7211_v44  ;;  %v13741_v44 = vld [vmem:[#allocation52_spill] sm:$0xff] }
0x121e   :  { %5195 = vmatprep.subr.bf16.mxu0 %v7212_v51 }
0x1221   :  { %5196 = vmatpush1.bf16.msra.mxu0 %v7213_v55 }
0x1222   :  { %5197 = vmatprep.subr.bf16.mxu0 %v7214_v50 }
0x1225   :  { %5198 = vmatpush1.bf16.msra.mxu0 %v7215_v21 }
0x1226   :  { %5199 = vmatprep.subr.bf16.mxu0 %v7216_v62 }
0x1229   :  { %5200 = vmatpush1.bf16.msra.mxu0 %v7217_v27 }
0x122a   :  { %5201 = vmatprep.subr.bf16.mxu0 %v7218_v20 }
0x122d   :  { %5202 = vmatpush1.bf16.msra.mxu0 %v7219_v31 }
0x122e   :  { %5203 = vmatprep.subr.bf16.mxu0 %v7220_v61 }
0x1231   :  { %5204 = vmatpush1.bf16.msra.mxu0 %v7221_v0 }
0x1232   :  { %5205 = vmatprep.subr.bf16.mxu0 %v7222_v45  ;;  %v13742_v45 = vld [vmem:[#allocation26_spill] sm:$0xff] }
0x1235   :  { %5206 = vmatpush1.bf16.msra.mxu0 %v7223_v10 }
0x1236   :  { %5207 = vmatprep.subr.bf16.mxu0 %v7224_v1 }
0x1239   :  { %5208 = vmatpush1.bf16.msra.mxu0 %v7225_v49 }
0x123a   :  { %5209 = vmatprep.subr.bf16.mxu0 %v7226_v48 }
0x123d   :  { %5210 = vmatpush1.bf16.msra.mxu0 %v7227_v58 }
0x123e   :  { %5211 = vmatprep.subr.bf16.mxu0 %v7228_v17 }
0x1241   :  { %5212 = vmatpush1.bf16.msra.mxu0 %v7229_v13 }
0x1242   :  { %5213 = vmatprep.subr.bf16.mxu0 %v7230_v7 }
0x1245   :  { %5214 = vmatpush1.bf16.msra.mxu0 %v7231_v63  ;;  %v13743_v63 = vld [vmem:[#allocation49_spill] sm:$0xff] }
0x1246   :  { %5215 = vmatprep.subr.bf16.mxu0 %v7232_v52 }
0x1249   :  { %5216 = vmatpush1.bf16.msra.mxu0 %v7233_v29 }
0x124a   :  { %5217 = vmatprep.subr.bf16.mxu0 %v7234_v4 }
0x124d   :  { %5218 = vmatpush1.bf16.msra.mxu0 %v13729_v2 }
0x124e   :  { %5219 = vmatprep.subr.bf16.mxu0 %v13730_v18 }
0x1251   :  { %5220 = vmatpush1.bf16.msra.mxu0 %v13731_v59 }
0x12a7   :  { %v5005_v57 = vpop.f32.mrb[116].mxu0  ;;  %v5046_v22 = vpop.f32.mrb[148].mxu1 }
0x12a8   :  { %v5100_v11 = vadd.f32 %v5005_v57, %v13738_v41  ;;  %v5007_v38 = vpop.f32.mrb[117].mxu0  ;;  %v5048_v23 = vpop.f32.mrb[149].mxu1  ;;  %v5114_v24 = vadd.f32 %v11847_v40, %v5046_v22 }
0x12a9   :  { %v5107_v16 = vadd.f32 %v5007_v38, %v13739_v35  ;;  %v5122_v53 = vadd.f32 %v5048_v23, %v13740_v30  ;;  %v5009_v26 = vpop.f32.mrb[118].mxu0  ;;  %v5050_v34 = vpop.f32.mrb[150].mxu1  ;;  %v7246_v30 = vld [vmem:[%s12551_s6 + $0x224] ss:$24 sps:$4 sm:$0xff]  }
0x12aa   :  { %v6014_v3 = vmul.f32 -1.442695, %v5100_v11  ;;  %v5010_v9 = vpop.f32.mrb[119].mxu0  ;;  %v5051_v60 = vpop.f32.mrb[151].mxu1  ;;  %v7248_v26 = vld [vmem:[%s12551_s6 + $0x254] ss:$24 sps:$4 sm:$0xff]  }
0x12ab   :  { %v6015_v2 = vmul.f32 -1.442695, %v5107_v16  ;;  %v6016_v55 = vmul.f32 -1.442695, %v5122_v53  ;;  %v7245_v16 = vld [vmem:[%s12551_s6 + $0x1f0] ss:$24 sps:$4 sm:$0xff]  }
0x12ac   :  { %6829 = vpow2.f32 %v6014_v3  ;;  %v7247_v53 = vld [vmem:[%s12551_s6 + $0x220] ss:$24 sps:$4 sm:$0xff]   ;;  %v7249_v34 = vld [vmem:[%s12551_s6 + $0x250] ss:$24 sps:$4 sm:$0xff]   ;;  %v7250_v3 = vld [vmem:[%s12551_s6 + $0x284] ss:$24 sps:$4 sm:$0xff]  }
0x12ad   :  { %6831 = vpow2.f32 %v6015_v2  ;;  %v7251_v9 = vld [vmem:[%s12551_s6 + $0x280] ss:$24 sps:$4 sm:$0xff]   ;;  %v7252_v60 = vld [vmem:[%s12551_s6 + $0x2b4] ss:$24 sps:$4 sm:$0xff]   ;;  %v7253_v2 = vld [vmem:[%s12551_s6 + $0x2b0] ss:$24 sps:$4 sm:$0xff]  }
0x12b6   :  { %v6830_v18 = vpop.eup %6829 }
0x12b7   :  { %v5104_v59 = vadd.f32 1.0, %v6830_v18  ;;  %v6832_v56 = vpop.eup %6831  ;;  %v7254_v18 = vld [vmem:[%s12551_s6 + $0x2e4] ss:$24 sps:$4 sm:$0xff]  }
0x12b8   :  { %v5111_v15 = vadd.f32 1.0, %v6832_v56  ;;  %v6501_v56 = vld [vmem:[%s12554_s9] ss:$8 sps:$4 sm:$0xff]  }
0x12b9   :  { %6833 = vrcp.f32 %v5104_v59  ;;  %v7255_v59 = vld [vmem:[%s12551_s6 + $0x2e0] ss:$24 sps:$4 sm:$0xff]  }
0x12ba   :  { %6835 = vrcp.f32 %v5111_v15  ;;  %v6503_v15 = vld [vmem:[%s12554_s9 + $0x4] ss:$8 sps:$4 sm:$0xff]  }
0x12bb   :  { %5551 = vmatprep.subr.bf16.mxu0 %v6503_v15 }
0x12c3   :  { %v6834_v43 = vpop.eup %6833 }
0x12c4   :  { %v5115_v37 = vmul.f32 %v6834_v43, %v5114_v24  ;;  %v6836_v50 = vpop.eup %6835  ;;  %v6506_v24 = vld [vmem:[%s12554_s9 + $0x14] ss:$8 sps:$4 sm:$0xff]   ;;  %v6504_v43 = vld [vmem:[%s12554_s9 + $0x10] ss:$8 sps:$4 sm:$0xff]  }
0x12c5   :  { %v5118_v21 = vsub.f32 1.0, %v6836_v50  ;;  %v5120_v20 = vmul.f32 %v6836_v50, %v12003_v39  ;;  %v6515_v50 = vld [vmem:[%s12554_s9 + $0x44] ss:$8 sps:$4 sm:$0xff]  }
0x12c6   :  { %v5116_v51 = vadd.f32 %v5115_v37, %v13741_v44  ;;  %v6509_v37 = vld [vmem:[%s12554_s9 + $0x24] ss:$8 sps:$4 sm:$0xff]   ;;  %v6507_v44 = vld [vmem:[%s12554_s9 + $0x20] ss:$8 sps:$4 sm:$0xff]  }
0x12c8   :  { %6837 = vtanh.f32 %v5116_v51  ;;  %v6512_v51 = vld [vmem:[%s12554_s9 + $0x34] ss:$8 sps:$4 sm:$0xff]  }
0x12c9   :  { %6839 = vpow2.f32 %v6016_v55  ;;  %v6510_v55 = vld [vmem:[%s12554_s9 + $0x30] ss:$8 sps:$4 sm:$0xff]  }
0x12d2   :  { %v6838_v62 = vpop.eup %6837 }
0x12d3   :  { %v5119_v27 = vmul.f32 %v6838_v62, %v5118_v21  ;;  %v6840_v61 = vpop.eup %6839  ;;  %v6513_v21 = vld [vmem:[%s12554_s9 + $0x40] ss:$8 sps:$4 sm:$0xff]   ;;  %v6518_v62 = vld [vmem:[%s12554_s9 + $0x54] ss:$8 sps:$4 sm:$0xff]  }
0x12d4   :  { %v5126_v0 = vadd.f32 1.0, %v6840_v61  ;;  %v6519_v61 = vld [vmem:[%s12554_s9 + $0x60] ss:$8 sps:$4 sm:$0xff]  }
0x12d5   :  { %v12283_v31 = vadd.f32 %v5120_v20, %v5119_v27  ;;  %v6516_v27 = vld [vmem:[%s12554_s9 + $0x50] ss:$8 sps:$4 sm:$0xff]   ;;  %v6521_v20 = vld [vmem:[%s12554_s9 + $0x64] ss:$8 sps:$4 sm:$0xff]  }
0x12d6   :  { %6841 = vrcp.f32 %v5126_v0  ;;  %v6524_v0 = vld [vmem:[%s12554_s9 + $0x74] ss:$8 sps:$4 sm:$0xff]  }
0x12d7   :  { %v5146_v35 = vpack.c.bf16 %v12283_v31, %v12283_v31 }
0x12e0   :  { %v6842_v58 = vpop.eup %6841 }
0x12e7   :  { %v5087_v40 = vpop.f32.mrb[120].mxu0 }
0x12e8   :  { %v5129_v10 = vadd.f32 %v5087_v40, %v13742_v45  ;;  %v5089_v1 = vpop.f32.mrb[121].mxu0  ;;  %v6522_v40 = vld [vmem:[%s12554_s9 + $0x70] ss:$8 sps:$4 sm:$0xff]   ;;  %v6527_v45 = vld [vmem:[%s12554_s9 + $0x84] ss:$8 sps:$4 sm:$0xff]  }
0x12e9   :  { %v5136_v49 = vadd.f32 %v11858_v33, %v5089_v1  ;;  %v5091_v48 = vpop.f32.mrb[122].mxu0  ;;  %v6530_v1 = vld [vmem:[%s12554_s9 + $0x94] ss:$8 sps:$4 sm:$0xff]  }
0x12ea   :  { %v6017_v17 = vmul.f32 -1.442695, %v5129_v10  ;;  %v5092_v13 = vpop.f32.mrb[123].mxu0  ;;  %v6525_v10 = vld [vmem:[%s12554_s9 + $0x80] ss:$8 sps:$4 sm:$0xff]  }
0x12eb   :  { %v5137_v7 = vmul.f32 %v6842_v58, %v5136_v49  ;;  %v6528_v49 = vld [vmem:[%s12554_s9 + $0x90] ss:$8 sps:$4 sm:$0xff]   ;;  %v6533_v48 = vld [vmem:[%s12554_s9 + $0xa4] ss:$8 sps:$4 sm:$0xff]   ;;  %v6531_v58 = vld [vmem:[%s12554_s9 + $0xa0] ss:$8 sps:$4 sm:$0xff]  }
0x12ec   :  { %6843 = vpow2.f32 %v6017_v17  ;;  %v6536_v17 = vld [vmem:[%s12554_s9 + $0xb4] ss:$8 sps:$4 sm:$0xff]   ;;  %v6534_v13 = vld [vmem:[%s12554_s9 + $0xb0] ss:$8 sps:$4 sm:$0xff]  }
0x12ed   :  { %v5138_v52 = vadd.f32 %v5137_v7, %v13743_v63  ;;  %v6539_v7 = vld [vmem:[%s12554_s9 + $0xc4] ss:$8 sps:$4 sm:$0xff]   ;;  %v6537_v63 = vld [vmem:[%s12554_s9 + $0xc0] ss:$8 sps:$4 sm:$0xff]  }
0x12f6   :  { %v6844_v29 = vpop.eup %6843 }
0x12f7   :  { %v5133_v4 = vadd.f32 1.0, %v6844_v29  ;;  %v6540_v29 = vld [vmem:[%s12554_s9 + $0xd0] ss:$8 sps:$4 sm:$0xff]  }
0x12f9   :  { %6845 = vrcp.f32 %v5133_v4  ;;  %v6545_v4 = vld [vmem:[%s12554_s9 + $0xe4] ss:$8 sps:$4 sm:$0xff]  }
0x12fa   :  { %6847 = vtanh.f32 %v5138_v52  ;;  %v6542_v52 = vld [vmem:[%s12554_s9 + $0xd4] ss:$8 sps:$4 sm:$0xff]  }
0x1303   :  { %v6846_v57 = vpop.eup %6845 }
0x1304   :  { %v5140_v22 = vsub.f32 1.0, %v6846_v57  ;;  %v6848_v41 = vpop.eup %6847  ;;  %v5142_v38 = vmul.f32 %v6846_v57, %v12009_v14  ;;  %v6543_v57 = vld [vmem:[%s12554_s9 + $0xe0] ss:$8 sps:$4 sm:$0xff]  }
0x1306   :  { %v5141_v11 = vmul.f32 %v6848_v41, %v5140_v22  ;;  %v6548_v22 = vld [vmem:[%s12554_s9 + $0xf4] ss:$8 sps:$4 sm:$0xff]   ;;  %v6546_v41 = vld [vmem:[%s12554_s9 + $0xf0] ss:$8 sps:$4 sm:$0xff]  }
0x1308   :  { %v12289_v23 = vadd.f32 %v5142_v38, %v5141_v11 }
0x130a   :  { %v5147_v33 = vpack.c.bf16 %v12289_v23, %v12289_v23 }
0x130c   :  { %5180 = vmatprep.mubr.bf16.mxu1 %v5147_v33  ;;  %5221 = vmatprep.mubr.bf16.mxu0 %v5147_v33 }
0x130d   :  { %5181 = vmatmul.mubr.bf16.vlgmr.msra.gmra.mrb[152].mxu1 %v5146_v35  ;;  %5222 = vmatmul.mubr.bf16.vlgmr.msra.gmra.mrb[124].mxu0 %v5146_v35 }
0x130e   :  { %5231 = vmatpush1.bf16.msra.mxu1 %v12022_v28  ;;  %5262 = vmatprep.mubr.bf16.mxu1 %v5147_v33  ;;  %v7235_v28 = vld [vmem:[%s12551_s6 + $0x100] ss:$24 sps:$4 sm:$0xff]  }
0x130f   :  { %5232 = vmatprep.subr.bf16.mxu1 %v12028_v54  ;;  %v7236_v54 = vld [vmem:[%s12551_s6 + $0x134] ss:$24 sps:$4 sm:$0xff]   ;;  %5552 = vmatpush1.bf16.msra.mxu0 %v6501_v56  ;;  %v13744_v33 = vld [vmem:[#allocation73_spill] sm:$0xff] }
0x1310   :  { %5553 = vmatprep.subr.bf16.mxu0 %v6506_v24 }
0x1312   :  { %5233 = vmatpush1.bf16.msra.mxu1 %v12036_v42  ;;  %v7237_v42 = vld [vmem:[%s12551_s6 + $0x130] ss:$24 sps:$4 sm:$0xff]  }
0x1313   :  { %5234 = vmatprep.subr.bf16.mxu1 %v12042_v46  ;;  %v7238_v46 = vld [vmem:[%s12551_s6 + $0x164] ss:$24 sps:$4 sm:$0xff]   ;;  %5554 = vmatpush1.bf16.msra.mxu0 %v6504_v43 }
0x1314   :  { %5555 = vmatprep.subr.bf16.mxu0 %v6509_v37 }
0x1316   :  { %5235 = vmatpush1.bf16.msra.mxu1 %v12050_v25  ;;  %v7239_v25 = vld [vmem:[%s12551_s6 + $0x160] ss:$24 sps:$4 sm:$0xff]  }
0x1317   :  { %5236 = vmatprep.subr.bf16.mxu1 %v12056_v5  ;;  %v7240_v5 = vld [vmem:[%s12551_s6 + $0x194] ss:$24 sps:$4 sm:$0xff]   ;;  %5556 = vmatpush1.bf16.msra.mxu0 %v6507_v44 }
0x1318   :  { %5557 = vmatprep.subr.bf16.mxu0 %v6512_v51 }
0x131a   :  { %5237 = vmatpush1.bf16.msra.mxu1 %v12066_v8  ;;  %v7241_v8 = vld [vmem:[%s12551_s6 + $0x190] ss:$24 sps:$4 sm:$0xff]  }
0x131b   :  { %5238 = vmatprep.subr.bf16.mxu1 %v12072_v19  ;;  %v7242_v19 = vld [vmem:[%s12551_s6 + $0x1c4] ss:$24 sps:$4 sm:$0xff]   ;;  %5558 = vmatpush1.bf16.msra.mxu0 %v6510_v55 }
0x131c   :  { %5559 = vmatprep.subr.bf16.mxu0 %v6515_v50 }
0x131e   :  { %5239 = vmatpush1.bf16.msra.mxu1 %v12084_v12  ;;  %v7243_v12 = vld [vmem:[%s12551_s6 + $0x1c0] ss:$24 sps:$4 sm:$0xff]  }
0x131f   :  { %5240 = vmatprep.subr.bf16.mxu1 %v12090_v32  ;;  %v7244_v32 = vld [vmem:[%s12551_s6 + $0x1f4] ss:$24 sps:$4 sm:$0xff]   ;;  %5560 = vmatpush1.bf16.msra.mxu0 %v6513_v21 }
0x1320   :  { %5561 = vmatprep.subr.bf16.mxu0 %v6518_v62 }
0x1322   :  { %5241 = vmatpush1.bf16.msra.mxu1 %v7235_v28 }
0x1323   :  { %5242 = vmatprep.subr.bf16.mxu1 %v7236_v54  ;;  %5562 = vmatpush1.bf16.msra.mxu0 %v6516_v27  ;;  %v13748_v27 = vld [vmem:[#allocation48_spill] sm:$0xff] }
0x1324   :  { %5563 = vmatprep.subr.bf16.mxu0 %v6521_v20 }
0x1326   :  { %5243 = vmatpush1.bf16.msra.mxu1 %v7237_v42  ;;  %v13745_v42 = vld [vmem:[#allocation47_spill] sm:$0xff] }
0x1327   :  { %5244 = vmatprep.subr.bf16.mxu1 %v7238_v46  ;;  %5564 = vmatpush1.bf16.msra.mxu0 %v6519_v61 }
0x1328   :  { %5565 = vmatprep.subr.bf16.mxu0 %v6524_v0  ;;  %v7257_v0 = vld [vmem:[%s12553_s8 + $0x1] ss:$0 sm:$0xff] }
0x132a   :  { %5245 = vmatpush1.bf16.msra.mxu1 %v7239_v25  ;;  %v13746_v25 = vld [vmem:[#allocation77_spill] sm:$0xff] }
0x132b   :  { %5246 = vmatprep.subr.bf16.mxu1 %v7240_v5  ;;  %5566 = vmatpush1.bf16.msra.mxu0 %v6522_v40 }
0x132c   :  { %5567 = vmatprep.subr.bf16.mxu0 %v6527_v45 }
0x132e   :  { %5247 = vmatpush1.bf16.msra.mxu1 %v7241_v8 }
0x132f   :  { %5248 = vmatprep.subr.bf16.mxu1 %v7242_v19  ;;  %5568 = vmatpush1.bf16.msra.mxu0 %v6525_v10 }
0x1330   :  { %5569 = vmatprep.subr.bf16.mxu0 %v6530_v1 }
0x1332   :  { %5249 = vmatpush1.bf16.msra.mxu1 %v7243_v12 }
0x1333   :  { %5250 = vmatprep.subr.bf16.mxu1 %v7244_v32  ;;  %5570 = vmatpush1.bf16.msra.mxu0 %v6528_v49 }
0x1334   :  { %5571 = vmatprep.subr.bf16.mxu0 %v6533_v48 }
0x1336   :  { %5251 = vmatpush1.bf16.msra.mxu1 %v7245_v16 }
0x1337   :  { %5252 = vmatprep.subr.bf16.mxu1 %v7246_v30  ;;  %5572 = vmatpush1.bf16.msra.mxu0 %v6531_v58  ;;  %v13749_v58 = vld [vmem:[#allocation87_spill] sm:$0xff] }
0x1338   :  { %5573 = vmatprep.subr.bf16.mxu0 %v6536_v17 }
0x133a   :  { %5253 = vmatpush1.bf16.msra.mxu1 %v7247_v53 }
0x133b   :  { %5254 = vmatprep.subr.bf16.mxu1 %v7248_v26  ;;  %5574 = vmatpush1.bf16.msra.mxu0 %v6534_v13 }
0x133c   :  { %5575 = vmatprep.subr.bf16.mxu0 %v6539_v7 }
0x133e   :  { %5255 = vmatpush1.bf16.msra.mxu1 %v7249_v34 }
0x133f   :  { %5256 = vmatprep.subr.bf16.mxu1 %v7250_v3  ;;  %5576 = vmatpush1.bf16.msra.mxu0 %v6537_v63 }
0x1340   :  { %5577 = vmatprep.subr.bf16.mxu0 %v6542_v52 }
0x1342   :  { %5257 = vmatpush1.bf16.msra.mxu1 %v7251_v9  ;;  %v7256_v9 = vld [vmem:[%s12553_s8] ss:$0 sm:$0xff] }
0x1343   :  { %5258 = vmatprep.subr.bf16.mxu1 %v7252_v60  ;;  %5578 = vmatpush1.bf16.msra.mxu0 %v6540_v29 }
0x1344   :  { %5579 = vmatprep.subr.bf16.mxu0 %v6545_v4 }
0x1346   :  { %5259 = vmatpush1.bf16.msra.mxu1 %v7253_v2 }
0x1347   :  { %5260 = vmatprep.subr.bf16.mxu1 %v7254_v18  ;;  %5580 = vmatpush1.bf16.msra.mxu0 %v6543_v57 }
0x1348   :  { %5581 = vmatprep.subr.bf16.mxu0 %v6548_v22 }
0x134a   :  { %5261 = vmatpush1.bf16.msra.mxu1 %v7255_v59  ;;  %v13747_v59 = vld [vmem:[#allocation86_spill] sm:$0xff] }
0x134b   :  { %5582 = vmatpush1.bf16.msra.mxu0 %v6546_v41 }
0x134d   :  { %5263 = vmatmul.mubr.bf16.vlgmr.msra.gmra.mrb[156].mxu1 %v5146_v35 }
0x13e0   :  { %v5182_v11 = vpop.f32.mrb[152].mxu1  ;;  %v5223_v38 = vpop.f32.mrb[124].mxu0 }
0x13e1   :  { %v5277_v35 = vadd.f32 %v5182_v11, %v13744_v33  ;;  %v5184_v28 = vpop.f32.mrb[153].mxu1  ;;  %v5225_v54 = vpop.f32.mrb[125].mxu0  ;;  %v5291_v60 = vadd.f32 %v7256_v9, %v5223_v38  ;;  %v13750_v11 = vld [vmem:[#allocation102_spill] sm:$0xff]  ;;  %v13751_v38 = vld [vmem:[#allocation19_spill] sm:$0xff] }
0x13e2   :  { %v5284_v46 = vadd.f32 %v5184_v28, %v13745_v42  ;;  %v5299_v5 = vadd.f32 %v5225_v54, %v13746_v25  ;;  %v5186_v8 = vpop.f32.mrb[154].mxu1  ;;  %v5227_v19 = vpop.f32.mrb[126].mxu0  ;;  %v5339_v33 = vpack.c.bf16 %v13751_v38, %v13750_v11  ;;  %v13752_v28 = vld [vmem:[#allocation74_spill] sm:$0xff]  ;;  %v13753_v54 = vld [vmem:[#allocation84_spill] sm:$0xff] }
0x13e3   :  { %v6018_v12 = vmul.f32 -1.442695, %v5277_v35  ;;  %v5187_v32 = vpop.f32.mrb[155].mxu1  ;;  %v5228_v16 = vpop.f32.mrb[127].mxu0  ;;  %v5342_v35 = vpack.c.bf16 %v11863_v36, %v12009_v14  ;;  %v5341_v42 = vpack.c.bf16 %v13753_v54, %v13752_v28  ;;  %v13756_v8 = vld [vmem:[#allocation103_spill] sm:$0xff] }
0x13e4   :  { %v6019_v30 = vmul.f32 -1.442695, %v5284_v46  ;;  %v6020_v15 = vmul.f32 -1.442695, %v5299_v5  ;;  %v13754_v46 = vld [vmem:[#allocation72_spill] sm:$0xff]  ;;  %v13755_v5 = vld [vmem:[#allocation35_spill] sm:$0xff] }
0x13e5   :  { %6849 = vpow2.f32 %v6018_v12  ;;  %v5344_v25 = vpack.c.bf16 %v13754_v46, %v11734_v6  ;;  %v5346_v19 = vpack.c.bf16 %v13756_v8, %v13755_v5  ;;  %v5379_v14 = vld [vmem:[%s12555_s10] sm:$0x3]  ;;  %v13757_v12 = vld [vmem:[#allocation43_spill] sm:$0xff]  ;;  %v13758_v6 = vld [vmem:[#allocation44_spill] sm:$0xff] }
0x13e6   :  { %6851 = vpow2.f32 %v6019_v30  ;;  %v5384_v32 = vrot.slane %v5379_v14, %v13757_v12  ;;  %v5388_v16 = vrot.slane %v5379_v14, %v13758_v6 }
0x13ef   :  { %v6850_v53 = vpop.eup %6849 }
0x13f0   :  { %v5281_v26 = vadd.f32 1.0, %v6850_v53  ;;  %v6852_v34 = vpop.eup %6851 }
0x13f1   :  { %v5288_v3 = vadd.f32 1.0, %v6852_v34 }
0x13f2   :  { %6853 = vrcp.f32 %v5281_v26 }
0x13f3   :  { %6855 = vrcp.f32 %v5288_v3 }
0x13fc   :  { %v6854_v2 = vpop.eup %6853 }
0x13fd   :  { %v5292_v18 = vmul.f32 %v6854_v2, %v5291_v60  ;;  %v6856_v24 = vpop.eup %6855 }
0x13fe   :  { %v5295_v43 = vsub.f32 1.0, %v6856_v24  ;;  %v5297_v51 = vmul.f32 %v6856_v24, %v12283_v31 }
0x13ff   :  { %v5293_v56 = vadd.f32 %v5292_v18, %v13747_v59 }
0x1401   :  { %6857 = vtanh.f32 %v5293_v56 }
0x1402   :  { %6859 = vpow2.f32 %v6020_v15 }
0x140b   :  { %v6858_v37 = vpop.eup %6857 }
0x140c   :  { %v5296_v44 = vmul.f32 %v6858_v37, %v5295_v43  ;;  %v6860_v50 = vpop.eup %6859 }
0x140d   :  { %v5303_v21 = vadd.f32 1.0, %v6860_v50 }
0x140e   :  { %v5298_v55 = vadd.f32 %v5297_v51, %v5296_v44 }
0x140f   :  { %6861 = vrcp.f32 %v5303_v21 }
0x1410   :  { %v5345_v36 = vpack.c.bf16 %v5298_v55, %v12283_v31 }
0x1419   :  { %v6862_v10 = vpop.eup %6861 }
0x1420   :  { %v5264_v62 = vpop.f32.mrb[156].mxu1 }
0x1421   :  { %v5306_v20 = vadd.f32 %v5264_v62, %v13748_v27  ;;  %v5266_v61 = vpop.f32.mrb[157].mxu1 }
0x1422   :  { %v5313_v40 = vadd.f32 %v7257_v0, %v5266_v61  ;;  %v5268_v45 = vpop.f32.mrb[158].mxu1 }
0x1423   :  { %v6021_v1 = vmul.f32 -1.442695, %v5306_v20  ;;  %v5269_v49 = vpop.f32.mrb[159].mxu1 }
0x1424   :  { %v5314_v48 = vmul.f32 %v6862_v10, %v5313_v40 }
0x1425   :  { %6863 = vpow2.f32 %v6021_v1 }
0x1426   :  { %v5315_v17 = vadd.f32 %v5314_v48, %v13749_v58 }
0x142f   :  { %v6864_v13 = vpop.eup %6863 }
0x1430   :  { %v5310_v7 = vadd.f32 1.0, %v6864_v13 }
0x1432   :  { %6865 = vrcp.f32 %v5310_v7 }
0x1433   :  { %6867 = vtanh.f32 %v5315_v17 }
0x143c   :  { %v6866_v63 = vpop.eup %6865 }
0x143d   :  { %v5317_v52 = vsub.f32 1.0, %v6866_v63  ;;  %v6868_v29 = vpop.eup %6867  ;;  %v5319_v57 = vmul.f32 %v6866_v63, %v12289_v23 }
0x143f   :  { %v5318_v4 = vmul.f32 %v6868_v29, %v5317_v52 }
0x1441   :  { %v5320_v22 = vadd.f32 %v5319_v57, %v5318_v4 }
0x1443   :  { %v5340_v41 = vpack.c.bf16 %v12289_v23, %v5320_v22  ;;  %v5343_v23 = vpack.c.bf16 %v12003_v39, %v11852_v47 }
0x1445   :  { %5583 = vmatprep.mubr.bf16.mxu0 %v5340_v41 }
0x1446   :  { %5584 = vmatmul.mubr.bf16.vlgmr.msra.gmra.mrb[128].mxu0 %v5339_v33 }
0x1447   :  { %5593 = vmatprep.mubr.bf16.mxu0 %v5342_v35 }
0x144e   :  { %5594 = vmatmul.mubr.bf16.gmra.mrb[132].mxu0 %v5341_v42 }
0x144f   :  { %5603 = vmatprep.mubr.bf16.mxu0 %v5344_v25 }
0x1456   :  { %5604 = vmatmul.mubr.bf16.gmra.mrb[136].mxu0 %v5343_v23 }
0x1457   :  { %5613 = vmatprep.mubr.bf16.mxu0 %v5346_v19 }
0x145e   :  { %5614 = vmatmul.mubr.bf16.gmra.mrb[140].mxu0 %v5345_v36 }
0x1519   :  { %v5585_v30 = vpop.f32.mrb[128].mxu0 }
0x151a   :  { %v5586_v53 = vadd.f32 %v5585_v30, %v5384_v32  ;;  %v5587_v26 = vpop.f32.mrb[129].mxu0 }
0x151b   :  { %v5588_v47 = vadd.f32 %v5587_v26, %v5388_v16  ;;  %v5589_v39 = vpop.f32.mrb[130].mxu0 }
0x151c   :  { %5624 = vst [vmem:[%s12556_s11] sm:$0xff] %v5586_v53  ;;  %v5590_v34 = vadd.f32 %v5589_v39, %v5384_v32  ;;  %v5591_v31 = vpop.f32.mrb[131].mxu0 }
0x151d   :  { %5625 = vst [vmem:[%s12556_s11 + $0x8] sm:$0xff] %v5588_v47  ;;  %v5592_v3 = vadd.f32 %v5591_v31, %v5388_v16 }
0x151e   :  { %5626 = vst [vmem:[%s12556_s11 + $0x10] sm:$0xff] %v5590_v34 }
0x151f   :  { %5627 = vst [vmem:[%s12556_s11 + $0x18] sm:$0xff] %v5592_v3 }
0x1521   :  { %v5595_v9 = vpop.f32.mrb[132].mxu0 }
0x1522   :  { %v5596_v60 = vadd.f32 %v5595_v9, %v5384_v32  ;;  %v5597_v2 = vpop.f32.mrb[133].mxu0 }
0x1523   :  { %v5598_v18 = vadd.f32 %v5597_v2, %v5388_v16  ;;  %v5599_v59 = vpop.f32.mrb[134].mxu0 }
0x1524   :  { %5628 = vst [vmem:[%s12556_s11 + $0x20] sm:$0xff] %v5596_v60  ;;  %v5600_v56 = vadd.f32 %v5599_v59, %v5384_v32  ;;  %v5601_v15 = vpop.f32.mrb[135].mxu0 }
0x1525   :  { %5629 = vst [vmem:[%s12556_s11 + $0x28] sm:$0xff] %v5598_v18  ;;  %v5602_v24 = vadd.f32 %v5601_v15, %v5388_v16 }
0x1526   :  { %5630 = vst [vmem:[%s12556_s11 + $0x30] sm:$0xff] %v5600_v56 }
0x1527   :  { %5631 = vst [vmem:[%s12556_s11 + $0x38] sm:$0xff] %v5602_v24 }
0x1529   :  { %v5605_v43 = vpop.f32.mrb[136].mxu0 }
0x152a   :  { %v5606_v37 = vadd.f32 %v5605_v43, %v5384_v32  ;;  %v5607_v44 = vpop.f32.mrb[137].mxu0 }
0x152b   :  { %v5608_v51 = vadd.f32 %v5607_v44, %v5388_v16  ;;  %v5609_v55 = vpop.f32.mrb[138].mxu0 }
0x152c   :  { %5632 = vst [vmem:[%s12556_s11 + $0x40] sm:$0xff] %v5606_v37  ;;  %v5610_v50 = vadd.f32 %v5609_v55, %v5384_v32  ;;  %v5611_v21 = vpop.f32.mrb[139].mxu0 }
0x152d   :  { %5633 = vst [vmem:[%s12556_s11 + $0x48] sm:$0xff] %v5608_v51  ;;  %v5612_v62 = vadd.f32 %v5611_v21, %v5388_v16 }
0x152e   :  { %5634 = vst [vmem:[%s12556_s11 + $0x50] sm:$0xff] %v5610_v50 }
0x152f   :  { %5635 = vst [vmem:[%s12556_s11 + $0x58] sm:$0xff] %v5612_v62 }
0x1531   :  { %v5615_v27 = vpop.f32.mrb[140].mxu0 }
0x1532   :  { %v5616_v20 = vadd.f32 %v5615_v27, %v5384_v32  ;;  %v5617_v61 = vpop.f32.mrb[141].mxu0 }
0x1533   :  { %v5618_v0 = vadd.f32 %v5617_v61, %v5388_v16  ;;  %v5619_v40 = vpop.f32.mrb[142].mxu0 }
0x1534   :  { %5636 = vst [vmem:[%s12556_s11 + $0x60] sm:$0xff] %v5616_v20  ;;  %v5620_v45 = vadd.f32 %v5619_v40, %v5384_v32  ;;  %v5621_v10 = vpop.f32.mrb[143].mxu0 }
0x1535   :  { %5637 = vst [vmem:[%s12556_s11 + $0x68] sm:$0xff] %v5618_v0  ;;  %v5622_v1 = vadd.f32 %v5621_v10, %v5388_v16 }
0x1536   :  { %5638 = vst [vmem:[%s12556_s11 + $0x70] sm:$0xff] %v5620_v45 }
0x1537   :  { %5639 = vst [vmem:[%s12556_s11 + $0x78] sm:$0xff] %v5622_v1 }

</bundles_post_ra>
